<compile_context>
chip_gen: v7x
topology: tpu7x:2x2x1
jax: 0.10.0
libtpu: 0.0.40
codegen_flags: <defaults>
</compile_context>

<pallas_src>
import jax
import jax.numpy as jnp
from jax import lax
from jax.experimental import pallas as pl
from jax.experimental.pallas import tpu as pltpu

# ----------------------------- hyper-parameters -----------------------------
PARAMS = dict(latent_dim=16, n_layers=1, max_length=100, batch=2)
D = 12                       # num_in_channels (grammar production count)
L = PARAMS["max_length"]     # encoder sequence length; (L - 26) * 10 == 740
H = 501                      # GRU hidden size (hard-coded in the module)
H_PAD = 512                  # padded hidden size -> clean (8,128) lane tiles
T = PARAMS["max_length"]     # decoder timesteps
T_SLOT = 128                 # per-batch row stride in the hidden-state scratch
LIN_IN = 740
LIN_OUT = 435
LATENT = PARAMS["latent_dim"]
CONV_L_OUT = 74
CONV_C_OUT = 10
LEAK = 0.01                  # nn.LeakyReLU default negative_slope


def leaky_relu(x):
    return jnp.where(x >= 0, x, LEAK * x)


def full_spec(shape):
    shape = tuple(shape)
    return pl.BlockSpec(shape, lambda *_: (0,) * len(shape))


# ------------------------------ kernel bodies -------------------------------
def _encoder_conv_kernel(x_ref, w1_ref, b1_ref, w2_ref, b2_ref, w3_ref, b3_ref,
                         o_ref):
    # Whole batch in a single invocation (no batch grid); static unroll over B.
    # TODO(synk): per-tap accumulation kept instead of im2col -- the im2col
    #             patch build needs unaligned lane-dim concatenation (lowering
    #             risk) and the encoder is a negligible fraction of runtime
    #             next to the 100-step GRU loop.
    def conv1d(h, w, bias, k_size):
        l_out = h.shape[0] - k_size + 1
        c_out = w.shape[2]
        acc = jnp.zeros((l_out, c_out), jnp.float32)
        for k in range(k_size):                     # static unroll over taps
            acc += jnp.dot(h[k:k + l_out, :], w[k],
                           preferred_element_type=jnp.float32)
        return leaky_relu(acc + bias)

    w1 = w1_ref[...]; b1 = b1_ref[...]
    w2 = w2_ref[...]; b2 = b2_ref[...]
    w3 = w3_ref[...]; b3 = b3_ref[...]

    for bi in range(o_ref.shape[0]):                # B = 2, static
        x = x_ref[bi]                               # (L, D) channels-last
        h = conv1d(x, w1, b1, 9)                    # (92, 9)
        h = conv1d(h, w2, b2, 9)                    # (84, 9)
        h = conv1d(h, w3, b3, 11)                   # (74, 10)
        o_ref[bi] = h


def _dense_decoder_kernel(hflat_ref, eps_ref,
                          wlin_ref, blin_ref, wmu_ref, bmu_ref,
                          wsig_ref, bsig_ref,
                          win_ref, bin_ref, wif_ref, bgate_ref,
                          whf_ref, bhn_ref, wout_ref, bout_ref,
                          mu_ref, sig_ref, z_ref, o_ref,
                          hstore_ref):
    f32 = jnp.float32

    # ---------------- encoder dense head ----------------
    hlin = leaky_relu(jnp.dot(hflat_ref[...].astype(jnp.bfloat16), wlin_ref[...],
                              preferred_element_type=f32) + blin_ref[...])
    mu = jnp.dot(hlin, wmu_ref[...], preferred_element_type=f32) + bmu_ref[...]
    sig = jnp.dot(hlin, wsig_ref[...], preferred_element_type=f32) + bsig_ref[...]
    mu_ref[...] = mu
    sig_ref[...] = sig
    # reparameterization trick: z = mu + exp(0.5*sigma) * eps
    z = mu + jnp.exp(0.5 * sig) * eps_ref[...]
    z_ref[...] = z

    # ---------------- decoder: linear_in + loop-invariant gate inputs --------
    hz = leaky_relu(jnp.dot(z, win_ref[...],
                            preferred_element_type=f32) + bin_ref[...])
    # The GRU input is the same vector at every timestep (z expanded), so the
    # fused input-to-hidden projection is computed once.  b_hr / b_hz are
    # already folded into b_gate (prepare_kernel_params); b_hn is not (it must
    # be scaled by r inside the step).
    gi = jnp.dot(hz, wif_ref[...], preferred_element_type=f32) + bgate_ref[...]
    gi_r = gi[:, 0 * H_PAD:1 * H_PAD]
    gi_u = gi[:, 1 * H_PAD:2 * H_PAD]
    gi_n = gi[:, 2 * H_PAD:3 * H_PAD]
    bhn = jnp.broadcast_to(bhn_ref[...], gi_r.shape)   # hoisted (1,HP)->(B,HP)

    batch = gi_r.shape[0]

    def step(t, h):
        # One fused (B,512)x(512,1536) bf16 matmul per step (f32 accumulate).
        gh = jnp.dot(h.astype(jnp.bfloat16), whf_ref[...],
                     preferred_element_type=f32)        # (B, 3*H_PAD)
        r = jax.nn.sigmoid(gi_r + gh[:, 0 * H_PAD:1 * H_PAD])
        u = jax.nn.sigmoid(gi_u + gh[:, 1 * H_PAD:2 * H_PAD])
        n = jnp.tanh(gi_n + r * (gh[:, 2 * H_PAD:3 * H_PAD] + bhn))
        h_new = (1.0 - u) * n + u * h
        # Stage the hidden state; output projection happens after the loop.
        for bi in range(batch):                         # static (B = 2)
            hstore_ref[pl.ds(bi * T_SLOT + t, 1), :] = h_new[bi:bi + 1, :]
        return h_new

    lax.fori_loop(0, T, step, jnp.zeros((batch, H_PAD), f32))

    # --------- output projection, hoisted out of the recurrent loop ---------
    # Note: the reference decoder applies LeakyReLU to linear_out -- kept.
    wout = wout_ref[...]
    bout = bout_ref[...]
    for bi in range(batch):                             # static (B = 2)
        hb = hstore_ref[pl.ds(bi * T_SLOT, T), :]       # (T, H_PAD), aligned
        logits_b = leaky_relu(jnp.dot(hb, wout,
                                      preferred_element_type=f32) + bout)
        o_ref[bi] = logits_b.astype(o_ref.dtype)        # (T, D)


# ------------------------------- wrappers ------------------------------------
def encoder_conv(x_bld, kp):
    batch = x_bld.shape[0]
    args = (x_bld, kp["w1"], kp["b1"], kp["w2"], kp["b2"], kp["w3"], kp["b3"])
    out_shape = jax.ShapeDtypeStruct((batch, CONV_L_OUT, CONV_C_OUT),
                                     jnp.float32)
    return pl.pallas_call(
        _encoder_conv_kernel,
        out_shape=out_shape,
        grid=(1,),
        in_specs=[full_spec(a.shape) for a in args],
        out_specs=full_spec(out_shape.shape),
        compiler_params=pltpu.CompilerParams(
            dimension_semantics=("arbitrary",)),
    )(*args)


def dense_decoder(h_flat, eps, kp):
    batch = h_flat.shape[0]
    args = (h_flat, eps,
            kp["w_lin"], kp["b_lin"], kp["w_mu"], kp["b_mu"],
            kp["w_sig"], kp["b_sig"],
            kp["w_in"], kp["b_in"], kp["w_i_fused"], kp["b_gate"],
            kp["w_h_fused"], kp["b_hn"], kp["w_out"], kp["b_out"])
    out_shapes = (
        jax.ShapeDtypeStruct((batch, LATENT), jnp.float32),   # mu
        jax.ShapeDtypeStruct((batch, LATENT), jnp.float32),   # sigma
        jax.ShapeDtypeStruct((batch, LATENT), jnp.float32),   # z
        jax.ShapeDtypeStruct((batch, T, D), jnp.float32),     # logits (B,T,D)
    )
    return pl.pallas_call(
        _dense_decoder_kernel,
        out_shape=out_shapes,
        grid=(1,),
        in_specs=[full_spec(a.shape) for a in args],
        out_specs=tuple(full_spec(o.shape) for o in out_shapes),
        scratch_shapes=[pltpu.VMEM((batch * T_SLOT, H_PAD), jnp.float32)],
        compiler_params=pltpu.CompilerParams(
            dimension_semantics=("arbitrary",)),
    )(*args)


def prepare_kernel_params(p):
    """Pad H 501->512, fuse GRU gates, fold b_hr/b_hz, cast big weights bf16."""
    def padc(a):   # pad last dim to H_PAD with zeros
        return jnp.pad(a, ((0, 0), (0, H_PAD - a.shape[1])))

    def padr(a):   # pad first dim to H_PAD with zeros
        return jnp.pad(a, ((0, H_PAD - a.shape[0]), (0, 0)))

    w_i_fused = jnp.concatenate(
        [padc(p["w_ir"]), padc(p["w_iz"]), padc(p["w_ig"])], axis=1)      # (16, 3*HP)
    b_gate = jnp.concatenate(
        [padc(p["b_ir"] + p["b_hr"]),
         padc(p["b_iz"] + p["b_hz"]),
         padc(p["b_ig"])], axis=1)                                        # (1, 3*HP)
    w_h_fused = jnp.concatenate(
        [padc(padr(p["w_hr"])), padc(padr(p["w_hz"])), padc(padr(p["w_hn"]))],
        axis=1).astype(jnp.bfloat16)                                      # (HP, 3*HP)
    b_hn = padc(p["b_hn"])                                                # (1, HP)
    w_out = padr(p["w_out"])                                              # (HP, D)

    return dict(
        w1=p["w1"], b1=p["b1"], w2=p["w2"], b2=p["b2"], w3=p["w3"], b3=p["b3"],
        w_lin=p["w_lin"].astype(jnp.bfloat16), b_lin=p["b_lin"],
        w_mu=p["w_mu"], b_mu=p["b_mu"], w_sig=p["w_sig"], b_sig=p["b_sig"],
        w_in=p["w_in"], b_in=p["b_in"],
        w_i_fused=w_i_fused, b_gate=b_gate,
        w_h_fused=w_h_fused, b_hn=b_hn,
        w_out=w_out, b_out=p["b_out"])


def grammar_vae_forward(p, x_bdl, eps):
    kp = prepare_kernel_params(p)
    # x_bdl follows the PyTorch Conv1d layout (B, D, L); convert to (B, L, D).
    x_bld = jnp.transpose(x_bdl, (0, 2, 1)).astype(jnp.float32)
    h3 = encoder_conv(x_bld, kp)                          # (B, 74, 10)
    # Matches torch: transpose(1,2) then view(B, -1)  (kernel output is already
    # (B, L_out, C), i.e. time-major, so a plain reshape reproduces it).
    h_flat = h3.reshape(h3.shape[0], -1)                  # (B, 740)
    mu, sigma, z, logits = dense_decoder(h_flat, eps, kp)  # logits: (B, T, D)
    return z, mu, sigma, logits


# -------------------------- deterministic parameters -------------------------
def init_params(key):
    keys = jax.random.split(key, 32)
    it = iter(keys)

    def nrm(shape, scale):
        return jax.random.normal(next(it), shape, jnp.float32) * scale

    p = {}
    # Encoder convs: stored as (K, C_in, C_out); biases as (1, C_out).
    p["w1"] = nrm((9, D, 9), 0.10);    p["b1"] = nrm((1, 9), 0.05)
    p["w2"] = nrm((9, 9, 9), 0.10);    p["b2"] = nrm((1, 9), 0.05)
    p["w3"] = nrm((11, 9, 10), 0.10);  p["b3"] = nrm((1, 10), 0.05)
    # Encoder dense
    p["w_lin"] = nrm((LIN_IN, LIN_OUT), 0.03); p["b_lin"] = nrm((1, LIN_OUT), 0.05)
    p["w_mu"] = nrm((LIN_OUT, LATENT), 0.04);  p["b_mu"] = nrm((1, LATENT), 0.05)
    p["w_sig"] = nrm((LIN_OUT, LATENT), 0.04); p["b_sig"] = nrm((1, LATENT), 0.05)
    # Decoder
    p["w_in"] = nrm((LATENT, LATENT), 0.10);   p["b_in"] = nrm((1, LATENT), 0.05)
    for g in ("r", "z", "g"):   # input-to-hidden gates (r, z, n)
        p[f"w_i{g}"] = nrm((LATENT, H), 0.08)
        p[f"b_i{g}"] = nrm((1, H), 0.05)
    for g in ("r", "z", "n"):   # hidden-to-hidden gates (r, z, n)
        p[f"w_h{g}"] = nrm((H, H), 0.03)
        p[f"b_h{g}"] = nrm((1, H), 0.05)
    p["w_out"] = nrm((H, D), 0.05);            p["b_out"] = nrm((1, D), 0.05)
    return p


# ----------------------------------- main ------------------------------------
if __name__ == "__main__":
    key = jax.random.PRNGKey(0)
    k_par, k_x, k_eps = jax.random.split(key, 3)

    params = init_params(k_par)
    x = jax.random.normal(k_x, (PARAMS["batch"], D, L), jnp.float32)       # NCL
    eps = jax.random.normal(k_eps, (PARAMS["batch"], LATENT), jnp.float32)

    fwd = jax.jit(grammar_vae_forward)
    z, mu, sigma, logits = jax.block_until_ready(fwd(params, x, eps))

    assert z.shape == (PARAMS["batch"], LATENT)
    assert mu.shape == (PARAMS["batch"], LATENT)
    assert sigma.shape == (PARAMS["batch"], LATENT)
    assert logits.shape == (PARAMS["batch"], PARAMS["max_length"], D)
    assert all(bool(jnp.all(jnp.isfinite(a))) for a in (z, mu, sigma, logits))
    print("KERNEL_OK")
</pallas_src>

<mosaic_0001>
module attributes {stable_mosaic.version = 11 : i64} {
  func.func @_encoder_conv_kernel(%arg0: i32, %arg1: memref<2x100x12xf32, #tpu.memory_space<vmem>>, %arg2: memref<9x12x9xf32, #tpu.memory_space<vmem>>, %arg3: memref<1x9xf32, #tpu.memory_space<vmem>>, %arg4: memref<9x9x9xf32, #tpu.memory_space<vmem>>, %arg5: memref<1x9xf32, #tpu.memory_space<vmem>>, %arg6: memref<11x9x10xf32, #tpu.memory_space<vmem>>, %arg7: memref<1x10xf32, #tpu.memory_space<vmem>>, %arg8: memref<2x74x10xf32, #tpu.memory_space<vmem>>) attributes {dimension_semantics = [#tpu.dimension_semantics<arbitrary>], iteration_bounds = array<i64: 1>, scalar_prefetch = 0 : i64, scratch_operands = 0 : i64, tpu.core_type = #tpu.core_type<tc>, window_params = [{pipeline_mode = #tpu.pipeline_mode<synchronous>, transform_indices = @transform_0, window_bounds = array<i64: 2, 100, 12>}, {pipeline_mode = #tpu.pipeline_mode<synchronous>, transform_indices = @transform_1, window_bounds = array<i64: 9, 12, 9>}, {pipeline_mode = #tpu.pipeline_mode<synchronous>, transform_indices = @transform_2, window_bounds = array<i64: 1, 9>}, {pipeline_mode = #tpu.pipeline_mode<synchronous>, transform_indices = @transform_3, window_bounds = array<i64: 9, 9, 9>}, {pipeline_mode = #tpu.pipeline_mode<synchronous>, transform_indices = @transform_4, window_bounds = array<i64: 1, 9>}, {pipeline_mode = #tpu.pipeline_mode<synchronous>, transform_indices = @transform_5, window_bounds = array<i64: 11, 9, 10>}, {pipeline_mode = #tpu.pipeline_mode<synchronous>, transform_indices = @transform_6, window_bounds = array<i64: 1, 10>}, {pipeline_mode = #tpu.pipeline_mode<synchronous>, transform_indices = @transform_7, window_bounds = array<i64: 2, 74, 10>}]} {
    %c0 = arith.constant 0 : index
    %c0_0 = arith.constant 0 : index
    %c0_1 = arith.constant 0 : index
    %0 = vector.load %arg2[%c0, %c0_0, %c0_1] : memref<9x12x9xf32, #tpu.memory_space<vmem>>, vector<9x12x9xf32>
    %c0_2 = arith.constant 0 : index
    %c0_3 = arith.constant 0 : index
    %1 = vector.load %arg3[%c0_2, %c0_3] : memref<1x9xf32, #tpu.memory_space<vmem>>, vector<1x9xf32>
    %c0_4 = arith.constant 0 : index
    %c0_5 = arith.constant 0 : index
    %c0_6 = arith.constant 0 : index
    %2 = vector.load %arg4[%c0_4, %c0_5, %c0_6] : memref<9x9x9xf32, #tpu.memory_space<vmem>>, vector<9x9x9xf32>
    %c0_7 = arith.constant 0 : index
    %c0_8 = arith.constant 0 : index
    %3 = vector.load %arg5[%c0_7, %c0_8] : memref<1x9xf32, #tpu.memory_space<vmem>>, vector<1x9xf32>
    %c0_9 = arith.constant 0 : index
    %c0_10 = arith.constant 0 : index
    %c0_11 = arith.constant 0 : index
    %4 = vector.load %arg6[%c0_9, %c0_10, %c0_11] : memref<11x9x10xf32, #tpu.memory_space<vmem>>, vector<11x9x10xf32>
    %c0_12 = arith.constant 0 : index
    %c0_13 = arith.constant 0 : index
    %5 = vector.load %arg7[%c0_12, %c0_13] : memref<1x10xf32, #tpu.memory_space<vmem>>, vector<1x10xf32>
    %c0_14 = arith.constant 0 : index
    %c0_15 = arith.constant 0 : index
    %c0_16 = arith.constant 0 : index
    %6 = vector.load %arg1[%c0_14, %c0_15, %c0_16] : memref<2x100x12xf32, #tpu.memory_space<vmem>>, vector<1x100x12xf32>
    %7 = vector.shape_cast %6 : vector<1x100x12xf32> to vector<100x12xf32>
    %cst = arith.constant 0.000000e+00 : f32
    %8 = vector.broadcast %cst : f32 to vector<92x9xf32>
    %9 = vector.extract_strided_slice %7 {offsets = [0, 0], sizes = [92, 12], strides = [1, 1]} : vector<100x12xf32> to vector<92x12xf32>
    %10 = vector.extract_strided_slice %0 {offsets = [0, 0, 0], sizes = [1, 12, 9], strides = [1, 1, 1]} : vector<9x12x9xf32> to vector<1x12x9xf32>
    %11 = vector.shape_cast %10 : vector<1x12x9xf32> to vector<12x9xf32>
    %cst_17 = arith.constant dense<0.000000e+00> : vector<92x9xf32>
    %12 = tpu.matmul %9, %11, %cst_17 {dimension_numbers = #tpu.dot_dimension_numbers<[1], [0], [0], [1], [0, 0, 1, 1], [], []>} : vector<92x12xf32>, vector<12x9xf32>, vector<92x9xf32> -> vector<92x9xf32>
    %13 = arith.addf %8, %12 : vector<92x9xf32>
    %14 = vector.extract_strided_slice %7 {offsets = [1, 0], sizes = [92, 12], strides = [1, 1]} : vector<100x12xf32> to vector<92x12xf32>
    %15 = vector.extract_strided_slice %0 {offsets = [1, 0, 0], sizes = [1, 12, 9], strides = [1, 1, 1]} : vector<9x12x9xf32> to vector<1x12x9xf32>
    %16 = vector.shape_cast %15 : vector<1x12x9xf32> to vector<12x9xf32>
    %cst_18 = arith.constant dense<0.000000e+00> : vector<92x9xf32>
    %17 = tpu.matmul %14, %16, %cst_18 {dimension_numbers = #tpu.dot_dimension_numbers<[1], [0], [0], [1], [0, 0, 1, 1], [], []>} : vector<92x12xf32>, vector<12x9xf32>, vector<92x9xf32> -> vector<92x9xf32>
    %18 = arith.addf %13, %17 : vector<92x9xf32>
    %19 = vector.extract_strided_slice %7 {offsets = [2, 0], sizes = [92, 12], strides = [1, 1]} : vector<100x12xf32> to vector<92x12xf32>
    %20 = vector.extract_strided_slice %0 {offsets = [2, 0, 0], sizes = [1, 12, 9], strides = [1, 1, 1]} : vector<9x12x9xf32> to vector<1x12x9xf32>
    %21 = vector.shape_cast %20 : vector<1x12x9xf32> to vector<12x9xf32>
    %cst_19 = arith.constant dense<0.000000e+00> : vector<92x9xf32>
    %22 = tpu.matmul %19, %21, %cst_19 {dimension_numbers = #tpu.dot_dimension_numbers<[1], [0], [0], [1], [0, 0, 1, 1], [], []>} : vector<92x12xf32>, vector<12x9xf32>, vector<92x9xf32> -> vector<92x9xf32>
    %23 = arith.addf %18, %22 : vector<92x9xf32>
    %24 = vector.extract_strided_slice %7 {offsets = [3, 0], sizes = [92, 12], strides = [1, 1]} : vector<100x12xf32> to vector<92x12xf32>
    %25 = vector.extract_strided_slice %0 {offsets = [3, 0, 0], sizes = [1, 12, 9], strides = [1, 1, 1]} : vector<9x12x9xf32> to vector<1x12x9xf32>
    %26 = vector.shape_cast %25 : vector<1x12x9xf32> to vector<12x9xf32>
    %cst_20 = arith.constant dense<0.000000e+00> : vector<92x9xf32>
    %27 = tpu.matmul %24, %26, %cst_20 {dimension_numbers = #tpu.dot_dimension_numbers<[1], [0], [0], [1], [0, 0, 1, 1], [], []>} : vector<92x12xf32>, vector<12x9xf32>, vector<92x9xf32> -> vector<92x9xf32>
    %28 = arith.addf %23, %27 : vector<92x9xf32>
    %29 = vector.extract_strided_slice %7 {offsets = [4, 0], sizes = [92, 12], strides = [1, 1]} : vector<100x12xf32> to vector<92x12xf32>
    %30 = vector.extract_strided_slice %0 {offsets = [4, 0, 0], sizes = [1, 12, 9], strides = [1, 1, 1]} : vector<9x12x9xf32> to vector<1x12x9xf32>
    %31 = vector.shape_cast %30 : vector<1x12x9xf32> to vector<12x9xf32>
    %cst_21 = arith.constant dense<0.000000e+00> : vector<92x9xf32>
    %32 = tpu.matmul %29, %31, %cst_21 {dimension_numbers = #tpu.dot_dimension_numbers<[1], [0], [0], [1], [0, 0, 1, 1], [], []>} : vector<92x12xf32>, vector<12x9xf32>, vector<92x9xf32> -> vector<92x9xf32>
    %33 = arith.addf %28, %32 : vector<92x9xf32>
    %34 = vector.extract_strided_slice %7 {offsets = [5, 0], sizes = [92, 12], strides = [1, 1]} : vector<100x12xf32> to vector<92x12xf32>
    %35 = vector.extract_strided_slice %0 {offsets = [5, 0, 0], sizes = [1, 12, 9], strides = [1, 1, 1]} : vector<9x12x9xf32> to vector<1x12x9xf32>
    %36 = vector.shape_cast %35 : vector<1x12x9xf32> to vector<12x9xf32>
    %cst_22 = arith.constant dense<0.000000e+00> : vector<92x9xf32>
    %37 = tpu.matmul %34, %36, %cst_22 {dimension_numbers = #tpu.dot_dimension_numbers<[1], [0], [0], [1], [0, 0, 1, 1], [], []>} : vector<92x12xf32>, vector<12x9xf32>, vector<92x9xf32> -> vector<92x9xf32>
    %38 = arith.addf %33, %37 : vector<92x9xf32>
    %39 = vector.extract_strided_slice %7 {offsets = [6, 0], sizes = [92, 12], strides = [1, 1]} : vector<100x12xf32> to vector<92x12xf32>
    %40 = vector.extract_strided_slice %0 {offsets = [6, 0, 0], sizes = [1, 12, 9], strides = [1, 1, 1]} : vector<9x12x9xf32> to vector<1x12x9xf32>
    %41 = vector.shape_cast %40 : vector<1x12x9xf32> to vector<12x9xf32>
    %cst_23 = arith.constant dense<0.000000e+00> : vector<92x9xf32>
    %42 = tpu.matmul %39, %41, %cst_23 {dimension_numbers = #tpu.dot_dimension_numbers<[1], [0], [0], [1], [0, 0, 1, 1], [], []>} : vector<92x12xf32>, vector<12x9xf32>, vector<92x9xf32> -> vector<92x9xf32>
    %43 = arith.addf %38, %42 : vector<92x9xf32>
    %44 = vector.extract_strided_slice %7 {offsets = [7, 0], sizes = [92, 12], strides = [1, 1]} : vector<100x12xf32> to vector<92x12xf32>
    %45 = vector.extract_strided_slice %0 {offsets = [7, 0, 0], sizes = [1, 12, 9], strides = [1, 1, 1]} : vector<9x12x9xf32> to vector<1x12x9xf32>
    %46 = vector.shape_cast %45 : vector<1x12x9xf32> to vector<12x9xf32>
    %cst_24 = arith.constant dense<0.000000e+00> : vector<92x9xf32>
    %47 = tpu.matmul %44, %46, %cst_24 {dimension_numbers = #tpu.dot_dimension_numbers<[1], [0], [0], [1], [0, 0, 1, 1], [], []>} : vector<92x12xf32>, vector<12x9xf32>, vector<92x9xf32> -> vector<92x9xf32>
    %48 = arith.addf %43, %47 : vector<92x9xf32>
    %49 = vector.extract_strided_slice %7 {offsets = [8, 0], sizes = [92, 12], strides = [1, 1]} : vector<100x12xf32> to vector<92x12xf32>
    %50 = vector.extract_strided_slice %0 {offsets = [8, 0, 0], sizes = [1, 12, 9], strides = [1, 1, 1]} : vector<9x12x9xf32> to vector<1x12x9xf32>
    %51 = vector.shape_cast %50 : vector<1x12x9xf32> to vector<12x9xf32>
    %cst_25 = arith.constant dense<0.000000e+00> : vector<92x9xf32>
    %52 = tpu.matmul %49, %51, %cst_25 {dimension_numbers = #tpu.dot_dimension_numbers<[1], [0], [0], [1], [0, 0, 1, 1], [], []>} : vector<92x12xf32>, vector<12x9xf32>, vector<92x9xf32> -> vector<92x9xf32>
    %53 = arith.addf %48, %52 : vector<92x9xf32>
    %54 = vector.broadcast %1 : vector<1x9xf32> to vector<92x9xf32>
    %55 = arith.addf %53, %54 : vector<92x9xf32>
    %cst_26 = arith.constant 0.000000e+00 : f32
    %56 = vector.broadcast %cst_26 : f32 to vector<92x9xf32>
    %57 = arith.cmpf oge, %55, %56 : vector<92x9xf32>
    %cst_27 = arith.constant 0.00999999977 : f32
    %58 = vector.broadcast %cst_27 : f32 to vector<92x9xf32>
    %59 = arith.mulf %58, %55 : vector<92x9xf32>
    %60 = arith.select %57, %55, %59 : vector<92x9xi1>, vector<92x9xf32>
    %cst_28 = arith.constant 0.000000e+00 : f32
    %61 = vector.broadcast %cst_28 : f32 to vector<84x9xf32>
    %62 = vector.extract_strided_slice %60 {offsets = [0, 0], sizes = [84, 9], strides = [1, 1]} : vector<92x9xf32> to vector<84x9xf32>
    %63 = vector.extract_strided_slice %2 {offsets = [0, 0, 0], sizes = [1, 9, 9], strides = [1, 1, 1]} : vector<9x9x9xf32> to vector<1x9x9xf32>
    %64 = vector.shape_cast %63 : vector<1x9x9xf32> to vector<9x9xf32>
    %cst_29 = arith.constant dense<0.000000e+00> : vector<84x9xf32>
    %65 = tpu.matmul %62, %64, %cst_29 {dimension_numbers = #tpu.dot_dimension_numbers<[1], [0], [0], [1], [0, 0, 1, 1], [], []>} : vector<84x9xf32>, vector<9x9xf32>, vector<84x9xf32> -> vector<84x9xf32>
    %66 = arith.addf %61, %65 : vector<84x9xf32>
    %67 = vector.extract_strided_slice %60 {offsets = [1, 0], sizes = [84, 9], strides = [1, 1]} : vector<92x9xf32> to vector<84x9xf32>
    %68 = vector.extract_strided_slice %2 {offsets = [1, 0, 0], sizes = [1, 9, 9], strides = [1, 1, 1]} : vector<9x9x9xf32> to vector<1x9x9xf32>
    %69 = vector.shape_cast %68 : vector<1x9x9xf32> to vector<9x9xf32>
    %cst_30 = arith.constant dense<0.000000e+00> : vector<84x9xf32>
    %70 = tpu.matmul %67, %69, %cst_30 {dimension_numbers = #tpu.dot_dimension_numbers<[1], [0], [0], [1], [0, 0, 1, 1], [], []>} : vector<84x9xf32>, vector<9x9xf32>, vector<84x9xf32> -> vector<84x9xf32>
    %71 = arith.addf %66, %70 : vector<84x9xf32>
    %72 = vector.extract_strided_slice %60 {offsets = [2, 0], sizes = [84, 9], strides = [1, 1]} : vector<92x9xf32> to vector<84x9xf32>
    %73 = vector.extract_strided_slice %2 {offsets = [2, 0, 0], sizes = [1, 9, 9], strides = [1, 1, 1]} : vector<9x9x9xf32> to vector<1x9x9xf32>
    %74 = vector.shape_cast %73 : vector<1x9x9xf32> to vector<9x9xf32>
    %cst_31 = arith.constant dense<0.000000e+00> : vector<84x9xf32>
    %75 = tpu.matmul %72, %74, %cst_31 {dimension_numbers = #tpu.dot_dimension_numbers<[1], [0], [0], [1], [0, 0, 1, 1], [], []>} : vector<84x9xf32>, vector<9x9xf32>, vector<84x9xf32> -> vector<84x9xf32>
    %76 = arith.addf %71, %75 : vector<84x9xf32>
    %77 = vector.extract_strided_slice %60 {offsets = [3, 0], sizes = [84, 9], strides = [1, 1]} : vector<92x9xf32> to vector<84x9xf32>
    %78 = vector.extract_strided_slice %2 {offsets = [3, 0, 0], sizes = [1, 9, 9], strides = [1, 1, 1]} : vector<9x9x9xf32> to vector<1x9x9xf32>
    %79 = vector.shape_cast %78 : vector<1x9x9xf32> to vector<9x9xf32>
    %cst_32 = arith.constant dense<0.000000e+00> : vector<84x9xf32>
    %80 = tpu.matmul %77, %79, %cst_32 {dimension_numbers = #tpu.dot_dimension_numbers<[1], [0], [0], [1], [0, 0, 1, 1], [], []>} : vector<84x9xf32>, vector<9x9xf32>, vector<84x9xf32> -> vector<84x9xf32>
    %81 = arith.addf %76, %80 : vector<84x9xf32>
    %82 = vector.extract_strided_slice %60 {offsets = [4, 0], sizes = [84, 9], strides = [1, 1]} : vector<92x9xf32> to vector<84x9xf32>
    %83 = vector.extract_strided_slice %2 {offsets = [4, 0, 0], sizes = [1, 9, 9], strides = [1, 1, 1]} : vector<9x9x9xf32> to vector<1x9x9xf32>
    %84 = vector.shape_cast %83 : vector<1x9x9xf32> to vector<9x9xf32>
    %cst_33 = arith.constant dense<0.000000e+00> : vector<84x9xf32>
    %85 = tpu.matmul %82, %84, %cst_33 {dimension_numbers = #tpu.dot_dimension_numbers<[1], [0], [0], [1], [0, 0, 1, 1], [], []>} : vector<84x9xf32>, vector<9x9xf32>, vector<84x9xf32> -> vector<84x9xf32>
    %86 = arith.addf %81, %85 : vector<84x9xf32>
    %87 = vector.extract_strided_slice %60 {offsets = [5, 0], sizes = [84, 9], strides = [1, 1]} : vector<92x9xf32> to vector<84x9xf32>
    %88 = vector.extract_strided_slice %2 {offsets = [5, 0, 0], sizes = [1, 9, 9], strides = [1, 1, 1]} : vector<9x9x9xf32> to vector<1x9x9xf32>
    %89 = vector.shape_cast %88 : vector<1x9x9xf32> to vector<9x9xf32>
    %cst_34 = arith.constant dense<0.000000e+00> : vector<84x9xf32>
    %90 = tpu.matmul %87, %89, %cst_34 {dimension_numbers = #tpu.dot_dimension_numbers<[1], [0], [0], [1], [0, 0, 1, 1], [], []>} : vector<84x9xf32>, vector<9x9xf32>, vector<84x9xf32> -> vector<84x9xf32>
    %91 = arith.addf %86, %90 : vector<84x9xf32>
    %92 = vector.extract_strided_slice %60 {offsets = [6, 0], sizes = [84, 9], strides = [1, 1]} : vector<92x9xf32> to vector<84x9xf32>
    %93 = vector.extract_strided_slice %2 {offsets = [6, 0, 0], sizes = [1, 9, 9], strides = [1, 1, 1]} : vector<9x9x9xf32> to vector<1x9x9xf32>
    %94 = vector.shape_cast %93 : vector<1x9x9xf32> to vector<9x9xf32>
    %cst_35 = arith.constant dense<0.000000e+00> : vector<84x9xf32>
    %95 = tpu.matmul %92, %94, %cst_35 {dimension_numbers = #tpu.dot_dimension_numbers<[1], [0], [0], [1], [0, 0, 1, 1], [], []>} : vector<84x9xf32>, vector<9x9xf32>, vector<84x9xf32> -> vector<84x9xf32>
    %96 = arith.addf %91, %95 : vector<84x9xf32>
    %97 = vector.extract_strided_slice %60 {offsets = [7, 0], sizes = [84, 9], strides = [1, 1]} : vector<92x9xf32> to vector<84x9xf32>
    %98 = vector.extract_strided_slice %2 {offsets = [7, 0, 0], sizes = [1, 9, 9], strides = [1, 1, 1]} : vector<9x9x9xf32> to vector<1x9x9xf32>
    %99 = vector.shape_cast %98 : vector<1x9x9xf32> to vector<9x9xf32>
    %cst_36 = arith.constant dense<0.000000e+00> : vector<84x9xf32>
    %100 = tpu.matmul %97, %99, %cst_36 {dimension_numbers = #tpu.dot_dimension_numbers<[1], [0], [0], [1], [0, 0, 1, 1], [], []>} : vector<84x9xf32>, vector<9x9xf32>, vector<84x9xf32> -> vector<84x9xf32>
    %101 = arith.addf %96, %100 : vector<84x9xf32>
    %102 = vector.extract_strided_slice %60 {offsets = [8, 0], sizes = [84, 9], strides = [1, 1]} : vector<92x9xf32> to vector<84x9xf32>
    %103 = vector.extract_strided_slice %2 {offsets = [8, 0, 0], sizes = [1, 9, 9], strides = [1, 1, 1]} : vector<9x9x9xf32> to vector<1x9x9xf32>
    %104 = vector.shape_cast %103 : vector<1x9x9xf32> to vector<9x9xf32>
    %cst_37 = arith.constant dense<0.000000e+00> : vector<84x9xf32>
    %105 = tpu.matmul %102, %104, %cst_37 {dimension_numbers = #tpu.dot_dimension_numbers<[1], [0], [0], [1], [0, 0, 1, 1], [], []>} : vector<84x9xf32>, vector<9x9xf32>, vector<84x9xf32> -> vector<84x9xf32>
    %106 = arith.addf %101, %105 : vector<84x9xf32>
    %107 = vector.broadcast %3 : vector<1x9xf32> to vector<84x9xf32>
    %108 = arith.addf %106, %107 : vector<84x9xf32>
    %cst_38 = arith.constant 0.000000e+00 : f32
    %109 = vector.broadcast %cst_38 : f32 to vector<84x9xf32>
    %110 = arith.cmpf oge, %108, %109 : vector<84x9xf32>
    %cst_39 = arith.constant 0.00999999977 : f32
    %111 = vector.broadcast %cst_39 : f32 to vector<84x9xf32>
    %112 = arith.mulf %111, %108 : vector<84x9xf32>
    %113 = arith.select %110, %108, %112 : vector<84x9xi1>, vector<84x9xf32>
    %cst_40 = arith.constant 0.000000e+00 : f32
    %114 = vector.broadcast %cst_40 : f32 to vector<74x10xf32>
    %115 = vector.extract_strided_slice %113 {offsets = [0, 0], sizes = [74, 9], strides = [1, 1]} : vector<84x9xf32> to vector<74x9xf32>
    %116 = vector.extract_strided_slice %4 {offsets = [0, 0, 0], sizes = [1, 9, 10], strides = [1, 1, 1]} : vector<11x9x10xf32> to vector<1x9x10xf32>
    %117 = vector.shape_cast %116 : vector<1x9x10xf32> to vector<9x10xf32>
    %cst_41 = arith.constant dense<0.000000e+00> : vector<74x10xf32>
    %118 = tpu.matmul %115, %117, %cst_41 {dimension_numbers = #tpu.dot_dimension_numbers<[1], [0], [0], [1], [0, 0, 1, 1], [], []>} : vector<74x9xf32>, vector<9x10xf32>, vector<74x10xf32> -> vector<74x10xf32>
    %119 = arith.addf %114, %118 : vector<74x10xf32>
    %120 = vector.extract_strided_slice %113 {offsets = [1, 0], sizes = [74, 9], strides = [1, 1]} : vector<84x9xf32> to vector<74x9xf32>
    %121 = vector.extract_strided_slice %4 {offsets = [1, 0, 0], sizes = [1, 9, 10], strides = [1, 1, 1]} : vector<11x9x10xf32> to vector<1x9x10xf32>
    %122 = vector.shape_cast %121 : vector<1x9x10xf32> to vector<9x10xf32>
    %cst_42 = arith.constant dense<0.000000e+00> : vector<74x10xf32>
    %123 = tpu.matmul %120, %122, %cst_42 {dimension_numbers = #tpu.dot_dimension_numbers<[1], [0], [0], [1], [0, 0, 1, 1], [], []>} : vector<74x9xf32>, vector<9x10xf32>, vector<74x10xf32> -> vector<74x10xf32>
    %124 = arith.addf %119, %123 : vector<74x10xf32>
    %125 = vector.extract_strided_slice %113 {offsets = [2, 0], sizes = [74, 9], strides = [1, 1]} : vector<84x9xf32> to vector<74x9xf32>
    %126 = vector.extract_strided_slice %4 {offsets = [2, 0, 0], sizes = [1, 9, 10], strides = [1, 1, 1]} : vector<11x9x10xf32> to vector<1x9x10xf32>
    %127 = vector.shape_cast %126 : vector<1x9x10xf32> to vector<9x10xf32>
    %cst_43 = arith.constant dense<0.000000e+00> : vector<74x10xf32>
    %128 = tpu.matmul %125, %127, %cst_43 {dimension_numbers = #tpu.dot_dimension_numbers<[1], [0], [0], [1], [0, 0, 1, 1], [], []>} : vector<74x9xf32>, vector<9x10xf32>, vector<74x10xf32> -> vector<74x10xf32>
    %129 = arith.addf %124, %128 : vector<74x10xf32>
    %130 = vector.extract_strided_slice %113 {offsets = [3, 0], sizes = [74, 9], strides = [1, 1]} : vector<84x9xf32> to vector<74x9xf32>
    %131 = vector.extract_strided_slice %4 {offsets = [3, 0, 0], sizes = [1, 9, 10], strides = [1, 1, 1]} : vector<11x9x10xf32> to vector<1x9x10xf32>
    %132 = vector.shape_cast %131 : vector<1x9x10xf32> to vector<9x10xf32>
    %cst_44 = arith.constant dense<0.000000e+00> : vector<74x10xf32>
    %133 = tpu.matmul %130, %132, %cst_44 {dimension_numbers = #tpu.dot_dimension_numbers<[1], [0], [0], [1], [0, 0, 1, 1], [], []>} : vector<74x9xf32>, vector<9x10xf32>, vector<74x10xf32> -> vector<74x10xf32>
    %134 = arith.addf %129, %133 : vector<74x10xf32>
    %135 = vector.extract_strided_slice %113 {offsets = [4, 0], sizes = [74, 9], strides = [1, 1]} : vector<84x9xf32> to vector<74x9xf32>
    %136 = vector.extract_strided_slice %4 {offsets = [4, 0, 0], sizes = [1, 9, 10], strides = [1, 1, 1]} : vector<11x9x10xf32> to vector<1x9x10xf32>
    %137 = vector.shape_cast %136 : vector<1x9x10xf32> to vector<9x10xf32>
    %cst_45 = arith.constant dense<0.000000e+00> : vector<74x10xf32>
    %138 = tpu.matmul %135, %137, %cst_45 {dimension_numbers = #tpu.dot_dimension_numbers<[1], [0], [0], [1], [0, 0, 1, 1], [], []>} : vector<74x9xf32>, vector<9x10xf32>, vector<74x10xf32> -> vector<74x10xf32>
    %139 = arith.addf %134, %138 : vector<74x10xf32>
    %140 = vector.extract_strided_slice %113 {offsets = [5, 0], sizes = [74, 9], strides = [1, 1]} : vector<84x9xf32> to vector<74x9xf32>
    %141 = vector.extract_strided_slice %4 {offsets = [5, 0, 0], sizes = [1, 9, 10], strides = [1, 1, 1]} : vector<11x9x10xf32> to vector<1x9x10xf32>
    %142 = vector.shape_cast %141 : vector<1x9x10xf32> to vector<9x10xf32>
    %cst_46 = arith.constant dense<0.000000e+00> : vector<74x10xf32>
    %143 = tpu.matmul %140, %142, %cst_46 {dimension_numbers = #tpu.dot_dimension_numbers<[1], [0], [0], [1], [0, 0, 1, 1], [], []>} : vector<74x9xf32>, vector<9x10xf32>, vector<74x10xf32> -> vector<74x10xf32>
    %144 = arith.addf %139, %143 : vector<74x10xf32>
    %145 = vector.extract_strided_slice %113 {offsets = [6, 0], sizes = [74, 9], strides = [1, 1]} : vector<84x9xf32> to vector<74x9xf32>
    %146 = vector.extract_strided_slice %4 {offsets = [6, 0, 0], sizes = [1, 9, 10], strides = [1, 1, 1]} : vector<11x9x10xf32> to vector<1x9x10xf32>
    %147 = vector.shape_cast %146 : vector<1x9x10xf32> to vector<9x10xf32>
    %cst_47 = arith.constant dense<0.000000e+00> : vector<74x10xf32>
    %148 = tpu.matmul %145, %147, %cst_47 {dimension_numbers = #tpu.dot_dimension_numbers<[1], [0], [0], [1], [0, 0, 1, 1], [], []>} : vector<74x9xf32>, vector<9x10xf32>, vector<74x10xf32> -> vector<74x10xf32>
    %149 = arith.addf %144, %148 : vector<74x10xf32>
    %150 = vector.extract_strided_slice %113 {offsets = [7, 0], sizes = [74, 9], strides = [1, 1]} : vector<84x9xf32> to vector<74x9xf32>
    %151 = vector.extract_strided_slice %4 {offsets = [7, 0, 0], sizes = [1, 9, 10], strides = [1, 1, 1]} : vector<11x9x10xf32> to vector<1x9x10xf32>
    %152 = vector.shape_cast %151 : vector<1x9x10xf32> to vector<9x10xf32>
    %cst_48 = arith.constant dense<0.000000e+00> : vector<74x10xf32>
    %153 = tpu.matmul %150, %152, %cst_48 {dimension_numbers = #tpu.dot_dimension_numbers<[1], [0], [0], [1], [0, 0, 1, 1], [], []>} : vector<74x9xf32>, vector<9x10xf32>, vector<74x10xf32> -> vector<74x10xf32>
    %154 = arith.addf %149, %153 : vector<74x10xf32>
    %155 = vector.extract_strided_slice %113 {offsets = [8, 0], sizes = [74, 9], strides = [1, 1]} : vector<84x9xf32> to vector<74x9xf32>
    %156 = vector.extract_strided_slice %4 {offsets = [8, 0, 0], sizes = [1, 9, 10], strides = [1, 1, 1]} : vector<11x9x10xf32> to vector<1x9x10xf32>
    %157 = vector.shape_cast %156 : vector<1x9x10xf32> to vector<9x10xf32>
    %cst_49 = arith.constant dense<0.000000e+00> : vector<74x10xf32>
    %158 = tpu.matmul %155, %157, %cst_49 {dimension_numbers = #tpu.dot_dimension_numbers<[1], [0], [0], [1], [0, 0, 1, 1], [], []>} : vector<74x9xf32>, vector<9x10xf32>, vector<74x10xf32> -> vector<74x10xf32>
    %159 = arith.addf %154, %158 : vector<74x10xf32>
    %160 = vector.extract_strided_slice %113 {offsets = [9, 0], sizes = [74, 9], strides = [1, 1]} : vector<84x9xf32> to vector<74x9xf32>
    %161 = vector.extract_strided_slice %4 {offsets = [9, 0, 0], sizes = [1, 9, 10], strides = [1, 1, 1]} : vector<11x9x10xf32> to vector<1x9x10xf32>
    %162 = vector.shape_cast %161 : vector<1x9x10xf32> to vector<9x10xf32>
    %cst_50 = arith.constant dense<0.000000e+00> : vector<74x10xf32>
    %163 = tpu.matmul %160, %162, %cst_50 {dimension_numbers = #tpu.dot_dimension_numbers<[1], [0], [0], [1], [0, 0, 1, 1], [], []>} : vector<74x9xf32>, vector<9x10xf32>, vector<74x10xf32> -> vector<74x10xf32>
    %164 = arith.addf %159, %163 : vector<74x10xf32>
    %165 = vector.extract_strided_slice %113 {offsets = [10, 0], sizes = [74, 9], strides = [1, 1]} : vector<84x9xf32> to vector<74x9xf32>
    %166 = vector.extract_strided_slice %4 {offsets = [10, 0, 0], sizes = [1, 9, 10], strides = [1, 1, 1]} : vector<11x9x10xf32> to vector<1x9x10xf32>
    %167 = vector.shape_cast %166 : vector<1x9x10xf32> to vector<9x10xf32>
    %cst_51 = arith.constant dense<0.000000e+00> : vector<74x10xf32>
    %168 = tpu.matmul %165, %167, %cst_51 {dimension_numbers = #tpu.dot_dimension_numbers<[1], [0], [0], [1], [0, 0, 1, 1], [], []>} : vector<74x9xf32>, vector<9x10xf32>, vector<74x10xf32> -> vector<74x10xf32>
    %169 = arith.addf %164, %168 : vector<74x10xf32>
    %170 = vector.broadcast %5 : vector<1x10xf32> to vector<74x10xf32>
    %171 = arith.addf %169, %170 : vector<74x10xf32>
    %cst_52 = arith.constant 0.000000e+00 : f32
    %172 = vector.broadcast %cst_52 : f32 to vector<74x10xf32>
    %173 = arith.cmpf oge, %171, %172 : vector<74x10xf32>
    %cst_53 = arith.constant 0.00999999977 : f32
    %174 = vector.broadcast %cst_53 : f32 to vector<74x10xf32>
    %175 = arith.mulf %174, %171 : vector<74x10xf32>
    %176 = arith.select %173, %171, %175 : vector<74x10xi1>, vector<74x10xf32>
    %c0_54 = arith.constant 0 : index
    %c0_55 = arith.constant 0 : index
    %c0_56 = arith.constant 0 : index
    %177 = vector.load %arg8[%c0_54, %c0_55, %c0_56] : memref<2x74x10xf32, #tpu.memory_space<vmem>>, vector<1x74x10xf32>
    %178 = vector.shape_cast %177 : vector<1x74x10xf32> to vector<74x10xf32>
    %179 = vector.shape_cast %176 : vector<74x10xf32> to vector<1x74x10xf32>
    tpu.vector_store %arg8[%c0_54, %c0_55, %c0_56], %179 {strides = array<i32>} : memref<2x74x10xf32, #tpu.memory_space<vmem>>, vector<1x74x10xf32>,
    %c1 = arith.constant 1 : index
    %c0_57 = arith.constant 0 : index
    %c0_58 = arith.constant 0 : index
    %180 = vector.load %arg1[%c1, %c0_57, %c0_58] : memref<2x100x12xf32, #tpu.memory_space<vmem>>, vector<1x100x12xf32>
    %181 = vector.shape_cast %180 : vector<1x100x12xf32> to vector<100x12xf32>
    %cst_59 = arith.constant 0.000000e+00 : f32
    %182 = vector.broadcast %cst_59 : f32 to vector<92x9xf32>
    %183 = vector.extract_strided_slice %181 {offsets = [0, 0], sizes = [92, 12], strides = [1, 1]} : vector<100x12xf32> to vector<92x12xf32>
    %184 = vector.extract_strided_slice %0 {offsets = [0, 0, 0], sizes = [1, 12, 9], strides = [1, 1, 1]} : vector<9x12x9xf32> to vector<1x12x9xf32>
    %185 = vector.shape_cast %184 : vector<1x12x9xf32> to vector<12x9xf32>
    %cst_60 = arith.constant dense<0.000000e+00> : vector<92x9xf32>
    %186 = tpu.matmul %183, %185, %cst_60 {dimension_numbers = #tpu.dot_dimension_numbers<[1], [0], [0], [1], [0, 0, 1, 1], [], []>} : vector<92x12xf32>, vector<12x9xf32>, vector<92x9xf32> -> vector<92x9xf32>
    %187 = arith.addf %182, %186 : vector<92x9xf32>
    %188 = vector.extract_strided_slice %181 {offsets = [1, 0], sizes = [92, 12], strides = [1, 1]} : vector<100x12xf32> to vector<92x12xf32>
    %189 = vector.extract_strided_slice %0 {offsets = [1, 0, 0], sizes = [1, 12, 9], strides = [1, 1, 1]} : vector<9x12x9xf32> to vector<1x12x9xf32>
    %190 = vector.shape_cast %189 : vector<1x12x9xf32> to vector<12x9xf32>
    %cst_61 = arith.constant dense<0.000000e+00> : vector<92x9xf32>
    %191 = tpu.matmul %188, %190, %cst_61 {dimension_numbers = #tpu.dot_dimension_numbers<[1], [0], [0], [1], [0, 0, 1, 1], [], []>} : vector<92x12xf32>, vector<12x9xf32>, vector<92x9xf32> -> vector<92x9xf32>
    %192 = arith.addf %187, %191 : vector<92x9xf32>
    %193 = vector.extract_strided_slice %181 {offsets = [2, 0], sizes = [92, 12], strides = [1, 1]} : vector<100x12xf32> to vector<92x12xf32>
    %194 = vector.extract_strided_slice %0 {offsets = [2, 0, 0], sizes = [1, 12, 9], strides = [1, 1, 1]} : vector<9x12x9xf32> to vector<1x12x9xf32>
    %195 = vector.shape_cast %194 : vector<1x12x9xf32> to vector<12x9xf32>
    %cst_62 = arith.constant dense<0.000000e+00> : vector<92x9xf32>
    %196 = tpu.matmul %193, %195, %cst_62 {dimension_numbers = #tpu.dot_dimension_numbers<[1], [0], [0], [1], [0, 0, 1, 1], [], []>} : vector<92x12xf32>, vector<12x9xf32>, vector<92x9xf32> -> vector<92x9xf32>
    %197 = arith.addf %192, %196 : vector<92x9xf32>
    %198 = vector.extract_strided_slice %181 {offsets = [3, 0], sizes = [92, 12], strides = [1, 1]} : vector<100x12xf32> to vector<92x12xf32>
    %199 = vector.extract_strided_slice %0 {offsets = [3, 0, 0], sizes = [1, 12, 9], strides = [1, 1, 1]} : vector<9x12x9xf32> to vector<1x12x9xf32>
    %200 = vector.shape_cast %199 : vector<1x12x9xf32> to vector<12x9xf32>
    %cst_63 = arith.constant dense<0.000000e+00> : vector<92x9xf32>
    %201 = tpu.matmul %198, %200, %cst_63 {dimension_numbers = #tpu.dot_dimension_numbers<[1], [0], [0], [1], [0, 0, 1, 1], [], []>} : vector<92x12xf32>, vector<12x9xf32>, vector<92x9xf32> -> vector<92x9xf32>
    %202 = arith.addf %197, %201 : vector<92x9xf32>
    %203 = vector.extract_strided_slice %181 {offsets = [4, 0], sizes = [92, 12], strides = [1, 1]} : vector<100x12xf32> to vector<92x12xf32>
    %204 = vector.extract_strided_slice %0 {offsets = [4, 0, 0], sizes = [1, 12, 9], strides = [1, 1, 1]} : vector<9x12x9xf32> to vector<1x12x9xf32>
    %205 = vector.shape_cast %204 : vector<1x12x9xf32> to vector<12x9xf32>
    %cst_64 = arith.constant dense<0.000000e+00> : vector<92x9xf32>
    %206 = tpu.matmul %203, %205, %cst_64 {dimension_numbers = #tpu.dot_dimension_numbers<[1], [0], [0], [1], [0, 0, 1, 1], [], []>} : vector<92x12xf32>, vector<12x9xf32>, vector<92x9xf32> -> vector<92x9xf32>
    %207 = arith.addf %202, %206 : vector<92x9xf32>
    %208 = vector.extract_strided_slice %181 {offsets = [5, 0], sizes = [92, 12], strides = [1, 1]} : vector<100x12xf32> to vector<92x12xf32>
    %209 = vector.extract_strided_slice %0 {offsets = [5, 0, 0], sizes = [1, 12, 9], strides = [1, 1, 1]} : vector<9x12x9xf32> to vector<1x12x9xf32>
    %210 = vector.shape_cast %209 : vector<1x12x9xf32> to vector<12x9xf32>
    %cst_65 = arith.constant dense<0.000000e+00> : vector<92x9xf32>
    %211 = tpu.matmul %208, %210, %cst_65 {dimension_numbers = #tpu.dot_dimension_numbers<[1], [0], [0], [1], [0, 0, 1, 1], [], []>} : vector<92x12xf32>, vector<12x9xf32>, vector<92x9xf32> -> vector<92x9xf32>
    %212 = arith.addf %207, %211 : vector<92x9xf32>
    %213 = vector.extract_strided_slice %181 {offsets = [6, 0], sizes = [92, 12], strides = [1, 1]} : vector<100x12xf32> to vector<92x12xf32>
    %214 = vector.extract_strided_slice %0 {offsets = [6, 0, 0], sizes = [1, 12, 9], strides = [1, 1, 1]} : vector<9x12x9xf32> to vector<1x12x9xf32>
    %215 = vector.shape_cast %214 : vector<1x12x9xf32> to vector<12x9xf32>
    %cst_66 = arith.constant dense<0.000000e+00> : vector<92x9xf32>
    %216 = tpu.matmul %213, %215, %cst_66 {dimension_numbers = #tpu.dot_dimension_numbers<[1], [0], [0], [1], [0, 0, 1, 1], [], []>} : vector<92x12xf32>, vector<12x9xf32>, vector<92x9xf32> -> vector<92x9xf32>
    %217 = arith.addf %212, %216 : vector<92x9xf32>
    %218 = vector.extract_strided_slice %181 {offsets = [7, 0], sizes = [92, 12], strides = [1, 1]} : vector<100x12xf32> to vector<92x12xf32>
    %219 = vector.extract_strided_slice %0 {offsets = [7, 0, 0], sizes = [1, 12, 9], strides = [1, 1, 1]} : vector<9x12x9xf32> to vector<1x12x9xf32>
    %220 = vector.shape_cast %219 : vector<1x12x9xf32> to vector<12x9xf32>
    %cst_67 = arith.constant dense<0.000000e+00> : vector<92x9xf32>
    %221 = tpu.matmul %218, %220, %cst_67 {dimension_numbers = #tpu.dot_dimension_numbers<[1], [0], [0], [1], [0, 0, 1, 1], [], []>} : vector<92x12xf32>, vector<12x9xf32>, vector<92x9xf32> -> vector<92x9xf32>
    %222 = arith.addf %217, %221 : vector<92x9xf32>
    %223 = vector.extract_strided_slice %181 {offsets = [8, 0], sizes = [92, 12], strides = [1, 1]} : vector<100x12xf32> to vector<92x12xf32>
    %224 = vector.extract_strided_slice %0 {offsets = [8, 0, 0], sizes = [1, 12, 9], strides = [1, 1, 1]} : vector<9x12x9xf32> to vector<1x12x9xf32>
    %225 = vector.shape_cast %224 : vector<1x12x9xf32> to vector<12x9xf32>
    %cst_68 = arith.constant dense<0.000000e+00> : vector<92x9xf32>
    %226 = tpu.matmul %223, %225, %cst_68 {dimension_numbers = #tpu.dot_dimension_numbers<[1], [0], [0], [1], [0, 0, 1, 1], [], []>} : vector<92x12xf32>, vector<12x9xf32>, vector<92x9xf32> -> vector<92x9xf32>
    %227 = arith.addf %222, %226 : vector<92x9xf32>
    %228 = vector.broadcast %1 : vector<1x9xf32> to vector<92x9xf32>
    %229 = arith.addf %227, %228 : vector<92x9xf32>
    %cst_69 = arith.constant 0.000000e+00 : f32
    %230 = vector.broadcast %cst_69 : f32 to vector<92x9xf32>
    %231 = arith.cmpf oge, %229, %230 : vector<92x9xf32>
    %cst_70 = arith.constant 0.00999999977 : f32
    %232 = vector.broadcast %cst_70 : f32 to vector<92x9xf32>
    %233 = arith.mulf %232, %229 : vector<92x9xf32>
    %234 = arith.select %231, %229, %233 : vector<92x9xi1>, vector<92x9xf32>
    %cst_71 = arith.constant 0.000000e+00 : f32
    %235 = vector.broadcast %cst_71 : f32 to vector<84x9xf32>
    %236 = vector.extract_strided_slice %234 {offsets = [0, 0], sizes = [84, 9], strides = [1, 1]} : vector<92x9xf32> to vector<84x9xf32>
    %237 = vector.extract_strided_slice %2 {offsets = [0, 0, 0], sizes = [1, 9, 9], strides = [1, 1, 1]} : vector<9x9x9xf32> to vector<1x9x9xf32>
    %238 = vector.shape_cast %237 : vector<1x9x9xf32> to vector<9x9xf32>
    %cst_72 = arith.constant dense<0.000000e+00> : vector<84x9xf32>
    %239 = tpu.matmul %236, %238, %cst_72 {dimension_numbers = #tpu.dot_dimension_numbers<[1], [0], [0], [1], [0, 0, 1, 1], [], []>} : vector<84x9xf32>, vector<9x9xf32>, vector<84x9xf32> -> vector<84x9xf32>
    %240 = arith.addf %235, %239 : vector<84x9xf32>
    %241 = vector.extract_strided_slice %234 {offsets = [1, 0], sizes = [84, 9], strides = [1, 1]} : vector<92x9xf32> to vector<84x9xf32>
    %242 = vector.extract_strided_slice %2 {offsets = [1, 0, 0], sizes = [1, 9, 9], strides = [1, 1, 1]} : vector<9x9x9xf32> to vector<1x9x9xf32>
    %243 = vector.shape_cast %242 : vector<1x9x9xf32> to vector<9x9xf32>
    %cst_73 = arith.constant dense<0.000000e+00> : vector<84x9xf32>
    %244 = tpu.matmul %241, %243, %cst_73 {dimension_numbers = #tpu.dot_dimension_numbers<[1], [0], [0], [1], [0, 0, 1, 1], [], []>} : vector<84x9xf32>, vector<9x9xf32>, vector<84x9xf32> -> vector<84x9xf32>
    %245 = arith.addf %240, %244 : vector<84x9xf32>
    %246 = vector.extract_strided_slice %234 {offsets = [2, 0], sizes = [84, 9], strides = [1, 1]} : vector<92x9xf32> to vector<84x9xf32>
    %247 = vector.extract_strided_slice %2 {offsets = [2, 0, 0], sizes = [1, 9, 9], strides = [1, 1, 1]} : vector<9x9x9xf32> to vector<1x9x9xf32>
    %248 = vector.shape_cast %247 : vector<1x9x9xf32> to vector<9x9xf32>
    %cst_74 = arith.constant dense<0.000000e+00> : vector<84x9xf32>
    %249 = tpu.matmul %246, %248, %cst_74 {dimension_numbers = #tpu.dot_dimension_numbers<[1], [0], [0], [1], [0, 0, 1, 1], [], []>} : vector<84x9xf32>, vector<9x9xf32>, vector<84x9xf32> -> vector<84x9xf32>
    %250 = arith.addf %245, %249 : vector<84x9xf32>
    %251 = vector.extract_strided_slice %234 {offsets = [3, 0], sizes = [84, 9], strides = [1, 1]} : vector<92x9xf32> to vector<84x9xf32>
    %252 = vector.extract_strided_slice %2 {offsets = [3, 0, 0], sizes = [1, 9, 9], strides = [1, 1, 1]} : vector<9x9x9xf32> to vector<1x9x9xf32>
    %253 = vector.shape_cast %252 : vector<1x9x9xf32> to vector<9x9xf32>
    %cst_75 = arith.constant dense<0.000000e+00> : vector<84x9xf32>
    %254 = tpu.matmul %251, %253, %cst_75 {dimension_numbers = #tpu.dot_dimension_numbers<[1], [0], [0], [1], [0, 0, 1, 1], [], []>} : vector<84x9xf32>, vector<9x9xf32>, vector<84x9xf32> -> vector<84x9xf32>
    %255 = arith.addf %250, %254 : vector<84x9xf32>
    %256 = vector.extract_strided_slice %234 {offsets = [4, 0], sizes = [84, 9], strides = [1, 1]} : vector<92x9xf32> to vector<84x9xf32>
    %257 = vector.extract_strided_slice %2 {offsets = [4, 0, 0], sizes = [1, 9, 9], strides = [1, 1, 1]} : vector<9x9x9xf32> to vector<1x9x9xf32>
    %258 = vector.shape_cast %257 : vector<1x9x9xf32> to vector<9x9xf32>
    %cst_76 = arith.constant dense<0.000000e+00> : vector<84x9xf32>
    %259 = tpu.matmul %256, %258, %cst_76 {dimension_numbers = #tpu.dot_dimension_numbers<[1], [0], [0], [1], [0, 0, 1, 1], [], []>} : vector<84x9xf32>, vector<9x9xf32>, vector<84x9xf32> -> vector<84x9xf32>
    %260 = arith.addf %255, %259 : vector<84x9xf32>
    %261 = vector.extract_strided_slice %234 {offsets = [5, 0], sizes = [84, 9], strides = [1, 1]} : vector<92x9xf32> to vector<84x9xf32>
    %262 = vector.extract_strided_slice %2 {offsets = [5, 0, 0], sizes = [1, 9, 9], strides = [1, 1, 1]} : vector<9x9x9xf32> to vector<1x9x9xf32>
    %263 = vector.shape_cast %262 : vector<1x9x9xf32> to vector<9x9xf32>
    %cst_77 = arith.constant dense<0.000000e+00> : vector<84x9xf32>
    %264 = tpu.matmul %261, %263, %cst_77 {dimension_numbers = #tpu.dot_dimension_numbers<[1], [0], [0], [1], [0, 0, 1, 1], [], []>} : vector<84x9xf32>, vector<9x9xf32>, vector<84x9xf32> -> vector<84x9xf32>
    %265 = arith.addf %260, %264 : vector<84x9xf32>
    %266 = vector.extract_strided_slice %234 {offsets = [6, 0], sizes = [84, 9], strides = [1, 1]} : vector<92x9xf32> to vector<84x9xf32>
    %267 = vector.extract_strided_slice %2 {offsets = [6, 0, 0], sizes = [1, 9, 9], strides = [1, 1, 1]} : vector<9x9x9xf32> to vector<1x9x9xf32>
    %268 = vector.shape_cast %267 : vector<1x9x9xf32> to vector<9x9xf32>
    %cst_78 = arith.constant dense<0.000000e+00> : vector<84x9xf32>
    %269 = tpu.matmul %266, %268, %cst_78 {dimension_numbers = #tpu.dot_dimension_numbers<[1], [0], [0], [1], [0, 0, 1, 1], [], []>} : vector<84x9xf32>, vector<9x9xf32>, vector<84x9xf32> -> vector<84x9xf32>
    %270 = arith.addf %265, %269 : vector<84x9xf32>
    %271 = vector.extract_strided_slice %234 {offsets = [7, 0], sizes = [84, 9], strides = [1, 1]} : vector<92x9xf32> to vector<84x9xf32>
    %272 = vector.extract_strided_slice %2 {offsets = [7, 0, 0], sizes = [1, 9, 9], strides = [1, 1, 1]} : vector<9x9x9xf32> to vector<1x9x9xf32>
    %273 = vector.shape_cast %272 : vector<1x9x9xf32> to vector<9x9xf32>
    %cst_79 = arith.constant dense<0.000000e+00> : vector<84x9xf32>
    %274 = tpu.matmul %271, %273, %cst_79 {dimension_numbers = #tpu.dot_dimension_numbers<[1], [0], [0], [1], [0, 0, 1, 1], [], []>} : vector<84x9xf32>, vector<9x9xf32>, vector<84x9xf32> -> vector<84x9xf32>
    %275 = arith.addf %270, %274 : vector<84x9xf32>
    %276 = vector.extract_strided_slice %234 {offsets = [8, 0], sizes = [84, 9], strides = [1, 1]} : vector<92x9xf32> to vector<84x9xf32>
    %277 = vector.extract_strided_slice %2 {offsets = [8, 0, 0], sizes = [1, 9, 9], strides = [1, 1, 1]} : vector<9x9x9xf32> to vector<1x9x9xf32>
    %278 = vector.shape_cast %277 : vector<1x9x9xf32> to vector<9x9xf32>
    %cst_80 = arith.constant dense<0.000000e+00> : vector<84x9xf32>
    %279 = tpu.matmul %276, %278, %cst_80 {dimension_numbers = #tpu.dot_dimension_numbers<[1], [0], [0], [1], [0, 0, 1, 1], [], []>} : vector<84x9xf32>, vector<9x9xf32>, vector<84x9xf32> -> vector<84x9xf32>
    %280 = arith.addf %275, %279 : vector<84x9xf32>
    %281 = vector.broadcast %3 : vector<1x9xf32> to vector<84x9xf32>
    %282 = arith.addf %280, %281 : vector<84x9xf32>
    %cst_81 = arith.constant 0.000000e+00 : f32
    %283 = vector.broadcast %cst_81 : f32 to vector<84x9xf32>
    %284 = arith.cmpf oge, %282, %283 : vector<84x9xf32>
    %cst_82 = arith.constant 0.00999999977 : f32
    %285 = vector.broadcast %cst_82 : f32 to vector<84x9xf32>
    %286 = arith.mulf %285, %282 : vector<84x9xf32>
    %287 = arith.select %284, %282, %286 : vector<84x9xi1>, vector<84x9xf32>
    %cst_83 = arith.constant 0.000000e+00 : f32
    %288 = vector.broadcast %cst_83 : f32 to vector<74x10xf32>
    %289 = vector.extract_strided_slice %287 {offsets = [0, 0], sizes = [74, 9], strides = [1, 1]} : vector<84x9xf32> to vector<74x9xf32>
    %290 = vector.extract_strided_slice %4 {offsets = [0, 0, 0], sizes = [1, 9, 10], strides = [1, 1, 1]} : vector<11x9x10xf32> to vector<1x9x10xf32>
    %291 = vector.shape_cast %290 : vector<1x9x10xf32> to vector<9x10xf32>
    %cst_84 = arith.constant dense<0.000000e+00> : vector<74x10xf32>
    %292 = tpu.matmul %289, %291, %cst_84 {dimension_numbers = #tpu.dot_dimension_numbers<[1], [0], [0], [1], [0, 0, 1, 1], [], []>} : vector<74x9xf32>, vector<9x10xf32>, vector<74x10xf32> -> vector<74x10xf32>
    %293 = arith.addf %288, %292 : vector<74x10xf32>
    %294 = vector.extract_strided_slice %287 {offsets = [1, 0], sizes = [74, 9], strides = [1, 1]} : vector<84x9xf32> to vector<74x9xf32>
    %295 = vector.extract_strided_slice %4 {offsets = [1, 0, 0], sizes = [1, 9, 10], strides = [1, 1, 1]} : vector<11x9x10xf32> to vector<1x9x10xf32>
    %296 = vector.shape_cast %295 : vector<1x9x10xf32> to vector<9x10xf32>
    %cst_85 = arith.constant dense<0.000000e+00> : vector<74x10xf32>
    %297 = tpu.matmul %294, %296, %cst_85 {dimension_numbers = #tpu.dot_dimension_numbers<[1], [0], [0], [1], [0, 0, 1, 1], [], []>} : vector<74x9xf32>, vector<9x10xf32>, vector<74x10xf32> -> vector<74x10xf32>
    %298 = arith.addf %293, %297 : vector<74x10xf32>
    %299 = vector.extract_strided_slice %287 {offsets = [2, 0], sizes = [74, 9], strides = [1, 1]} : vector<84x9xf32> to vector<74x9xf32>
    %300 = vector.extract_strided_slice %4 {offsets = [2, 0, 0], sizes = [1, 9, 10], strides = [1, 1, 1]} : vector<11x9x10xf32> to vector<1x9x10xf32>
    %301 = vector.shape_cast %300 : vector<1x9x10xf32> to vector<9x10xf32>
    %cst_86 = arith.constant dense<0.000000e+00> : vector<74x10xf32>
    %302 = tpu.matmul %299, %301, %cst_86 {dimension_numbers = #tpu.dot_dimension_numbers<[1], [0], [0], [1], [0, 0, 1, 1], [], []>} : vector<74x9xf32>, vector<9x10xf32>, vector<74x10xf32> -> vector<74x10xf32>
    %303 = arith.addf %298, %302 : vector<74x10xf32>
    %304 = vector.extract_strided_slice %287 {offsets = [3, 0], sizes = [74, 9], strides = [1, 1]} : vector<84x9xf32> to vector<74x9xf32>
    %305 = vector.extract_strided_slice %4 {offsets = [3, 0, 0], sizes = [1, 9, 10], strides = [1, 1, 1]} : vector<11x9x10xf32> to vector<1x9x10xf32>
    %306 = vector.shape_cast %305 : vector<1x9x10xf32> to vector<9x10xf32>
    %cst_87 = arith.constant dense<0.000000e+00> : vector<74x10xf32>
    %307 = tpu.matmul %304, %306, %cst_87 {dimension_numbers = #tpu.dot_dimension_numbers<[1], [0], [0], [1], [0, 0, 1, 1], [], []>} : vector<74x9xf32>, vector<9x10xf32>, vector<74x10xf32> -> vector<74x10xf32>
    %308 = arith.addf %303, %307 : vector<74x10xf32>
    %309 = vector.extract_strided_slice %287 {offsets = [4, 0], sizes = [74, 9], strides = [1, 1]} : vector<84x9xf32> to vector<74x9xf32>
    %310 = vector.extract_strided_slice %4 {offsets = [4, 0, 0], sizes = [1, 9, 10], strides = [1, 1, 1]} : vector<11x9x10xf32> to vector<1x9x10xf32>
    %311 = vector.shape_cast %310 : vector<1x9x10xf32> to vector<9x10xf32>
    %cst_88 = arith.constant dense<0.000000e+00> : vector<74x10xf32>
    %312 = tpu.matmul %309, %311, %cst_88 {dimension_numbers = #tpu.dot_dimension_numbers<[1], [0], [0], [1], [0, 0, 1, 1], [], []>} : vector<74x9xf32>, vector<9x10xf32>, vector<74x10xf32> -> vector<74x10xf32>
    %313 = arith.addf %308, %312 : vector<74x10xf32>
    %314 = vector.extract_strided_slice %287 {offsets = [5, 0], sizes = [74, 9], strides = [1, 1]} : vector<84x9xf32> to vector<74x9xf32>
    %315 = vector.extract_strided_slice %4 {offsets = [5, 0, 0], sizes = [1, 9, 10], strides = [1, 1, 1]} : vector<11x9x10xf32> to vector<1x9x10xf32>
    %316 = vector.shape_cast %315 : vector<1x9x10xf32> to vector<9x10xf32>
    %cst_89 = arith.constant dense<0.000000e+00> : vector<74x10xf32>
    %317 = tpu.matmul %314, %316, %cst_89 {dimension_numbers = #tpu.dot_dimension_numbers<[1], [0], [0], [1], [0, 0, 1, 1], [], []>} : vector<74x9xf32>, vector<9x10xf32>, vector<74x10xf32> -> vector<74x10xf32>
    %318 = arith.addf %313, %317 : vector<74x10xf32>
    %319 = vector.extract_strided_slice %287 {offsets = [6, 0], sizes = [74, 9], strides = [1, 1]} : vector<84x9xf32> to vector<74x9xf32>
    %320 = vector.extract_strided_slice %4 {offsets = [6, 0, 0], sizes = [1, 9, 10], strides = [1, 1, 1]} : vector<11x9x10xf32> to vector<1x9x10xf32>
    %321 = vector.shape_cast %320 : vector<1x9x10xf32> to vector<9x10xf32>
    %cst_90 = arith.constant dense<0.000000e+00> : vector<74x10xf32>
    %322 = tpu.matmul %319, %321, %cst_90 {dimension_numbers = #tpu.dot_dimension_numbers<[1], [0], [0], [1], [0, 0, 1, 1], [], []>} : vector<74x9xf32>, vector<9x10xf32>, vector<74x10xf32> -> vector<74x10xf32>
    %323 = arith.addf %318, %322 : vector<74x10xf32>
    %324 = vector.extract_strided_slice %287 {offsets = [7, 0], sizes = [74, 9], strides = [1, 1]} : vector<84x9xf32> to vector<74x9xf32>
    %325 = vector.extract_strided_slice %4 {offsets = [7, 0, 0], sizes = [1, 9, 10], strides = [1, 1, 1]} : vector<11x9x10xf32> to vector<1x9x10xf32>
    %326 = vector.shape_cast %325 : vector<1x9x10xf32> to vector<9x10xf32>
    %cst_91 = arith.constant dense<0.000000e+00> : vector<74x10xf32>
    %327 = tpu.matmul %324, %326, %cst_91 {dimension_numbers = #tpu.dot_dimension_numbers<[1], [0], [0], [1], [0, 0, 1, 1], [], []>} : vector<74x9xf32>, vector<9x10xf32>, vector<74x10xf32> -> vector<74x10xf32>
    %328 = arith.addf %323, %327 : vector<74x10xf32>
    %329 = vector.extract_strided_slice %287 {offsets = [8, 0], sizes = [74, 9], strides = [1, 1]} : vector<84x9xf32> to vector<74x9xf32>
    %330 = vector.extract_strided_slice %4 {offsets = [8, 0, 0], sizes = [1, 9, 10], strides = [1, 1, 1]} : vector<11x9x10xf32> to vector<1x9x10xf32>
    %331 = vector.shape_cast %330 : vector<1x9x10xf32> to vector<9x10xf32>
    %cst_92 = arith.constant dense<0.000000e+00> : vector<74x10xf32>
    %332 = tpu.matmul %329, %331, %cst_92 {dimension_numbers = #tpu.dot_dimension_numbers<[1], [0], [0], [1], [0, 0, 1, 1], [], []>} : vector<74x9xf32>, vector<9x10xf32>, vector<74x10xf32> -> vector<74x10xf32>
    %333 = arith.addf %328, %332 : vector<74x10xf32>
    %334 = vector.extract_strided_slice %287 {offsets = [9, 0], sizes = [74, 9], strides = [1, 1]} : vector<84x9xf32> to vector<74x9xf32>
    %335 = vector.extract_strided_slice %4 {offsets = [9, 0, 0], sizes = [1, 9, 10], strides = [1, 1, 1]} : vector<11x9x10xf32> to vector<1x9x10xf32>
    %336 = vector.shape_cast %335 : vector<1x9x10xf32> to vector<9x10xf32>
    %cst_93 = arith.constant dense<0.000000e+00> : vector<74x10xf32>
    %337 = tpu.matmul %334, %336, %cst_93 {dimension_numbers = #tpu.dot_dimension_numbers<[1], [0], [0], [1], [0, 0, 1, 1], [], []>} : vector<74x9xf32>, vector<9x10xf32>, vector<74x10xf32> -> vector<74x10xf32>
    %338 = arith.addf %333, %337 : vector<74x10xf32>
    %339 = vector.extract_strided_slice %287 {offsets = [10, 0], sizes = [74, 9], strides = [1, 1]} : vector<84x9xf32> to vector<74x9xf32>
    %340 = vector.extract_strided_slice %4 {offsets = [10, 0, 0], sizes = [1, 9, 10], strides = [1, 1, 1]} : vector<11x9x10xf32> to vector<1x9x10xf32>
    %341 = vector.shape_cast %340 : vector<1x9x10xf32> to vector<9x10xf32>
    %cst_94 = arith.constant dense<0.000000e+00> : vector<74x10xf32>
    %342 = tpu.matmul %339, %341, %cst_94 {dimension_numbers = #tpu.dot_dimension_numbers<[1], [0], [0], [1], [0, 0, 1, 1], [], []>} : vector<74x9xf32>, vector<9x10xf32>, vector<74x10xf32> -> vector<74x10xf32>
    %343 = arith.addf %338, %342 : vector<74x10xf32>
    %344 = vector.broadcast %5 : vector<1x10xf32> to vector<74x10xf32>
    %345 = arith.addf %343, %344 : vector<74x10xf32>
    %cst_95 = arith.constant 0.000000e+00 : f32
    %346 = vector.broadcast %cst_95 : f32 to vector<74x10xf32>
    %347 = arith.cmpf oge, %345, %346 : vector<74x10xf32>
    %cst_96 = arith.constant 0.00999999977 : f32
    %348 = vector.broadcast %cst_96 : f32 to vector<74x10xf32>
    %349 = arith.mulf %348, %345 : vector<74x10xf32>
    %350 = arith.select %347, %345, %349 : vector<74x10xi1>, vector<74x10xf32>
    %c1_97 = arith.constant 1 : index
    %c0_98 = arith.constant 0 : index
    %c0_99 = arith.constant 0 : index
    %351 = vector.load %arg8[%c1_97, %c0_98, %c0_99] : memref<2x74x10xf32, #tpu.memory_space<vmem>>, vector<1x74x10xf32>
    %352 = vector.shape_cast %351 : vector<1x74x10xf32> to vector<74x10xf32>
    %353 = vector.shape_cast %350 : vector<74x10xf32> to vector<1x74x10xf32>
    tpu.vector_store %arg8[%c1_97, %c0_98, %c0_99], %353 {strides = array<i32>} : memref<2x74x10xf32, #tpu.memory_space<vmem>>, vector<1x74x10xf32>,
    return
  }
  func.func @transform_0(%arg0: i32) -> (i32, i32, i32) {
    %c0_i32 = arith.constant 0 : i32
    %c0_i32_0 = arith.constant 0 : i32
    %c0_i32_1 = arith.constant 0 : i32
    %c0_i32_2 = arith.constant 0 : i32
    return %c0_i32, %c0_i32_0, %c0_i32_1 : i32, i32, i32
  }
  func.func @transform_1(%arg0: i32) -> (i32, i32, i32) {
    %c0_i32 = arith.constant 0 : i32
    %c0_i32_0 = arith.constant 0 : i32
    %c0_i32_1 = arith.constant 0 : i32
    %c0_i32_2 = arith.constant 0 : i32
    return %c0_i32, %c0_i32_0, %c0_i32_1 : i32, i32, i32
  }
  func.func @transform_2(%arg0: i32) -> (i32, i32) {
    %c0_i32 = arith.constant 0 : i32
    %c0_i32_0 = arith.constant 0 : i32
    %c0_i32_1 = arith.constant 0 : i32
    return %c0_i32, %c0_i32_0 : i32, i32
  }
  func.func @transform_3(%arg0: i32) -> (i32, i32, i32) {
    %c0_i32 = arith.constant 0 : i32
    %c0_i32_0 = arith.constant 0 : i32
    %c0_i32_1 = arith.constant 0 : i32
    %c0_i32_2 = arith.constant 0 : i32
    return %c0_i32, %c0_i32_0, %c0_i32_1 : i32, i32, i32
  }
  func.func @transform_4(%arg0: i32) -> (i32, i32) {
    %c0_i32 = arith.constant 0 : i32
    %c0_i32_0 = arith.constant 0 : i32
    %c0_i32_1 = arith.constant 0 : i32
    return %c0_i32, %c0_i32_0 : i32, i32
  }
  func.func @transform_5(%arg0: i32) -> (i32, i32, i32) {
    %c0_i32 = arith.constant 0 : i32
    %c0_i32_0 = arith.constant 0 : i32
    %c0_i32_1 = arith.constant 0 : i32
    %c0_i32_2 = arith.constant 0 : i32
    return %c0_i32, %c0_i32_0, %c0_i32_1 : i32, i32, i32
  }
  func.func @transform_6(%arg0: i32) -> (i32, i32) {
    %c0_i32 = arith.constant 0 : i32
    %c0_i32_0 = arith.constant 0 : i32
    %c0_i32_1 = arith.constant 0 : i32
    return %c0_i32, %c0_i32_0 : i32, i32
  }
  func.func @transform_7(%arg0: i32) -> (i32, i32, i32) {
    %c0_i32 = arith.constant 0 : i32
    %c0_i32_0 = arith.constant 0 : i32
    %c0_i32_1 = arith.constant 0 : i32
    %c0_i32_2 = arith.constant 0 : i32
    return %c0_i32, %c0_i32_0, %c0_i32_1 : i32, i32, i32
  }
}

module attributes {stable_mosaic.version = 11 : i64} {
  func.func @_dense_decoder_kernel(%arg0: i32, %arg1: memref<2x740xf32, #tpu.memory_space<vmem>>, %arg2: memref<2x16xf32, #tpu.memory_space<vmem>>, %arg3: memref<740x435xbf16, #tpu.memory_space<vmem>>, %arg4: memref<1x435xf32, #tpu.memory_space<vmem>>, %arg5: memref<435x16xf32, #tpu.memory_space<vmem>>, %arg6: memref<1x16xf32, #tpu.memory_space<vmem>>, %arg7: memref<435x16xf32, #tpu.memory_space<vmem>>, %arg8: memref<1x16xf32, #tpu.memory_space<vmem>>, %arg9: memref<16x16xf32, #tpu.memory_space<vmem>>, %arg10: memref<1x16xf32, #tpu.memory_space<vmem>>, %arg11: memref<16x1536xf32, #tpu.memory_space<vmem>>, %arg12: memref<1x1536xf32, #tpu.memory_space<vmem>>, %arg13: memref<512x1536xbf16, #tpu.memory_space<vmem>>, %arg14: memref<1x512xf32, #tpu.memory_space<vmem>>, %arg15: memref<512x12xf32, #tpu.memory_space<vmem>>, %arg16: memref<1x12xf32, #tpu.memory_space<vmem>>, %arg17: memref<2x16xf32, #tpu.memory_space<vmem>>, %arg18: memref<2x16xf32, #tpu.memory_space<vmem>>, %arg19: memref<2x16xf32, #tpu.memory_space<vmem>>, %arg20: memref<2x100x12xf32, #tpu.memory_space<vmem>>, %arg21: memref<256x512xf32, #tpu.memory_space<vmem>>) attributes {dimension_semantics = [#tpu.dimension_semantics<arbitrary>], iteration_bounds = array<i64: 1>, scalar_prefetch = 0 : i64, scratch_operands = 1 : i64, tpu.core_type = #tpu.core_type<tc>, window_params = [{pipeline_mode = #tpu.pipeline_mode<synchronous>, transform_indices = @transform_0, window_bounds = array<i64: 2, 740>}, {pipeline_mode = #tpu.pipeline_mode<synchronous>, transform_indices = @transform_1, window_bounds = array<i64: 2, 16>}, {pipeline_mode = #tpu.pipeline_mode<synchronous>, transform_indices = @transform_2, window_bounds = array<i64: 740, 435>}, {pipeline_mode = #tpu.pipeline_mode<synchronous>, transform_indices = @transform_3, window_bounds = array<i64: 1, 435>}, {pipeline_mode = #tpu.pipeline_mode<synchronous>, transform_indices = @transform_4, window_bounds = array<i64: 435, 16>}, {pipeline_mode = #tpu.pipeline_mode<synchronous>, transform_indices = @transform_5, window_bounds = array<i64: 1, 16>}, {pipeline_mode = #tpu.pipeline_mode<synchronous>, transform_indices = @transform_6, window_bounds = array<i64: 435, 16>}, {pipeline_mode = #tpu.pipeline_mode<synchronous>, transform_indices = @transform_7, window_bounds = array<i64: 1, 16>}, {pipeline_mode = #tpu.pipeline_mode<synchronous>, transform_indices = @transform_8, window_bounds = array<i64: 16, 16>}, {pipeline_mode = #tpu.pipeline_mode<synchronous>, transform_indices = @transform_9, window_bounds = array<i64: 1, 16>}, {pipeline_mode = #tpu.pipeline_mode<synchronous>, transform_indices = @transform_10, window_bounds = array<i64: 16, 1536>}, {pipeline_mode = #tpu.pipeline_mode<synchronous>, transform_indices = @transform_11, window_bounds = array<i64: 1, 1536>}, {pipeline_mode = #tpu.pipeline_mode<synchronous>, transform_indices = @transform_12, window_bounds = array<i64: 512, 1536>}, {pipeline_mode = #tpu.pipeline_mode<synchronous>, transform_indices = @transform_13, window_bounds = array<i64: 1, 512>}, {pipeline_mode = #tpu.pipeline_mode<synchronous>, transform_indices = @transform_14, window_bounds = array<i64: 512, 12>}, {pipeline_mode = #tpu.pipeline_mode<synchronous>, transform_indices = @transform_15, window_bounds = array<i64: 1, 12>}, {pipeline_mode = #tpu.pipeline_mode<synchronous>, transform_indices = @transform_16, window_bounds = array<i64: 2, 16>}, {pipeline_mode = #tpu.pipeline_mode<synchronous>, transform_indices = @transform_17, window_bounds = array<i64: 2, 16>}, {pipeline_mode = #tpu.pipeline_mode<synchronous>, transform_indices = @transform_18, window_bounds = array<i64: 2, 16>}, {pipeline_mode = #tpu.pipeline_mode<synchronous>, transform_indices = @transform_19, window_bounds = array<i64: 2, 100, 12>}]} {
    %c0 = arith.constant 0 : index
    %c0_0 = arith.constant 0 : index
    %0 = vector.load %arg1[%c0, %c0_0] : memref<2x740xf32, #tpu.memory_space<vmem>>, vector<2x740xf32>
    %1 = arith.truncf %0 : vector<2x740xf32> to vector<2x740xbf16>
    %c0_1 = arith.constant 0 : index
    %c0_2 = arith.constant 0 : index
    %2 = vector.load %arg3[%c0_1, %c0_2] : memref<740x435xbf16, #tpu.memory_space<vmem>>, vector<740x435xbf16>
    %cst = arith.constant dense<0.000000e+00> : vector<2x435xf32>
    %3 = tpu.matmul %1, %2, %cst {dimension_numbers = #tpu.dot_dimension_numbers<[1], [0], [0], [1], [0, 0, 1, 1], [], []>} : vector<2x740xbf16>, vector<740x435xbf16>, vector<2x435xf32> -> vector<2x435xf32>
    %c0_3 = arith.constant 0 : index
    %c0_4 = arith.constant 0 : index
    %4 = vector.load %arg4[%c0_3, %c0_4] : memref<1x435xf32, #tpu.memory_space<vmem>>, vector<1x435xf32>
    %5 = vector.broadcast %4 : vector<1x435xf32> to vector<2x435xf32>
    %6 = arith.addf %3, %5 : vector<2x435xf32>
    %cst_5 = arith.constant 0.000000e+00 : f32
    %7 = vector.broadcast %cst_5 : f32 to vector<2x435xf32>
    %8 = arith.cmpf oge, %6, %7 : vector<2x435xf32>
    %cst_6 = arith.constant 0.00999999977 : f32
    %9 = vector.broadcast %cst_6 : f32 to vector<2x435xf32>
    %10 = arith.mulf %9, %6 : vector<2x435xf32>
    %11 = arith.select %8, %6, %10 : vector<2x435xi1>, vector<2x435xf32>
    %c0_7 = arith.constant 0 : index
    %c0_8 = arith.constant 0 : index
    %12 = vector.load %arg5[%c0_7, %c0_8] : memref<435x16xf32, #tpu.memory_space<vmem>>, vector<435x16xf32>
    %cst_9 = arith.constant dense<0.000000e+00> : vector<2x16xf32>
    %13 = tpu.matmul %11, %12, %cst_9 {dimension_numbers = #tpu.dot_dimension_numbers<[1], [0], [0], [1], [0, 0, 1, 1], [], []>} : vector<2x435xf32>, vector<435x16xf32>, vector<2x16xf32> -> vector<2x16xf32>
    %c0_10 = arith.constant 0 : index
    %c0_11 = arith.constant 0 : index
    %14 = vector.load %arg6[%c0_10, %c0_11] : memref<1x16xf32, #tpu.memory_space<vmem>>, vector<1x16xf32>
    %15 = vector.broadcast %14 : vector<1x16xf32> to vector<2x16xf32>
    %16 = arith.addf %13, %15 : vector<2x16xf32>
    %c0_12 = arith.constant 0 : index
    %c0_13 = arith.constant 0 : index
    %17 = vector.load %arg7[%c0_12, %c0_13] : memref<435x16xf32, #tpu.memory_space<vmem>>, vector<435x16xf32>
    %cst_14 = arith.constant dense<0.000000e+00> : vector<2x16xf32>
    %18 = tpu.matmul %11, %17, %cst_14 {dimension_numbers = #tpu.dot_dimension_numbers<[1], [0], [0], [1], [0, 0, 1, 1], [], []>} : vector<2x435xf32>, vector<435x16xf32>, vector<2x16xf32> -> vector<2x16xf32>
    %c0_15 = arith.constant 0 : index
    %c0_16 = arith.constant 0 : index
    %19 = vector.load %arg8[%c0_15, %c0_16] : memref<1x16xf32, #tpu.memory_space<vmem>>, vector<1x16xf32>
    %20 = vector.broadcast %19 : vector<1x16xf32> to vector<2x16xf32>
    %21 = arith.addf %18, %20 : vector<2x16xf32>
    %c0_17 = arith.constant 0 : index
    %c0_18 = arith.constant 0 : index
    %22 = vector.load %arg17[%c0_17, %c0_18] : memref<2x16xf32, #tpu.memory_space<vmem>>, vector<2x16xf32>
    tpu.vector_store %arg17[%c0_17, %c0_18], %16 {strides = array<i32>} : memref<2x16xf32, #tpu.memory_space<vmem>>, vector<2x16xf32>,
    %c0_19 = arith.constant 0 : index
    %c0_20 = arith.constant 0 : index
    %23 = vector.load %arg18[%c0_19, %c0_20] : memref<2x16xf32, #tpu.memory_space<vmem>>, vector<2x16xf32>
    tpu.vector_store %arg18[%c0_19, %c0_20], %21 {strides = array<i32>} : memref<2x16xf32, #tpu.memory_space<vmem>>, vector<2x16xf32>,
    %cst_21 = arith.constant 5.000000e-01 : f32
    %24 = vector.broadcast %cst_21 : f32 to vector<2x16xf32>
    %25 = arith.mulf %24, %21 : vector<2x16xf32>
    %26 = math.exp %25 : vector<2x16xf32>
    %c0_22 = arith.constant 0 : index
    %c0_23 = arith.constant 0 : index
    %27 = vector.load %arg2[%c0_22, %c0_23] : memref<2x16xf32, #tpu.memory_space<vmem>>, vector<2x16xf32>
    %28 = arith.mulf %26, %27 : vector<2x16xf32>
    %29 = arith.addf %16, %28 : vector<2x16xf32>
    %c0_24 = arith.constant 0 : index
    %c0_25 = arith.constant 0 : index
    %30 = vector.load %arg19[%c0_24, %c0_25] : memref<2x16xf32, #tpu.memory_space<vmem>>, vector<2x16xf32>
    tpu.vector_store %arg19[%c0_24, %c0_25], %29 {strides = array<i32>} : memref<2x16xf32, #tpu.memory_space<vmem>>, vector<2x16xf32>,
    %c0_26 = arith.constant 0 : index
    %c0_27 = arith.constant 0 : index
    %31 = vector.load %arg9[%c0_26, %c0_27] : memref<16x16xf32, #tpu.memory_space<vmem>>, vector<16x16xf32>
    %cst_28 = arith.constant dense<0.000000e+00> : vector<2x16xf32>
    %32 = tpu.matmul %29, %31, %cst_28 {dimension_numbers = #tpu.dot_dimension_numbers<[1], [0], [0], [1], [0, 0, 1, 1], [], []>} : vector<2x16xf32>, vector<16x16xf32>, vector<2x16xf32> -> vector<2x16xf32>
    %c0_29 = arith.constant 0 : index
    %c0_30 = arith.constant 0 : index
    %33 = vector.load %arg10[%c0_29, %c0_30] : memref<1x16xf32, #tpu.memory_space<vmem>>, vector<1x16xf32>
    %34 = vector.broadcast %33 : vector<1x16xf32> to vector<2x16xf32>
    %35 = arith.addf %32, %34 : vector<2x16xf32>
    %cst_31 = arith.constant 0.000000e+00 : f32
    %36 = vector.broadcast %cst_31 : f32 to vector<2x16xf32>
    %37 = arith.cmpf oge, %35, %36 : vector<2x16xf32>
    %cst_32 = arith.constant 0.00999999977 : f32
    %38 = vector.broadcast %cst_32 : f32 to vector<2x16xf32>
    %39 = arith.mulf %38, %35 : vector<2x16xf32>
    %40 = arith.select %37, %35, %39 : vector<2x16xi1>, vector<2x16xf32>
    %c0_33 = arith.constant 0 : index
    %c0_34 = arith.constant 0 : index
    %41 = vector.load %arg11[%c0_33, %c0_34] : memref<16x1536xf32, #tpu.memory_space<vmem>>, vector<16x1536xf32>
    %cst_35 = arith.constant dense<0.000000e+00> : vector<2x1536xf32>
    %42 = tpu.matmul %40, %41, %cst_35 {dimension_numbers = #tpu.dot_dimension_numbers<[1], [0], [0], [1], [0, 0, 1, 1], [], []>} : vector<2x16xf32>, vector<16x1536xf32>, vector<2x1536xf32> -> vector<2x1536xf32>
    %c0_36 = arith.constant 0 : index
    %c0_37 = arith.constant 0 : index
    %43 = vector.load %arg12[%c0_36, %c0_37] : memref<1x1536xf32, #tpu.memory_space<vmem>>, vector<1x1536xf32>
    %44 = vector.broadcast %43 : vector<1x1536xf32> to vector<2x1536xf32>
    %45 = arith.addf %42, %44 : vector<2x1536xf32>
    %46 = vector.extract_strided_slice %45 {offsets = [0, 0], sizes = [2, 512], strides = [1, 1]} : vector<2x1536xf32> to vector<2x512xf32>
    %47 = vector.extract_strided_slice %45 {offsets = [0, 512], sizes = [2, 512], strides = [1, 1]} : vector<2x1536xf32> to vector<2x512xf32>
    %48 = vector.extract_strided_slice %45 {offsets = [0, 1024], sizes = [2, 512], strides = [1, 1]} : vector<2x1536xf32> to vector<2x512xf32>
    %c0_38 = arith.constant 0 : index
    %c0_39 = arith.constant 0 : index
    %49 = vector.load %arg14[%c0_38, %c0_39] : memref<1x512xf32, #tpu.memory_space<vmem>>, vector<1x512xf32>
    %50 = vector.shape_cast %49 : vector<1x512xf32> to vector<1x512xf32>
    %51 = vector.broadcast %50 : vector<1x512xf32> to vector<2x512xf32>
    %cst_40 = arith.constant 0.000000e+00 : f32
    %52 = vector.broadcast %cst_40 : f32 to vector<2x512xf32>
    %c0_i32 = arith.constant 0 : i32
    %c100_i32 = arith.constant 100 : i32
    %53 = arith.addi %c0_i32, %c100_i32 : i32
    %c1_i32 = arith.constant 1 : i32
    %54 = scf.for %arg22 = %c0_i32 to %53 step %c1_i32 iter_args(%arg23 = %52) -> (vector<2x512xf32>)  : i32 {
      %81 = arith.truncf %arg23 : vector<2x512xf32> to vector<2x512xbf16>
      %c0_60 = arith.constant 0 : index
      %c0_61 = arith.constant 0 : index
      %82 = vector.load %arg13[%c0_60, %c0_61] : memref<512x1536xbf16, #tpu.memory_space<vmem>>, vector<512x1536xbf16>
      %cst_62 = arith.constant dense<0.000000e+00> : vector<2x1536xf32>
      %83 = tpu.matmul %81, %82, %cst_62 {dimension_numbers = #tpu.dot_dimension_numbers<[1], [0], [0], [1], [0, 0, 1, 1], [], []>} : vector<2x512xbf16>, vector<512x1536xbf16>, vector<2x1536xf32> -> vector<2x1536xf32>
      %84 = vector.extract_strided_slice %83 {offsets = [0, 0], sizes = [2, 512], strides = [1, 1]} : vector<2x1536xf32> to vector<2x512xf32>
      %85 = arith.addf %46, %84 : vector<2x512xf32>
      %86 = arith.negf %85 : vector<2x512xf32>
      %87 = math.exp %86 : vector<2x512xf32>
      %cst_63 = arith.constant 1.000000e+00 : f32
      %88 = vector.broadcast %cst_63 : f32 to vector<2x512xf32>
      %89 = arith.addf %88, %87 : vector<2x512xf32>
      %90 = arith.divf %88, %89 : vector<2x512xf32>
      %91 = vector.extract_strided_slice %83 {offsets = [0, 512], sizes = [2, 512], strides = [1, 1]} : vector<2x1536xf32> to vector<2x512xf32>
      %92 = arith.addf %47, %91 : vector<2x512xf32>
      %93 = arith.negf %92 : vector<2x512xf32>
      %94 = math.exp %93 : vector<2x512xf32>
      %cst_64 = arith.constant 1.000000e+00 : f32
      %95 = vector.broadcast %cst_64 : f32 to vector<2x512xf32>
      %96 = arith.addf %95, %94 : vector<2x512xf32>
      %97 = arith.divf %95, %96 : vector<2x512xf32>
      %98 = vector.extract_strided_slice %83 {offsets = [0, 1024], sizes = [2, 512], strides = [1, 1]} : vector<2x1536xf32> to vector<2x512xf32>
      %99 = arith.addf %98, %51 : vector<2x512xf32>
      %100 = arith.mulf %90, %99 : vector<2x512xf32>
      %101 = arith.addf %48, %100 : vector<2x512xf32>
      %102 = math.tanh %101 : vector<2x512xf32>
      %cst_65 = arith.constant 1.000000e+00 : f32
      %103 = vector.broadcast %cst_65 : f32 to vector<2x512xf32>
      %104 = arith.subf %103, %97 : vector<2x512xf32>
      %105 = arith.mulf %104, %102 : vector<2x512xf32>
      %106 = arith.mulf %97, %arg23 : vector<2x512xf32>
      %107 = arith.addf %105, %106 : vector<2x512xf32>
      %108 = vector.extract_strided_slice %107 {offsets = [0, 0], sizes = [1, 512], strides = [1, 1]} : vector<2x512xf32> to vector<1x512xf32>
      %c0_i32_66 = arith.constant 0 : i32
      %109 = arith.addi %c0_i32_66, %arg22 : i32
      %110 = arith.index_cast %109 : i32 to index
      %c0_67 = arith.constant 0 : index
      %111 = vector.load %arg21[%110, %c0_67] : memref<256x512xf32, #tpu.memory_space<vmem>>, vector<1x512xf32>
      tpu.vector_store %arg21[%110, %c0_67], %108 {strides = array<i32>} : memref<256x512xf32, #tpu.memory_space<vmem>>, vector<1x512xf32>,
      %112 = vector.extract_strided_slice %107 {offsets = [1, 0], sizes = [1, 512], strides = [1, 1]} : vector<2x512xf32> to vector<1x512xf32>
      %c128_i32 = arith.constant 128 : i32
      %113 = arith.addi %c128_i32, %arg22 : i32
      %114 = arith.index_cast %113 : i32 to index
      %c0_68 = arith.constant 0 : index
      %115 = vector.load %arg21[%114, %c0_68] : memref<256x512xf32, #tpu.memory_space<vmem>>, vector<1x512xf32>
      tpu.vector_store %arg21[%114, %c0_68], %112 {strides = array<i32>} : memref<256x512xf32, #tpu.memory_space<vmem>>, vector<1x512xf32>,
      scf.yield %107 : vector<2x512xf32>
    }
    %c100_i32_41 = arith.constant 100 : i32
    %c0_42 = arith.constant 0 : index
    %c0_43 = arith.constant 0 : index
    %55 = vector.load %arg15[%c0_42, %c0_43] : memref<512x12xf32, #tpu.memory_space<vmem>>, vector<512x12xf32>
    %c0_44 = arith.constant 0 : index
    %c0_45 = arith.constant 0 : index
    %56 = vector.load %arg16[%c0_44, %c0_45] : memref<1x12xf32, #tpu.memory_space<vmem>>, vector<1x12xf32>
    %c0_46 = arith.constant 0 : index
    %c0_47 = arith.constant 0 : index
    %57 = vector.load %arg21[%c0_46, %c0_47] : memref<256x512xf32, #tpu.memory_space<vmem>>, vector<100x512xf32>
    %cst_48 = arith.constant dense<0.000000e+00> : vector<100x12xf32>
    %58 = tpu.matmul %57, %55, %cst_48 {dimension_numbers = #tpu.dot_dimension_numbers<[1], [0], [0], [1], [0, 0, 1, 1], [], []>} : vector<100x512xf32>, vector<512x12xf32>, vector<100x12xf32> -> vector<100x12xf32>
    %59 = vector.broadcast %56 : vector<1x12xf32> to vector<100x12xf32>
    %60 = arith.addf %58, %59 : vector<100x12xf32>
    %cst_49 = arith.constant 0.000000e+00 : f32
    %61 = vector.broadcast %cst_49 : f32 to vector<100x12xf32>
    %62 = arith.cmpf oge, %60, %61 : vector<100x12xf32>
    %cst_50 = arith.constant 0.00999999977 : f32
    %63 = vector.broadcast %cst_50 : f32 to vector<100x12xf32>
    %64 = arith.mulf %63, %60 : vector<100x12xf32>
    %65 = arith.select %62, %60, %64 : vector<100x12xi1>, vector<100x12xf32>
    %c0_51 = arith.constant 0 : index
    %c0_52 = arith.constant 0 : index
    %c0_53 = arith.constant 0 : index
    %66 = vector.load %arg20[%c0_51, %c0_52, %c0_53] : memref<2x100x12xf32, #tpu.memory_space<vmem>>, vector<1x100x12xf32>
    %67 = vector.shape_cast %66 : vector<1x100x12xf32> to vector<100x12xf32>
    %68 = vector.shape_cast %65 : vector<100x12xf32> to vector<1x100x12xf32>
    tpu.vector_store %arg20[%c0_51, %c0_52, %c0_53], %68 {strides = array<i32>} : memref<2x100x12xf32, #tpu.memory_space<vmem>>, vector<1x100x12xf32>,
    %c128 = arith.constant 128 : index
    %c0_54 = arith.constant 0 : index
    %69 = vector.load %arg21[%c128, %c0_54] : memref<256x512xf32, #tpu.memory_space<vmem>>, vector<100x512xf32>
    %cst_55 = arith.constant dense<0.000000e+00> : vector<100x12xf32>
    %70 = tpu.matmul %69, %55, %cst_55 {dimension_numbers = #tpu.dot_dimension_numbers<[1], [0], [0], [1], [0, 0, 1, 1], [], []>} : vector<100x512xf32>, vector<512x12xf32>, vector<100x12xf32> -> vector<100x12xf32>
    %71 = vector.broadcast %56 : vector<1x12xf32> to vector<100x12xf32>
    %72 = arith.addf %70, %71 : vector<100x12xf32>
    %cst_56 = arith.constant 0.000000e+00 : f32
    %73 = vector.broadcast %cst_56 : f32 to vector<100x12xf32>
    %74 = arith.cmpf oge, %72, %73 : vector<100x12xf32>
    %cst_57 = arith.constant 0.00999999977 : f32
    %75 = vector.broadcast %cst_57 : f32 to vector<100x12xf32>
    %76 = arith.mulf %75, %72 : vector<100x12xf32>
    %77 = arith.select %74, %72, %76 : vector<100x12xi1>, vector<100x12xf32>
    %c1 = arith.constant 1 : index
    %c0_58 = arith.constant 0 : index
    %c0_59 = arith.constant 0 : index
    %78 = vector.load %arg20[%c1, %c0_58, %c0_59] : memref<2x100x12xf32, #tpu.memory_space<vmem>>, vector<1x100x12xf32>
    %79 = vector.shape_cast %78 : vector<1x100x12xf32> to vector<100x12xf32>
    %80 = vector.shape_cast %77 : vector<100x12xf32> to vector<1x100x12xf32>
    tpu.vector_store %arg20[%c1, %c0_58, %c0_59], %80 {strides = array<i32>} : memref<2x100x12xf32, #tpu.memory_space<vmem>>, vector<1x100x12xf32>,
    return
  }
  func.func @transform_0(%arg0: i32) -> (i32, i32) {
    %c0_i32 = arith.constant 0 : i32
    %c0_i32_0 = arith.constant 0 : i32
    %c0_i32_1 = arith.constant 0 : i32
    return %c0_i32, %c0_i32_0 : i32, i32
  }
  func.func @transform_1(%arg0: i32) -> (i32, i32) {
    %c0_i32 = arith.constant 0 : i32
    %c0_i32_0 = arith.constant 0 : i32
    %c0_i32_1 = arith.constant 0 : i32
    return %c0_i32, %c0_i32_0 : i32, i32
  }
  func.func @transform_2(%arg0: i32) -> (i32, i32) {
    %c0_i32 = arith.constant 0 : i32
    %c0_i32_0 = arith.constant 0 : i32
    %c0_i32_1 = arith.constant 0 : i32
    return %c0_i32, %c0_i32_0 : i32, i32
  }
  func.func @transform_3(%arg0: i32) -> (i32, i32) {
    %c0_i32 = arith.constant 0 : i32
    %c0_i32_0 = arith.constant 0 : i32
    %c0_i32_1 = arith.constant 0 : i32
    return %c0_i32, %c0_i32_0 : i32, i32
  }
  func.func @transform_4(%arg0: i32) -> (i32, i32) {
    %c0_i32 = arith.constant 0 : i32
    %c0_i32_0 = arith.constant 0 : i32
    %c0_i32_1 = arith.constant 0 : i32
    return %c0_i32, %c0_i32_0 : i32, i32
  }
  func.func @transform_5(%arg0: i32) -> (i32, i32) {
    %c0_i32 = arith.constant 0 : i32
    %c0_i32_0 = arith.constant 0 : i32
    %c0_i32_1 = arith.constant 0 : i32
    return %c0_i32, %c0_i32_0 : i32, i32
  }
  func.func @transform_6(%arg0: i32) -> (i32, i32) {
    %c0_i32 = arith.constant 0 : i32
    %c0_i32_0 = arith.constant 0 : i32
    %c0_i32_1 = arith.constant 0 : i32
    return %c0_i32, %c0_i32_0 : i32, i32
  }
  func.func @transform_7(%arg0: i32) -> (i32, i32) {
    %c0_i32 = arith.constant 0 : i32
    %c0_i32_0 = arith.constant 0 : i32
    %c0_i32_1 = arith.constant 0 : i32
    return %c0_i32, %c0_i32_0 : i32, i32
  }
  func.func @transform_8(%arg0: i32) -> (i32, i32) {
    %c0_i32 = arith.constant 0 : i32
    %c0_i32_0 = arith.constant 0 : i32
    %c0_i32_1 = arith.constant 0 : i32
    return %c0_i32, %c0_i32_0 : i32, i32
  }
  func.func @transform_9(%arg0: i32) -> (i32, i32) {
    %c0_i32 = arith.constant 0 : i32
    %c0_i32_0 = arith.constant 0 : i32
    %c0_i32_1 = arith.constant 0 : i32
    return %c0_i32, %c0_i32_0 : i32, i32
  }
  func.func @transform_10(%arg0: i32) -> (i32, i32) {
    %c0_i32 = arith.constant 0 : i32
    %c0_i32_0 = arith.constant 0 : i32
    %c0_i32_1 = arith.constant 0 : i32
    return %c0_i32, %c0_i32_0 : i32, i32
  }
  func.func @transform_11(%arg0: i32) -> (i32, i32) {
    %c0_i32 = arith.constant 0 : i32
    %c0_i32_0 = arith.constant 0 : i32
    %c0_i32_1 = arith.constant 0 : i32
    return %c0_i32, %c0_i32_0 : i32, i32
  }
  func.func @transform_12(%arg0: i32) -> (i32, i32) {
    %c0_i32 = arith.constant 0 : i32
    %c0_i32_0 = arith.constant 0 : i32
    %c0_i32_1 = arith.constant 0 : i32
    return %c0_i32, %c0_i32_0 : i32, i32
  }
  func.func @transform_13(%arg0: i32) -> (i32, i32) {
    %c0_i32 = arith.constant 0 : i32
    %c0_i32_0 = arith.constant 0 : i32
    %c0_i32_1 = arith.constant 0 : i32
    return %c0_i32, %c0_i32_0 : i32, i32
  }
  func.func @transform_14(%arg0: i32) -> (i32, i32) {
    %c0_i32 = arith.constant 0 : i32
    %c0_i32_0 = arith.constant 0 : i32
    %c0_i32_1 = arith.constant 0 : i32
    return %c0_i32, %c0_i32_0 : i32, i32
  }
  func.func @transform_15(%arg0: i32) -> (i32, i32) {
    %c0_i32 = arith.constant 0 : i32
    %c0_i32_0 = arith.constant 0 : i32
    %c0_i32_1 = arith.constant 0 : i32
    return %c0_i32, %c0_i32_0 : i32, i32
  }
  func.func @transform_16(%arg0: i32) -> (i32, i32) {
    %c0_i32 = arith.constant 0 : i32
    %c0_i32_0 = arith.constant 0 : i32
    %c0_i32_1 = arith.constant 0 : i32
    return %c0_i32, %c0_i32_0 : i32, i32
  }
  func.func @transform_17(%arg0: i32) -> (i32, i32) {
    %c0_i32 = arith.constant 0 : i32
    %c0_i32_0 = arith.constant 0 : i32
    %c0_i32_1 = arith.constant 0 : i32
    return %c0_i32, %c0_i32_0 : i32, i32
  }
  func.func @transform_18(%arg0: i32) -> (i32, i32) {
    %c0_i32 = arith.constant 0 : i32
    %c0_i32_0 = arith.constant 0 : i32
    %c0_i32_1 = arith.constant 0 : i32
    return %c0_i32, %c0_i32_0 : i32, i32
  }
  func.func @transform_19(%arg0: i32) -> (i32, i32, i32) {
    %c0_i32 = arith.constant 0 : i32
    %c0_i32_0 = arith.constant 0 : i32
    %c0_i32_1 = arith.constant 0 : i32
    %c0_i32_2 = arith.constant 0 : i32
    return %c0_i32, %c0_i32_0, %c0_i32_1 : i32, i32, i32
  }
}

</mosaic_0001>

<bundles_post_ra>
// kernel: grammar_vae_forward.2
= control target key start
LH: loop header
LB: loop body
LE: loop exit
PB: predicated region body
PF: predicated region fallthrough
CT: control target
= control target key end

     0   :  { %vm161_vm0 = vcmask 1043456   ;;  %vm13705_vm1 = vmmov 1   ;;  %vm112_vm3 = vcmask 1046528   ;;  %vm136_vm4 = vcmask 97280   ;;  %s17213_s1 = inlined_call_operand.vmem [shape: f32[9,12,9], index: 1, kind: input, shape index: {}]   ;;  %s17214_s0 = inlined_call_operand.vmem [shape: f32[2,100,12], index: 0, kind: input, shape index: {}]   ;;  %s17215_s3 = inlined_call_operand.vmem [shape: f32[9,9,9], index: 3, kind: input, shape index: {}]   ;;  %s17216_s2 = inlined_call_operand.vmem [shape: f32[1,9], index: 2, kind: input, shape index: {}]   ;;  %s17217_s5 = inlined_call_operand.vmem [shape: f32[11,9,10], index: 5, kind: input, shape index: {}]   ;;  %s17218_s4 = inlined_call_operand.vmem [shape: f32[1,9], index: 4, kind: input, shape index: {}]   ;;  %s17219_s6 = inlined_call_operand.vmem [shape: f32[1,10], index: 6, kind: input, shape index: {}]   ;;  %s17220_s7 = inlined_call_operand.vmem [shape: f32[2,74,10], index: 7, kind: output, shape index: {}]  }
   0x1   :  { %v28_v0 = vld [vmem:[%s17213_s1 + $0x10] sm:$0xff]  ;;  %v29_v1 = vld [vmem:[%s17213_s1 + $0x18] sm:$0xf]  ;;  %vm13757_vm2 = vmpackc.low %vm161_vm0, %vm13705_vm1  ;;  %vm442_vm5 = vcmask 1045504   ;;  %vm630_vm6 = vcmask 1044480   ;;  %vm1006_vm7 = vcmask 1042432  }
   0x2   :  { %v13761_v3 = vpack.c.bf16 %v29_v1, %v28_v0  ;;  %v13766_v4 = vld [vmem:[%s17214_s0] sm:$0xff]  ;;  %v13771_v5 = vld [vmem:[%s17214_s0 + $0x8] sm:$0xff]  ;;  %v13778_v8 = vld [vmem:[%s17214_s0 + $0x10] sm:$0xff]  ;;  %vm1196_vm8 = vcmask 1041408   ;;  %vm1386_vm9 = vcmask 1040384   ;;  %vm13707_vm11 = vmmov 0  }
   0x3   :  { %v113_v6 = vrot.slane %v13766_v4, 1  ;;  %v114_v7 = vrot.slane %v13771_v5, 1  ;;  %v26_v9 = vld [vmem:[%s17213_s1] sm:$0xff]  ;;  %v27_v10 = vld [vmem:[%s17213_s1 + $0x8] sm:$0xf]  ;;  %v116_v11 = vrot.slane %v13778_v8, 1  ;;  %vm14247_vm10 = vmpackc.low %vm1386_vm9, %vm13705_vm1 }
   0x4   :  { %12985 = vmatprep.subr.msk.bf16.mxu0 %vm13757_vm2, %v13761_v3  ;;  %v13790_v12 = vpack.c.bf16 %v27_v10, %v26_v9  ;;  %v13795_v13 = vld [vmem:[%s17214_s0 + $0x18] sm:$0xff]  ;;  %v13800_v14 = vld [vmem:[%s17214_s0 + $0x20] sm:$0xff]  ;;  %v13805_v15 = vld [vmem:[%s17214_s0 + $0x28] sm:$0xff]  ;;  %v443_v48 = vrot.slane %v13766_v4, 2  ;;  %v444_v49 = vrot.slane %v13771_v5, 2  ;;  %v446_v50 = vrot.slane %v13778_v8, 2 }
   0x5   :  { %12988 = vmatpush3.bf16.msk.msra.mxu0 %vm13757_vm2, %v13761_v3  ;;  %v115_v16 = vsel %vm112_vm3, %v113_v6, %v114_v7  ;;  %v118_v17 = vrot.slane %v13795_v13, 1  ;;  %v120_v18 = vrot.slane %v13800_v14, 1  ;;  %v117_v19 = vsel %vm112_vm3, %v114_v7, %v116_v11  ;;  %v13822_v21 = vld [vmem:[%s17214_s0 + $0x30] sm:$0xff]  ;;  %v13828_v23 = vld [vmem:[%s17214_s0 + $0x38] sm:$0xff]  ;;  %v30_v24 = vld [vmem:[%s17213_s1 + $0x20] sm:$0xff] }
   0x6   :  { %11507 = vmatprep.mubr.msk.f32.mxu0 %vm136_vm4, %v115_v16  ;;  %12991 = vmatprep.subr.msk.bf16.mxu0 %vm13757_vm2, %v13790_v12  ;;  %v122_v20 = vrot.slane %v13805_v15, 1  ;;  %v31_v25 = vld [vmem:[%s17213_s1 + $0x28] sm:$0xf]  ;;  %v124_v27 = vrot.slane %v13822_v21, 1  ;;  %v126_v30 = vrot.slane %v13828_v23, 1  ;;  %v13850_v31 = vld [vmem:[%s17214_s0 + $0x40] sm:$0xff]  ;;  %v445_v51 = vsel %vm442_vm5, %v443_v48, %v444_v49 }
   0x7   :  { %v119_v22 = vsel %vm112_vm3, %v116_v11, %v118_v17  ;;  %v121_v26 = vsel %vm112_vm3, %v118_v17, %v120_v18  ;;  %v13843_v28 = vpack.c.bf16 %v31_v25, %v30_v24  ;;  %v13855_v32 = vld [vmem:[%s17214_s0 + $0x48] sm:$0xff]  ;;  %v128_v34 = vrot.slane %v13850_v31, 1  ;;  %v13869_v37 = vld [vmem:[%s17214_s0 + $0x50] sm:$0xff]  ;;  %v13874_v38 = vld [vmem:[%s17214_s0 + $0x58] sm:$0xff] }
   0x8   :  { %11508 = vmatmul.mubr.msk.f32.vlgmr.msra.gmra.mrb[0].mxu0 %vm136_vm4, %v117_v19  ;;  %v123_v29 = vsel %vm112_vm3, %v120_v18, %v122_v20  ;;  %v125_v33 = vsel %vm112_vm3, %v122_v20, %v124_v27  ;;  %v127_v35 = vsel %vm112_vm3, %v124_v27, %v126_v30  ;;  %v130_v36 = vrot.slane %v13855_v32, 1  ;;  %v32_v45 = vld [vmem:[%s17213_s1 + $0x30] sm:$0xff]  ;;  %v33_v46 = vld [vmem:[%s17213_s1 + $0x38] sm:$0xf]  ;;  %v34_v53 = vld [vmem:[%s17213_s1 + $0x40] sm:$0xff] }
   0x9   :  { %12994 = vmatpush3.bf16.msk.msra.mxu0 %vm13757_vm2, %v13790_v12  ;;  %11510 = vmatprep.mubr.msk.f32.mxu0 %vm136_vm4, %v119_v22  ;;  %v129_v39 = vsel %vm112_vm3, %v126_v30, %v128_v34  ;;  %v132_v40 = vrot.slane %v13869_v37, 1  ;;  %v134_v42 = vrot.slane %v13874_v38, 1  ;;  %v13897_v47 = vpack.c.bf16 %v33_v46, %v32_v45  ;;  %v35_v54 = vld [vmem:[%s17213_s1 + $0x48] sm:$0xf]  ;;  %v37_v27 = vld [vmem:[%s17213_s1 + $0x58] sm:$0xf] }
   0xa   :  { %12997 = vmatprep.subr.msk.bf16.mxu0 %vm13757_vm2, %v13843_v28  ;;  %v131_v41 = vsel %vm112_vm3, %v128_v34, %v130_v36  ;;  %v448_v52 = vrot.slane %v13795_v13, 2  ;;  %v447_v55 = vsel %vm442_vm5, %v444_v49, %v446_v50  ;;  %v450_v56 = vrot.slane %v13800_v14, 2 }
   0xb   :  { %v133_v43 = vsel %vm112_vm3, %v130_v36, %v132_v40  ;;  %v135_v44 = vsel %vm112_vm3, %v132_v40, %v134_v42  ;;  %v452_v58 = vrot.slane %v13805_v15, 2  ;;  %v13943_v59 = vpack.c.bf16 %v35_v54, %v34_v53 }
   0xc   :  { %11511 = vmatmul.mubr.msk.f32.gmra.mrb[2].mxu0 %vm136_vm4, %v121_v26  ;;  %v449_v57 = vsel %vm442_vm5, %v446_v50, %v448_v52  ;;  %v451_v60 = vsel %vm442_vm5, %v448_v52, %v450_v56  ;;  %v454_v61 = vrot.slane %v13822_v21, 2  ;;  %v456_v63 = vrot.slane %v13828_v23, 2  ;;  %v36_v26 = vld [vmem:[%s17213_s1 + $0x50] sm:$0xff] }
   0xd   :  { %11513 = vmatprep.mubr.msk.f32.mxu0 %vm136_vm4, %v123_v29  ;;  %v453_v62 = vsel %vm442_vm5, %v450_v56, %v452_v58  ;;  %v458_v1 = vrot.slane %v13850_v31, 2  ;;  %v460_v7 = vrot.slane %v13855_v32, 2  ;;  %v462_v10 = vrot.slane %v13869_v37, 2 }
   0xe   :  { %v455_v0 = vsel %vm442_vm5, %v452_v58, %v454_v61  ;;  %v457_v6 = vsel %vm442_vm5, %v454_v61, %v456_v63  ;;  %v464_v16 = vrot.slane %v13874_v38, 2  ;;  %v631_v19 = vrot.slane %v13766_v4, 3  ;;  %v38_v58 = vld [vmem:[%s17213_s1 + $0x60] sm:$0xff] }
   0xf   :  { %v459_v9 = vsel %vm442_vm5, %v456_v63, %v458_v1  ;;  %v461_v11 = vsel %vm442_vm5, %v458_v1, %v460_v7  ;;  %v463_v17 = vsel %vm442_vm5, %v460_v7, %v462_v10  ;;  %v632_v20 = vrot.slane %v13771_v5, 3 }
  0x10   :  { %11514 = vmatmul.mubr.msk.f32.gmra.mrb[4].mxu0 %vm136_vm4, %v125_v33  ;;  %v465_v18 = vsel %vm442_vm5, %v462_v10, %v464_v16  ;;  %v634_v22 = vrot.slane %v13778_v8, 3  ;;  %v636_v25 = vrot.slane %v13795_v13, 3  ;;  %v638_v30 = vrot.slane %v13800_v14, 3 }
  0x11   :  { %11516 = vmatprep.mubr.msk.f32.mxu0 %vm136_vm4, %v127_v35  ;;  %v633_v24 = vsel %vm630_vm6, %v631_v19, %v632_v20  ;;  %v640_v34 = vrot.slane %v13805_v15, 3  ;;  %v13992_v35 = vpack.c.bf16 %v37_v27, %v36_v26  ;;  %v648_v45 = vrot.slane %v13855_v32, 3 }
  0x12   :  { %v635_v29 = vsel %vm630_vm6, %v632_v20, %v634_v22  ;;  %v637_v33 = vsel %vm630_vm6, %v634_v22, %v636_v25  ;;  %v639_v36 = vsel %vm630_vm6, %v636_v25, %v638_v30  ;;  %v650_v48 = vrot.slane %v13869_v37, 3 }
  0x13   :  { %v641_v40 = vsel %vm630_vm6, %v638_v30, %v640_v34  ;;  %v652_v50 = vrot.slane %v13874_v38, 3  ;;  %v818_v53 = vrot.slane %v13766_v4, 4  ;;  %v819_v54 = vrot.slane %v13771_v5, 4 }
  0x14   :  { %11517 = vmatmul.mubr.msk.f32.gmra.mrb[6].mxu0 %vm136_vm4, %v129_v39  ;;  %v642_v39 = vrot.slane %v13822_v21, 3  ;;  %v829_v7 = vrot.slane %v13822_v21, 4  ;;  %v831_v10 = vrot.slane %v13828_v23, 4  ;;  %v837_v20 = vrot.slane %v13869_v37, 4 }
  0x15   :  { %11519 = vmatprep.mubr.msk.f32.mxu0 %vm136_vm4, %v131_v41  ;;  %v644_v41 = vrot.slane %v13828_v23, 3  ;;  %v653_v52 = vsel %vm630_vm6, %v650_v48, %v652_v50  ;;  %v820_v56 = vsel %vm161_vm0, %v818_v53, %v819_v54  ;;  %v1007_v27 = vrot.slane %v13766_v4, 5 }
  0x16   :  { %v1010_v30 = vrot.slane %v13778_v8, 5  ;;  %v1024_v53 = vrot.slane %v13855_v32, 5  ;;  %vm1804_vm14 = vcmask 72704  }
  0x18   :  { %11520 = vmatmul.mubr.msk.f32.gmra.mrb[8].mxu0 %vm136_vm4, %v133_v43  ;;  %v646_v43 = vrot.slane %v13850_v31, 3 }
  0x19   :  { %11522 = vmatprep.mubr.msk.f32.mxu0 %vm136_vm4, %v135_v44  ;;  %v645_v44 = vsel %vm630_vm6, %v642_v39, %v644_v41 }
  0x1a   :  { %v647_v46 = vsel %vm630_vm6, %v644_v41, %v646_v43  ;;  %v649_v49 = vsel %vm630_vm6, %v646_v43, %v648_v45  ;;  %v1014_v41 = vrot.slane %v13800_v14, 5  ;;  %v1016_v43 = vrot.slane %v13805_v15, 5 }
  0x1c   :  { %11523 = vmatmul.mubr.msk.f32.gmra.mrb[10].mxu0 %vm136_vm4, %v134_v42  ;;  %v643_v42 = vsel %vm630_vm6, %v640_v34, %v642_v39  ;;  %v1012_v34 = vrot.slane %v13795_v13, 5  ;;  %v41_v39 = vld [vmem:[%s17213_s1 + $0x78] sm:$0xf] }
  0x1d   :  { %11529 = vmatprep.mubr.msk.f32.mxu0 %vm136_vm4, %v13766_v4 }
  0x20   :  { %11530 = vmatmul.mubr.msk.f32.vlgmr.msra.gmra.mrb[0].mxu0 %vm136_vm4, %v13771_v5 }
  0x21   :  { %13000 = vmatpush3.bf16.msk.msra.mxu0 %vm13757_vm2, %v13843_v28  ;;  %11532 = vmatprep.mubr.msk.f32.mxu0 %vm136_vm4, %v13778_v8 }
  0x22   :  { %13003 = vmatprep.subr.msk.bf16.mxu0 %vm13757_vm2, %v13897_v47 }
  0x24   :  { %11533 = vmatmul.mubr.msk.f32.gmra.mrb[2].mxu0 %vm136_vm4, %v13795_v13 }
  0x25   :  { %11535 = vmatprep.mubr.msk.f32.mxu0 %vm136_vm4, %v13800_v14 }
  0x28   :  { %11536 = vmatmul.mubr.msk.f32.gmra.mrb[4].mxu0 %vm136_vm4, %v13805_v15 }
  0x29   :  { %11538 = vmatprep.mubr.msk.f32.mxu0 %vm136_vm4, %v13822_v21 }
  0x2c   :  { %11539 = vmatmul.mubr.msk.f32.gmra.mrb[6].mxu0 %vm136_vm4, %v13828_v23 }
  0x2d   :  { %11541 = vmatprep.mubr.msk.f32.mxu0 %vm136_vm4, %v13850_v31 }
  0x30   :  { %11542 = vmatmul.mubr.msk.f32.gmra.mrb[8].mxu0 %vm136_vm4, %v13855_v32 }
  0x31   :  { %11544 = vmatprep.mubr.msk.f32.mxu0 %vm136_vm4, %v13869_v37 }
  0x34   :  { %11545 = vmatmul.mubr.msk.f32.gmra.mrb[10].mxu0 %vm136_vm4, %v13874_v38 }
  0x35   :  { %11551 = vmatprep.mubr.msk.f32.mxu0 %vm136_vm4, %v445_v51  ;;  %v651_v51 = vsel %vm630_vm6, %v648_v45, %v650_v48  ;;  %v1015_v45 = vsel %vm1006_vm7, %v1012_v34, %v1014_v41  ;;  %v1017_v48 = vsel %vm1006_vm7, %v1014_v41, %v1016_v43  ;;  %v1218_v41 = vrot.slane %v13874_v38, 6 }
  0x38   :  { %11552 = vmatmul.mubr.msk.f32.vlgmr.msra.gmra.mrb[0].mxu0 %vm136_vm4, %v447_v55  ;;  %v821_v55 = vrot.slane %v13778_v8, 4 }
  0x39   :  { %13006 = vmatpush3.bf16.msk.msra.mxu0 %vm13757_vm2, %v13897_v47  ;;  %11554 = vmatprep.mubr.msk.f32.mxu0 %vm136_vm4, %v449_v57  ;;  %v823_v57 = vrot.slane %v13795_v13, 4 }
  0x3a   :  { %13009 = vmatprep.subr.msk.bf16.mxu0 %vm13757_vm2, %v13943_v59  ;;  %v822_v61 = vsel %vm161_vm0, %v819_v54, %v821_v55 }
  0x3b   :  { %v824_v63 = vsel %vm161_vm0, %v821_v55, %v823_v57  ;;  %v1026_v55 = vrot.slane %v13869_v37, 5 }
  0x3c   :  { %11555 = vmatmul.mubr.msk.f32.gmra.mrb[2].mxu0 %vm136_vm4, %v451_v60  ;;  %v39_v60 = vld [vmem:[%s17213_s1 + $0x68] sm:$0xf] }
  0x3d   :  { %11557 = vmatprep.mubr.msk.f32.mxu0 %vm136_vm4, %v453_v62  ;;  %v825_v62 = vrot.slane %v13800_v14, 4  ;;  %v14041_v1 = vpack.c.bf16 %v39_v60, %v38_v58  ;;  %v14119_v58 = vld [vmem:[%s17214_s0 + $0x60] sm:$0xf]  ;;  %v1027_v60 = vsel %vm1006_vm7, %v1024_v53, %v1026_v55 }
  0x40   :  { %11558 = vmatmul.mubr.msk.f32.gmra.mrb[4].mxu0 %vm136_vm4, %v455_v0  ;;  %v827_v0 = vrot.slane %v13805_v15, 4 }
  0x41   :  { %11560 = vmatprep.mubr.msk.f32.mxu0 %vm136_vm4, %v457_v6  ;;  %v826_v6 = vsel %vm161_vm0, %v823_v57, %v825_v62  ;;  %v1028_v57 = vrot.slane %v13874_v38, 5 }
  0x44   :  { %11561 = vmatmul.mubr.msk.f32.gmra.mrb[6].mxu0 %vm136_vm4, %v459_v9  ;;  %v828_v9 = vsel %vm161_vm0, %v825_v62, %v827_v0  ;;  %v1029_v62 = vsel %vm1006_vm7, %v1026_v55, %v1028_v57  ;;  %v1396_v55 = vrot.slane %v13805_v15, 7 }
  0x45   :  { %11563 = vmatprep.mubr.msk.f32.mxu0 %vm136_vm4, %v461_v11  ;;  %v830_v11 = vsel %vm161_vm0, %v827_v0, %v829_v7  ;;  %v1198_v0 = vrot.slane %v13771_v5, 6 }
  0x48   :  { %11564 = vmatmul.mubr.msk.f32.gmra.mrb[8].mxu0 %vm136_vm4, %v463_v17  ;;  %v832_v17 = vsel %vm161_vm0, %v829_v7, %v831_v10  ;;  %v1200_v7 = vrot.slane %v13778_v8, 6 }
  0x49   :  { %11566 = vmatprep.mubr.msk.f32.mxu0 %vm136_vm4, %v465_v18  ;;  %v835_v18 = vrot.slane %v13855_v32, 4 }
  0x4b   :  { %v838_v25 = vsel %vm161_vm0, %v835_v18, %v837_v20 }
  0x4c   :  { %11567 = vmatmul.mubr.msk.f32.gmra.mrb[10].mxu0 %vm136_vm4, %v464_v16  ;;  %v833_v16 = vrot.slane %v13850_v31, 4 }
  0x4d   :  { %11573 = vmatprep.mubr.msk.f32.mxu0 %vm136_vm4, %v633_v24  ;;  %v839_v24 = vrot.slane %v13874_v38, 4 }
  0x4e   :  { %v834_v19 = vsel %vm161_vm0, %v831_v10, %v833_v16  ;;  %v836_v22 = vsel %vm161_vm0, %v833_v16, %v835_v18  ;;  %v1202_v10 = vrot.slane %v13795_v13, 6  ;;  %v43_v16 = vld [vmem:[%s17213_s1 + $0x88] sm:$0xf]  ;;  %v1204_v18 = vrot.slane %v13800_v14, 6 }
  0x4f   :  { %v840_v26 = vsel %vm161_vm0, %v837_v20, %v839_v24  ;;  %v1206_v20 = vrot.slane %v13805_v15, 6 }
  0x50   :  { %11574 = vmatmul.mubr.msk.f32.vlgmr.msra.gmra.mrb[0].mxu0 %vm136_vm4, %v635_v29  ;;  %v1008_v29 = vrot.slane %v13771_v5, 5 }
  0x51   :  { %13012 = vmatpush3.bf16.msk.msra.mxu0 %vm13757_vm2, %v13943_v59  ;;  %11576 = vmatprep.mubr.msk.f32.mxu0 %vm136_vm4, %v637_v33 }
  0x52   :  { %13015 = vmatprep.subr.msk.bf16.mxu0 %vm13757_vm2, %v13992_v35  ;;  %v1009_v33 = vsel %vm1006_vm7, %v1007_v27, %v1008_v29  ;;  %v1210_v27 = vrot.slane %v13828_v23, 6 }
  0x54   :  { %11577 = vmatmul.mubr.msk.f32.gmra.mrb[2].mxu0 %vm136_vm4, %v639_v36  ;;  %v40_v36 = vld [vmem:[%s17213_s1 + $0x70] sm:$0xff] }
  0x55   :  { %11579 = vmatprep.mubr.msk.f32.mxu0 %vm136_vm4, %v641_v40  ;;  %v1011_v40 = vsel %vm1006_vm7, %v1008_v29, %v1010_v30 }
  0x58   :  { %11580 = vmatmul.mubr.msk.f32.gmra.mrb[4].mxu0 %vm136_vm4, %v643_v42  ;;  %v1013_v42 = vsel %vm1006_vm7, %v1010_v30, %v1012_v34  ;;  %v1212_v30 = vrot.slane %v13850_v31, 6  ;;  %v1214_v34 = vrot.slane %v13855_v32, 6 }
  0x59   :  { %11582 = vmatprep.mubr.msk.f32.mxu0 %vm136_vm4, %v645_v44  ;;  %v14090_v44 = vpack.c.bf16 %v41_v39, %v40_v36  ;;  %v1216_v39 = vrot.slane %v13869_v37, 6 }
  0x5a   :  { %v1213_v36 = vsel %vm1196_vm8, %v1210_v27, %v1212_v30 }
  0x5c   :  { %11583 = vmatmul.mubr.msk.f32.gmra.mrb[6].mxu0 %vm136_vm4, %v647_v46  ;;  %v1018_v46 = vrot.slane %v13822_v21, 5 }
  0x5d   :  { %11585 = vmatprep.mubr.msk.f32.mxu0 %vm136_vm4, %v649_v49  ;;  %v1020_v49 = vrot.slane %v13828_v23, 5 }
  0x60   :  { %11586 = vmatmul.mubr.msk.f32.gmra.mrb[8].mxu0 %vm136_vm4, %v651_v51  ;;  %v1022_v51 = vrot.slane %v13850_v31, 5 }
  0x61   :  { %11588 = vmatprep.mubr.msk.f32.mxu0 %vm136_vm4, %v653_v52  ;;  %v1021_v52 = vsel %vm1006_vm7, %v1018_v46, %v1020_v49 }
  0x62   :  { %v1023_v54 = vsel %vm1006_vm7, %v1020_v49, %v1022_v51 }
  0x64   :  { %11589 = vmatmul.mubr.msk.f32.gmra.mrb[10].mxu0 %vm136_vm4, %v652_v50  ;;  %v1019_v50 = vsel %vm1006_vm7, %v1016_v43, %v1018_v46  ;;  %v1220_v43 = vrot.slane %v14119_v58, 6  ;;  %v1387_v46 = vrot.slane %v13766_v4, 7 }
  0x65   :  { %11595 = vmatprep.mubr.msk.f32.mxu0 %vm136_vm4, %v820_v56  ;;  %v1025_v56 = vsel %vm1006_vm7, %v1022_v51, %v1024_v53  ;;  %v1394_v53 = vrot.slane %v13800_v14, 7 }
  0x66   :  { %v1221_v49 = vsel %vm1196_vm8, %v1218_v41, %v1220_v43 }
  0x68   :  { %11596 = vmatmul.mubr.msk.f32.vlgmr.msra.gmra.mrb[0].mxu0 %vm136_vm4, %v822_v61  ;;  %v1030_v61 = vrot.slane %v14119_v58, 5 }
  0x69   :  { %13018 = vmatpush3.bf16.msk.msra.mxu0 %vm13757_vm2, %v13992_v35  ;;  %11598 = vmatprep.mubr.msk.f32.mxu0 %vm136_vm4, %v824_v63  ;;  %v1197_v63 = vrot.slane %v13766_v4, 6 }
  0x6a   :  { %13021 = vmatprep.subr.msk.bf16.mxu0 %vm13757_vm2, %v14041_v1 }
  0x6c   :  { %11599 = vmatmul.mubr.msk.f32.gmra.mrb[2].mxu0 %vm136_vm4, %v826_v6  ;;  %v1031_v6 = vsel %vm1006_vm7, %v1028_v57, %v1030_v61  ;;  %v1398_v57 = vrot.slane %v13822_v21, 7  ;;  %v1400_v61 = vrot.slane %v13828_v23, 7 }
  0x6d   :  { %11601 = vmatprep.mubr.msk.f32.mxu0 %vm136_vm4, %v828_v9  ;;  %v1199_v9 = vsel %vm1196_vm8, %v1197_v63, %v1198_v0  ;;  %v1402_v63 = vrot.slane %v13850_v31, 7 }
  0x70   :  { %11602 = vmatmul.mubr.msk.f32.gmra.mrb[4].mxu0 %vm136_vm4, %v830_v11  ;;  %v42_v11 = vld [vmem:[%s17213_s1 + $0x80] sm:$0xff] }
  0x71   :  { %11604 = vmatprep.mubr.msk.f32.mxu0 %vm136_vm4, %v832_v17  ;;  %v1201_v17 = vsel %vm1196_vm8, %v1198_v0, %v1200_v7  ;;  %v1401_v0 = vsel %vm1386_vm9, %v1398_v57, %v1400_v61 }
  0x74   :  { %11605 = vmatmul.mubr.msk.f32.gmra.mrb[6].mxu0 %vm136_vm4, %v834_v19  ;;  %v1203_v19 = vsel %vm1196_vm8, %v1200_v7, %v1202_v10  ;;  %v1403_v7 = vsel %vm1386_vm9, %v1400_v61, %v1402_v63 }
  0x75   :  { %11607 = vmatprep.mubr.msk.f32.mxu0 %vm136_vm4, %v836_v22  ;;  %v14146_v22 = vpack.c.bf16 %v43_v16, %v42_v11  ;;  %v1408_v11 = vrot.slane %v13874_v38, 7 }
  0x78   :  { %11608 = vmatmul.mubr.msk.f32.gmra.mrb[8].mxu0 %vm136_vm4, %v838_v25  ;;  %v1208_v25 = vrot.slane %v13822_v21, 6 }
  0x79   :  { %11610 = vmatprep.mubr.msk.f32.mxu0 %vm136_vm4, %v840_v26  ;;  %v1207_v26 = vsel %vm1196_vm8, %v1204_v18, %v1206_v20 }
  0x7a   :  { %v1209_v29 = vsel %vm1196_vm8, %v1206_v20, %v1208_v25 }
  0x7c   :  { %11611 = vmatmul.mubr.msk.f32.gmra.mrb[10].mxu0 %vm136_vm4, %v839_v24  ;;  %v1205_v24 = vsel %vm1196_vm8, %v1202_v10, %v1204_v18 }
  0x7d   :  { %11617 = vmatprep.mubr.msk.f32.mxu0 %vm136_vm4, %v1009_v33  ;;  %v1211_v33 = vsel %vm1196_vm8, %v1208_v25, %v1210_v27  ;;  %v51_v25 = vld [vmem:[%s17215_s3 + $0x30] sm:$0xff] }
  0x80   :  { %11618 = vmatmul.mubr.msk.f32.vlgmr.msra.gmra.mrb[0].mxu0 %vm136_vm4, %v1011_v40  ;;  %v1215_v40 = vsel %vm1196_vm8, %v1212_v30, %v1214_v34 }
  0x81   :  { %13024 = vmatpush3.bf16.msk.msra.mxu0 %vm13757_vm2, %v14041_v1  ;;  %11620 = vmatprep.mubr.msk.f32.mxu0 %vm136_vm4, %v1013_v42  ;;  %v1217_v42 = vsel %vm1196_vm8, %v1214_v34, %v1216_v39 }
  0x82   :  { %13027 = vmatprep.subr.msk.bf16.mxu0 %vm13757_vm2, %v14090_v44 }
  0x84   :  { %11621 = vmatmul.mubr.msk.f32.gmra.mrb[2].mxu0 %vm136_vm4, %v1015_v45  ;;  %v1219_v45 = vsel %vm1196_vm8, %v1216_v39, %v1218_v41  ;;  %v46_v41 = vld [vmem:[%s17215_s3 + $0x8] sm:$0x1] }
  0x85   :  { %11623 = vmatprep.mubr.msk.f32.mxu0 %vm136_vm4, %v1017_v48  ;;  %v1388_v48 = vrot.slane %v13771_v5, 7 }
  0x87   :  { %v1389_v51 = vsel %vm1386_vm9, %v1387_v46, %v1388_v48 }
  0x88   :  { %11624 = vmatmul.mubr.msk.f32.gmra.mrb[4].mxu0 %vm136_vm4, %v1019_v50  ;;  %v1390_v50 = vrot.slane %v13778_v8, 7 }
  0x89   :  { %11626 = vmatprep.mubr.msk.f32.mxu0 %vm136_vm4, %v1021_v52  ;;  %v1392_v52 = vrot.slane %v13795_v13, 7 }
  0x8a   :  { %v1391_v4 = vsel %vm1386_vm9, %v1388_v48, %v1390_v50 }
  0x8c   :  { %11627 = vmatmul.mubr.msk.f32.gmra.mrb[6].mxu0 %vm136_vm4, %v1023_v54  ;;  %v1393_v54 = vsel %vm1386_vm9, %v1390_v50, %v1392_v52 }
  0x8d   :  { %11629 = vmatprep.mubr.msk.f32.mxu0 %vm136_vm4, %v1025_v56  ;;  %v1395_v56 = vsel %vm1386_vm9, %v1392_v52, %v1394_v53 }
  0x90   :  { %11630 = vmatmul.mubr.msk.f32.gmra.mrb[8].mxu0 %vm136_vm4, %v1027_v60  ;;  %v1397_v60 = vsel %vm1386_vm9, %v1394_v53, %v1396_v55 }
  0x91   :  { %11632 = vmatprep.mubr.msk.f32.mxu0 %vm136_vm4, %v1029_v62  ;;  %v1399_v62 = vsel %vm1386_vm9, %v1396_v55, %v1398_v57 }
  0x94   :  { %11633 = vmatmul.mubr.msk.f32.gmra.mrb[10].mxu0 %vm136_vm4, %v1031_v6  ;;  %v1404_v6 = vrot.slane %v13855_v32, 7 }
  0x95   :  { %11639 = vmatprep.mubr.msk.f32.mxu0 %vm136_vm4, %v1199_v9  ;;  %v1406_v9 = vrot.slane %v13869_v37, 7 }
  0x96   :  { %v1405_v10 = vsel %vm1386_vm9, %v1402_v63, %v1404_v6 }
  0x97   :  { %v1407_v16 = vsel %vm1386_vm9, %v1404_v6, %v1406_v9  ;;  %v1409_v18 = vsel %vm1386_vm9, %v1406_v9, %v1408_v11 }
  0x98   :  { %11640 = vmatmul.mubr.msk.f32.vlgmr.msra.gmra.mrb[0].mxu0 %vm136_vm4, %v1201_v17  ;;  %v1410_v17 = vrot.slane %v14119_v58, 7 }
  0x99   :  { %13030 = vmatpush3.bf16.msk.msra.mxu0 %vm13757_vm2, %v14090_v44  ;;  %11642 = vmatprep.mubr.msk.f32.mxu0 %vm136_vm4, %v1203_v19 }
  0x9a   :  { %13033 = vmatprep.subr.msk.bf16.mxu0 %vm13757_vm2, %v14146_v22  ;;  %v1411_v19 = vsel %vm1386_vm9, %v1408_v11, %v1410_v17 }
  0x9c   :  { %11643 = vmatmul.mubr.msk.f32.gmra.mrb[2].mxu0 %vm136_vm4, %v1205_v24 }
  0x9d   :  { %11645 = vmatprep.mubr.msk.f32.mxu0 %vm136_vm4, %v1207_v26  ;;  %v52_v26 = vld [vmem:[%s17215_s3 + $0x38] sm:$0x1] }
  0x9e   :  { %v14297_v39 = vpack.c.bf16 %v52_v26, %v51_v25 }
  0xa0   :  { %11646 = vmatmul.mubr.msk.f32.gmra.mrb[4].mxu0 %vm136_vm4, %v1209_v29 }
  0xa1   :  { %11648 = vmatprep.mubr.msk.f32.mxu0 %vm136_vm4, %v1211_v33 }
  0xa4   :  { %11649 = vmatmul.mubr.msk.f32.gmra.mrb[6].mxu0 %vm136_vm4, %v1213_v36 }
  0xa5   :  { %11651 = vmatprep.mubr.msk.f32.mxu0 %vm136_vm4, %v1215_v40  ;;  %v45_v40 = vld [vmem:[%s17215_s3] sm:$0xff] }
  0xa8   :  { %11652 = vmatmul.mubr.msk.f32.gmra.mrb[8].mxu0 %vm136_vm4, %v1217_v42 }
  0xa9   :  { %11654 = vmatprep.mubr.msk.f32.mxu0 %vm136_vm4, %v1219_v45 }
  0xac   :  { %11655 = vmatmul.mubr.msk.f32.gmra.mrb[10].mxu0 %vm136_vm4, %v1221_v49 }
  0xad   :  { %11661 = vmatprep.mubr.msk.f32.mxu0 %vm136_vm4, %v1389_v51 }
  0xb0   :  { %11662 = vmatmul.mubr.msk.f32.vlgmr.msra.gmra.mrb[0].mxu0 %vm136_vm4, %v1391_v4  ;;  %v14312_v4 = vpack.c.bf16 %v46_v41, %v45_v40 }
  0xb1   :  { %13036 = vmatpush3.bf16.msk.msra.mxu0 %vm13757_vm2, %v14146_v22  ;;  %11664 = vmatprep.mubr.msk.f32.mxu0 %vm136_vm4, %v1393_v54 }
  0xb4   :  { %11665 = vmatmul.mubr.msk.f32.gmra.mrb[2].mxu0 %vm136_vm4, %v1395_v56 }
  0xb5   :  { %11667 = vmatprep.mubr.msk.f32.mxu0 %vm136_vm4, %v1397_v60 }
  0xb8   :  { %11668 = vmatmul.mubr.msk.f32.gmra.mrb[4].mxu0 %vm136_vm4, %v1399_v62 }
  0xb9   :  { %11670 = vmatprep.mubr.msk.f32.mxu0 %vm136_vm4, %v1401_v0 }
  0xbc   :  { %11671 = vmatmul.mubr.msk.f32.gmra.mrb[6].mxu0 %vm136_vm4, %v1403_v7 }
  0xbd   :  { %11673 = vmatprep.mubr.msk.f32.mxu0 %vm136_vm4, %v1405_v10 }
  0xc0   :  { %11674 = vmatmul.mubr.msk.f32.gmra.mrb[8].mxu0 %vm136_vm4, %v1407_v16 }
  0xc1   :  { %11676 = vmatprep.mubr.msk.f32.mxu0 %vm136_vm4, %v1409_v18 }
  0xc4   :  { %11677 = vmatmul.mubr.msk.f32.gmra.mrb[10].mxu0 %vm136_vm4, %v1411_v19 }
  0xc5   :  { %11683 = vmatprep.mubr.msk.f32.mxu0 %vm136_vm4, %v13771_v5 }
  0xc8   :  { %11684 = vmatmul.mubr.msk.f32.vlgmr.msra.gmra.mrb[0].mxu0 %vm136_vm4, %v13778_v8  ;;  %v47_v8 = vld [vmem:[%s17215_s3 + $0x10] sm:$0xff] }
  0xc9   :  { %11686 = vmatprep.mubr.msk.f32.mxu0 %vm136_vm4, %v13795_v13  ;;  %v48_v13 = vld [vmem:[%s17215_s3 + $0x18] sm:$0x1] }
  0xcc   :  { %11687 = vmatmul.mubr.msk.f32.gmra.mrb[2].mxu0 %vm136_vm4, %v13800_v14  ;;  %v49_v14 = vld [vmem:[%s17215_s3 + $0x20] sm:$0xff] }
  0xcd   :  { %11689 = vmatprep.mubr.msk.f32.mxu0 %vm136_vm4, %v13805_v15  ;;  %v14260_v15 = vpack.c.bf16 %v48_v13, %v47_v8 }
  0xd0   :  { %11690 = vmatmul.mubr.msk.f32.gmra.mrb[4].mxu0 %vm136_vm4, %v13822_v21  ;;  %v50_v21 = vld [vmem:[%s17215_s3 + $0x28] sm:$0x1] }
  0xd1   :  { %11692 = vmatprep.mubr.msk.f32.mxu0 %vm136_vm4, %v13828_v23  ;;  %v17223_v23 = vmov 0.0|0.0  }
  0xd2   :  { %13037 = vmatprep.subr.bf16.mxu0 %v17223_v23  ;;  %13045 = vmatprep.subr.bf16.mxu1 %v17223_v23 }
  0xd3   :  { %13040 = vmatpush3.bf16.msk.msra.mxu0 %vm14247_vm10, %v14260_v15 }
  0xd4   :  { %11693 = vmatmul.mubr.msk.f32.gmra.mrb[6].mxu0 %vm136_vm4, %v13850_v31  ;;  %v14267_v31 = vpack.c.bf16 %v50_v21, %v49_v14  ;;  %13041 = vmatprep.subr.bf16.mxu0 %v17223_v23 }
  0xd5   :  { %11695 = vmatprep.mubr.msk.f32.mxu0 %vm136_vm4, %v13855_v32  ;;  %v17221_v32 = vmov 0.0  }
  0xd6   :  { %13048 = vmatpush3.bf16.msk.msra.mxu1 %vm14247_vm10, %v14267_v31  ;;  %11779 = vmatprep.mubr.msk.f32.mxu1 %vm13707_vm11, %v17221_v32 }
  0xd7   :  { %13049 = vmatprep.subr.bf16.mxu1 %v17223_v23 }
  0xd8   :  { %11696 = vmatmul.mubr.msk.f32.gmra.mrb[8].mxu0 %vm136_vm4, %v13869_v37  ;;  %v14284_v37 = vld [vmem:[%s17216_s2] ss:$0 sm:$0xff] }
  0xd9   :  { %11698 = vmatprep.mubr.msk.f32.mxu0 %vm136_vm4, %v13874_v38 }
  0xdc   :  { %11699 = vmatmul.mubr.msk.f32.gmra.mrb[10].mxu0 %vm136_vm4, %v14119_v58 }
  0xdd   :  { %11705 = vmatprep.mubr.msk.f32.mxu0 %vm13707_vm11, %v17221_v32 }
 0x19b   :  { %v11685_v38 = vpop.f32.mrb[0].mxu0 }
 0x19c   :  { %v1725_v58 = vadd.f32 %v11685_v38, %v14284_v37  ;;  %v1647_v20 = vpop.f32.mrb[1].mxu0 }
 0x19d   :  { %v1724_v24 = vadd.f32 %v14284_v37, %v1647_v20 }
 0x19e   :  { %vm1737_vm12 = vcmp.ge.f32.partialorder %v1725_v58, 0.0  ;;  %v1749_v27 = vmul.f32 0.01, %v1725_v58 }
 0x19f   :  { %vm1736_vm13 = vcmp.ge.f32.partialorder %v1724_v24, 0.0  ;;  %v1748_v29 = vmul.f32 0.01, %v1724_v24  ;;  %v11688_v30 = vpop.f32.mrb[2].mxu0 }
 0x1a0   :  { %v14294_v33 = vsel %vm1737_vm12, %v1725_v58, %v1749_v27  ;;  %v1727_v34 = vadd.f32 %v11688_v30, %v14284_v37  ;;  %v1657_v36 = vpop.f32.mrb[3].mxu0 }
 0x1a1   :  { %v14305_v42 = vsel %vm1736_vm13, %v1724_v24, %v1748_v29  ;;  %v1726_v43 = vadd.f32 %v14284_v37, %v1657_v36  ;;  %v1784_v45 = vrot.slane %v14294_v33, 1  ;;  %v2096_v46 = vrot.slane %v14294_v33, 2 }
 0x1a2   :  { %vm1739_vm15 = vcmp.ge.f32.partialorder %v1727_v34, 0.0  ;;  %v1751_v48 = vmul.f32 0.01, %v1727_v34  ;;  %v1783_v49 = vrot.slane %v14305_v42, 1  ;;  %v2095_v50 = vrot.slane %v14305_v42, 2 }
 0x1a3   :  { %vm1738_vm1 = vcmp.ge.f32.partialorder %v1726_v43, 0.0  ;;  %v1750_v51 = vmul.f32 0.01, %v1726_v43  ;;  %v11691_v52 = vpop.f32.mrb[4].mxu0 }
 0x1a4   :  { %v14314_v53 = vsel %vm1739_vm15, %v1727_v34, %v1751_v48  ;;  %v1667_v54 = vpop.f32.mrb[5].mxu0  ;;  %v1785_v55 = vsel %vm112_vm3, %v1783_v49, %v1784_v45  ;;  %v2097_v56 = vsel %vm442_vm5, %v2095_v50, %v2096_v46  ;;  %v1729_v60 = vadd.f32 %v11691_v52, %v14284_v37 }
 0x1a5   :  { %v14318_v57 = vsel %vm1738_vm1, %v1726_v43, %v1750_v51  ;;  %v1728_v61 = vadd.f32 %v14284_v37, %v1667_v54  ;;  %11706 = vmatmul.mubr.msk.f32.vlgmr.msra.gmra.mrb[12].mxu0 %vm1804_vm14, %v1785_v55  ;;  %11780 = vmatmul.mubr.msk.f32.vlgmr.msra.gmra.mrb[0].mxu1 %vm1804_vm14, %v2097_v56  ;;  %v1788_v11 = vrot.slane %v14314_v53, 1  ;;  %v2100_v16 = vrot.slane %v14314_v53, 2 }
 0x1a6   :  { %13052 = vmatpush3.bf16.msk.msra.mxu1 %vm14247_vm10, %v14297_v39  ;;  %11708 = vmatprep.mubr.msk.f32.mxu0 %vm13707_vm11, %v17221_v32  ;;  %v1786_v62 = vrot.slane %v14318_v57, 1  ;;  %v2098_v63 = vrot.slane %v14318_v57, 2  ;;  %v1753_v17 = vmul.f32 0.01, %v1729_v60  ;;  %vm1741_vm13 = vcmp.ge.f32.partialorder %v1729_v60, 0.0 }
 0x1a7   :  { %vm1740_vm12 = vcmp.ge.f32.partialorder %v1728_v61, 0.0  ;;  %v1752_v0 = vmul.f32 0.01, %v1728_v61  ;;  %v11694_v6 = vpop.f32.mrb[6].mxu0  ;;  %11782 = vmatprep.mubr.msk.f32.mxu1 %vm13707_vm11, %v17221_v32  ;;  %13044 = vmatpush3.bf16.msk.msra.mxu0 %vm14247_vm10, %v14312_v4 }
 0x1a8   :  { %v1677_v7 = vpop.f32.mrb[7].mxu0  ;;  %v1787_v9 = vsel %vm112_vm3, %v1784_v45, %v1786_v62  ;;  %v2099_v10 = vsel %vm442_vm5, %v2096_v46, %v2098_v63  ;;  %13053 = vmatprep.subr.bf16.mxu1 %v17223_v23  ;;  %13057 = vmatprep.subr.bf16.mxu0 %v17223_v23  ;;  %v1789_v14 = vsel %vm112_vm3, %v1786_v62, %v1788_v11 }
 0x1a9   :  { %v14341_v18 = vsel %vm1740_vm12, %v1728_v61, %v1752_v0  ;;  %v1730_v19 = vadd.f32 %v14284_v37, %v1677_v7  ;;  %11709 = vmatmul.mubr.msk.f32.gmra.mrb[14].mxu0 %vm1804_vm14, %v1787_v9  ;;  %11783 = vmatmul.mubr.msk.f32.gmra.mrb[2].mxu1 %vm1804_vm14, %v2099_v10  ;;  %v2101_v21 = vsel %vm442_vm5, %v2098_v63, %v2100_v16 }
 0x1aa   :  { %11711 = vmatprep.mubr.msk.f32.mxu0 %vm13707_vm11, %v17221_v32  ;;  %11785 = vmatprep.mubr.msk.f32.mxu1 %vm13707_vm11, %v17221_v32  ;;  %v1790_v38 = vrot.slane %v14341_v18, 1  ;;  %v2102_v58 = vrot.slane %v14341_v18, 2  ;;  %v14355_v20 = vsel %vm1741_vm13, %v1729_v60, %v1753_v17  ;;  %v1731_v24 = vadd.f32 %v11694_v6, %v14284_v37 }
 0x1ab   :  { %v11697_v8 = vpop.f32.mrb[8].mxu0  ;;  %v1754_v25 = vmul.f32 0.01, %v1730_v19  ;;  %vm1742_vm15 = vcmp.ge.f32.partialorder %v1730_v19, 0.0  ;;  %v1792_v34 = vrot.slane %v14355_v20, 1  ;;  %v2104_v36 = vrot.slane %v14355_v20, 2 }
 0x1ac   :  { %v1687_v13 = vpop.f32.mrb[9].mxu0  ;;  %v1791_v29 = vsel %vm112_vm3, %v1788_v11, %v1790_v38  ;;  %v2103_v30 = vsel %vm442_vm5, %v2100_v16, %v2102_v58  ;;  %v1755_v40 = vmul.f32 0.01, %v1731_v24  ;;  %vm1743_vm1 = vcmp.ge.f32.partialorder %v1731_v24, 0.0 }
 0x1ad   :  { %11712 = vmatmul.mubr.msk.f32.gmra.mrb[16].mxu0 %vm1804_vm14, %v1789_v14  ;;  %11786 = vmatmul.mubr.msk.f32.gmra.mrb[4].mxu1 %vm1804_vm14, %v2101_v21  ;;  %v14370_v41 = vsel %vm1742_vm15, %v1730_v19, %v1754_v25  ;;  %v1732_v43 = vadd.f32 %v14284_v37, %v1687_v13  ;;  %v1793_v45 = vsel %vm112_vm3, %v1790_v38, %v1792_v34 }
 0x1ae   :  { %11714 = vmatprep.mubr.msk.f32.mxu0 %vm13707_vm11, %v17221_v32  ;;  %11788 = vmatprep.mubr.msk.f32.mxu1 %vm13707_vm11, %v17221_v32  ;;  %v2105_v46 = vsel %vm442_vm5, %v2102_v58, %v2104_v36  ;;  %v1794_v48 = vrot.slane %v14370_v41, 1  ;;  %v2106_v49 = vrot.slane %v14370_v41, 2  ;;  %v14383_v50 = vsel %vm1743_vm1, %v1731_v24, %v1755_v40  ;;  %v56_v40 = vld [vmem:[%s17215_s3 + $0x58] sm:$0x1] }
 0x1af   :  { %v14364_v26 = vpop.f32.mrb[10].mxu0  ;;  %v1733_v51 = vadd.f32 %v11697_v8, %v14284_v37  ;;  %v1756_v52 = vmul.f32 0.01, %v1732_v43  ;;  %vm1744_vm12 = vcmp.ge.f32.partialorder %v1732_v43, 0.0  ;;  %v1796_v56 = vrot.slane %v14383_v50, 1 }
 0x1b0   :  { %v1697_v27 = vpop.f32.mrb[11].mxu0  ;;  %v1795_v54 = vsel %vm112_vm3, %v1792_v34, %v1794_v48  ;;  %v2107_v55 = vsel %vm442_vm5, %v2104_v36, %v2106_v49  ;;  %v2108_v60 = vrot.slane %v14383_v50, 2  ;;  %v2273_v34 = vrot.slane %v14294_v33, 3  ;;  %v55_v36 = vld [vmem:[%s17215_s3 + $0x50] sm:$0xff] }
 0x1b1   :  { %11715 = vmatmul.mubr.msk.f32.gmra.mrb[18].mxu0 %vm1804_vm14, %v1791_v29  ;;  %11789 = vmatmul.mubr.msk.f32.gmra.mrb[6].mxu1 %vm1804_vm14, %v2103_v30  ;;  %v1757_v61 = vmul.f32 0.01, %v1733_v51  ;;  %v14396_v62 = vsel %vm1744_vm12, %v1732_v43, %v1756_v52  ;;  %v1734_v63 = vadd.f32 %v14284_v37, %v1697_v27  ;;  %vm1745_vm13 = vcmp.ge.f32.partialorder %v1733_v51, 0.0  ;;  %v53_v27 = vld [vmem:[%s17215_s3 + $0x40] sm:$0xff]  ;;  %v54_v29 = vld [vmem:[%s17215_s3 + $0x48] sm:$0x1] }
 0x1b2   :  { %11717 = vmatprep.mubr.msk.f32.mxu0 %vm13707_vm11, %v17221_v32  ;;  %11791 = vmatprep.mubr.msk.f32.mxu1 %vm13707_vm11, %v17221_v32  ;;  %v1797_v0 = vsel %vm112_vm3, %v1794_v48, %v1796_v56  ;;  %v2109_v6 = vsel %vm442_vm5, %v2106_v49, %v2108_v60  ;;  %v1798_v7 = vrot.slane %v14396_v62, 1  ;;  %v2110_v9 = vrot.slane %v14396_v62, 2 }
 0x1b3   :  { %v14409_v10 = vsel %vm1745_vm13, %v1733_v51, %v1757_v61  ;;  %v1758_v11 = vmul.f32 0.01, %v1734_v63  ;;  %vm1746_vm15 = vcmp.ge.f32.partialorder %v1734_v63, 0.0  ;;  %v2272_v30 = vrot.slane %v14305_v42, 3 }
 0x1b4   :  { %v1799_v16 = vsel %vm112_vm3, %v1796_v56, %v1798_v7  ;;  %v2111_v17 = vsel %vm442_vm5, %v2108_v60, %v2110_v9  ;;  %v1800_v19 = vrot.slane %v14409_v10, 1  ;;  %v2112_v8 = vrot.slane %v14409_v10, 2 }
 0x1b5   :  { %11718 = vmatmul.mubr.msk.f32.gmra.mrb[20].mxu0 %vm1804_vm14, %v1793_v45  ;;  %11792 = vmatmul.mubr.msk.f32.gmra.mrb[8].mxu1 %vm1804_vm14, %v2105_v46  ;;  %v14421_v13 = vsel %vm1746_vm15, %v1734_v63, %v1758_v11  ;;  %v14467_v43 = vpack.c.bf16 %v54_v29, %v53_v27  ;;  %v14469_v45 = vpack.c.bf16 %v56_v40, %v55_v36  ;;  %v2275_v48 = vrot.slane %v14318_v57, 3  ;;  %v60_v27 = vld [vmem:[%s17215_s3 + $0x78] sm:$0x1] }
 0x1b6   :  { %11720 = vmatprep.mubr.msk.f32.mxu0 %vm13707_vm11, %v17221_v32  ;;  %11794 = vmatprep.mubr.msk.f32.mxu1 %vm13707_vm11, %v17221_v32  ;;  %v1801_v14 = vsel %vm112_vm3, %v1798_v7, %v1800_v19  ;;  %v2113_v21 = vsel %vm442_vm5, %v2110_v9, %v2112_v8  ;;  %v1802_v38 = vrot.slane %v14421_v13, 1  ;;  %v2114_v58 = vrot.slane %v14421_v13, 2 }
 0x1b7   :  { %v2274_v46 = vsel %vm630_vm6, %v2272_v30, %v2273_v34  ;;  %v2276_v49 = vsel %vm630_vm6, %v2273_v34, %v2275_v48  ;;  %v2277_v51 = vrot.slane %v14314_v53, 3  ;;  %v2281_v56 = vrot.slane %v14355_v20, 3 }
 0x1b8   :  { %v1803_v24 = vsel %vm112_vm3, %v1800_v19, %v1802_v38  ;;  %v2115_v25 = vsel %vm442_vm5, %v2112_v8, %v2114_v58  ;;  %v2283_v61 = vrot.slane %v14370_v41, 3  ;;  %v2287_v7 = vrot.slane %v14396_v62, 3  ;;  %v57_v8 = vld [vmem:[%s17215_s3 + $0x60] sm:$0xff] }
 0x1b9   :  { %11721 = vmatmul.mubr.msk.f32.gmra.mrb[22].mxu0 %vm1804_vm14, %v1795_v54  ;;  %11795 = vmatmul.mubr.msk.f32.gmra.mrb[10].mxu1 %vm1804_vm14, %v2107_v55  ;;  %v2278_v52 = vsel %vm630_vm6, %v2275_v48, %v2277_v51  ;;  %v2279_v54 = vrot.slane %v14341_v18, 3  ;;  %v2289_v11 = vrot.slane %v14409_v10, 3  ;;  %v2452_v40 = vrot.slane %v14318_v57, 4 }
 0x1ba   :  { %11723 = vmatprep.mubr.msk.f32.mxu0 %vm13707_vm11, %v17221_v32  ;;  %11797 = vmatprep.mubr.msk.f32.mxu1 %vm13707_vm11, %v17221_v32  ;;  %v2284_v63 = vsel %vm630_vm6, %v2281_v56, %v2283_v61 }
 0x1bb   :  { %v2280_v55 = vsel %vm630_vm6, %v2277_v51, %v2279_v54  ;;  %v2282_v60 = vsel %vm630_vm6, %v2279_v54, %v2281_v56  ;;  %v2454_v51 = vrot.slane %v14314_v53, 4  ;;  %v2456_v56 = vrot.slane %v14341_v18, 4 }
 0x1bd   :  { %11724 = vmatmul.mubr.msk.f32.gmra.mrb[24].mxu0 %vm1804_vm14, %v1797_v0  ;;  %11798 = vmatmul.mubr.msk.f32.gmra.mrb[12].mxu1 %vm1804_vm14, %v2109_v6  ;;  %v2285_v0 = vrot.slane %v14383_v50, 3  ;;  %v2455_v54 = vsel %vm161_vm0, %v2452_v40, %v2454_v51 }
 0x1be   :  { %11726 = vmatprep.mubr.msk.f32.mxu0 %vm13707_vm11, %v17221_v32  ;;  %11800 = vmatprep.mubr.msk.f32.mxu1 %vm13707_vm11, %v17221_v32 }
 0x1bf   :  { %v2286_v6 = vsel %vm630_vm6, %v2283_v61, %v2285_v0  ;;  %v2288_v9 = vsel %vm630_vm6, %v2285_v0, %v2287_v7  ;;  %v2457_v61 = vsel %vm161_vm0, %v2454_v51, %v2456_v56  ;;  %v2458_v0 = vrot.slane %v14355_v20, 4 }
 0x1c1   :  { %11727 = vmatmul.mubr.msk.f32.gmra.mrb[26].mxu0 %vm1804_vm14, %v1799_v16  ;;  %11801 = vmatmul.mubr.msk.f32.gmra.mrb[14].mxu1 %vm1804_vm14, %v2111_v17  ;;  %v2290_v16 = vsel %vm630_vm6, %v2287_v7, %v2289_v11  ;;  %v2291_v17 = vrot.slane %v14421_v13, 3  ;;  %v2459_v7 = vsel %vm161_vm0, %v2456_v56, %v2458_v0  ;;  %v2806_v56 = vrot.slane %v14305_v42, 6 }
 0x1c2   :  { %11729 = vmatprep.mubr.msk.f32.mxu0 %vm13707_vm11, %v17221_v32  ;;  %11803 = vmatprep.mubr.msk.f32.mxu1 %vm13707_vm11, %v17221_v32 }
 0x1c3   :  { %v2292_v19 = vsel %vm630_vm6, %v2289_v11, %v2291_v17  ;;  %v2460_v11 = vrot.slane %v14370_v41, 4 }
 0x1c5   :  { %11730 = vmatmul.mubr.msk.f32.gmra.mrb[28].mxu0 %vm1804_vm14, %v1801_v14  ;;  %11804 = vmatmul.mubr.msk.f32.gmra.mrb[16].mxu1 %vm1804_vm14, %v2113_v21  ;;  %v58_v14 = vld [vmem:[%s17215_s3 + $0x68] sm:$0x1]  ;;  %v59_v21 = vld [vmem:[%s17215_s3 + $0x70] sm:$0xff] }
 0x1c6   :  { %11732 = vmatprep.mubr.msk.f32.mxu0 %vm13707_vm11, %v17221_v32  ;;  %11806 = vmatprep.mubr.msk.f32.mxu1 %vm13707_vm11, %v17221_v32  ;;  %v14591_v29 = vpack.c.bf16 %v58_v14, %v57_v8  ;;  %v14593_v30 = vpack.c.bf16 %v60_v27, %v59_v21  ;;  %v2462_v8 = vrot.slane %v14383_v50, 4  ;;  %v2640_v14 = vrot.slane %v14383_v50, 5 }
 0x1c8   :  { %17231 = vst [vmem:[#allocation2_spill] sm:$0xff] %v14591_v29  ;;  %v2463_v21 = vsel %vm161_vm0, %v2460_v11, %v2462_v8 }
 0x1c9   :  { %11733 = vmatmul.mubr.msk.f32.gmra.mrb[30].mxu0 %vm1804_vm14, %v1803_v24  ;;  %11807 = vmatmul.mubr.msk.f32.gmra.mrb[18].mxu1 %vm1804_vm14, %v2115_v25  ;;  %v2627_v24 = vrot.slane %v14305_v42, 5  ;;  %v2628_v25 = vrot.slane %v14294_v33, 5 }
 0x1ca   :  { %11735 = vmatprep.mubr.msk.f32.mxu0 %vm13707_vm11, %v17221_v32  ;;  %11809 = vmatprep.mubr.msk.f32.mxu1 %vm13707_vm11, %v17221_v32 }
 0x1cb   :  { %v2629_v36 = vsel %vm1006_vm7, %v2627_v24, %v2628_v25  ;;  %v2642_v24 = vrot.slane %v14396_v62, 5 }
 0x1cd   :  { %11736 = vmatmul.mubr.msk.f32.gmra.mrb[32].mxu0 %vm1804_vm14, %v1802_v38  ;;  %11810 = vmatmul.mubr.msk.f32.gmra.mrb[20].mxu1 %vm1804_vm14, %v2114_v58  ;;  %v2449_v38 = vrot.slane %v14305_v42, 4  ;;  %v2450_v58 = vrot.slane %v14294_v33, 4 }
 0x1ce   :  { %11742 = vmatprep.mubr.msk.f32.mxu0 %vm13707_vm11, %v17221_v32  ;;  %11816 = vmatprep.mubr.msk.f32.mxu1 %vm13707_vm11, %v17221_v32 }
 0x1cf   :  { %v2451_v34 = vsel %vm161_vm0, %v2449_v38, %v2450_v58  ;;  %v2453_v48 = vsel %vm161_vm0, %v2450_v58, %v2452_v40  ;;  %v2464_v58 = vrot.slane %v14396_v62, 4  ;;  %v2644_v40 = vrot.slane %v14409_v10, 5 }
 0x1d1   :  { %11743 = vmatmul.mubr.msk.f32.vlgmr.msra.gmra.mrb[34].mxu0 %vm1804_vm14, %v14305_v42  ;;  %11817 = vmatmul.mubr.msk.f32.vlgmr.msra.gmra.mrb[22].mxu1 %vm1804_vm14, %v2274_v46  ;;  %v2630_v46 = vrot.slane %v14318_v57, 5  ;;  %v2465_v27 = vsel %vm161_vm0, %v2462_v8, %v2464_v58 }
 0x1d2   :  { %13056 = vmatpush3.bf16.msk.msra.mxu1 %vm14247_vm10, %v14467_v43  ;;  %11745 = vmatprep.mubr.msk.f32.mxu0 %vm13707_vm11, %v17221_v32 }
 0x1d3   :  { %11819 = vmatprep.mubr.msk.f32.mxu1 %vm13707_vm11, %v17221_v32  ;;  %13060 = vmatpush3.bf16.msk.msra.mxu0 %vm14247_vm10, %v14469_v45 }
 0x1d4   :  { %13061 = vmatprep.subr.bf16.mxu1 %v17223_v23  ;;  %13065 = vmatprep.subr.bf16.mxu0 %v17223_v23 }
 0x1d5   :  { %11746 = vmatmul.mubr.msk.f32.gmra.mrb[36].mxu0 %vm1804_vm14, %v14294_v33  ;;  %11820 = vmatmul.mubr.msk.f32.gmra.mrb[24].mxu1 %vm1804_vm14, %v2276_v49  ;;  %v2631_v49 = vsel %vm1006_vm7, %v2628_v25, %v2630_v46  ;;  %v1735_v25 = vadd.f32 %v14364_v26, %v14284_v37  ;;  %v2645_v26 = vsel %vm1006_vm7, %v2642_v24, %v2644_v40 }
 0x1d6   :  { %11748 = vmatprep.mubr.msk.f32.mxu0 %vm13707_vm11, %v17221_v32  ;;  %11822 = vmatprep.mubr.msk.f32.mxu1 %vm13707_vm11, %v17221_v32 }
 0x1d7   :  { %vm1747_vm1 = vcmp.ge.f32.partialorder %v1735_v25, 0.0 }
 0x1d9   :  { %11749 = vmatmul.mubr.msk.f32.gmra.mrb[38].mxu0 %vm1804_vm14, %v14318_v57  ;;  %11823 = vmatmul.mubr.msk.f32.gmra.mrb[26].mxu1 %vm1804_vm14, %v2278_v52  ;;  %v2632_v52 = vrot.slane %v14314_v53, 5 }
 0x1da   :  { %11751 = vmatprep.mubr.msk.f32.mxu0 %vm13707_vm11, %v17221_v32  ;;  %11825 = vmatprep.mubr.msk.f32.mxu1 %vm13707_vm11, %v17221_v32 }
 0x1dd   :  { %11752 = vmatmul.mubr.msk.f32.gmra.mrb[40].mxu0 %vm1804_vm14, %v14314_v53  ;;  %11826 = vmatmul.mubr.msk.f32.gmra.mrb[28].mxu1 %vm1804_vm14, %v2280_v55  ;;  %v2633_v55 = vsel %vm1006_vm7, %v2630_v46, %v2632_v52  ;;  %v1759_v46 = vmul.f32 0.01, %v1735_v25 }
 0x1de   :  { %11754 = vmatprep.mubr.msk.f32.mxu0 %vm13707_vm11, %v17221_v32  ;;  %11828 = vmatprep.mubr.msk.f32.mxu1 %vm13707_vm11, %v17221_v32 }
 0x1df   :  { %v14688_v51 = vsel %vm1747_vm1, %v1735_v25, %v1759_v46  ;;  %v2992_v25 = vrot.slane %v14341_v18, 7 }
 0x1e1   :  { %11755 = vmatmul.mubr.msk.f32.gmra.mrb[42].mxu0 %vm1804_vm14, %v14341_v18  ;;  %11829 = vmatmul.mubr.msk.f32.gmra.mrb[30].mxu1 %vm1804_vm14, %v2282_v60  ;;  %v2634_v60 = vrot.slane %v14341_v18, 5 }
 0x1e2   :  { %11757 = vmatprep.mubr.msk.f32.mxu0 %vm13707_vm11, %v17221_v32  ;;  %11831 = vmatprep.mubr.msk.f32.mxu1 %vm13707_vm11, %v17221_v32 }
 0x1e5   :  { %11758 = vmatmul.mubr.msk.f32.gmra.mrb[44].mxu0 %vm1804_vm14, %v14355_v20  ;;  %11832 = vmatmul.mubr.msk.f32.gmra.mrb[32].mxu1 %vm1804_vm14, %v2284_v63  ;;  %v2635_v63 = vsel %vm1006_vm7, %v2632_v52, %v2634_v60 }
 0x1e6   :  { %11760 = vmatprep.mubr.msk.f32.mxu0 %vm13707_vm11, %v17221_v32  ;;  %11834 = vmatprep.mubr.msk.f32.mxu1 %vm13707_vm11, %v17221_v32 }
 0x1e9   :  { %11761 = vmatmul.mubr.msk.f32.gmra.mrb[46].mxu0 %vm1804_vm14, %v14370_v41  ;;  %11835 = vmatmul.mubr.msk.f32.gmra.mrb[34].mxu1 %vm1804_vm14, %v2286_v6  ;;  %v2636_v6 = vrot.slane %v14355_v20, 5 }
 0x1ea   :  { %11763 = vmatprep.mubr.msk.f32.mxu0 %vm13707_vm11, %v17221_v32  ;;  %11837 = vmatprep.mubr.msk.f32.mxu1 %vm13707_vm11, %v17221_v32 }
 0x1ed   :  { %11764 = vmatmul.mubr.msk.f32.gmra.mrb[48].mxu0 %vm1804_vm14, %v14383_v50  ;;  %11838 = vmatmul.mubr.msk.f32.gmra.mrb[36].mxu1 %vm1804_vm14, %v2288_v9  ;;  %v2637_v9 = vsel %vm1006_vm7, %v2634_v60, %v2636_v6  ;;  %v61_v60 = vld [vmem:[%s17215_s3 + $0x80] sm:$0xff] }
 0x1ee   :  { %11766 = vmatprep.mubr.msk.f32.mxu0 %vm13707_vm11, %v17221_v32  ;;  %11840 = vmatprep.mubr.msk.f32.mxu1 %vm13707_vm11, %v17221_v32 }
 0x1f1   :  { %11767 = vmatmul.mubr.msk.f32.gmra.mrb[50].mxu0 %vm1804_vm14, %v14396_v62  ;;  %11841 = vmatmul.mubr.msk.f32.gmra.mrb[38].mxu1 %vm1804_vm14, %v2290_v16  ;;  %v2638_v16 = vrot.slane %v14370_v41, 5 }
 0x1f2   :  { %11769 = vmatprep.mubr.msk.f32.mxu0 %vm13707_vm11, %v17221_v32  ;;  %11843 = vmatprep.mubr.msk.f32.mxu1 %vm13707_vm11, %v17221_v32 }
 0x1f3   :  { %v2641_v38 = vsel %vm1006_vm7, %v2638_v16, %v2640_v14 }
 0x1f5   :  { %11770 = vmatmul.mubr.msk.f32.gmra.mrb[52].mxu0 %vm1804_vm14, %v14409_v10  ;;  %11844 = vmatmul.mubr.msk.f32.gmra.mrb[40].mxu1 %vm1804_vm14, %v2292_v19  ;;  %v2639_v19 = vsel %vm1006_vm7, %v2636_v6, %v2638_v16  ;;  %v2985_v6 = vrot.slane %v14305_v42, 7  ;;  %v2809_v42 = vrot.slane %v14318_v57, 6 }
 0x1f6   :  { %11772 = vmatprep.mubr.msk.f32.mxu0 %vm13707_vm11, %v17221_v32  ;;  %11846 = vmatprep.mubr.msk.f32.mxu1 %vm13707_vm11, %v17221_v32 }
 0x1f9   :  { %11773 = vmatmul.mubr.msk.f32.gmra.mrb[54].mxu0 %vm1804_vm14, %v14421_v13  ;;  %11847 = vmatmul.mubr.msk.f32.gmra.mrb[42].mxu1 %vm1804_vm14, %v2291_v17  ;;  %v2461_v17 = vsel %vm161_vm0, %v2458_v0, %v2460_v11  ;;  %v2807_v0 = vrot.slane %v14294_v33, 6 }
 0x1fa   :  { %11853 = vmatprep.mubr.msk.f32.mxu1 %vm13707_vm11, %v17221_v32  ;;  %11890 = vmatprep.mubr.msk.f32.mxu0 %vm13707_vm11, %v17221_v32 }
 0x1fb   :  { %v2808_v11 = vsel %vm1196_vm8, %v2806_v56, %v2807_v0 }
 0x1fd   :  { %11854 = vmatmul.mubr.msk.f32.vlgmr.msra.gmra.mrb[44].mxu1 %vm1804_vm14, %v2451_v34  ;;  %11891 = vmatmul.mubr.msk.f32.vlgmr.msra.gmra.mrb[56].mxu0 %vm1804_vm14, %v2629_v36  ;;  %v2643_v34 = vsel %vm1006_vm7, %v2640_v14, %v2642_v24  ;;  %v2466_v36 = vrot.slane %v14409_v10, 4  ;;  %v2811_v14 = vrot.slane %v14314_v53, 6  ;;  %v2813_v24 = vrot.slane %v14341_v18, 6 }
 0x1fe   :  { %13064 = vmatpush3.bf16.msk.msra.mxu1 %vm14247_vm10, %v14591_v29  ;;  %11856 = vmatprep.mubr.msk.f32.mxu1 %vm13707_vm11, %v17221_v32 }
 0x1ff   :  { %11893 = vmatprep.mubr.msk.f32.mxu0 %vm13707_vm11, %v17221_v32  ;;  %13068 = vmatpush3.bf16.msk.msra.mxu0 %vm14247_vm10, %v14593_v30  ;;  %v2467_v37 = vsel %vm161_vm0, %v2464_v58, %v2466_v36 }
 0x200   :  { %13069 = vmatprep.subr.bf16.mxu1 %v17223_v23 }
 0x201   :  { %11857 = vmatmul.mubr.msk.f32.gmra.mrb[46].mxu1 %vm1804_vm14, %v2453_v48  ;;  %11894 = vmatmul.mubr.msk.f32.gmra.mrb[58].mxu0 %vm1804_vm14, %v2631_v49  ;;  %v2468_v48 = vrot.slane %v14421_v13, 4  ;;  %v2646_v49 = vrot.slane %v14421_v13, 5 }
 0x202   :  { %11859 = vmatprep.mubr.msk.f32.mxu1 %vm13707_vm11, %v17221_v32  ;;  %11896 = vmatprep.mubr.msk.f32.mxu0 %vm13707_vm11, %v17221_v32 }
 0x203   :  { %v2469_v52 = vsel %vm161_vm0, %v2466_v36, %v2468_v48  ;;  %v2815_v36 = vrot.slane %v14355_v20, 6 }
 0x205   :  { %11860 = vmatmul.mubr.msk.f32.gmra.mrb[48].mxu1 %vm1804_vm14, %v2455_v54  ;;  %11897 = vmatmul.mubr.msk.f32.gmra.mrb[60].mxu0 %vm1804_vm14, %v2633_v55  ;;  %v2647_v54 = vsel %vm1006_vm7, %v2644_v40, %v2646_v49  ;;  %v2648_v55 = vrot.slane %v14688_v51, 5  ;;  %v2994_v40 = vrot.slane %v14355_v20, 7  ;;  %v2816_v46 = vsel %vm1196_vm8, %v2813_v24, %v2815_v36 }
 0x206   :  { %11862 = vmatprep.mubr.msk.f32.mxu1 %vm13707_vm11, %v17221_v32  ;;  %11899 = vmatprep.mubr.msk.f32.mxu0 %vm13707_vm11, %v17221_v32 }
 0x209   :  { %11863 = vmatmul.mubr.msk.f32.gmra.mrb[50].mxu1 %vm1804_vm14, %v2457_v61  ;;  %11900 = vmatmul.mubr.msk.f32.gmra.mrb[62].mxu0 %vm1804_vm14, %v2635_v63  ;;  %v62_v61 = vld [vmem:[%s17215_s3 + $0x88] sm:$0x1]  ;;  %v2649_v63 = vsel %vm1006_vm7, %v2646_v49, %v2648_v55  ;;  %v2998_v55 = vrot.slane %v14383_v50, 7 }
 0x20a   :  { %11865 = vmatprep.mubr.msk.f32.mxu1 %vm13707_vm11, %v17221_v32  ;;  %11902 = vmatprep.mubr.msk.f32.mxu0 %vm13707_vm11, %v17221_v32 }
 0x20d   :  { %11866 = vmatmul.mubr.msk.f32.gmra.mrb[52].mxu1 %vm1804_vm14, %v2459_v7  ;;  %11903 = vmatmul.mubr.msk.f32.gmra.mrb[64].mxu0 %vm1804_vm14, %v2637_v9  ;;  %v2986_v7 = vrot.slane %v14294_v33, 7  ;;  %v14722_v9 = vpack.c.bf16 %v62_v61, %v61_v60  ;;  %v2821_v61 = vrot.slane %v14396_v62, 6 }
 0x20e   :  { %11868 = vmatprep.mubr.msk.f32.mxu1 %vm13707_vm11, %v17221_v32  ;;  %11905 = vmatprep.mubr.msk.f32.mxu0 %vm13707_vm11, %v17221_v32 }
 0x20f   :  { %17232 = vst [vmem:[#allocation3_spill] sm:$0xff] %v14722_v9  ;;  %v2987_v16 = vsel %vm1386_vm9, %v2985_v6, %v2986_v7 }
 0x211   :  { %11869 = vmatmul.mubr.msk.f32.gmra.mrb[54].mxu1 %vm1804_vm14, %v2461_v17  ;;  %11906 = vmatmul.mubr.msk.f32.gmra.mrb[66].mxu0 %vm1804_vm14, %v2639_v19  ;;  %v2988_v17 = vrot.slane %v14318_v57, 7  ;;  %v2810_v19 = vsel %vm1196_vm8, %v2807_v0, %v2809_v42 }
 0x212   :  { %11871 = vmatprep.mubr.msk.f32.mxu1 %vm13707_vm11, %v17221_v32  ;;  %11908 = vmatprep.mubr.msk.f32.mxu0 %vm13707_vm11, %v17221_v32 }
 0x213   :  { %v2989_v8 = vsel %vm1386_vm9, %v2986_v7, %v2988_v17  ;;  %v2823_v7 = vrot.slane %v14409_v10, 6 }
 0x215   :  { %11872 = vmatmul.mubr.msk.f32.gmra.mrb[56].mxu1 %vm1804_vm14, %v2463_v21  ;;  %11909 = vmatmul.mubr.msk.f32.gmra.mrb[68].mxu0 %vm1804_vm14, %v2641_v38  ;;  %v2990_v21 = vrot.slane %v14314_v53, 7  ;;  %v2812_v38 = vsel %vm1196_vm8, %v2809_v42, %v2811_v14 }
 0x216   :  { %11874 = vmatprep.mubr.msk.f32.mxu1 %vm13707_vm11, %v17221_v32  ;;  %11911 = vmatprep.mubr.msk.f32.mxu0 %vm13707_vm11, %v17221_v32 }
 0x217   :  { %v2991_v58 = vsel %vm1386_vm9, %v2988_v17, %v2990_v21  ;;  %v2825_v17 = vrot.slane %v14421_v13, 6 }
 0x219   :  { %11875 = vmatmul.mubr.msk.f32.gmra.mrb[58].mxu1 %vm1804_vm14, %v2465_v27  ;;  %11912 = vmatmul.mubr.msk.f32.gmra.mrb[70].mxu0 %vm1804_vm14, %v2643_v34  ;;  %v2814_v27 = vsel %vm1196_vm8, %v2811_v14, %v2813_v24  ;;  %v2993_v34 = vsel %vm1386_vm9, %v2990_v21, %v2992_v25  ;;  %v2827_v21 = vrot.slane %v14688_v51, 6 }
 0x21a   :  { %11877 = vmatprep.mubr.msk.f32.mxu1 %vm13707_vm11, %v17221_v32  ;;  %11914 = vmatprep.mubr.msk.f32.mxu0 %vm13707_vm11, %v17221_v32 }
 0x21d   :  { %11878 = vmatmul.mubr.msk.f32.gmra.mrb[60].mxu1 %vm1804_vm14, %v2467_v37  ;;  %11915 = vmatmul.mubr.msk.f32.gmra.mrb[72].mxu0 %vm1804_vm14, %v2645_v26  ;;  %v2995_v37 = vsel %vm1386_vm9, %v2992_v25, %v2994_v40  ;;  %v2817_v26 = vrot.slane %v14370_v41, 6 }
 0x21e   :  { %11880 = vmatprep.mubr.msk.f32.mxu1 %vm13707_vm11, %v17221_v32  ;;  %11917 = vmatprep.mubr.msk.f32.mxu0 %vm13707_vm11, %v17221_v32 }
 0x21f   :  { %v2818_v49 = vsel %vm1196_vm8, %v2815_v36, %v2817_v26  ;;  %v14914_v36 = vld [vmem:[%s17214_s0 + $0x88] sm:$0xff] }
 0x221   :  { %11881 = vmatmul.mubr.msk.f32.gmra.mrb[62].mxu1 %vm1804_vm14, %v2469_v52  ;;  %11918 = vmatmul.mubr.msk.f32.gmra.mrb[74].mxu0 %vm1804_vm14, %v2647_v54  ;;  %v2819_v54 = vrot.slane %v14383_v50, 6 }
 0x222   :  { %11883 = vmatprep.mubr.msk.f32.mxu1 %vm13707_vm11, %v17221_v32  ;;  %11920 = vmatprep.mubr.msk.f32.mxu0 %vm13707_vm11, %v17221_v32 }
 0x223   :  { %v2820_v56 = vsel %vm1196_vm8, %v2817_v26, %v2819_v54  ;;  %v2822_v0 = vsel %vm1196_vm8, %v2819_v54, %v2821_v61 }
 0x225   :  { %11884 = vmatmul.mubr.msk.f32.gmra.mrb[64].mxu1 %vm1804_vm14, %v2468_v48  ;;  %11921 = vmatmul.mubr.msk.f32.gmra.mrb[76].mxu0 %vm1804_vm14, %v2649_v63  ;;  %v2996_v48 = vrot.slane %v14370_v41, 7  ;;  %v3000_v63 = vrot.slane %v14396_v62, 7 }
 0x226   :  { %11927 = vmatprep.mubr.msk.f32.mxu1 %vm13707_vm11, %v17221_v32  ;;  %11964 = vmatprep.mubr.msk.f32.mxu0 %vm13707_vm11, %v17221_v32 }
 0x227   :  { %v2997_v52 = vsel %vm1386_vm9, %v2994_v40, %v2996_v48  ;;  %v2999_v60 = vsel %vm1386_vm9, %v2996_v48, %v2998_v55  ;;  %v3001_v6 = vsel %vm1386_vm9, %v2998_v55, %v3000_v63  ;;  %v14935_v55 = vld [vmem:[%s17214_s0 + $0x98] sm:$0xff] }
 0x229   :  { %11928 = vmatmul.mubr.msk.f32.vlgmr.msra.gmra.mrb[66].mxu1 %vm1804_vm14, %v2808_v11  ;;  %11965 = vmatmul.mubr.msk.f32.vlgmr.msra.gmra.mrb[78].mxu0 %vm1804_vm14, %v2987_v16  ;;  %v3002_v11 = vrot.slane %v14409_v10, 7  ;;  %v2824_v16 = vsel %vm1196_vm8, %v2821_v61, %v2823_v7 }
 0x22a   :  { %13072 = vmatpush3.bf16.msk.msra.mxu1 %vm14247_vm10, %v14722_v9  ;;  %11930 = vmatprep.mubr.msk.f32.mxu1 %vm13707_vm11, %v17221_v32 }
 0x22b   :  { %11967 = vmatprep.mubr.msk.f32.mxu0 %vm13707_vm11, %v17221_v32  ;;  %13141 = vmatprep.subr.msk.bf16.mxu1 %vm13757_vm2, %v13761_v3  ;;  %v3003_v42 = vsel %vm1386_vm9, %v3000_v63, %v3002_v11 }
 0x22d   :  { %11931 = vmatmul.mubr.msk.f32.gmra.mrb[68].mxu1 %vm1804_vm14, %v2810_v19  ;;  %11968 = vmatmul.mubr.msk.f32.gmra.mrb[80].mxu0 %vm1804_vm14, %v2989_v8  ;;  %v3004_v19 = vrot.slane %v14421_v13, 7  ;;  %v2826_v8 = vsel %vm1196_vm8, %v2823_v7, %v2825_v17 }
 0x22e   :  { %11933 = vmatprep.mubr.msk.f32.mxu1 %vm13707_vm11, %v17221_v32  ;;  %11970 = vmatprep.mubr.msk.f32.mxu0 %vm13707_vm11, %v17221_v32 }
 0x22f   :  { %v3005_v14 = vsel %vm1386_vm9, %v3002_v11, %v3004_v19 }
 0x231   :  { %11934 = vmatmul.mubr.msk.f32.gmra.mrb[70].mxu1 %vm1804_vm14, %v2812_v38  ;;  %11971 = vmatmul.mubr.msk.f32.gmra.mrb[82].mxu0 %vm1804_vm14, %v2991_v58  ;;  %v3006_v38 = vrot.slane %v14688_v51, 7  ;;  %v2828_v58 = vsel %vm1196_vm8, %v2825_v17, %v2827_v21 }
 0x232   :  { %11936 = vmatprep.mubr.msk.f32.mxu1 %vm13707_vm11, %v17221_v32  ;;  %11973 = vmatprep.mubr.msk.f32.mxu0 %vm13707_vm11, %v17221_v32 }
 0x233   :  { %v3007_v24 = vsel %vm1386_vm9, %v3004_v19, %v3006_v38 }
 0x235   :  { %11937 = vmatmul.mubr.msk.f32.gmra.mrb[72].mxu1 %vm1804_vm14, %v2814_v27  ;;  %11974 = vmatmul.mubr.msk.f32.gmra.mrb[84].mxu0 %vm1804_vm14, %v2993_v34 }
 0x236   :  { %11939 = vmatprep.mubr.msk.f32.mxu1 %vm13707_vm11, %v17221_v32  ;;  %11976 = vmatprep.mubr.msk.f32.mxu0 %vm13707_vm11, %v17221_v32 }
 0x239   :  { %11940 = vmatmul.mubr.msk.f32.gmra.mrb[74].mxu1 %vm1804_vm14, %v2816_v46  ;;  %11977 = vmatmul.mubr.msk.f32.gmra.mrb[86].mxu0 %vm1804_vm14, %v2995_v37 }
 0x23a   :  { %11942 = vmatprep.mubr.msk.f32.mxu1 %vm13707_vm11, %v17221_v32  ;;  %11979 = vmatprep.mubr.msk.f32.mxu0 %vm13707_vm11, %v17221_v32 }
 0x23d   :  { %11943 = vmatmul.mubr.msk.f32.gmra.mrb[76].mxu1 %vm1804_vm14, %v2818_v49  ;;  %11980 = vmatmul.mubr.msk.f32.gmra.mrb[88].mxu0 %vm1804_vm14, %v2997_v52  ;;  %v5149_v49 = vrot.slane %v14914_v36, 1 }
 0x23e   :  { %11945 = vmatprep.mubr.msk.f32.mxu1 %vm13707_vm11, %v17221_v32  ;;  %11982 = vmatprep.mubr.msk.f32.mxu0 %vm13707_vm11, %v17221_v32 }
 0x241   :  { %11946 = vmatmul.mubr.msk.f32.gmra.mrb[78].mxu1 %vm1804_vm14, %v2820_v56  ;;  %11983 = vmatmul.mubr.msk.f32.gmra.mrb[90].mxu0 %vm1804_vm14, %v2999_v60 }
 0x242   :  { %11948 = vmatprep.mubr.msk.f32.mxu1 %vm13707_vm11, %v17221_v32  ;;  %11985 = vmatprep.mubr.msk.f32.mxu0 %vm13707_vm11, %v17221_v32 }
 0x245   :  { %11949 = vmatmul.mubr.msk.f32.gmra.mrb[80].mxu1 %vm1804_vm14, %v2822_v0  ;;  %11986 = vmatmul.mubr.msk.f32.gmra.mrb[92].mxu0 %vm1804_vm14, %v3001_v6  ;;  %v5153_v6 = vrot.slane %v14935_v55, 1 }
 0x246   :  { %11951 = vmatprep.mubr.msk.f32.mxu1 %vm13707_vm11, %v17221_v32  ;;  %11988 = vmatprep.mubr.msk.f32.mxu0 %vm13707_vm11, %v17221_v32 }
 0x249   :  { %11952 = vmatmul.mubr.msk.f32.gmra.mrb[82].mxu1 %vm1804_vm14, %v2824_v16  ;;  %11989 = vmatmul.mubr.msk.f32.gmra.mrb[94].mxu0 %vm1804_vm14, %v3003_v42  ;;  %v14958_v16 = vld [vmem:[%s17214_s0 + $0xa8] sm:$0xff] }
 0x24a   :  { %11954 = vmatprep.mubr.msk.f32.mxu1 %vm13707_vm11, %v17221_v32  ;;  %11991 = vmatprep.mubr.msk.f32.mxu0 %vm13707_vm11, %v17221_v32  ;;  %v5157_v21 = vrot.slane %v14958_v16, 1 }
 0x24d   :  { %11955 = vmatmul.mubr.msk.f32.gmra.mrb[84].mxu1 %vm1804_vm14, %v2826_v8  ;;  %11992 = vmatmul.mubr.msk.f32.gmra.mrb[96].mxu0 %vm1804_vm14, %v3005_v14 }
 0x24e   :  { %11957 = vmatprep.mubr.msk.f32.mxu1 %vm13707_vm11, %v17221_v32  ;;  %11994 = vmatprep.mubr.msk.f32.mxu0 %vm13707_vm11, %v17221_v32 }
 0x251   :  { %11958 = vmatmul.mubr.msk.f32.gmra.mrb[86].mxu1 %vm1804_vm14, %v2828_v58  ;;  %11995 = vmatmul.mubr.msk.f32.gmra.mrb[98].mxu0 %vm1804_vm14, %v3007_v24  ;;  %v14981_v24 = vld [vmem:[%s17214_s0 + $0xb8] sm:$0xff] }
 0x252   :  { %12001 = vmatprep.mubr.msk.f32.mxu1 %vm13707_vm11, %v17221_v32 }
 0x255   :  { %12002 = vmatmul.mubr.msk.f32.vlgmr.msra.gmra.mrb[88].mxu1 %vm1804_vm14, %v14294_v33  ;;  %v14882_v33 = vld [vmem:[%s17214_s0 + $0x70] sm:$0xff] }
 0x256   :  { %12004 = vmatprep.mubr.msk.f32.mxu1 %vm13707_vm11, %v17221_v32  ;;  %13144 = vmatpush3.bf16.msk.msra.mxu1 %vm13757_vm2, %v13761_v3  ;;  %v14877_v3 = vld [vmem:[%s17214_s0 + $0x68] sm:$0xff] }
 0x257   :  { %13147 = vmatprep.subr.msk.bf16.mxu1 %vm13757_vm2, %v13790_v12 }
 0x259   :  { %12005 = vmatmul.mubr.msk.f32.gmra.mrb[90].mxu1 %vm1804_vm14, %v14318_v57  ;;  %v5143_v57 = vrot.slane %v14882_v33, 1 }
 0x25a   :  { %12007 = vmatprep.mubr.msk.f32.mxu1 %vm13707_vm11, %v17221_v32 }
 0x25d   :  { %12008 = vmatmul.mubr.msk.f32.gmra.mrb[92].mxu1 %vm1804_vm14, %v14314_v53  ;;  %v5142_v53 = vrot.slane %v14877_v3, 1 }
 0x25e   :  { %12010 = vmatprep.mubr.msk.f32.mxu1 %vm13707_vm11, %v17221_v32 }
 0x25f   :  { %v5144_v27 = vsel %vm112_vm3, %v5142_v53, %v5143_v57 }
 0x261   :  { %12011 = vmatmul.mubr.msk.f32.gmra.mrb[94].mxu1 %vm1804_vm14, %v14341_v18  ;;  %v14893_v18 = vld [vmem:[%s17214_s0 + $0x78] sm:$0xff] }
 0x262   :  { %12013 = vmatprep.mubr.msk.f32.mxu1 %vm13707_vm11, %v17221_v32  ;;  %v5145_v25 = vrot.slane %v14893_v18, 1 }
 0x264   :  { %v5146_v48 = vsel %vm112_vm3, %v5143_v57, %v5145_v25 }
 0x265   :  { %12014 = vmatmul.mubr.msk.f32.gmra.mrb[96].mxu1 %vm1804_vm14, %v14355_v20 }
 0x266   :  { %12016 = vmatprep.mubr.msk.f32.mxu1 %vm13707_vm11, %v17221_v32 }
 0x269   :  { %12017 = vmatmul.mubr.msk.f32.gmra.mrb[98].mxu1 %vm1804_vm14, %v14370_v41 }
 0x26a   :  { %12019 = vmatprep.mubr.msk.f32.mxu1 %vm13707_vm11, %v17221_v32 }
 0x26d   :  { %12020 = vmatmul.mubr.msk.f32.gmra.mrb[100].mxu1 %vm1804_vm14, %v14383_v50  ;;  %v14902_v50 = vld [vmem:[%s17214_s0 + $0x80] sm:$0xff] }
 0x26e   :  { %12022 = vmatprep.mubr.msk.f32.mxu1 %vm13707_vm11, %v17221_v32  ;;  %v5147_v34 = vrot.slane %v14902_v50, 1  ;;  %v5468_v23 = vrot.slane %v14902_v50, 2 }
 0x270   :  { %v5148_v52 = vsel %vm112_vm3, %v5145_v25, %v5147_v34  ;;  %v5150_v0 = vsel %vm112_vm3, %v5147_v34, %v5149_v49  ;;  %v5161_v34 = vrot.slane %v14981_v24, 1 }
 0x271   :  { %12023 = vmatmul.mubr.msk.f32.gmra.mrb[102].mxu1 %vm1804_vm14, %v14396_v62 }
 0x272   :  { %12025 = vmatprep.mubr.msk.f32.mxu1 %vm13707_vm11, %v17221_v32 }
 0x275   :  { %12026 = vmatmul.mubr.msk.f32.gmra.mrb[104].mxu1 %vm1804_vm14, %v14409_v10 }
 0x276   :  { %12028 = vmatprep.mubr.msk.f32.mxu1 %vm13707_vm11, %v17221_v32 }
 0x278   :  { %v14895_v20 = vpop.f32.mrb[12].mxu0  ;;  %v14897_v41 = vpop.f32.mrb[0].mxu1 }
 0x279   :  { %v11707_v62 = vpop.f32.mrb[13].mxu0  ;;  %v11781_v10 = vpop.f32.mrb[1].mxu1  ;;  %12029 = vmatmul.mubr.msk.f32.gmra.mrb[106].mxu1 %vm1804_vm14, %v14421_v13  ;;  %v14923_v13 = vld [vmem:[%s17214_s0 + $0x90] sm:$0xff] }
 0x27a   :  { %12031 = vmatprep.mubr.msk.f32.mxu1 %vm13707_vm11, %v17221_v32  ;;  %v5151_v54 = vrot.slane %v14923_v13, 1  ;;  %v14990_v62 = vld [vmem:[%s17214_s0 + $0xc0] sm:$0xff] }
 0x27c   :  { %v14916_v40 = vpop.f32.mrb[14].mxu0  ;;  %v14918_v46 = vpop.f32.mrb[2].mxu1  ;;  %v5152_v7 = vsel %vm112_vm3, %v5149_v49, %v5151_v54  ;;  %v5154_v14 = vsel %vm112_vm3, %v5151_v54, %v5153_v6 }
 0x27d   :  { %v11710_v37 = vpop.f32.mrb[15].mxu0  ;;  %v11784_v26 = vpop.f32.mrb[3].mxu1  ;;  %12032 = vmatmul.mubr.msk.f32.gmra.mrb[108].mxu1 %vm1804_vm14, %v14688_v51  ;;  %v14944_v51 = vld [vmem:[%s17214_s0 + $0xa0] sm:$0xff] }
 0x27e   :  { %12247 = vmatprep.mubr.msk.f32.mxu1 %vm136_vm4, %v5144_v27  ;;  %v5155_v11 = vrot.slane %v14944_v51, 1  ;;  %v5163_v26 = vrot.slane %v14990_v62, 1 }
 0x280   :  { %v14937_v56 = vpop.f32.mrb[16].mxu0  ;;  %v14939_v60 = vpop.f32.mrb[4].mxu1  ;;  %v5156_v38 = vsel %vm112_vm3, %v5153_v6, %v5155_v11  ;;  %v5158_v27 = vsel %vm112_vm3, %v5155_v11, %v5157_v21 }
 0x281   :  { %v11713_v61 = vpop.f32.mrb[17].mxu0  ;;  %v11787_v63 = vpop.f32.mrb[5].mxu1  ;;  %12248 = vmatmul.mubr.msk.f32.vlgmr.msra.gmra.mrb[110].mxu1 %vm136_vm4, %v5146_v48 }
 0x282   :  { %12250 = vmatprep.mubr.msk.f32.mxu1 %vm136_vm4, %v5148_v52  ;;  %13150 = vmatpush3.bf16.msk.msra.mxu1 %vm13757_vm2, %v13790_v12  ;;  %v14970_v12 = vld [vmem:[%s17214_s0 + $0xb0] sm:$0xff]  ;;  %v5164_v63 = vsel %vm112_vm3, %v5161_v34, %v5163_v26 }
 0x283   :  { %13153 = vmatprep.subr.msk.bf16.mxu1 %vm13757_vm2, %v13843_v28  ;;  %v5159_v58 = vrot.slane %v14970_v12, 1 }
 0x284   :  { %v14963_v42 = vpop.f32.mrb[18].mxu0  ;;  %v14965_v17 = vpop.f32.mrb[6].mxu1 }
 0x285   :  { %v11716_v19 = vpop.f32.mrb[19].mxu0  ;;  %v11790_v8 = vpop.f32.mrb[7].mxu1  ;;  %12251 = vmatmul.mubr.msk.f32.gmra.mrb[112].mxu1 %vm136_vm4, %v5150_v0  ;;  %v5160_v37 = vsel %vm112_vm3, %v5157_v21, %v5159_v58  ;;  %v5162_v61 = vsel %vm112_vm3, %v5159_v58, %v5161_v34 }
 0x286   :  { %12253 = vmatprep.mubr.msk.f32.mxu1 %vm136_vm4, %v5152_v7 }
 0x288   :  { %v14983_v53 = vpop.f32.mrb[20].mxu0  ;;  %v14985_v57 = vpop.f32.mrb[8].mxu1 }
 0x289   :  { %v11719_v10 = vpop.f32.mrb[21].mxu0  ;;  %v11793_v25 = vpop.f32.mrb[9].mxu1  ;;  %12254 = vmatmul.mubr.msk.f32.gmra.mrb[114].mxu1 %vm136_vm4, %v5154_v14 }
 0x28a   :  { %12256 = vmatprep.mubr.msk.f32.mxu1 %vm136_vm4, %v5156_v38 }
 0x28c   :  { %v14998_v48 = vpop.f32.mrb[22].mxu0  ;;  %v15000_v49 = vpop.f32.mrb[10].mxu1 }
 0x28d   :  { %v11722_v52 = vpop.f32.mrb[23].mxu0  ;;  %v11796_v54 = vpop.f32.mrb[11].mxu1  ;;  %12257 = vmatmul.mubr.msk.f32.gmra.mrb[116].mxu1 %vm136_vm4, %v5158_v27 }
 0x28e   :  { %12259 = vmatprep.mubr.msk.f32.mxu1 %vm136_vm4, %v5160_v37 }
 0x290   :  { %v15006_v0 = vpop.f32.mrb[24].mxu0  ;;  %v15008_v6 = vpop.f32.mrb[12].mxu1 }
 0x291   :  { %v11725_v7 = vpop.f32.mrb[25].mxu0  ;;  %v11799_v11 = vpop.f32.mrb[13].mxu1  ;;  %12260 = vmatmul.mubr.msk.f32.gmra.mrb[118].mxu1 %vm136_vm4, %v5162_v61  ;;  %v67_v61 = vld [vmem:[%s17217_s5 + $0x18] sm:$0x1] }
 0x292   :  { %12262 = vmatprep.mubr.msk.f32.mxu1 %vm136_vm4, %v5164_v63 }
 0x294   :  { %v15012_v19 = vpop.f32.mrb[26].mxu0  ;;  %v15014_v8 = vpop.f32.mrb[14].mxu1 }
 0x295   :  { %v11728_v14 = vpop.f32.mrb[27].mxu0  ;;  %v11802_v21 = vpop.f32.mrb[15].mxu1  ;;  %12263 = vmatmul.mubr.msk.f32.gmra.mrb[120].mxu1 %vm136_vm4, %v5163_v26 }
 0x296   :  { %12269 = vmatprep.mubr.msk.f32.mxu1 %vm136_vm4, %v14877_v3 }
 0x298   :  { %v15019_v38 = vpop.f32.mrb[28].mxu0  ;;  %v15021_v58 = vpop.f32.mrb[16].mxu1 }
 0x299   :  { %v11731_v10 = vpop.f32.mrb[29].mxu0  ;;  %v11805_v25 = vpop.f32.mrb[17].mxu1  ;;  %12270 = vmatmul.mubr.msk.f32.vlgmr.msra.gmra.mrb[110].mxu1 %vm136_vm4, %v14882_v33 }
 0x29a   :  { %12272 = vmatprep.mubr.msk.f32.mxu1 %vm136_vm4, %v14893_v18  ;;  %13156 = vmatpush3.bf16.msk.msra.mxu1 %vm13757_vm2, %v13843_v28  ;;  %v66_v28 = vld [vmem:[%s17217_s5 + $0x10] sm:$0xff] }
 0x29b   :  { %13159 = vmatprep.subr.msk.bf16.mxu1 %vm13757_vm2, %v13897_v47  ;;  %v15053_v11 = vpack.c.bf16 %v67_v61, %v66_v28  ;;  %v5463_v28 = vrot.slane %v14877_v3, 2  ;;  %v5464_v61 = vrot.slane %v14882_v33, 2 }
 0x29c   :  { %v15033_v27 = vpop.f32.mrb[30].mxu0  ;;  %v15035_v34 = vpop.f32.mrb[18].mxu1 }
 0x29d   :  { %v11734_v37 = vpop.f32.mrb[31].mxu0  ;;  %v11808_v26 = vpop.f32.mrb[19].mxu1  ;;  %12273 = vmatmul.mubr.msk.f32.gmra.mrb[112].mxu1 %vm136_vm4, %v14902_v50  ;;  %13075 = vmatprep.subr.msk.bf16.mxu0 %vm14247_vm10, %v15053_v11 }
 0x29e   :  { %12275 = vmatprep.mubr.msk.f32.mxu1 %vm136_vm4, %v14914_v36  ;;  %13078 = vmatpush3.bf16.msk.msra.mxu0 %vm14247_vm10, %v15053_v11 }
 0x2a0   :  { %v15041_v52 = vpop.f32.mrb[32].mxu0  ;;  %v15043_v54 = vpop.f32.mrb[20].mxu1 }
 0x2a1   :  { %v11737_v63 = vpop.f32.mrb[33].mxu0  ;;  %v11811_v7 = vpop.f32.mrb[21].mxu1  ;;  %12276 = vmatmul.mubr.msk.f32.gmra.mrb[114].mxu1 %vm136_vm4, %v14923_v13 }
 0x2a2   :  { %12278 = vmatprep.mubr.msk.f32.mxu1 %vm136_vm4, %v14935_v55 }
 0x2a4   :  { %v2041_v14 = vpop.f32.mrb[34].mxu0  ;;  %v2384_v21 = vpop.f32.mrb[22].mxu1 }
 0x2a5   :  { %v2042_v10 = vadd.f32 %v2041_v14, %v14895_v20  ;;  %v11744_v25 = vpop.f32.mrb[35].mxu0  ;;  %v11818_v37 = vpop.f32.mrb[23].mxu1  ;;  %12279 = vmatmul.mubr.msk.f32.gmra.mrb[116].mxu1 %vm136_vm4, %v14944_v51 }
 0x2a6   :  { %12281 = vmatprep.mubr.msk.f32.mxu1 %vm136_vm4, %v14958_v16  ;;  %v5465_v37 = vsel %vm442_vm5, %v5463_v28, %v5464_v61 }
 0x2a7   :  { %v2261_v26 = vadd.f32 %v14897_v41, %v2042_v10  ;;  %v5466_v41 = vrot.slane %v14893_v18, 2 }
 0x2a8   :  { %v2046_v63 = vpop.f32.mrb[36].mxu0  ;;  %v2389_v7 = vpop.f32.mrb[24].mxu1 }
 0x2a9   :  { %v15071_v32 = vadd.f32 %v2384_v21, %v2261_v26  ;;  %v2047_v20 = vadd.f32 %v2046_v63, %v14916_v40  ;;  %v11747_v14 = vpop.f32.mrb[37].mxu0  ;;  %v11821_v25 = vpop.f32.mrb[25].mxu1  ;;  %12282 = vmatmul.mubr.msk.f32.gmra.mrb[118].mxu1 %vm136_vm4, %v14970_v12 }
 0x2aa   :  { %12284 = vmatprep.mubr.msk.f32.mxu1 %vm136_vm4, %v14981_v24  ;;  %v5467_v25 = vsel %vm442_vm5, %v5464_v61, %v5466_v41 }
 0x2ab   :  { %v2262_v10 = vadd.f32 %v14918_v46, %v2047_v20  ;;  %v5470_v46 = vrot.slane %v14914_v36, 2  ;;  %v5469_v20 = vsel %vm442_vm5, %v5466_v41, %v5468_v23 }
 0x2ac   :  { %v2051_v21 = vpop.f32.mrb[38].mxu0  ;;  %v2394_v26 = vpop.f32.mrb[26].mxu1 }
 0x2ad   :  { %v15082_v9 = vadd.f32 %v2389_v7, %v2262_v10  ;;  %v2052_v40 = vadd.f32 %v2051_v21, %v14937_v56  ;;  %v11750_v63 = vpop.f32.mrb[39].mxu0  ;;  %v11824_v14 = vpop.f32.mrb[27].mxu1  ;;  %12285 = vmatmul.mubr.msk.f32.gmra.mrb[120].mxu1 %vm136_vm4, %v14990_v62  ;;  %v5472_v7 = vrot.slane %v14923_v13, 2  ;;  %v5471_v61 = vsel %vm442_vm5, %v5468_v23, %v5470_v46 }
 0x2ae   :  { %12291 = vmatprep.mubr.msk.f32.mxu1 %vm136_vm4, %v5465_v37 }
 0x2af   :  { %v2263_v28 = vadd.f32 %v14939_v60, %v2052_v40  ;;  %v5474_v60 = vrot.slane %v14935_v55, 2  ;;  %v5473_v37 = vsel %vm442_vm5, %v5470_v46, %v5472_v7  ;;  %v5478_v46 = vrot.slane %v14958_v16, 2 }
 0x2b0   :  { %v2056_v10 = vpop.f32.mrb[40].mxu0  ;;  %v2399_v29 = vpop.f32.mrb[28].mxu1 }
 0x2b1   :  { %v15093_v56 = vadd.f32 %v2394_v26, %v2263_v28  ;;  %v2057_v21 = vadd.f32 %v2056_v10, %v14963_v42  ;;  %v11753_v63 = vpop.f32.mrb[41].mxu0  ;;  %v11827_v14 = vpop.f32.mrb[29].mxu1  ;;  %12292 = vmatmul.mubr.msk.f32.vlgmr.msra.gmra.mrb[110].mxu1 %vm136_vm4, %v5467_v25  ;;  %v5476_v42 = vrot.slane %v14944_v51, 2 }
 0x2b2   :  { %12294 = vmatprep.mubr.msk.f32.mxu1 %vm136_vm4, %v5469_v20  ;;  %13162 = vmatpush3.bf16.msk.msra.mxu1 %vm13757_vm2, %v13897_v47 }
 0x2b3   :  { %v2264_v41 = vadd.f32 %v14965_v17, %v2057_v21  ;;  %13165 = vmatprep.subr.msk.bf16.mxu1 %vm13757_vm2, %v13943_v59  ;;  %v5475_v17 = vsel %vm442_vm5, %v5472_v7, %v5474_v60  ;;  %v5477_v10 = vsel %vm442_vm5, %v5474_v60, %v5476_v42  ;;  %v5480_v21 = vrot.slane %v14970_v12, 2 }
 0x2b4   :  { %v2061_v26 = vpop.f32.mrb[42].mxu0  ;;  %v2404_v40 = vpop.f32.mrb[30].mxu1  ;;  %v5479_v7 = vsel %vm442_vm5, %v5476_v42, %v5478_v46 }
 0x2b5   :  { %v15109_v25 = vadd.f32 %v2399_v29, %v2264_v41  ;;  %v2062_v23 = vadd.f32 %v2061_v26, %v14983_v53  ;;  %v11756_v28 = vpop.f32.mrb[43].mxu0  ;;  %v11830_v47 = vpop.f32.mrb[31].mxu1  ;;  %12295 = vmatmul.mubr.msk.f32.gmra.mrb[112].mxu1 %vm136_vm4, %v5471_v61  ;;  %v5484_v26 = vrot.slane %v14990_v62, 2 }
 0x2b6   :  { %12297 = vmatprep.mubr.msk.f32.mxu1 %vm136_vm4, %v5473_v37  ;;  %v5481_v37 = vsel %vm442_vm5, %v5478_v46, %v5480_v21 }
 0x2b7   :  { %v2265_v20 = vadd.f32 %v14985_v57, %v2062_v23  ;;  %v5482_v57 = vrot.slane %v14981_v24, 2 }
 0x2b8   :  { %v2066_v29 = vpop.f32.mrb[44].mxu0  ;;  %v2409_v63 = vpop.f32.mrb[32].mxu1 }
 0x2b9   :  { %v15119_v14 = vadd.f32 %v2404_v40, %v2265_v20  ;;  %v2067_v53 = vadd.f32 %v2066_v29, %v14998_v48  ;;  %v11759_v41 = vpop.f32.mrb[45].mxu0  ;;  %v11833_v61 = vpop.f32.mrb[33].mxu1  ;;  %12298 = vmatmul.mubr.msk.f32.gmra.mrb[114].mxu1 %vm136_vm4, %v5475_v17  ;;  %v5483_v42 = vsel %vm442_vm5, %v5480_v21, %v5482_v57  ;;  %v5485_v46 = vsel %vm442_vm5, %v5482_v57, %v5484_v26 }
 0x2ba   :  { %12300 = vmatprep.mubr.msk.f32.mxu1 %vm136_vm4, %v5477_v10  ;;  %v5647_v20 = vrot.slane %v14877_v3, 3  ;;  %v5648_v10 = vrot.slane %v14882_v33, 3  ;;  %v5652_v57 = vrot.slane %v14902_v50, 3 }
 0x2bb   :  { %v2266_v60 = vadd.f32 %v15000_v49, %v2067_v53 }
 0x2bc   :  { %v2071_v40 = vpop.f32.mrb[46].mxu0  ;;  %v2414_v23 = vpop.f32.mrb[34].mxu1 }
 0x2bd   :  { %v15129_v28 = vadd.f32 %v2409_v63, %v2266_v60  ;;  %v2072_v48 = vadd.f32 %v2071_v40, %v15006_v0  ;;  %v11762_v47 = vpop.f32.mrb[47].mxu0  ;;  %v11836_v17 = vpop.f32.mrb[35].mxu1  ;;  %12301 = vmatmul.mubr.msk.f32.gmra.mrb[116].mxu1 %vm136_vm4, %v5479_v7  ;;  %v5649_v7 = vsel %vm630_vm6, %v5647_v20, %v5648_v10 }
 0x2be   :  { %12303 = vmatprep.mubr.msk.f32.mxu1 %vm136_vm4, %v5481_v37 }
 0x2bf   :  { %v2267_v49 = vadd.f32 %v15008_v6, %v2072_v48  ;;  %v5650_v6 = vrot.slane %v14893_v18, 3 }
 0x2c0   :  { %v2076_v29 = vpop.f32.mrb[48].mxu0  ;;  %v2419_v63 = vpop.f32.mrb[36].mxu1 }
 0x2c1   :  { %v15139_v53 = vadd.f32 %v2414_v23, %v2267_v49  ;;  %v2077_v0 = vadd.f32 %v2076_v29, %v15012_v19  ;;  %v11765_v41 = vpop.f32.mrb[49].mxu0  ;;  %v11839_v61 = vpop.f32.mrb[37].mxu1  ;;  %12304 = vmatmul.mubr.msk.f32.gmra.mrb[118].mxu1 %vm136_vm4, %v5483_v42  ;;  %v5651_v47 = vsel %vm630_vm6, %v5648_v10, %v5650_v6  ;;  %v5653_v42 = vsel %vm630_vm6, %v5650_v6, %v5652_v57 }
 0x2c2   :  { %12306 = vmatprep.mubr.msk.f32.mxu1 %vm136_vm4, %v5485_v46  ;;  %v5656_v49 = vrot.slane %v14923_v13, 3 }
 0x2c3   :  { %v2268_v21 = vadd.f32 %v15014_v8, %v2077_v0  ;;  %v5654_v8 = vrot.slane %v14914_v36, 3 }
 0x2c4   :  { %v2081_v60 = vpop.f32.mrb[50].mxu0  ;;  %v2424_v37 = vpop.f32.mrb[38].mxu1 }
 0x2c5   :  { %v15148_v40 = vadd.f32 %v2419_v63, %v2268_v21  ;;  %v2082_v19 = vadd.f32 %v2081_v60, %v15019_v38  ;;  %v11768_v23 = vpop.f32.mrb[51].mxu0  ;;  %v11842_v48 = vpop.f32.mrb[39].mxu1  ;;  %12307 = vmatmul.mubr.msk.f32.gmra.mrb[120].mxu1 %vm136_vm4, %v5484_v26  ;;  %v5655_v10 = vsel %vm630_vm6, %v5652_v57, %v5654_v8  ;;  %v5657_v41 = vsel %vm630_vm6, %v5654_v8, %v5656_v49 }
 0x2c6   :  { %12313 = vmatprep.mubr.msk.f32.mxu1 %vm136_vm4, %v5649_v7  ;;  %v5662_v60 = vrot.slane %v14958_v16, 3  ;;  %v5664_v23 = vrot.slane %v14970_v12, 3  ;;  %v65_v48 = vld [vmem:[%s17217_s5 + $0x8] sm:$0x1] }
 0x2c7   :  { %v2269_v17 = vadd.f32 %v15021_v58, %v2082_v19  ;;  %v5658_v58 = vrot.slane %v14935_v55, 3 }
 0x2c8   :  { %v2086_v46 = vpop.f32.mrb[52].mxu0  ;;  %v2429_v20 = vpop.f32.mrb[40].mxu1 }
 0x2c9   :  { %v15158_v29 = vadd.f32 %v2424_v37, %v2269_v17  ;;  %v2087_v38 = vadd.f32 %v2086_v46, %v15033_v27  ;;  %v11771_v63 = vpop.f32.mrb[53].mxu0  ;;  %v11845_v26 = vpop.f32.mrb[41].mxu1  ;;  %12314 = vmatmul.mubr.msk.f32.vlgmr.msra.gmra.mrb[110].mxu1 %vm136_vm4, %v5651_v47  ;;  %v5660_v27 = vrot.slane %v14944_v51, 3 }
 0x2ca   :  { %12316 = vmatprep.mubr.msk.f32.mxu1 %vm136_vm4, %v5653_v42  ;;  %13168 = vmatpush3.bf16.msk.msra.mxu1 %vm13757_vm2, %v13943_v59  ;;  %v5665_v26 = vsel %vm630_vm6, %v5662_v60, %v5664_v23 }
 0x2cb   :  { %v2270_v0 = vadd.f32 %v15035_v34, %v2087_v38  ;;  %13171 = vmatprep.subr.msk.bf16.mxu1 %vm13757_vm2, %v13992_v35  ;;  %v5659_v34 = vsel %vm630_vm6, %v5656_v49, %v5658_v58  ;;  %v5661_v19 = vsel %vm630_vm6, %v5658_v58, %v5660_v27  ;;  %v5666_v38 = vrot.slane %v14981_v24, 3 }
 0x2cc   :  { %v2091_v61 = vpop.f32.mrb[54].mxu0  ;;  %v2434_v6 = vpop.f32.mrb[42].mxu1 }
 0x2cd   :  { %v15174_v21 = vadd.f32 %v2429_v20, %v2270_v0  ;;  %v2092_v7 = vadd.f32 %v2091_v61, %v15041_v52  ;;  %v11774_v57 = vpop.f32.mrb[55].mxu0  ;;  %v11848_v59 = vpop.f32.mrb[43].mxu1  ;;  %12317 = vmatmul.mubr.msk.f32.gmra.mrb[112].mxu1 %vm136_vm4, %v5655_v10  ;;  %v64_v52 = vld [vmem:[%s17217_s5] sm:$0xff]  ;;  %v5663_v20 = vsel %vm630_vm6, %v5660_v27, %v5662_v60  ;;  %v5667_v27 = vsel %vm630_vm6, %v5664_v23, %v5666_v38 }
 0x2ce   :  { %12319 = vmatprep.mubr.msk.f32.mxu1 %vm136_vm4, %v5657_v41  ;;  %v15190_v17 = vpack.c.bf16 %v65_v48, %v64_v52  ;;  %v5831_v57 = vrot.slane %v14877_v3, 4  ;;  %v5832_v59 = vrot.slane %v14882_v33, 4  ;;  %v5834_v23 = vrot.slane %v14893_v18, 4 }
 0x2cf   :  { %v2271_v37 = vadd.f32 %v15043_v54, %v2092_v7 }
 0x2d0   :  { %v2561_v47 = vpop.f32.mrb[44].mxu1  ;;  %v2741_v8 = vpop.f32.mrb[56].mxu0  ;;  %13081 = vmatprep.subr.msk.bf16.mxu0 %vm14247_vm10, %v15190_v17  ;;  %v5833_v48 = vsel %vm161_vm0, %v5831_v57, %v5832_v59 }
 0x2d1   :  { %v15192_v42 = vadd.f32 %v2434_v6, %v2271_v37  ;;  %v2615_v54 = vadd.f32 %v2561_v47, %v15071_v32  ;;  %v11855_v49 = vpop.f32.mrb[45].mxu1  ;;  %v11892_v46 = vpop.f32.mrb[57].mxu0  ;;  %12320 = vmatmul.mubr.msk.f32.gmra.mrb[114].mxu1 %vm136_vm4, %v5659_v34  ;;  %v5668_v32 = vrot.slane %v14990_v62, 3  ;;  %v5836_v47 = vrot.slane %v14902_v50, 4 }
 0x2d2   :  { %12322 = vmatprep.mubr.msk.f32.mxu1 %vm136_vm4, %v5661_v19 }
 0x2d3   :  { %v15202_v63 = vadd.f32 %v2741_v8, %v2615_v54  ;;  %v5669_v7 = vsel %vm630_vm6, %v5666_v38, %v5668_v32  ;;  %v5838_v38 = vrot.slane %v14914_v36, 4 }
 0x2d4   :  { %v2566_v10 = vpop.f32.mrb[46].mxu1  ;;  %v2746_v58 = vpop.f32.mrb[58].mxu0 }
 0x2d5   :  { %v2616_v0 = vadd.f32 %v2566_v10, %v15082_v9  ;;  %v11858_v41 = vpop.f32.mrb[47].mxu1  ;;  %v11895_v61 = vpop.f32.mrb[59].mxu0  ;;  %12323 = vmatmul.mubr.msk.f32.gmra.mrb[116].mxu1 %vm136_vm4, %v5663_v20  ;;  %v5835_v20 = vsel %vm161_vm0, %v5832_v59, %v5834_v23  ;;  %v5837_v10 = vsel %vm161_vm0, %v5834_v23, %v5836_v47  ;;  %v5846_v23 = vrot.slane %v14958_v16, 4 }
 0x2d6   :  { %12325 = vmatprep.mubr.msk.f32.mxu1 %vm136_vm4, %v5665_v26 }
 0x2d7   :  { %v15210_v6 = vadd.f32 %v2746_v58, %v2616_v0  ;;  %v5840_v58 = vrot.slane %v14923_v13, 4 }
 0x2d8   :  { %v2571_v34 = vpop.f32.mrb[48].mxu1  ;;  %v2751_v60 = vpop.f32.mrb[60].mxu0 }
 0x2d9   :  { %v2617_v9 = vadd.f32 %v2571_v34, %v15093_v56  ;;  %v11861_v37 = vpop.f32.mrb[49].mxu1  ;;  %v11898_v19 = vpop.f32.mrb[61].mxu0  ;;  %12326 = vmatmul.mubr.msk.f32.gmra.mrb[118].mxu1 %vm136_vm4, %v5667_v27  ;;  %v5841_v59 = vsel %vm161_vm0, %v5838_v38, %v5840_v58 }
 0x2da   :  { %12328 = vmatprep.mubr.msk.f32.mxu1 %vm136_vm4, %v5669_v7  ;;  %v5842_v7 = vrot.slane %v14935_v55, 4 }
 0x2db   :  { %v15219_v52 = vadd.f32 %v2751_v60, %v2617_v9 }
 0x2dc   :  { %v2576_v8 = vpop.f32.mrb[50].mxu1  ;;  %v2756_v54 = vpop.f32.mrb[62].mxu0 }
 0x2dd   :  { %v2618_v49 = vadd.f32 %v2576_v8, %v15109_v25  ;;  %v11864_v46 = vpop.f32.mrb[51].mxu1  ;;  %v11901_v56 = vpop.f32.mrb[63].mxu0  ;;  %12329 = vmatmul.mubr.msk.f32.gmra.mrb[120].mxu1 %vm136_vm4, %v5668_v32  ;;  %v5839_v32 = vsel %vm161_vm0, %v5836_v47, %v5838_v38  ;;  %v5848_v8 = vrot.slane %v14970_v12, 4  ;;  %v5850_v38 = vrot.slane %v14981_v24, 4 }
 0x2de   :  { %12335 = vmatprep.mubr.msk.f32.mxu1 %vm136_vm4, %v5833_v48 }
 0x2df   :  { %v15228_v26 = vadd.f32 %v2756_v54, %v2618_v49 }
 0x2e0   :  { %v2581_v0 = vpop.f32.mrb[52].mxu1  ;;  %v2761_v41 = vpop.f32.mrb[64].mxu0 }
 0x2e1   :  { %v2619_v25 = vadd.f32 %v2581_v0, %v15119_v14  ;;  %v11867_v61 = vpop.f32.mrb[53].mxu1  ;;  %v11904_v27 = vpop.f32.mrb[65].mxu0  ;;  %12336 = vmatmul.mubr.msk.f32.vlgmr.msra.gmra.mrb[110].mxu1 %vm136_vm4, %v5835_v20  ;;  %v5844_v14 = vrot.slane %v14944_v51, 4  ;;  %v5852_v0 = vrot.slane %v14990_v62, 4 }
 0x2e2   :  { %12338 = vmatprep.mubr.msk.f32.mxu1 %vm136_vm4, %v5837_v10  ;;  %13174 = vmatpush3.bf16.msk.msra.mxu1 %vm13757_vm2, %v13992_v35  ;;  %v5843_v35 = vsel %vm161_vm0, %v5840_v58, %v5842_v7  ;;  %v5849_v58 = vsel %vm161_vm0, %v5846_v23, %v5848_v8 }
 0x2e3   :  { %v15240_v57 = vadd.f32 %v2761_v41, %v2619_v25  ;;  %13177 = vmatprep.subr.msk.bf16.mxu1 %vm13757_vm2, %v14041_v1  ;;  %v5845_v47 = vsel %vm161_vm0, %v5842_v7, %v5844_v14  ;;  %v5847_v20 = vsel %vm161_vm0, %v5844_v14, %v5846_v23  ;;  %v6016_v14 = vrot.slane %v14877_v3, 5 }
 0x2e4   :  { %v2586_v34 = vpop.f32.mrb[54].mxu1  ;;  %v2766_v60 = vpop.f32.mrb[66].mxu0 }
 0x2e5   :  { %v2620_v9 = vadd.f32 %v2586_v34, %v15129_v28  ;;  %v11870_v37 = vpop.f32.mrb[55].mxu1  ;;  %v11907_v19 = vpop.f32.mrb[67].mxu0  ;;  %12339 = vmatmul.mubr.msk.f32.gmra.mrb[112].mxu1 %vm136_vm4, %v5839_v32  ;;  %v5851_v32 = vsel %vm161_vm0, %v5848_v8, %v5850_v38  ;;  %v6017_v34 = vrot.slane %v14882_v33, 5  ;;  %v6021_v8 = vrot.slane %v14902_v50, 5 }
 0x2e6   :  { %12341 = vmatprep.mubr.msk.f32.mxu1 %vm136_vm4, %v5841_v59  ;;  %v5853_v59 = vsel %vm161_vm0, %v5850_v38, %v5852_v0 }
 0x2e7   :  { %v15252_v48 = vadd.f32 %v2766_v60, %v2620_v9 }
 0x2e8   :  { %v2591_v54 = vpop.f32.mrb[56].mxu1  ;;  %v2771_v49 = vpop.f32.mrb[68].mxu0 }
 0x2e9   :  { %v2621_v28 = vadd.f32 %v2591_v54, %v15139_v53  ;;  %v11873_v46 = vpop.f32.mrb[57].mxu1  ;;  %v11910_v56 = vpop.f32.mrb[69].mxu0  ;;  %12342 = vmatmul.mubr.msk.f32.gmra.mrb[114].mxu1 %vm136_vm4, %v5843_v35  ;;  %v6019_v35 = vrot.slane %v14893_v18, 5 }
 0x2ea   :  { %12344 = vmatprep.mubr.msk.f32.mxu1 %vm136_vm4, %v5845_v47  ;;  %v6018_v47 = vsel %vm1006_vm7, %v6016_v14, %v6017_v34 }
 0x2eb   :  { %v15261_v10 = vadd.f32 %v2771_v49, %v2621_v28  ;;  %v6020_v56 = vsel %vm1006_vm7, %v6017_v34, %v6019_v35 }
 0x2ec   :  { %v2596_v41 = vpop.f32.mrb[58].mxu1  ;;  %v2776_v25 = vpop.f32.mrb[70].mxu0 }
 0x2ed   :  { %v2622_v53 = vadd.f32 %v2596_v41, %v15148_v40  ;;  %v11876_v61 = vpop.f32.mrb[59].mxu1  ;;  %v11913_v27 = vpop.f32.mrb[71].mxu0  ;;  %12345 = vmatmul.mubr.msk.f32.gmra.mrb[116].mxu1 %vm136_vm4, %v5847_v20  ;;  %v6023_v20 = vrot.slane %v14914_v36, 5  ;;  %v6025_v41 = vrot.slane %v14923_v13, 5 }
 0x2ee   :  { %12347 = vmatprep.mubr.msk.f32.mxu1 %vm136_vm4, %v5849_v58  ;;  %v6022_v58 = vsel %vm1006_vm7, %v6019_v35, %v6021_v8 }
 0x2ef   :  { %v15269_v7 = vadd.f32 %v2776_v25, %v2622_v53  ;;  %v6026_v14 = vsel %vm1006_vm7, %v6023_v20, %v6025_v41 }
 0x2f0   :  { %v2601_v60 = vpop.f32.mrb[60].mxu1  ;;  %v2781_v9 = vpop.f32.mrb[72].mxu0 }
 0x2f1   :  { %v2623_v40 = vadd.f32 %v2601_v60, %v15158_v29  ;;  %v11879_v37 = vpop.f32.mrb[61].mxu1  ;;  %v11916_v19 = vpop.f32.mrb[73].mxu0  ;;  %12348 = vmatmul.mubr.msk.f32.gmra.mrb[118].mxu1 %vm136_vm4, %v5851_v32  ;;  %v6027_v32 = vrot.slane %v14935_v55, 5 }
 0x2f2   :  { %12350 = vmatprep.mubr.msk.f32.mxu1 %vm136_vm4, %v5853_v59  ;;  %v6031_v19 = vrot.slane %v14958_v16, 5 }
 0x2f3   :  { %v15278_v23 = vadd.f32 %v2781_v9, %v2623_v40 }
 0x2f4   :  { %v2606_v54 = vpop.f32.mrb[62].mxu1  ;;  %v2786_v49 = vpop.f32.mrb[74].mxu0 }
 0x2f5   :  { %v2624_v28 = vadd.f32 %v2606_v54, %v15174_v21  ;;  %v11882_v46 = vpop.f32.mrb[63].mxu1  ;;  %v11919_v29 = vpop.f32.mrb[75].mxu0  ;;  %12351 = vmatmul.mubr.msk.f32.gmra.mrb[120].mxu1 %vm136_vm4, %v5852_v0  ;;  %v6024_v0 = vsel %vm1006_vm7, %v6021_v8, %v6023_v20  ;;  %v6033_v8 = vrot.slane %v14970_v12, 5 }
 0x2f6   :  { %12357 = vmatprep.mubr.msk.f32.mxu1 %vm136_vm4, %v6018_v47 }
 0x2f7   :  { %v15287_v38 = vadd.f32 %v2786_v49, %v2624_v28 }
 0x2f8   :  { %v2611_v25 = vpop.f32.mrb[64].mxu1  ;;  %v2791_v53 = vpop.f32.mrb[76].mxu0 }
 0x2f9   :  { %v2625_v21 = vadd.f32 %v2611_v25, %v15192_v42  ;;  %v11885_v61 = vpop.f32.mrb[65].mxu1  ;;  %v11922_v27 = vpop.f32.mrb[77].mxu0  ;;  %12358 = vmatmul.mubr.msk.f32.vlgmr.msra.gmra.mrb[110].mxu1 %vm136_vm4, %v6020_v56  ;;  %v6029_v42 = vrot.slane %v14944_v51, 5  ;;  %v6035_v56 = vrot.slane %v14981_v24, 5 }
 0x2fa   :  { %12360 = vmatprep.mubr.msk.f32.mxu1 %vm136_vm4, %v6022_v58  ;;  %13180 = vmatpush3.bf16.msk.msra.mxu1 %vm13757_vm2, %v14041_v1  ;;  %v6028_v1 = vsel %vm1006_vm7, %v6025_v41, %v6027_v32  ;;  %v6034_v58 = vsel %vm1006_vm7, %v6031_v19, %v6033_v8  ;;  %v6037_v41 = vrot.slane %v14990_v62, 5 }
 0x2fb   :  { %v15299_v59 = vadd.f32 %v2791_v53, %v2625_v21  ;;  %13183 = vmatprep.subr.msk.bf16.mxu1 %vm13757_vm2, %v14090_v44  ;;  %v6030_v47 = vsel %vm1006_vm7, %v6027_v32, %v6029_v42  ;;  %v6032_v29 = vsel %vm1006_vm7, %v6029_v42, %v6031_v19 }
 0x2fc   :  { %v2920_v34 = vpop.f32.mrb[66].mxu1  ;;  %v3099_v60 = vpop.f32.mrb[78].mxu0  ;;  %v6038_v42 = vsel %vm1006_vm7, %v6035_v56, %v6037_v41 }
 0x2fd   :  { %v2974_v9 = vadd.f32 %v2920_v34, %v15202_v63  ;;  %v11929_v40 = vpop.f32.mrb[67].mxu1  ;;  %v11966_v37 = vpop.f32.mrb[79].mxu0  ;;  %12361 = vmatmul.mubr.msk.f32.gmra.mrb[112].mxu1 %vm136_vm4, %v6024_v0  ;;  %v6036_v0 = vsel %vm1006_vm7, %v6033_v8, %v6035_v56  ;;  %v6202_v34 = vrot.slane %v14877_v3, 6 }
 0x2fe   :  { %12363 = vmatprep.mubr.msk.f32.mxu1 %vm136_vm4, %v6026_v14 }
 0x2ff   :  { %v15311_v35 = vadd.f32 %v3099_v60, %v2974_v9  ;;  %v6203_v60 = vrot.slane %v14882_v33, 6 }
 0x300   :  { %v2925_v54 = vpop.f32.mrb[68].mxu1  ;;  %v3104_v49 = vpop.f32.mrb[80].mxu0 }
 0x301   :  { %v2975_v63 = vadd.f32 %v2925_v54, %v15210_v6  ;;  %v11932_v28 = vpop.f32.mrb[69].mxu1  ;;  %v11969_v46 = vpop.f32.mrb[81].mxu0  ;;  %12364 = vmatmul.mubr.msk.f32.gmra.mrb[114].mxu1 %vm136_vm4, %v6028_v1  ;;  %v15327_v6 = vld [vmem:[%s17214_s0 + $0xc8] sm:$0xf]  ;;  %v6204_v54 = vsel %vm1196_vm8, %v6202_v34, %v6203_v60 }
 0x302   :  { %12366 = vmatprep.mubr.msk.f32.mxu1 %vm136_vm4, %v6030_v47  ;;  %v6039_v32 = vrot.slane %v15327_v6, 5  ;;  %v6205_v47 = vrot.slane %v14893_v18, 6 }
 0x303   :  { %v15320_v20 = vadd.f32 %v3104_v49, %v2975_v63  ;;  %v6207_v49 = vrot.slane %v14902_v50, 6 }
 0x304   :  { %v2930_v25 = vpop.f32.mrb[70].mxu1  ;;  %v3109_v53 = vpop.f32.mrb[82].mxu0  ;;  %v6040_v19 = vsel %vm1006_vm7, %v6037_v41, %v6039_v32  ;;  %v6206_v56 = vsel %vm1196_vm8, %v6203_v60, %v6205_v47 }
 0x305   :  { %v2976_v21 = vadd.f32 %v2930_v25, %v15219_v52  ;;  %v11935_v61 = vpop.f32.mrb[71].mxu1  ;;  %v11972_v27 = vpop.f32.mrb[83].mxu0  ;;  %12367 = vmatmul.mubr.msk.f32.gmra.mrb[116].mxu1 %vm136_vm4, %v6032_v29  ;;  %v6208_v25 = vsel %vm1196_vm8, %v6205_v47, %v6207_v49 }
 0x306   :  { %12369 = vmatprep.mubr.msk.f32.mxu1 %vm136_vm4, %v6034_v58  ;;  %v6209_v58 = vrot.slane %v14914_v36, 6 }
 0x307   :  { %v15334_v14 = vadd.f32 %v3109_v53, %v2976_v21  ;;  %v6211_v53 = vrot.slane %v14923_v13, 6 }
 0x308   :  { %v2935_v9 = vpop.f32.mrb[72].mxu1  ;;  %v3114_v52 = vpop.f32.mrb[84].mxu0  ;;  %v6210_v32 = vsel %vm1196_vm8, %v6207_v49, %v6209_v58  ;;  %v6219_v49 = vrot.slane %v14970_v12, 6 }
 0x309   :  { %v2977_v40 = vadd.f32 %v2935_v9, %v15228_v26  ;;  %v11938_v37 = vpop.f32.mrb[73].mxu1  ;;  %v11975_v1 = vpop.f32.mrb[85].mxu0  ;;  %12370 = vmatmul.mubr.msk.f32.gmra.mrb[118].mxu1 %vm136_vm4, %v6036_v0  ;;  %v6212_v60 = vsel %vm1196_vm8, %v6209_v58, %v6211_v53 }
 0x30a   :  { %12372 = vmatprep.mubr.msk.f32.mxu1 %vm136_vm4, %v6038_v42  ;;  %v6213_v42 = vrot.slane %v14935_v55, 6 }
 0x30b   :  { %v15344_v8 = vadd.f32 %v3114_v52, %v2977_v40 }
 0x30c   :  { %v2940_v63 = vpop.f32.mrb[74].mxu1  ;;  %v3119_v28 = vpop.f32.mrb[86].mxu0 }
 0x30d   :  { %v2978_v26 = vadd.f32 %v2940_v63, %v15240_v57  ;;  %v11941_v46 = vpop.f32.mrb[75].mxu1  ;;  %v11978_v29 = vpop.f32.mrb[87].mxu0  ;;  %12373 = vmatmul.mubr.msk.f32.gmra.mrb[120].mxu1 %vm136_vm4, %v6040_v19  ;;  %v6217_v19 = vrot.slane %v14958_v16, 6 }
 0x30e   :  { %12379 = vmatprep.mubr.msk.f32.mxu1 %vm136_vm4, %v6204_v54 }
 0x30f   :  { %v15353_v41 = vadd.f32 %v3119_v28, %v2978_v26 }
 0x310   :  { %v2945_v21 = vpop.f32.mrb[76].mxu1  ;;  %v3124_v61 = vpop.f32.mrb[88].mxu0 }
 0x311   :  { %v2979_v57 = vadd.f32 %v2945_v21, %v15252_v48  ;;  %v11944_v27 = vpop.f32.mrb[77].mxu1  ;;  %v11981_v0 = vpop.f32.mrb[89].mxu0  ;;  %12380 = vmatmul.mubr.msk.f32.vlgmr.msra.gmra.mrb[110].mxu1 %vm136_vm4, %v6206_v56  ;;  %v6215_v48 = vrot.slane %v14944_v51, 6  ;;  %v6221_v56 = vrot.slane %v14981_v24, 6 }
 0x312   :  { %12382 = vmatprep.mubr.msk.f32.mxu1 %vm136_vm4, %v6208_v25  ;;  %13186 = vmatpush3.bf16.msk.msra.mxu1 %vm13757_vm2, %v14090_v44  ;;  %v6214_v44 = vsel %vm1196_vm8, %v6211_v53, %v6213_v42  ;;  %v6220_v25 = vsel %vm1196_vm8, %v6217_v19, %v6219_v49  ;;  %v6223_v53 = vrot.slane %v14990_v62, 6  ;;  %v6388_v62 = vrot.slane %v14877_v3, 7 }
 0x313   :  { %v15365_v34 = vadd.f32 %v3124_v61, %v2979_v57  ;;  %13189 = vmatprep.subr.msk.bf16.mxu1 %vm13757_vm2, %v14146_v22  ;;  %v6216_v54 = vsel %vm1196_vm8, %v6213_v42, %v6215_v48  ;;  %v6218_v29 = vsel %vm1196_vm8, %v6215_v48, %v6217_v19  ;;  %v6222_v0 = vsel %vm1196_vm8, %v6219_v49, %v6221_v56 }
 0x314   :  { %v2950_v9 = vpop.f32.mrb[78].mxu1  ;;  %v3129_v52 = vpop.f32.mrb[90].mxu0  ;;  %v6389_v48 = vrot.slane %v14882_v33, 7  ;;  %v6393_v33 = vrot.slane %v14902_v50, 7  ;;  %v6397_v50 = vrot.slane %v14923_v13, 7  ;;  %v6399_v13 = vrot.slane %v14935_v55, 7 }
 0x315   :  { %v2980_v40 = vadd.f32 %v2950_v9, %v15261_v10  ;;  %v11947_v37 = vpop.f32.mrb[79].mxu1  ;;  %v11984_v1 = vpop.f32.mrb[91].mxu0  ;;  %12383 = vmatmul.mubr.msk.f32.gmra.mrb[112].mxu1 %vm136_vm4, %v6210_v32  ;;  %v6225_v32 = vrot.slane %v15327_v6, 6 }
 0x316   :  { %12385 = vmatprep.mubr.msk.f32.mxu1 %vm136_vm4, %v6212_v60  ;;  %v6224_v60 = vsel %vm1196_vm8, %v6221_v56, %v6223_v53  ;;  %v6390_v3 = vsel %vm1386_vm9, %v6388_v62, %v6389_v48  ;;  %v6400_v2 = vsel %vm1386_vm9, %v6397_v50, %v6399_v13 }
 0x317   :  { %v15377_v47 = vadd.f32 %v3129_v52, %v2980_v40  ;;  %v6226_v1 = vsel %vm1196_vm8, %v6223_v53, %v6225_v32  ;;  %v6405_v32 = vrot.slane %v14970_v12, 7 }
 0x318   :  { %v2955_v63 = vpop.f32.mrb[80].mxu1  ;;  %v3134_v28 = vpop.f32.mrb[92].mxu0 }
 0x319   :  { %v2981_v10 = vadd.f32 %v2955_v63, %v15269_v7  ;;  %v11950_v26 = vpop.f32.mrb[81].mxu1  ;;  %v11987_v46 = vpop.f32.mrb[93].mxu0  ;;  %12386 = vmatmul.mubr.msk.f32.gmra.mrb[114].mxu1 %vm136_vm4, %v6214_v44  ;;  %v6391_v44 = vrot.slane %v14893_v18, 7  ;;  %v6395_v18 = vrot.slane %v14914_v36, 7 }
 0x31a   :  { %12388 = vmatprep.mubr.msk.f32.mxu1 %vm136_vm4, %v6216_v54 }
 0x31b   :  { %v15386_v58 = vadd.f32 %v3134_v28, %v2981_v10  ;;  %v6392_v10 = vsel %vm1386_vm9, %v6389_v48, %v6391_v44  ;;  %v6394_v46 = vsel %vm1386_vm9, %v6391_v44, %v6393_v33  ;;  %v6396_v36 = vsel %vm1386_vm9, %v6393_v33, %v6395_v18 }
 0x31c   :  { %v2960_v21 = vpop.f32.mrb[82].mxu1  ;;  %v3139_v61 = vpop.f32.mrb[94].mxu0 }
 0x31d   :  { %v2982_v7 = vadd.f32 %v2960_v21, %v15278_v23  ;;  %v11953_v57 = vpop.f32.mrb[83].mxu1  ;;  %v11990_v27 = vpop.f32.mrb[95].mxu0  ;;  %12389 = vmatmul.mubr.msk.f32.gmra.mrb[116].mxu1 %vm136_vm4, %v6218_v29  ;;  %v6398_v21 = vsel %vm1386_vm9, %v6395_v18, %v6397_v50 }
 0x31e   :  { %12391 = vmatprep.mubr.msk.f32.mxu1 %vm136_vm4, %v6220_v25 }
 0x31f   :  { %v15395_v42 = vadd.f32 %v3139_v61, %v2982_v7  ;;  %v6401_v61 = vrot.slane %v14944_v51, 7 }
 0x320   :  { %v2965_v9 = vpop.f32.mrb[84].mxu1  ;;  %v3144_v23 = vpop.f32.mrb[96].mxu0 }
 0x321   :  { %v2983_v52 = vadd.f32 %v2965_v9, %v15287_v38  ;;  %v11956_v40 = vpop.f32.mrb[85].mxu1  ;;  %v11993_v37 = vpop.f32.mrb[97].mxu0  ;;  %12392 = vmatmul.mubr.msk.f32.gmra.mrb[118].mxu1 %vm136_vm4, %v6222_v0  ;;  %v6402_v51 = vsel %vm1386_vm9, %v6399_v13, %v6401_v61 }
 0x322   :  { %12394 = vmatprep.mubr.msk.f32.mxu1 %vm136_vm4, %v6224_v60  ;;  %v15457_v37 = vld [vmem:[%s17214_s0 + $0xc0] sm:$0xff] }
 0x323   :  { %v15405_v19 = vadd.f32 %v3144_v23, %v2983_v52  ;;  %v6407_v23 = vrot.slane %v14981_v24, 7 }
 0x324   :  { %v2970_v54 = vpop.f32.mrb[86].mxu1  ;;  %v3149_v49 = vpop.f32.mrb[98].mxu0 }
 0x325   :  { %v2984_v38 = vadd.f32 %v2970_v54, %v15299_v59  ;;  %v11959_v63 = vpop.f32.mrb[87].mxu1  ;;  %v11996_v28 = vpop.f32.mrb[99].mxu0  ;;  %12395 = vmatmul.mubr.msk.f32.gmra.mrb[120].mxu1 %vm136_vm4, %v6226_v1  ;;  %v15421_v59 = vld [vmem:[%s17218_s4] ss:$0 sm:$0xff] }
 0x326   :  { %12401 = vmatprep.mubr.msk.f32.mxu1 %vm136_vm4, %v6390_v3  ;;  %v6411_v63 = vrot.slane %v15327_v6, 7  ;;  %v68_v28 = vld [vmem:[%s17217_s5 + $0x20] sm:$0xff] }
 0x327   :  { %v15414_v26 = vadd.f32 %v3149_v49, %v2984_v38  ;;  %v6408_v38 = vsel %vm1386_vm9, %v6405_v32, %v6407_v23 }
 0x328   :  { %v3235_v29 = vpop.f32.mrb[88].mxu1 }
 0x329   :  { %v3289_v56 = vadd.f32 %v3235_v29, %v15311_v35  ;;  %v12003_v25 = vpop.f32.mrb[89].mxu1  ;;  %12402 = vmatmul.mubr.msk.f32.vlgmr.msra.gmra.mrb[110].mxu1 %vm136_vm4, %v6392_v10  ;;  %v17233_v35 = vmov 0.0|0.0   ;;  %v69_v10 = vld [vmem:[%s17217_s5 + $0x28] sm:$0x1] }
 0x32a   :  { %12404 = vmatprep.mubr.msk.f32.mxu1 %vm136_vm4, %v6394_v46  ;;  %13192 = vmatpush3.bf16.msk.msra.mxu1 %vm13757_vm2, %v14146_v22  ;;  %v6403_v22 = vrot.slane %v14958_v16, 7  ;;  %v15482_v13 = vpack.c.bf16 %v69_v10, %v68_v28 }
 0x32b   :  { %v3306_v53 = vadd.f32 %v15421_v59, %v3289_v56  ;;  %13197 = vmatprep.subr.bf16.mxu1 %v17233_v35 }
 0x32c   :  { %v3240_v7 = vpop.f32.mrb[90].mxu1  ;;  %v6404_v16 = vsel %vm1386_vm9, %v6401_v61, %v6403_v22  ;;  %v6406_v40 = vsel %vm1386_vm9, %v6403_v22, %v6405_v32 }
 0x32d   :  { %v3328_v57 = vmul.f32 0.01, %v3306_v53  ;;  %v3290_v27 = vadd.f32 %v3240_v7, %v15320_v20  ;;  %v12006_v0 = vpop.f32.mrb[91].mxu1  ;;  %12405 = vmatmul.mubr.msk.f32.gmra.mrb[112].mxu1 %vm136_vm4, %v6396_v36  ;;  %vm3317_vm12 = vcmp.ge.f32.partialorder %v3306_v53, 0.0 }
 0x32e   :  { %12407 = vmatprep.mubr.msk.f32.mxu1 %vm136_vm4, %v6398_v21 }
 0x32f   :  { %v3307_v55 = vadd.f32 %v15421_v59, %v3290_v27  ;;  %v15443_v62 = vsel %vm3317_vm12, %v3306_v53, %v3328_v57 }
 0x330   :  { %v3245_v60 = vpop.f32.mrb[92].mxu1  ;;  %v3360_v44 = vrot.slane %v15443_v62, 1 }
 0x331   :  { %vm3318_vm2 = vcmp.ge.f32.partialorder %v3307_v55, 0.0  ;;  %v3329_v20 = vmul.f32 0.01, %v3307_v55  ;;  %v3291_v48 = vadd.f32 %v3245_v60, %v15334_v14  ;;  %v12009_v9 = vpop.f32.mrb[93].mxu1  ;;  %12408 = vmatmul.mubr.msk.f32.gmra.mrb[114].mxu1 %vm136_vm4, %v6400_v2  ;;  %v6409_v14 = vrot.slane %v15457_v37, 7 }
 0x332   :  { %12410 = vmatprep.mubr.msk.f32.mxu1 %vm136_vm4, %v6402_v51 }
 0x333   :  { %v15450_v52 = vsel %vm3318_vm2, %v3307_v55, %v3329_v20  ;;  %v3308_v12 = vadd.f32 %v15421_v59, %v3291_v48  ;;  %v6410_v46 = vsel %vm1386_vm9, %v6407_v23, %v6409_v14  ;;  %v6412_v21 = vsel %vm1386_vm9, %v6409_v14, %v6411_v63  ;;  %v13692_v55 = vld [vmem:[%s17214_s0 + $0x70] sm:$0xff] }
 0x334   :  { %v3250_v1 = vpop.f32.mrb[94].mxu1  ;;  %v3361_v3 = vrot.slane %v15450_v52, 1 }
 0x335   :  { %vm3319_vm13 = vcmp.ge.f32.partialorder %v3308_v12, 0.0  ;;  %v3330_v24 = vmul.f32 0.01, %v3308_v12  ;;  %v3292_v33 = vadd.f32 %v3250_v1, %v15344_v8  ;;  %v12012_v54 = vpop.f32.mrb[95].mxu1  ;;  %12411 = vmatmul.mubr.msk.f32.gmra.mrb[116].mxu1 %vm136_vm4, %v6404_v16  ;;  %v13693_v16 = vld [vmem:[%s17214_s0 + $0x78] sm:$0xff] }
 0x336   :  { %v3362_v49 = vsel %vm112_vm3, %v3360_v44, %v3361_v3  ;;  %12413 = vmatprep.mubr.msk.f32.mxu1 %vm136_vm4, %v6406_v40 }
 0x337   :  { %v15474_v8 = vsel %vm3319_vm13, %v3308_v12, %v3330_v24  ;;  %v3309_v18 = vadd.f32 %v15421_v59, %v3292_v33  ;;  %12038 = vmatprep.mubr.msk.f32.mxu0 %vm1804_vm14, %v3362_v49  ;;  %v13694_v12 = vld [vmem:[%s17214_s0 + $0x80] sm:$0xff]  ;;  %v13695_v33 = vld [vmem:[%s17214_s0 + $0x88] sm:$0xff] }
 0x338   :  { %v3255_v50 = vpop.f32.mrb[96].mxu1  ;;  %v3363_v29 = vrot.slane %v15474_v8, 1 }
 0x339   :  { %vm3320_vm15 = vcmp.ge.f32.partialorder %v3309_v18, 0.0  ;;  %v3331_v56 = vmul.f32 0.01, %v3309_v18  ;;  %v3293_v25 = vadd.f32 %v3255_v50, %v15353_v41  ;;  %v12015_v36 = vpop.f32.mrb[97].mxu1  ;;  %12414 = vmatmul.mubr.msk.f32.gmra.mrb[118].mxu1 %vm136_vm4, %v6408_v38 }
 0x33a   :  { %v15485_v53 = vsel %vm112_vm3, %v3361_v3, %v3363_v29  ;;  %12416 = vmatprep.mubr.msk.f32.mxu1 %vm136_vm4, %v6410_v46  ;;  %v13697_v46 = vld [vmem:[%s17214_s0 + $0x98] sm:$0xff] }
 0x33b   :  { %v15489_v61 = vsel %vm3320_vm15, %v3309_v18, %v3331_v56  ;;  %v3310_v7 = vadd.f32 %v15421_v59, %v3293_v25  ;;  %12039 = vmatmul.mubr.msk.f32.vlgmr.msra.gmra.mrb[100].mxu0 %vm1804_vm14, %v15485_v53 }
 0x33c   :  { %v3260_v41 = vpop.f32.mrb[98].mxu1  ;;  %v3365_v57 = vrot.slane %v15489_v61, 1  ;;  %13084 = vmatpush3.bf16.msk.msra.mxu0 %vm14247_vm10, %v15190_v17 }
 0x33d   :  { %vm3321_vm1 = vcmp.ge.f32.partialorder %v3310_v7, 0.0  ;;  %v3332_v27 = vmul.f32 0.01, %v3310_v7  ;;  %v3294_v0 = vadd.f32 %v3260_v41, %v15365_v34  ;;  %v12018_v2 = vpop.f32.mrb[99].mxu1  ;;  %12417 = vmatmul.mubr.msk.f32.gmra.mrb[120].mxu1 %vm136_vm4, %v6412_v21  ;;  %13087 = vmatprep.subr.msk.bf16.mxu0 %vm14247_vm10, %v15482_v13 }
 0x33e   :  { %v15504_v22 = vsel %vm112_vm3, %v3363_v29, %v3365_v57  ;;  %12423 = vmatprep.mubr.msk.f32.mxu1 %vm136_vm4, %v13692_v55  ;;  %v13698_v29 = vld [vmem:[%s17214_s0 + $0xa0] sm:$0xff] }
 0x33f   :  { %v15510_v51 = vsel %vm3321_vm1, %v3310_v7, %v3332_v27  ;;  %v3311_v34 = vadd.f32 %v15421_v59, %v3294_v0  ;;  %12041 = vmatprep.mubr.msk.f32.mxu0 %vm1804_vm14, %v15504_v22  ;;  %v13700_v0 = vld [vmem:[%s17214_s0 + $0xb0] sm:$0xff] }
 0x340   :  { %v3265_v32 = vpop.f32.mrb[100].mxu1  ;;  %v3367_v60 = vrot.slane %v15510_v51, 1 }
 0x341   :  { %vm3322_vm12 = vcmp.ge.f32.partialorder %v3311_v34, 0.0  ;;  %v3333_v20 = vmul.f32 0.01, %v3311_v34  ;;  %v3295_v48 = vadd.f32 %v3265_v32, %v15377_v47  ;;  %v12021_v9 = vpop.f32.mrb[101].mxu1  ;;  %12424 = vmatmul.mubr.msk.f32.vlgmr.msra.gmra.mrb[110].mxu1 %vm136_vm4, %v13693_v16 }
 0x342   :  { %v15522_v23 = vsel %vm112_vm3, %v3365_v57, %v3367_v60  ;;  %12426 = vmatprep.mubr.msk.f32.mxu1 %vm136_vm4, %v13694_v12  ;;  %13200 = vmatpush3.bf16.msk.msra.mxu1 %vm14247_vm10, %v14312_v4  ;;  %v13696_v4 = vld [vmem:[%s17214_s0 + $0x90] sm:$0xff]  ;;  %v13699_v57 = vld [vmem:[%s17214_s0 + $0xa8] sm:$0xff] }
 0x343   :  { %v15528_v40 = vsel %vm3322_vm12, %v3311_v34, %v3333_v20  ;;  %v3312_v47 = vadd.f32 %v15421_v59, %v3295_v48  ;;  %12042 = vmatmul.mubr.msk.f32.gmra.mrb[102].mxu0 %vm1804_vm14, %v15522_v23  ;;  %13205 = vmatprep.subr.bf16.mxu1 %v17233_v35  ;;  %v13701_v48 = vld [vmem:[%s17214_s0 + $0xb8] sm:$0xff] }
 0x344   :  { %v3270_v14 = vpop.f32.mrb[102].mxu1  ;;  %v3369_v1 = vrot.slane %v15528_v40, 1 }
 0x345   :  { %vm3323_vm2 = vcmp.ge.f32.partialorder %v3312_v47, 0.0  ;;  %v3334_v44 = vmul.f32 0.01, %v3312_v47  ;;  %v3296_v3 = vadd.f32 %v3270_v14, %v15386_v58  ;;  %v12024_v24 = vpop.f32.mrb[103].mxu1  ;;  %12427 = vmatmul.mubr.msk.f32.gmra.mrb[112].mxu1 %vm136_vm4, %v13695_v33  ;;  %v17234_v14 = vmov 0.0  }
 0x346   :  { %v15544_v54 = vsel %vm112_vm3, %v3367_v60, %v3369_v1  ;;  %12429 = vmatprep.mubr.msk.f32.mxu1 %vm136_vm4, %v13696_v4 }
 0x347   :  { %v15550_v49 = vsel %vm3323_vm2, %v3312_v47, %v3334_v44  ;;  %v3313_v58 = vadd.f32 %v15421_v59, %v3296_v3  ;;  %12044 = vmatprep.mubr.msk.f32.mxu0 %vm1804_vm14, %v15544_v54 }
 0x348   :  { %v3275_v38 = vpop.f32.mrb[104].mxu1  ;;  %v3371_v63 = vrot.slane %v15550_v49, 1 }
 0x349   :  { %vm3324_vm13 = vcmp.ge.f32.partialorder %v3313_v58, 0.0  ;;  %v3335_v28 = vmul.f32 0.01, %v3313_v58  ;;  %v3297_v10 = vadd.f32 %v3275_v38, %v15395_v42  ;;  %v12027_v18 = vpop.f32.mrb[105].mxu1  ;;  %12430 = vmatmul.mubr.msk.f32.gmra.mrb[114].mxu1 %vm136_vm4, %v13697_v46  ;;  %v3656_v38 = vrot.slane %v15450_v52, 2 }
 0x34a   :  { %v15562_v50 = vsel %vm112_vm3, %v3369_v1, %v3371_v63  ;;  %12432 = vmatprep.mubr.msk.f32.mxu1 %vm136_vm4, %v13698_v29  ;;  %v73_v18 = vld [vmem:[%s17217_s5 + $0x48] sm:$0x1]  ;;  %v3660_v29 = vrot.slane %v15489_v61, 2 }
 0x34b   :  { %v15568_v56 = vsel %vm3324_vm13, %v3313_v58, %v3335_v28  ;;  %v3314_v42 = vadd.f32 %v15421_v59, %v3297_v10  ;;  %12045 = vmatmul.mubr.msk.f32.gmra.mrb[104].mxu0 %vm1804_vm14, %v15562_v50  ;;  %v3658_v28 = vrot.slane %v15474_v8, 2  ;;  %v72_v10 = vld [vmem:[%s17217_s5 + $0x40] sm:$0xff] }
 0x34c   :  { %v3280_v25 = vpop.f32.mrb[106].mxu1  ;;  %v3373_v36 = vrot.slane %v15568_v56, 1 }
 0x34d   :  { %vm3325_vm15 = vcmp.ge.f32.partialorder %v3314_v42, 0.0  ;;  %v3336_v21 = vmul.f32 0.01, %v3314_v42  ;;  %v3298_v7 = vadd.f32 %v3280_v25, %v15405_v19  ;;  %v12030_v41 = vpop.f32.mrb[107].mxu1  ;;  %12433 = vmatmul.mubr.msk.f32.gmra.mrb[116].mxu1 %vm136_vm4, %v13699_v57  ;;  %v15682_v25 = vsel %vm442_vm5, %v3656_v38, %v3658_v28 }
 0x34e   :  { %v15580_v27 = vsel %vm112_vm3, %v3371_v63, %v3373_v36  ;;  %12435 = vmatprep.mubr.msk.f32.mxu1 %vm136_vm4, %v13700_v0  ;;  %v3655_v63 = vrot.slane %v15443_v62, 2  ;;  %v3666_v57 = vrot.slane %v15550_v49, 2 }
 0x34f   :  { %v15586_v2 = vsel %vm3325_vm15, %v3314_v42, %v3336_v21  ;;  %v3315_v19 = vadd.f32 %v15421_v59, %v3298_v7  ;;  %12047 = vmatprep.mubr.msk.f32.mxu0 %vm1804_vm14, %v15580_v27  ;;  %v15679_v42 = vpack.c.bf16 %v73_v18, %v72_v10  ;;  %v15688_v21 = vsel %vm442_vm5, %v3658_v28, %v3660_v29 }
 0x350   :  { %v3285_v55 = vpop.f32.mrb[108].mxu1  ;;  %v3375_v34 = vrot.slane %v15586_v2, 1  ;;  %v3657_v46 = vsel %vm442_vm5, %v3655_v63, %v3656_v38  ;;  %v3664_v7 = vrot.slane %v15528_v40, 2  ;;  %v3827_v38 = vrot.slane %v15489_v61, 3 }
 0x351   :  { %vm3326_vm1 = vcmp.ge.f32.partialorder %v3315_v19, 0.0  ;;  %v3337_v32 = vmul.f32 0.01, %v3315_v19  ;;  %v3299_v60 = vadd.f32 %v3285_v55, %v15414_v26  ;;  %v12033_v20 = vpop.f32.mrb[109].mxu1  ;;  %12436 = vmatmul.mubr.msk.f32.gmra.mrb[118].mxu1 %vm136_vm4, %v13701_v48  ;;  %v3823_v48 = vrot.slane %v15450_v52, 3 }
 0x352   :  { %v15598_v9 = vsel %vm112_vm3, %v3373_v36, %v3375_v34  ;;  %12438 = vmatprep.mubr.msk.f32.mxu1 %vm136_vm4, %v15457_v37  ;;  %v70_v37 = vld [vmem:[%s17217_s5 + $0x30] sm:$0xff]  ;;  %v3662_v36 = vrot.slane %v15510_v51, 2  ;;  %v15712_v55 = vsel %vm442_vm5, %v3664_v7, %v3666_v57  ;;  %v3829_v10 = vrot.slane %v15510_v51, 3 }
 0x353   :  { %v15602_v16 = vsel %vm3326_vm1, %v3315_v19, %v3337_v32  ;;  %12048 = vmatmul.mubr.msk.f32.gmra.mrb[106].mxu0 %vm1804_vm14, %v15598_v9  ;;  %v3316_v26 = vadd.f32 %v15421_v59, %v3299_v60  ;;  %v71_v59 = vld [vmem:[%s17217_s5 + $0x38] sm:$0x1]  ;;  %v3668_v19 = vrot.slane %v15568_v56, 2 }
 0x354   :  { %v3377_v12 = vrot.slane %v15602_v16, 1  ;;  %v3672_v3 = vrot.slane %v15602_v16, 2  ;;  %v15700_v41 = vsel %vm442_vm5, %v3660_v29, %v3662_v36  ;;  %v15706_v0 = vsel %vm442_vm5, %v3662_v36, %v3664_v7 }
 0x355   :  { %12439 = vmatmul.mubr.msk.f32.gmra.mrb[120].mxu1 %vm136_vm4, %v15327_v6  ;;  %v3338_v1 = vmul.f32 0.01, %v3316_v26  ;;  %vm3327_vm4 = vcmp.ge.f32.partialorder %v3316_v26, 0.0  ;;  %v15626_v6 = vpack.c.bf16 %v71_v59, %v70_v37  ;;  %v15718_v32 = vsel %vm442_vm5, %v3666_v57, %v3668_v19  ;;  %v74_v37 = vld [vmem:[%s17217_s5 + $0x50] sm:$0xff]  ;;  %v75_v59 = vld [vmem:[%s17217_s5 + $0x58] sm:$0x1] }
 0x356   :  { %v15611_v47 = vsel %vm112_vm3, %v3375_v34, %v3377_v12  ;;  %12482 = vmatprep.mubr.msk.f32.mxu1 %vm13707_vm11, %v17234_v14  ;;  %v3670_v34 = vrot.slane %v15586_v2, 2  ;;  %v15745_v63 = vpack.c.bf16 %v75_v59, %v74_v37  ;;  %v3833_v29 = vrot.slane %v15550_v49, 3 }
 0x357   :  { %12050 = vmatprep.mubr.msk.f32.mxu0 %vm1804_vm14, %v15611_v47  ;;  %v15628_v44 = vsel %vm3327_vm4, %v3316_v26, %v3338_v1  ;;  %v3822_v26 = vrot.slane %v15443_v62, 3  ;;  %v3835_v7 = vrot.slane %v15568_v56, 3  ;;  %v3990_v37 = vrot.slane %v15450_v52, 4 }
 0x358   :  { %12051 = vmatmul.mubr.msk.f32.gmra.mrb[108].mxu0 %vm1804_vm14, %v3377_v12  ;;  %v4790_v24 = vrot.slane %v15628_v44, 1  ;;  %v4924_v33 = vrot.slane %v15628_v44, 2  ;;  %v15723_v60 = vsel %vm442_vm5, %v3668_v19, %v3670_v34  ;;  %v15728_v20 = vsel %vm442_vm5, %v3670_v34, %v3672_v3 }
 0x359   :  { %12057 = vmatprep.mubr.msk.f32.mxu0 %vm1804_vm14, %v15443_v62  ;;  %v3824_v1 = vsel %vm630_vm6, %v3822_v26, %v3823_v48  ;;  %v3837_v19 = vrot.slane %v15586_v2, 3  ;;  %v3836_v34 = vsel %vm630_vm6, %v3833_v29, %v3835_v7  ;;  %v3989_v59 = vrot.slane %v15443_v62, 4 }
 0x35a   :  { %v15650_v4 = vsel %vm112_vm3, %v3377_v12, %v4790_v24  ;;  %v15655_v58 = vsel %vm442_vm5, %v3672_v3, %v4924_v33  ;;  %v3825_v12 = vrot.slane %v15474_v8, 3 }
 0x35b   :  { %v3838_v26 = vsel %vm630_vm6, %v3835_v7, %v3837_v19  ;;  %v3998_v7 = vrot.slane %v15528_v40, 4 }
 0x35c   :  { %12058 = vmatmul.mubr.msk.f32.vlgmr.msra.gmra.mrb[100].mxu0 %vm1804_vm14, %v15450_v52  ;;  %v3826_v28 = vsel %vm630_vm6, %v3823_v48, %v3825_v12  ;;  %v3828_v18 = vsel %vm630_vm6, %v3825_v12, %v3827_v38  ;;  %v3839_v48 = vrot.slane %v15602_v16, 3 }
 0x35d   :  { %12060 = vmatprep.mubr.msk.f32.mxu0 %vm1804_vm14, %v15474_v8  ;;  %13090 = vmatpush3.bf16.msk.msra.mxu0 %vm14247_vm10, %v15482_v13 }
 0x35e   :  { %13093 = vmatprep.subr.msk.bf16.mxu0 %vm14247_vm10, %v15626_v6  ;;  %v3840_v12 = vsel %vm630_vm6, %v3837_v19, %v3839_v48  ;;  %v4000_v19 = vrot.slane %v15550_v49, 4 }
 0x360   :  { %12061 = vmatmul.mubr.msk.f32.gmra.mrb[102].mxu0 %vm1804_vm14, %v15489_v61 }
 0x361   :  { %12063 = vmatprep.mubr.msk.f32.mxu0 %vm1804_vm14, %v15510_v51 }
 0x364   :  { %12064 = vmatmul.mubr.msk.f32.gmra.mrb[104].mxu0 %vm1804_vm14, %v15528_v40 }
 0x365   :  { %12066 = vmatprep.mubr.msk.f32.mxu0 %vm1804_vm14, %v15550_v49 }
 0x368   :  { %12067 = vmatmul.mubr.msk.f32.gmra.mrb[106].mxu0 %vm1804_vm14, %v15568_v56 }
 0x369   :  { %12069 = vmatprep.mubr.msk.f32.mxu0 %vm1804_vm14, %v15586_v2 }
 0x36c   :  { %12070 = vmatmul.mubr.msk.f32.gmra.mrb[108].mxu0 %vm1804_vm14, %v15602_v16 }
 0x36d   :  { %12076 = vmatprep.mubr.msk.f32.mxu0 %vm1804_vm14, %v3657_v46  ;;  %v3831_v46 = vrot.slane %v15528_v40, 3 }
 0x36f   :  { %v3832_v36 = vsel %vm630_vm6, %v3829_v10, %v3831_v46  ;;  %v3834_v57 = vsel %vm630_vm6, %v3831_v46, %v3833_v29  ;;  %v3996_v29 = vrot.slane %v15510_v51, 4 }
 0x370   :  { %12077 = vmatmul.mubr.msk.f32.vlgmr.msra.gmra.mrb[100].mxu0 %vm1804_vm14, %v15682_v25 }
 0x371   :  { %12079 = vmatprep.mubr.msk.f32.mxu0 %vm1804_vm14, %v15688_v21  ;;  %13096 = vmatpush3.bf16.msk.msra.mxu0 %vm14247_vm10, %v15626_v6 }
 0x372   :  { %13099 = vmatprep.subr.msk.bf16.mxu0 %vm14247_vm10, %v15679_v42 }
 0x374   :  { %12080 = vmatmul.mubr.msk.f32.gmra.mrb[102].mxu0 %vm1804_vm14, %v15700_v41 }
 0x375   :  { %12082 = vmatprep.mubr.msk.f32.mxu0 %vm1804_vm14, %v15706_v0 }
 0x378   :  { %12083 = vmatmul.mubr.msk.f32.gmra.mrb[104].mxu0 %vm1804_vm14, %v15712_v55 }
 0x379   :  { %12085 = vmatprep.mubr.msk.f32.mxu0 %vm1804_vm14, %v15718_v32 }
 0x37c   :  { %12086 = vmatmul.mubr.msk.f32.gmra.mrb[106].mxu0 %vm1804_vm14, %v15723_v60 }
 0x37d   :  { %12088 = vmatprep.mubr.msk.f32.mxu0 %vm1804_vm14, %v15728_v20 }
 0x380   :  { %12089 = vmatmul.mubr.msk.f32.gmra.mrb[108].mxu0 %vm1804_vm14, %v3672_v3  ;;  %v3830_v3 = vsel %vm630_vm6, %v3827_v38, %v3829_v10  ;;  %v76_v38 = vld [vmem:[%s17217_s5 + $0x60] sm:$0xff]  ;;  %v3991_v10 = vsel %vm161_vm0, %v3989_v59, %v3990_v37  ;;  %v4006_v59 = vrot.slane %v15602_v16, 4 }
 0x381   :  { %12095 = vmatprep.mubr.msk.f32.mxu0 %vm1804_vm14, %v3824_v1  ;;  %v3992_v1 = vrot.slane %v15474_v8, 4 }
 0x384   :  { %12096 = vmatmul.mubr.msk.f32.vlgmr.msra.gmra.mrb[100].mxu0 %vm1804_vm14, %v3826_v28  ;;  %v77_v28 = vld [vmem:[%s17217_s5 + $0x68] sm:$0x1] }
 0x385   :  { %12098 = vmatprep.mubr.msk.f32.mxu0 %vm1804_vm14, %v3828_v18  ;;  %13102 = vmatpush3.bf16.msk.msra.mxu0 %vm14247_vm10, %v15679_v42  ;;  %v3994_v18 = vrot.slane %v15489_v61, 4  ;;  %v15788_v46 = vpack.c.bf16 %v77_v28, %v76_v38  ;;  %v4157_v28 = vrot.slane %v15450_v52, 5 }
 0x386   :  { %13105 = vmatprep.subr.msk.bf16.mxu0 %vm14247_vm10, %v15745_v63 }
 0x388   :  { %12099 = vmatmul.mubr.msk.f32.gmra.mrb[102].mxu0 %vm1804_vm14, %v3830_v3  ;;  %v3993_v3 = vsel %vm161_vm0, %v3990_v37, %v3992_v1 }
 0x389   :  { %12101 = vmatprep.mubr.msk.f32.mxu0 %vm1804_vm14, %v3832_v36  ;;  %v3995_v36 = vsel %vm161_vm0, %v3992_v1, %v3994_v18 }
 0x38c   :  { %12102 = vmatmul.mubr.msk.f32.gmra.mrb[104].mxu0 %vm1804_vm14, %v3834_v57  ;;  %v3997_v57 = vsel %vm161_vm0, %v3994_v18, %v3996_v29  ;;  %v4159_v18 = vrot.slane %v15474_v8, 5 }
 0x38d   :  { %12104 = vmatprep.mubr.msk.f32.mxu0 %vm1804_vm14, %v3836_v34  ;;  %v3999_v34 = vsel %vm161_vm0, %v3996_v29, %v3998_v7  ;;  %v79_v29 = vld [vmem:[%s17217_s5 + $0x78] sm:$0x1] }
 0x390   :  { %12105 = vmatmul.mubr.msk.f32.gmra.mrb[106].mxu0 %vm1804_vm14, %v3838_v26  ;;  %v4001_v26 = vsel %vm161_vm0, %v3998_v7, %v4000_v19  ;;  %v4161_v7 = vrot.slane %v15489_v61, 5 }
 0x391   :  { %12107 = vmatprep.mubr.msk.f32.mxu0 %vm1804_vm14, %v3840_v12  ;;  %v4004_v12 = vrot.slane %v15586_v2, 4 }
 0x393   :  { %v4007_v38 = vsel %vm161_vm0, %v4004_v12, %v4006_v59 }
 0x394   :  { %12108 = vmatmul.mubr.msk.f32.gmra.mrb[108].mxu0 %vm1804_vm14, %v3839_v48  ;;  %v4002_v48 = vrot.slane %v15568_v56, 4 }
 0x395   :  { %12114 = vmatprep.mubr.msk.f32.mxu0 %vm1804_vm14, %v3991_v10  ;;  %v4156_v10 = vrot.slane %v15443_v62, 5 }
 0x396   :  { %v4003_v37 = vsel %vm161_vm0, %v4000_v19, %v4002_v48  ;;  %v4005_v1 = vsel %vm161_vm0, %v4002_v48, %v4004_v12  ;;  %v4160_v19 = vsel %vm1006_vm7, %v4157_v28, %v4159_v18  ;;  %v4162_v48 = vsel %vm1006_vm7, %v4159_v18, %v4161_v7 }
 0x397   :  { %v4173_v18 = vrot.slane %v15602_v16, 5 }
 0x398   :  { %12115 = vmatmul.mubr.msk.f32.vlgmr.msra.gmra.mrb[100].mxu0 %vm1804_vm14, %v3993_v3  ;;  %v78_v3 = vld [vmem:[%s17217_s5 + $0x70] sm:$0xff] }
 0x399   :  { %12117 = vmatprep.mubr.msk.f32.mxu0 %vm1804_vm14, %v3995_v36  ;;  %13108 = vmatpush3.bf16.msk.msra.mxu0 %vm14247_vm10, %v15745_v63  ;;  %v4158_v36 = vsel %vm1006_vm7, %v4156_v10, %v4157_v28  ;;  %v4171_v28 = vrot.slane %v15586_v2, 5 }
 0x39a   :  { %13111 = vmatprep.subr.msk.bf16.mxu0 %vm14247_vm10, %v15788_v46 }
 0x39c   :  { %12118 = vmatmul.mubr.msk.f32.gmra.mrb[102].mxu0 %vm1804_vm14, %v3997_v57  ;;  %v15831_v57 = vpack.c.bf16 %v79_v29, %v78_v3  ;;  %v4174_v29 = vsel %vm1006_vm7, %v4171_v28, %v4173_v18 }
 0x39d   :  { %12120 = vmatprep.mubr.msk.f32.mxu0 %vm1804_vm14, %v3999_v34  ;;  %v4163_v34 = vrot.slane %v15510_v51, 5 }
 0x39f   :  { %v4164_v12 = vsel %vm1006_vm7, %v4161_v7, %v4163_v34  ;;  %v4323_v7 = vrot.slane %v15443_v62, 6 }
 0x3a0   :  { %12121 = vmatmul.mubr.msk.f32.gmra.mrb[104].mxu0 %vm1804_vm14, %v4001_v26  ;;  %v4165_v26 = vrot.slane %v15528_v40, 5 }
 0x3a1   :  { %12123 = vmatprep.mubr.msk.f32.mxu0 %vm1804_vm14, %v4003_v37  ;;  %v4167_v37 = vrot.slane %v15550_v49, 5 }
 0x3a4   :  { %12124 = vmatmul.mubr.msk.f32.gmra.mrb[106].mxu0 %vm1804_vm14, %v4005_v1  ;;  %v4169_v1 = vrot.slane %v15568_v56, 5 }
 0x3a5   :  { %12126 = vmatprep.mubr.msk.f32.mxu0 %vm1804_vm14, %v4007_v38  ;;  %v4168_v38 = vsel %vm1006_vm7, %v4165_v26, %v4167_v37 }
 0x3a6   :  { %v4170_v10 = vsel %vm1006_vm7, %v4167_v37, %v4169_v1  ;;  %v4172_v3 = vsel %vm1006_vm7, %v4169_v1, %v4171_v28  ;;  %v4330_v1 = vrot.slane %v15510_v51, 6  ;;  %v4332_v28 = vrot.slane %v15528_v40, 6 }
 0x3a8   :  { %12127 = vmatmul.mubr.msk.f32.gmra.mrb[108].mxu0 %vm1804_vm14, %v4006_v59  ;;  %v4166_v59 = vsel %vm1006_vm7, %v4163_v34, %v4165_v26  ;;  %v80_v34 = vld [vmem:[%s17217_s5 + $0x80] sm:$0xff] }
 0x3a9   :  { %12133 = vmatprep.mubr.msk.f32.mxu0 %vm1804_vm14, %v4158_v36  ;;  %v4324_v36 = vrot.slane %v15450_v52, 6 }
 0x3ab   :  { %v4325_v26 = vsel %vm1196_vm8, %v4323_v7, %v4324_v36  ;;  %v4338_v7 = vrot.slane %v15586_v2, 6 }
 0x3ac   :  { %12134 = vmatmul.mubr.msk.f32.vlgmr.msra.gmra.mrb[100].mxu0 %vm1804_vm14, %v4160_v19  ;;  %v4326_v19 = vrot.slane %v15474_v8, 6 }
 0x3ad   :  { %12136 = vmatprep.mubr.msk.f32.mxu0 %vm1804_vm14, %v4162_v48  ;;  %13114 = vmatpush3.bf16.msk.msra.mxu0 %vm14247_vm10, %v15788_v46  ;;  %v81_v48 = vld [vmem:[%s17217_s5 + $0x88] sm:$0x1] }
 0x3ae   :  { %13117 = vmatprep.subr.msk.bf16.mxu0 %vm14247_vm10, %v15831_v57  ;;  %v15874_v37 = vpack.c.bf16 %v81_v48, %v80_v34  ;;  %v4340_v34 = vrot.slane %v15602_v16, 6 }
 0x3b0   :  { %12137 = vmatmul.mubr.msk.f32.gmra.mrb[102].mxu0 %vm1804_vm14, %v4164_v12  ;;  %v4328_v12 = vrot.slane %v15489_v61, 6 }
 0x3b1   :  { %12139 = vmatprep.mubr.msk.f32.mxu0 %vm1804_vm14, %v4166_v59  ;;  %v4327_v59 = vsel %vm1196_vm8, %v4324_v36, %v4326_v19 }
 0x3b4   :  { %12140 = vmatmul.mubr.msk.f32.gmra.mrb[104].mxu0 %vm1804_vm14, %v4168_v38  ;;  %v4329_v38 = vsel %vm1196_vm8, %v4326_v19, %v4328_v12 }
 0x3b5   :  { %12142 = vmatprep.mubr.msk.f32.mxu0 %vm1804_vm14, %v4170_v10  ;;  %v4331_v10 = vsel %vm1196_vm8, %v4328_v12, %v4330_v1  ;;  %v4492_v12 = vrot.slane %v15450_v52, 7 }
 0x3b8   :  { %12143 = vmatmul.mubr.msk.f32.gmra.mrb[106].mxu0 %vm1804_vm14, %v4172_v3  ;;  %v4333_v3 = vsel %vm1196_vm8, %v4330_v1, %v4332_v28  ;;  %v4494_v1 = vrot.slane %v15474_v8, 7 }
 0x3b9   :  { %12145 = vmatprep.mubr.msk.f32.mxu0 %vm1804_vm14, %v4174_v29  ;;  %v4336_v29 = vrot.slane %v15568_v56, 6 }
 0x3bb   :  { %v4339_v48 = vsel %vm1196_vm8, %v4336_v29, %v4338_v7 }
 0x3bc   :  { %12146 = vmatmul.mubr.msk.f32.gmra.mrb[108].mxu0 %vm1804_vm14, %v4173_v18  ;;  %v4334_v18 = vrot.slane %v15550_v49, 6 }
 0x3bd   :  { %12152 = vmatprep.mubr.msk.f32.mxu0 %vm1804_vm14, %v4325_v26  ;;  %v4341_v26 = vsel %vm1196_vm8, %v4338_v7, %v4340_v34  ;;  %v4500_v7 = vrot.slane %v15528_v40, 7 }
 0x3be   :  { %v4335_v36 = vsel %vm1196_vm8, %v4332_v28, %v4334_v18  ;;  %v4337_v19 = vsel %vm1196_vm8, %v4334_v18, %v4336_v29  ;;  %v83_v28 = vld [vmem:[%s17217_s5 + $0x98] sm:$0x1]  ;;  %v4496_v18 = vrot.slane %v15489_v61, 7  ;;  %v4498_v29 = vrot.slane %v15510_v51, 7 }
 0x3c0   :  { %12153 = vmatmul.mubr.msk.f32.vlgmr.msra.gmra.mrb[100].mxu0 %vm1804_vm14, %v4327_v59  ;;  %v4491_v59 = vrot.slane %v15443_v62, 7  ;;  %v4495_v62 = vsel %vm1386_vm9, %v4492_v12, %v4494_v1 }
 0x3c1   :  { %12155 = vmatprep.mubr.msk.f32.mxu0 %vm1804_vm14, %v4329_v38  ;;  %13120 = vmatpush3.bf16.msk.msra.mxu0 %vm14247_vm10, %v15831_v57  ;;  %v82_v38 = vld [vmem:[%s17217_s5 + $0x90] sm:$0xff] }
 0x3c2   :  { %13123 = vmatprep.subr.msk.bf16.mxu0 %vm14247_vm10, %v15874_v37 }
 0x3c4   :  { %12156 = vmatmul.mubr.msk.f32.gmra.mrb[102].mxu0 %vm1804_vm14, %v4331_v10  ;;  %v4493_v10 = vsel %vm1386_vm9, %v4491_v59, %v4492_v12  ;;  %v4506_v59 = vrot.slane %v15586_v2, 7 }
 0x3c5   :  { %12158 = vmatprep.mubr.msk.f32.mxu0 %vm1804_vm14, %v4333_v3  ;;  %v15917_v3 = vpack.c.bf16 %v83_v28, %v82_v38  ;;  %v4508_v38 = vrot.slane %v15602_v16, 7 }
 0x3c8   :  { %12159 = vmatmul.mubr.msk.f32.gmra.mrb[104].mxu0 %vm1804_vm14, %v4335_v36  ;;  %v4497_v36 = vsel %vm1386_vm9, %v4494_v1, %v4496_v18 }
 0x3c9   :  { %12161 = vmatprep.mubr.msk.f32.mxu0 %vm1804_vm14, %v4337_v19  ;;  %v4499_v19 = vsel %vm1386_vm9, %v4496_v18, %v4498_v29  ;;  %v4509_v18 = vsel %vm1386_vm9, %v4506_v59, %v4508_v38 }
 0x3cc   :  { %12162 = vmatmul.mubr.msk.f32.gmra.mrb[106].mxu0 %vm1804_vm14, %v4339_v48  ;;  %v4501_v48 = vsel %vm1386_vm9, %v4498_v29, %v4500_v7  ;;  %v84_v29 = vld [vmem:[%s17217_s5 + $0xa0] sm:$0xff] }
 0x3cd   :  { %12164 = vmatprep.mubr.msk.f32.mxu0 %vm1804_vm14, %v4341_v26  ;;  %v4504_v26 = vrot.slane %v15568_v56, 7 }
 0x3cf   :  { %v4507_v28 = vsel %vm1386_vm9, %v4504_v26, %v4506_v59 }
 0x3d0   :  { %12165 = vmatmul.mubr.msk.f32.gmra.mrb[108].mxu0 %vm1804_vm14, %v4340_v34  ;;  %v4502_v34 = vrot.slane %v15550_v49, 7 }
 0x3d1   :  { %12171 = vmatprep.mubr.msk.f32.mxu0 %vm1804_vm14, %v4493_v10  ;;  %v4510_v10 = vrot.slane %v15628_v44, 7 }
 0x3d2   :  { %v4503_v12 = vsel %vm1386_vm9, %v4500_v7, %v4502_v34  ;;  %v4505_v1 = vsel %vm1386_vm9, %v4502_v34, %v4504_v26 }
 0x3d4   :  { %12172 = vmatmul.mubr.msk.f32.vlgmr.msra.gmra.mrb[100].mxu0 %vm1804_vm14, %v4495_v62  ;;  %v4511_v62 = vsel %vm1386_vm9, %v4508_v38, %v4510_v10 }
 0x3d5   :  { %12174 = vmatprep.mubr.msk.f32.mxu0 %vm1804_vm14, %v4497_v36  ;;  %13126 = vmatpush3.bf16.msk.msra.mxu0 %vm14247_vm10, %v15874_v37  ;;  %v85_v36 = vld [vmem:[%s17217_s5 + $0xa8] sm:$0x1] }
 0x3d6   :  { %13129 = vmatprep.subr.msk.bf16.mxu0 %vm14247_vm10, %v15917_v3  ;;  %v15958_v7 = vpack.c.bf16 %v85_v36, %v84_v29 }
 0x3d8   :  { %12175 = vmatmul.mubr.msk.f32.gmra.mrb[102].mxu0 %vm1804_vm14, %v4499_v19 }
 0x3d9   :  { %12177 = vmatprep.mubr.msk.f32.mxu0 %vm1804_vm14, %v4501_v48 }
 0x3dc   :  { %12178 = vmatmul.mubr.msk.f32.gmra.mrb[104].mxu0 %vm1804_vm14, %v4503_v12 }
 0x3dd   :  { %12180 = vmatprep.mubr.msk.f32.mxu0 %vm1804_vm14, %v4505_v1 }
 0x3e0   :  { %12181 = vmatmul.mubr.msk.f32.gmra.mrb[106].mxu0 %vm1804_vm14, %v4507_v28 }
 0x3e1   :  { %12183 = vmatprep.mubr.msk.f32.mxu0 %vm1804_vm14, %v4509_v18 }
 0x3e4   :  { %12184 = vmatmul.mubr.msk.f32.gmra.mrb[108].mxu0 %vm1804_vm14, %v4511_v62 }
 0x3e5   :  { %12190 = vmatprep.mubr.msk.f32.mxu0 %vm1804_vm14, %v15450_v52 }
 0x3e8   :  { %12191 = vmatmul.mubr.msk.f32.vlgmr.msra.gmra.mrb[100].mxu0 %vm1804_vm14, %v15474_v8  ;;  %v16024_v8 = vld [vmem:[%s17216_s2] ss:$0 sm:$0xff] }
 0x3e9   :  { %12193 = vmatprep.mubr.msk.f32.mxu0 %vm1804_vm14, %v15489_v61  ;;  %13132 = vmatpush3.bf16.msk.msra.mxu0 %vm14247_vm10, %v15917_v3 }
 0x3ea   :  { %13135 = vmatprep.subr.msk.bf16.mxu0 %vm14247_vm10, %v15958_v7 }
 0x3ec   :  { %12194 = vmatmul.mubr.msk.f32.gmra.mrb[102].mxu0 %vm1804_vm14, %v15510_v51 }
 0x3ed   :  { %12196 = vmatprep.mubr.msk.f32.mxu0 %vm1804_vm14, %v15528_v40 }
 0x3f0   :  { %12197 = vmatmul.mubr.msk.f32.gmra.mrb[104].mxu0 %vm1804_vm14, %v15550_v49 }
 0x3f1   :  { %12199 = vmatprep.mubr.msk.f32.mxu0 %vm1804_vm14, %v15568_v56 }
 0x3f4   :  { %12200 = vmatmul.mubr.msk.f32.gmra.mrb[106].mxu0 %vm1804_vm14, %v15586_v2 }
 0x3f5   :  { %12202 = vmatprep.mubr.msk.f32.mxu0 %vm1804_vm14, %v15602_v16 }
 0x3f8   :  { %12203 = vmatmul.mubr.msk.f32.gmra.mrb[108].mxu0 %vm1804_vm14, %v15628_v44 }
 0x3f9   :  { %12209 = vmatprep.mubr.msk.f32.mxu0 %vm1804_vm14, %v15485_v53 }
 0x3fc   :  { %12210 = vmatmul.mubr.msk.f32.vlgmr.msra.gmra.mrb[100].mxu0 %vm1804_vm14, %v15504_v22 }
 0x3fd   :  { %12212 = vmatprep.mubr.msk.f32.mxu0 %vm1804_vm14, %v15522_v23  ;;  %13138 = vmatpush3.bf16.msk.msra.mxu0 %vm14247_vm10, %v15958_v7 }
 0x3fe   :  { %13193 = vmatprep.subr.bf16.mxu0 %v17233_v35 }
 0x400   :  { %12213 = vmatmul.mubr.msk.f32.gmra.mrb[102].mxu0 %vm1804_vm14, %v15544_v54 }
 0x401   :  { %12215 = vmatprep.mubr.msk.f32.mxu0 %vm1804_vm14, %v15562_v50 }
 0x404   :  { %12216 = vmatmul.mubr.msk.f32.gmra.mrb[104].mxu0 %vm1804_vm14, %v15580_v27 }
 0x405   :  { %12218 = vmatprep.mubr.msk.f32.mxu0 %vm1804_vm14, %v15598_v9 }
 0x408   :  { %12219 = vmatmul.mubr.msk.f32.gmra.mrb[106].mxu0 %vm1804_vm14, %v15611_v47 }
 0x409   :  { %12221 = vmatprep.mubr.msk.f32.mxu0 %vm1804_vm14, %v15650_v4 }
 0x40c   :  { %12222 = vmatmul.mubr.msk.f32.gmra.mrb[108].mxu0 %vm1804_vm14, %v4790_v24 }
 0x40d   :  { %12228 = vmatprep.mubr.msk.f32.mxu0 %vm1804_vm14, %v15682_v25 }
 0x410   :  { %12229 = vmatmul.mubr.msk.f32.vlgmr.msra.gmra.mrb[100].mxu0 %vm1804_vm14, %v15688_v21 }
 0x411   :  { %12231 = vmatprep.mubr.msk.f32.mxu0 %vm1804_vm14, %v15700_v41  ;;  %13196 = vmatpush3.bf16.msk.msra.mxu0 %vm14247_vm10, %v14260_v15 }
 0x412   :  { %13201 = vmatprep.subr.bf16.mxu0 %v17233_v35 }
 0x414   :  { %12232 = vmatmul.mubr.msk.f32.gmra.mrb[102].mxu0 %vm1804_vm14, %v15706_v0  ;;  %v12425_v52 = vpop.f32.mrb[110].mxu1 }
 0x415   :  { %v6714_v53 = vadd.f32 %v16024_v8, %v12425_v52  ;;  %12234 = vmatprep.mubr.msk.f32.mxu0 %vm1804_vm14, %v15712_v55  ;;  %v6642_v61 = vpop.f32.mrb[111].mxu1 }
 0x416   :  { %v6713_v22 = vadd.f32 %v16024_v8, %v6642_v61 }
 0x417   :  { %v6738_v15 = vmul.f32 0.01, %v6714_v53  ;;  %vm6726_vm2 = vcmp.ge.f32.partialorder %v6714_v53, 0.0 }
 0x418   :  { %vm6725_vm12 = vcmp.ge.f32.partialorder %v6713_v22, 0.0  ;;  %v6737_v51 = vmul.f32 0.01, %v6713_v22  ;;  %12235 = vmatmul.mubr.msk.f32.gmra.mrb[104].mxu0 %vm1804_vm14, %v15718_v32  ;;  %v12428_v23 = vpop.f32.mrb[112].mxu1 }
 0x419   :  { %12237 = vmatprep.mubr.msk.f32.mxu0 %vm1804_vm14, %v15723_v60  ;;  %v6652_v40 = vpop.f32.mrb[113].mxu1  ;;  %v16039_v50 = vsel %vm6726_vm2, %v6714_v53, %v6738_v15  ;;  %v6716_v56 = vadd.f32 %v16024_v8, %v12428_v23 }
 0x41a   :  { %v16034_v54 = vsel %vm6725_vm12, %v6713_v22, %v6737_v51  ;;  %v6715_v49 = vadd.f32 %v16024_v8, %v6652_v40  ;;  %v6773_v47 = vrot.slane %v16039_v50, 1 }
 0x41b   :  { %12483 = vmatmul.mubr.msk.f32.vlgmr.msra.gmra.mrb[122].mxu1 %vm1804_vm14, %v16034_v54  ;;  %v6772_v16 = vrot.slane %v16034_v54, 1  ;;  %v6740_v24 = vmul.f32 0.01, %v6716_v56  ;;  %vm6728_vm15 = vcmp.ge.f32.partialorder %v6716_v56, 0.0 }
 0x41c   :  { %v6739_v27 = vmul.f32 0.01, %v6715_v49  ;;  %12238 = vmatmul.mubr.msk.f32.gmra.mrb[106].mxu0 %vm1804_vm14, %v15728_v20  ;;  %v12431_v2 = vpop.f32.mrb[114].mxu1  ;;  %12485 = vmatprep.mubr.msk.f32.mxu1 %vm13707_vm11, %v17234_v14  ;;  %vm6727_vm13 = vcmp.ge.f32.partialorder %v6715_v49, 0.0 }
 0x41d   :  { %12240 = vmatprep.mubr.msk.f32.mxu0 %vm1804_vm14, %v15655_v58  ;;  %v6662_v9 = vpop.f32.mrb[115].mxu1  ;;  %13208 = vmatpush3.bf16.msk.msra.mxu1 %vm14247_vm10, %v14297_v39  ;;  %v6774_v21 = vsel %vm112_vm3, %v6772_v16, %v6773_v47  ;;  %v16070_v0 = vsel %vm6728_vm15, %v6716_v56, %v6740_v24  ;;  %v6718_v44 = vadd.f32 %v16024_v8, %v12431_v2 }
 0x41e   :  { %13213 = vmatprep.subr.bf16.mxu1 %v17233_v35  ;;  %v16056_v4 = vsel %vm6727_vm13, %v6715_v49, %v6739_v27  ;;  %v6717_v25 = vadd.f32 %v16024_v8, %v6662_v9  ;;  %v6777_v20 = vrot.slane %v16070_v0, 1 }
 0x41f   :  { %12486 = vmatmul.mubr.msk.f32.gmra.mrb[124].mxu1 %vm1804_vm14, %v16039_v50  ;;  %v6775_v41 = vrot.slane %v16056_v4, 1  ;;  %v6742_v19 = vmul.f32 0.01, %v6718_v44  ;;  %vm6730_vm4 = vcmp.ge.f32.partialorder %v6718_v44, 0.0 }
 0x420   :  { %12241 = vmatmul.mubr.msk.f32.gmra.mrb[108].mxu0 %vm1804_vm14, %v4924_v33  ;;  %v12434_v58 = vpop.f32.mrb[116].mxu1  ;;  %12488 = vmatprep.mubr.msk.f32.mxu1 %vm13707_vm11, %v17234_v14  ;;  %v6741_v33 = vmul.f32 0.01, %v6717_v25  ;;  %vm6729_vm1 = vcmp.ge.f32.partialorder %v6717_v25, 0.0 }
 0x421   :  { %v6672_v39 = vpop.f32.mrb[117].mxu1  ;;  %12445 = vmatprep.mubr.msk.f32.mxu0 %vm13707_vm11, %v17234_v14  ;;  %v6776_v60 = vsel %vm112_vm3, %v6773_v47, %v6775_v41  ;;  %v6778_v12 = vsel %vm112_vm3, %v6775_v41, %v6777_v20  ;;  %v16100_v1 = vsel %vm6730_vm4, %v6718_v44, %v6742_v19  ;;  %v6720_v38 = vadd.f32 %v16024_v8, %v12434_v58 }
 0x422   :  { %v16086_v34 = vsel %vm6729_vm1, %v6717_v25, %v6741_v33  ;;  %v6719_v48 = vadd.f32 %v16024_v8, %v6672_v39  ;;  %v6781_v18 = vrot.slane %v16100_v1, 1  ;;  %v7251_v58 = vrot.slane %v16034_v54, 3 }
 0x423   :  { %12489 = vmatmul.mubr.msk.f32.gmra.mrb[126].mxu1 %vm1804_vm14, %v16056_v4  ;;  %v6779_v59 = vrot.slane %v16086_v34, 1  ;;  %v6744_v62 = vmul.f32 0.01, %v6720_v38  ;;  %vm6732_vm2 = vcmp.ge.f32.partialorder %v6720_v38, 0.0  ;;  %v7252_v39 = vrot.slane %v16039_v50, 3 }
 0x424   :  { %v12437_v55 = vpop.f32.mrb[118].mxu1  ;;  %12446 = vmatmul.mubr.msk.f32.vlgmr.msra.gmra.mrb[110].mxu0 %vm1804_vm14, %v6774_v21  ;;  %12491 = vmatprep.mubr.msk.f32.mxu1 %vm13707_vm11, %v17234_v14  ;;  %v6743_v28 = vmul.f32 0.01, %v6719_v48  ;;  %vm6731_vm12 = vcmp.ge.f32.partialorder %v6719_v48, 0.0  ;;  %v7254_v33 = vrot.slane %v16056_v4, 3  ;;  %v7078_v19 = vrot.slane %v16039_v50, 2 }
 0x425   :  { %v6682_v32 = vpop.f32.mrb[119].mxu1  ;;  %13204 = vmatpush3.bf16.msk.msra.mxu0 %vm14247_vm10, %v14267_v31  ;;  %12448 = vmatprep.mubr.msk.f32.mxu0 %vm13707_vm11, %v17234_v14  ;;  %v6780_v10 = vsel %vm112_vm3, %v6777_v20, %v6779_v59  ;;  %v6782_v52 = vsel %vm112_vm3, %v6779_v59, %v6781_v18  ;;  %v16124_v61 = vsel %vm6732_vm2, %v6720_v38, %v6744_v62  ;;  %v7077_v20 = vrot.slane %v16034_v54, 2 }
 0x426   :  { %13209 = vmatprep.subr.bf16.mxu0 %v17233_v35  ;;  %v16112_v29 = vsel %vm6731_vm12, %v6719_v48, %v6743_v28  ;;  %v6721_v36 = vadd.f32 %v16024_v8, %v6682_v32  ;;  %v6722_v22 = vadd.f32 %v16024_v8, %v12437_v55  ;;  %v6785_v23 = vrot.slane %v16124_v61, 1 }
 0x427   :  { %12492 = vmatmul.mubr.msk.f32.gmra.mrb[128].mxu1 %vm1804_vm14, %v16070_v0  ;;  %v6783_v53 = vrot.slane %v16112_v29, 1  ;;  %v7253_v44 = vsel %vm630_vm6, %v7251_v58, %v7252_v39  ;;  %v7255_v32 = vsel %vm630_vm6, %v7252_v39, %v7254_v33  ;;  %v7258_v48 = vrot.slane %v16086_v34, 3 }
 0x428   :  { %v16089_v26 = vpop.f32.mrb[120].mxu1  ;;  %12449 = vmatmul.mubr.msk.f32.gmra.mrb[112].mxu0 %vm1804_vm14, %v6776_v60  ;;  %12494 = vmatprep.mubr.msk.f32.mxu1 %vm13707_vm11, %v17234_v14  ;;  %v6745_v15 = vmul.f32 0.01, %v6721_v36  ;;  %vm6733_vm13 = vcmp.ge.f32.partialorder %v6721_v36, 0.0  ;;  %v6746_v40 = vmul.f32 0.01, %v6722_v22 }
 0x429   :  { %v6692_v31 = vpop.f32.mrb[121].mxu1  ;;  %12451 = vmatprep.mubr.msk.f32.mxu0 %vm13707_vm11, %v17234_v14  ;;  %v6784_v51 = vsel %vm112_vm3, %v6781_v18, %v6783_v53  ;;  %vm6734_vm15 = vcmp.ge.f32.partialorder %v6722_v22, 0.0  ;;  %v6786_v27 = vsel %vm112_vm3, %v6783_v53, %v6785_v23  ;;  %v7256_v60 = vrot.slane %v16070_v0, 3 }
 0x42a   :  { %v16136_v49 = vsel %vm6733_vm13, %v6721_v36, %v6745_v15  ;;  %v6723_v56 = vadd.f32 %v16024_v8, %v6692_v31  ;;  %v16148_v9 = vsel %vm6734_vm15, %v6722_v22, %v6746_v40  ;;  %v7079_v31 = vsel %vm442_vm5, %v7077_v20, %v7078_v19 }
 0x42b   :  { %12495 = vmatmul.mubr.msk.f32.gmra.mrb[130].mxu1 %vm1804_vm14, %v16086_v34  ;;  %v6787_v2 = vrot.slane %v16136_v49, 1  ;;  %v6789_v24 = vrot.slane %v16148_v9, 1  ;;  %v7259_v59 = vsel %vm630_vm6, %v7256_v60, %v7258_v48  ;;  %v7260_v38 = vrot.slane %v16100_v1, 3 }
 0x42c   :  { %12452 = vmatmul.mubr.msk.f32.gmra.mrb[114].mxu0 %vm1804_vm14, %v6778_v12  ;;  %12497 = vmatprep.mubr.msk.f32.mxu1 %vm13707_vm11, %v17234_v14  ;;  %v6747_v16 = vmul.f32 0.01, %v6723_v56  ;;  %vm6735_vm1 = vcmp.ge.f32.partialorder %v6723_v56, 0.0  ;;  %v7080_v12 = vrot.slane %v16056_v4, 2  ;;  %v7262_v18 = vrot.slane %v16112_v29, 3 }
 0x42d   :  { %12454 = vmatprep.mubr.msk.f32.mxu0 %vm13707_vm11, %v17234_v14  ;;  %v6788_v47 = vsel %vm112_vm3, %v6785_v23, %v6787_v2  ;;  %v6790_v21 = vsel %vm112_vm3, %v6787_v2, %v6789_v24  ;;  %v7084_v36 = vrot.slane %v16086_v34, 2  ;;  %v7264_v53 = vrot.slane %v16124_v61, 3 }
 0x42e   :  { %v16159_v25 = vsel %vm6735_vm1, %v6723_v56, %v6747_v16  ;;  %v7081_v28 = vsel %vm442_vm5, %v7078_v19, %v7080_v12  ;;  %v7086_v15 = vrot.slane %v16100_v1, 2  ;;  %v7266_v23 = vrot.slane %v16136_v49, 3 }
 0x42f   :  { %12498 = vmatmul.mubr.msk.f32.gmra.mrb[132].mxu1 %vm1804_vm14, %v16100_v1  ;;  %v6791_v41 = vrot.slane %v16159_v25, 1  ;;  %v7088_v56 = vrot.slane %v16112_v29, 2  ;;  %v7268_v2 = vrot.slane %v16148_v9, 3  ;;  %v7270_v58 = vrot.slane %v16159_v25, 3 }
 0x430   :  { %12455 = vmatmul.mubr.msk.f32.gmra.mrb[116].mxu0 %vm1804_vm14, %v6780_v10  ;;  %12500 = vmatprep.mubr.msk.f32.mxu1 %vm13707_vm11, %v17234_v14  ;;  %v7082_v10 = vrot.slane %v16070_v0, 2  ;;  %v7087_v40 = vsel %vm442_vm5, %v7084_v36, %v7086_v15  ;;  %v7096_v20 = vrot.slane %v16159_v25, 2  ;;  %vm5104_vm2 = vcmask 80896  }
 0x431   :  { %12457 = vmatprep.mubr.msk.f32.mxu0 %vm13707_vm11, %v17234_v14  ;;  %v6792_v55 = vsel %vm112_vm3, %v6789_v24, %v6791_v41  ;;  %v7089_v16 = vsel %vm442_vm5, %v7086_v15, %v7088_v56  ;;  %v7269_v24 = vsel %vm630_vm6, %v7266_v23, %v7268_v2  ;;  %v7611_v15 = vrot.slane %v16112_v29, 5 }
 0x432   :  { %v7083_v62 = vsel %vm442_vm5, %v7080_v12, %v7082_v10  ;;  %v7085_v22 = vsel %vm442_vm5, %v7082_v10, %v7084_v36  ;;  %v7605_v12 = vrot.slane %v16070_v0, 5  ;;  %v7609_v36 = vrot.slane %v16100_v1, 5 }
 0x433   :  { %12501 = vmatmul.mubr.msk.f32.gmra.mrb[134].mxu1 %vm1804_vm14, %v16112_v29 }
 0x434   :  { %12458 = vmatmul.mubr.msk.f32.gmra.mrb[118].mxu0 %vm1804_vm14, %v6782_v52  ;;  %12503 = vmatprep.mubr.msk.f32.mxu1 %vm13707_vm11, %v17234_v14  ;;  %v7263_v52 = vsel %vm630_vm6, %v7260_v38, %v7262_v18 }
 0x435   :  { %12460 = vmatprep.mubr.msk.f32.mxu0 %vm13707_vm11, %v17234_v14 }
 0x437   :  { %12504 = vmatmul.mubr.msk.f32.gmra.mrb[136].mxu1 %vm1804_vm14, %v16124_v61 }
 0x438   :  { %12461 = vmatmul.mubr.msk.f32.gmra.mrb[120].mxu0 %vm1804_vm14, %v6784_v51  ;;  %12506 = vmatprep.mubr.msk.f32.mxu1 %vm13707_vm11, %v17234_v14  ;;  %v7265_v51 = vsel %vm630_vm6, %v7262_v18, %v7264_v53  ;;  %v17235_v18 = vld [vmem:[#allocation2_spill] sm:$0xff] }
 0x439   :  { %12463 = vmatprep.mubr.msk.f32.mxu0 %vm13707_vm11, %v17234_v14 }
 0x43b   :  { %12507 = vmatmul.mubr.msk.f32.gmra.mrb[138].mxu1 %vm1804_vm14, %v16136_v49 }
 0x43c   :  { %12464 = vmatmul.mubr.msk.f32.gmra.mrb[122].mxu0 %vm1804_vm14, %v6786_v27  ;;  %12509 = vmatprep.mubr.msk.f32.mxu1 %vm13707_vm11, %v17234_v14  ;;  %v7267_v27 = vsel %vm630_vm6, %v7264_v53, %v7266_v23  ;;  %v7430_v53 = vrot.slane %v16070_v0, 4  ;;  %v7612_v23 = vsel %vm1006_vm7, %v7609_v36, %v7611_v15 }
 0x43d   :  { %12466 = vmatprep.mubr.msk.f32.mxu0 %vm13707_vm11, %v17234_v14 }
 0x43f   :  { %12510 = vmatmul.mubr.msk.f32.gmra.mrb[140].mxu1 %vm1804_vm14, %v16148_v9 }
 0x440   :  { %12467 = vmatmul.mubr.msk.f32.gmra.mrb[124].mxu0 %vm1804_vm14, %v6788_v47  ;;  %12512 = vmatprep.mubr.msk.f32.mxu1 %vm13707_vm11, %v17234_v14  ;;  %v7090_v47 = vrot.slane %v16124_v61, 2 }
 0x441   :  { %12469 = vmatprep.mubr.msk.f32.mxu0 %vm13707_vm11, %v17234_v14 }
 0x442   :  { %v7091_v39 = vsel %vm442_vm5, %v7088_v56, %v7090_v47 }
 0x443   :  { %12513 = vmatmul.mubr.msk.f32.gmra.mrb[142].mxu1 %vm1804_vm14, %v16159_v25 }
 0x444   :  { %12470 = vmatmul.mubr.msk.f32.gmra.mrb[126].mxu0 %vm1804_vm14, %v6790_v21  ;;  %12556 = vmatprep.mubr.msk.f32.mxu1 %vm13707_vm11, %v17234_v14  ;;  %v7092_v21 = vrot.slane %v16136_v49, 2 }
 0x445   :  { %12472 = vmatprep.mubr.msk.f32.mxu0 %vm13707_vm11, %v17234_v14 }
 0x447   :  { %12557 = vmatmul.mubr.msk.f32.vlgmr.msra.gmra.mrb[144].mxu1 %vm1804_vm14, %v7253_v44  ;;  %v7093_v44 = vsel %vm442_vm5, %v7090_v47, %v7092_v21  ;;  %v6724_v47 = vadd.f32 %v16024_v8, %v16089_v26  ;;  %v7438_v26 = vrot.slane %v16124_v61, 4 }
 0x448   :  { %12473 = vmatmul.mubr.msk.f32.gmra.mrb[128].mxu0 %vm1804_vm14, %v6792_v55  ;;  %12559 = vmatprep.mubr.msk.f32.mxu1 %vm13707_vm11, %v17234_v14  ;;  %v7600_v55 = vrot.slane %v16034_v54, 5 }
 0x449   :  { %12475 = vmatprep.mubr.msk.f32.mxu0 %vm13707_vm11, %v17234_v14  ;;  %13216 = vmatpush3.bf16.msk.msra.mxu1 %vm14247_vm10, %v14469_v45  ;;  %v7257_v45 = vsel %vm630_vm6, %v7254_v33, %v7256_v60  ;;  %v7094_v33 = vrot.slane %v16148_v9, 2  ;;  %vm6736_vm4 = vcmp.ge.f32.partialorder %v6724_v47, 0.0 }
 0x44a   :  { %13221 = vmatprep.subr.bf16.mxu1 %v17233_v35 }
 0x44b   :  { %12560 = vmatmul.mubr.msk.f32.gmra.mrb[146].mxu1 %vm1804_vm14, %v7255_v32  ;;  %v7601_v32 = vrot.slane %v16039_v50, 5  ;;  %v7095_v60 = vsel %vm442_vm5, %v7092_v21, %v7094_v33  ;;  %v7617_v21 = vrot.slane %v16148_v9, 5 }
 0x44c   :  { %12476 = vmatmul.mubr.msk.f32.gmra.mrb[130].mxu0 %vm1804_vm14, %v6791_v41  ;;  %12562 = vmatprep.mubr.msk.f32.mxu1 %vm13707_vm11, %v17234_v14  ;;  %v7271_v41 = vsel %vm630_vm6, %v7268_v2, %v7270_v58 }
 0x44d   :  { %12519 = vmatprep.mubr.msk.f32.mxu0 %vm13707_vm11, %v17234_v14  ;;  %v7602_v19 = vsel %vm1006_vm7, %v7600_v55, %v7601_v32 }
 0x44f   :  { %12563 = vmatmul.mubr.msk.f32.gmra.mrb[148].mxu1 %vm1804_vm14, %v7257_v45  ;;  %v7603_v45 = vrot.slane %v16056_v4, 5 }
 0x450   :  { %12520 = vmatmul.mubr.msk.f32.vlgmr.msra.gmra.mrb[132].mxu0 %vm1804_vm14, %v7079_v31  ;;  %12565 = vmatprep.mubr.msk.f32.mxu1 %vm13707_vm11, %v17234_v14 }
 0x451   :  { %13212 = vmatpush3.bf16.msk.msra.mxu0 %vm14247_vm10, %v14467_v43  ;;  %12522 = vmatprep.mubr.msk.f32.mxu0 %vm13707_vm11, %v17234_v14  ;;  %v7261_v43 = vsel %vm630_vm6, %v7258_v48, %v7260_v38  ;;  %v7097_v48 = vsel %vm442_vm5, %v7094_v33, %v7096_v20  ;;  %v7604_v31 = vsel %vm1006_vm7, %v7601_v32, %v7603_v45  ;;  %v7426_v38 = vrot.slane %v16039_v50, 4 }
 0x452   :  { %13217 = vmatprep.subr.bf16.mxu0 %v17233_v35  ;;  %v7619_v33 = vrot.slane %v16159_v25, 5 }
 0x453   :  { %12566 = vmatmul.mubr.msk.f32.gmra.mrb[150].mxu1 %vm1804_vm14, %v7259_v59  ;;  %v7425_v59 = vrot.slane %v16034_v54, 4 }
 0x454   :  { %12523 = vmatmul.mubr.msk.f32.gmra.mrb[134].mxu0 %vm1804_vm14, %v7081_v28  ;;  %12568 = vmatprep.mubr.msk.f32.mxu1 %vm13707_vm11, %v17234_v14  ;;  %v7607_v28 = vrot.slane %v16086_v34, 5 }
 0x455   :  { %12525 = vmatprep.mubr.msk.f32.mxu0 %vm13707_vm11, %v17234_v14  ;;  %v7427_v10 = vsel %vm161_vm0, %v7425_v59, %v7426_v38  ;;  %v7953_v59 = vrot.slane %v16039_v50, 7 }
 0x457   :  { %12569 = vmatmul.mubr.msk.f32.gmra.mrb[152].mxu1 %vm1804_vm14, %v7261_v43  ;;  %v7428_v43 = vrot.slane %v16056_v4, 4 }
 0x458   :  { %12526 = vmatmul.mubr.msk.f32.gmra.mrb[136].mxu0 %vm1804_vm14, %v7083_v62  ;;  %12571 = vmatprep.mubr.msk.f32.mxu1 %vm13707_vm11, %v17234_v14  ;;  %v7608_v62 = vsel %vm1006_vm7, %v7605_v12, %v7607_v28 }
 0x459   :  { %12528 = vmatprep.mubr.msk.f32.mxu0 %vm13707_vm11, %v17234_v14 }
 0x45b   :  { %12572 = vmatmul.mubr.msk.f32.gmra.mrb[154].mxu1 %vm1804_vm14, %v7263_v52  ;;  %v7429_v52 = vsel %vm161_vm0, %v7426_v38, %v7428_v43 }
 0x45c   :  { %12529 = vmatmul.mubr.msk.f32.gmra.mrb[138].mxu0 %vm1804_vm14, %v7085_v22  ;;  %12574 = vmatprep.mubr.msk.f32.mxu1 %vm13707_vm11, %v17234_v14  ;;  %v7610_v22 = vsel %vm1006_vm7, %v7607_v28, %v7609_v36  ;;  %v7776_v36 = vrot.slane %v16034_v54, 6 }
 0x45d   :  { %12531 = vmatprep.mubr.msk.f32.mxu0 %vm13707_vm11, %v17234_v14 }
 0x45f   :  { %12575 = vmatmul.mubr.msk.f32.gmra.mrb[156].mxu1 %vm1804_vm14, %v7265_v51  ;;  %v7432_v51 = vrot.slane %v16086_v34, 4 }
 0x460   :  { %12532 = vmatmul.mubr.msk.f32.gmra.mrb[140].mxu0 %vm1804_vm14, %v7087_v40  ;;  %12577 = vmatprep.mubr.msk.f32.mxu1 %vm13707_vm11, %v17234_v14  ;;  %v7613_v40 = vrot.slane %v16124_v61, 5 }
 0x461   :  { %12534 = vmatprep.mubr.msk.f32.mxu0 %vm13707_vm11, %v17234_v14  ;;  %v7433_v56 = vsel %vm161_vm0, %v7430_v53, %v7432_v51 }
 0x462   :  { %v7614_v2 = vsel %vm1006_vm7, %v7611_v15, %v7613_v40  ;;  %v17236_v15 = vld [vmem:[#allocation3_spill] sm:$0xff] }
 0x463   :  { %12578 = vmatmul.mubr.msk.f32.gmra.mrb[158].mxu1 %vm1804_vm14, %v7267_v27  ;;  %v7434_v27 = vrot.slane %v16100_v1, 4 }
 0x464   :  { %12535 = vmatmul.mubr.msk.f32.gmra.mrb[142].mxu0 %vm1804_vm14, %v7089_v16  ;;  %12580 = vmatprep.mubr.msk.f32.mxu1 %vm13707_vm11, %v17234_v14  ;;  %v7615_v16 = vrot.slane %v16136_v49, 5 }
 0x465   :  { %12537 = vmatprep.mubr.msk.f32.mxu0 %vm13707_vm11, %v17234_v14 }
 0x467   :  { %12581 = vmatmul.mubr.msk.f32.gmra.mrb[160].mxu1 %vm1804_vm14, %v7269_v24  ;;  %v7435_v24 = vsel %vm161_vm0, %v7432_v51, %v7434_v27  ;;  %v7961_v51 = vrot.slane %v16100_v1, 7 }
 0x468   :  { %12538 = vmatmul.mubr.msk.f32.gmra.mrb[144].mxu0 %vm1804_vm14, %v7091_v39  ;;  %12583 = vmatprep.mubr.msk.f32.mxu1 %vm13707_vm11, %v17234_v14  ;;  %v7616_v39 = vsel %vm1006_vm7, %v7613_v40, %v7615_v16  ;;  %v7781_v40 = vrot.slane %v16070_v0, 6 }
 0x469   :  { %12540 = vmatprep.mubr.msk.f32.mxu0 %vm13707_vm11, %v17234_v14 }
 0x46b   :  { %12584 = vmatmul.mubr.msk.f32.gmra.mrb[162].mxu1 %vm1804_vm14, %v7271_v41  ;;  %v6748_v41 = vmul.f32 0.01, %v6724_v47 }
 0x46c   :  { %12541 = vmatmul.mubr.msk.f32.gmra.mrb[146].mxu0 %vm1804_vm14, %v7093_v44  ;;  %12586 = vmatprep.mubr.msk.f32.mxu1 %vm13707_vm11, %v17234_v14  ;;  %v7618_v44 = vsel %vm1006_vm7, %v7615_v16, %v7617_v21  ;;  %v7783_v16 = vrot.slane %v16086_v34, 6 }
 0x46d   :  { %12543 = vmatprep.mubr.msk.f32.mxu0 %vm13707_vm11, %v17234_v14  ;;  %v16386_v55 = vsel %vm6736_vm4, %v6724_v47, %v6748_v41  ;;  %v7967_v41 = vrot.slane %v16136_v49, 7 }
 0x46f   :  { %12587 = vmatmul.mubr.msk.f32.gmra.mrb[164].mxu1 %vm1804_vm14, %v7270_v58  ;;  %v7436_v58 = vrot.slane %v16112_v29, 4 }
 0x470   :  { %12544 = vmatmul.mubr.msk.f32.gmra.mrb[148].mxu0 %vm1804_vm14, %v7095_v60  ;;  %12630 = vmatprep.mubr.msk.f32.mxu1 %vm13707_vm11, %v17234_v14  ;;  %v7440_v60 = vrot.slane %v16136_v49, 4 }
 0x471   :  { %12546 = vmatprep.mubr.msk.f32.mxu0 %vm13707_vm11, %v17234_v14  ;;  %v7437_v8 = vsel %vm161_vm0, %v7434_v27, %v7436_v58  ;;  %v7439_v32 = vsel %vm161_vm0, %v7436_v58, %v7438_v26  ;;  %v7963_v27 = vrot.slane %v16112_v29, 7  ;;  %v7784_v58 = vsel %vm1196_vm8, %v7781_v40, %v7783_v16 }
 0x473   :  { %12631 = vmatmul.mubr.msk.f32.vlgmr.msra.gmra.mrb[166].mxu1 %vm1804_vm14, %v7602_v19  ;;  %v7621_v19 = vrot.slane %v16386_v55, 5  ;;  %v7964_v47 = vsel %vm1386_vm9, %v7961_v51, %v7963_v27 }
 0x474   :  { %12547 = vmatmul.mubr.msk.f32.gmra.mrb[150].mxu0 %vm1804_vm14, %v7097_v48  ;;  %12633 = vmatprep.mubr.msk.f32.mxu1 %vm13707_vm11, %v17234_v14  ;;  %v7442_v48 = vrot.slane %v16148_v9, 4 }
 0x475   :  { %12549 = vmatprep.mubr.msk.f32.mxu0 %vm13707_vm11, %v17234_v14  ;;  %13224 = vmatpush3.bf16.msk.msra.mxu1 %vm14247_vm10, %v14593_v30  ;;  %v7606_v30 = vsel %vm1006_vm7, %v7603_v45, %v7605_v12  ;;  %v7441_v45 = vsel %vm161_vm0, %v7438_v26, %v7440_v60  ;;  %v7952_v12 = vrot.slane %v16034_v54, 7  ;;  %v7779_v54 = vrot.slane %v16056_v4, 6 }
 0x476   :  { %13231 = vmatprep.subr.msk.bf16.mxu1 %vm14247_vm10, %v15053_v11  ;;  %v7443_v38 = vsel %vm161_vm0, %v7440_v60, %v7442_v48  ;;  %v7787_v26 = vrot.slane %v16112_v29, 6  ;;  %v7789_v60 = vrot.slane %v16124_v61, 6 }
 0x477   :  { %12634 = vmatmul.mubr.msk.f32.gmra.mrb[168].mxu1 %vm1804_vm14, %v7604_v31  ;;  %v7622_v31 = vsel %vm1006_vm7, %v7619_v33, %v7621_v19  ;;  %v7954_v28 = vsel %vm1386_vm9, %v7952_v12, %v7953_v59  ;;  %v7971_v19 = vrot.slane %v16159_v25, 7  ;;  %v7973_v12 = vrot.slane %v16386_v55, 7 }
 0x478   :  { %12550 = vmatmul.mubr.msk.f32.gmra.mrb[152].mxu0 %vm1804_vm14, %v7096_v20  ;;  %12636 = vmatprep.mubr.msk.f32.mxu1 %vm13707_vm11, %v17234_v14  ;;  %v7620_v20 = vsel %vm1006_vm7, %v7617_v21, %v7619_v33  ;;  %v7969_v33 = vrot.slane %v16148_v9, 7 }
 0x479   :  { %12593 = vmatprep.mubr.msk.f32.mxu0 %vm13707_vm11, %v17234_v14 }
 0x47b   :  { %12637 = vmatmul.mubr.msk.f32.gmra.mrb[170].mxu1 %vm1804_vm14, %v7606_v30  ;;  %v7444_v30 = vrot.slane %v16159_v25, 4 }
 0x47c   :  { %12594 = vmatmul.mubr.msk.f32.vlgmr.msra.gmra.mrb[154].mxu0 %vm1804_vm14, %v7427_v10  ;;  %12639 = vmatprep.mubr.msk.f32.mxu1 %vm13707_vm11, %v17234_v14  ;;  %v7955_v10 = vrot.slane %v16056_v4, 7 }
 0x47d   :  { %13220 = vmatpush3.bf16.msk.msra.mxu0 %vm14247_vm10, %v17235_v18  ;;  %12596 = vmatprep.mubr.msk.f32.mxu0 %vm13707_vm11, %v17234_v14 }
 0x47e   :  { %13225 = vmatprep.subr.bf16.mxu0 %v17233_v35  ;;  %v7431_v35 = vsel %vm161_vm0, %v7428_v43, %v7430_v53  ;;  %v7445_v43 = vsel %vm161_vm0, %v7442_v48, %v7444_v30  ;;  %v7956_v18 = vsel %vm1386_vm9, %v7953_v59, %v7955_v10  ;;  %v7959_v53 = vrot.slane %v16086_v34, 7 }
 0x47f   :  { %12640 = vmatmul.mubr.msk.f32.gmra.mrb[172].mxu1 %vm1804_vm14, %v7608_v62  ;;  %v7957_v62 = vrot.slane %v16070_v0, 7  ;;  %v7791_v48 = vrot.slane %v16136_v49, 6 }
 0x480   :  { %12597 = vmatmul.mubr.msk.f32.gmra.mrb[156].mxu0 %vm1804_vm14, %v7429_v52  ;;  %12642 = vmatprep.mubr.msk.f32.mxu1 %vm13707_vm11, %v17234_v14  ;;  %v7777_v52 = vrot.slane %v16039_v50, 6 }
 0x481   :  { %12599 = vmatprep.mubr.msk.f32.mxu0 %vm13707_vm11, %v17234_v14  ;;  %v7792_v59 = vsel %vm1196_vm8, %v7789_v60, %v7791_v48 }
 0x483   :  { %12643 = vmatmul.mubr.msk.f32.gmra.mrb[174].mxu1 %vm1804_vm14, %v7610_v22  ;;  %v7778_v22 = vsel %vm1196_vm8, %v7776_v36, %v7777_v52 }
 0x484   :  { %12600 = vmatmul.mubr.msk.f32.gmra.mrb[158].mxu0 %vm1804_vm14, %v7431_v35  ;;  %12645 = vmatprep.mubr.msk.f32.mxu1 %vm13707_vm11, %v17234_v14  ;;  %v7960_v35 = vsel %vm1386_vm9, %v7957_v62, %v7959_v53 }
 0x485   :  { %12602 = vmatprep.mubr.msk.f32.mxu0 %vm13707_vm11, %v17234_v14 }
 0x487   :  { %12646 = vmatmul.mubr.msk.f32.gmra.mrb[176].mxu1 %vm1804_vm14, %v7612_v23  ;;  %v7780_v23 = vsel %vm1196_vm8, %v7777_v52, %v7779_v54 }
 0x488   :  { %12603 = vmatmul.mubr.msk.f32.gmra.mrb[160].mxu0 %vm1804_vm14, %v7433_v56  ;;  %12648 = vmatprep.mubr.msk.f32.mxu1 %vm13707_vm11, %v17234_v14  ;;  %v7962_v56 = vsel %vm1386_vm9, %v7959_v53, %v7961_v51 }
 0x489   :  { %12605 = vmatprep.mubr.msk.f32.mxu0 %vm13707_vm11, %v17234_v14 }
 0x48b   :  { %12649 = vmatmul.mubr.msk.f32.gmra.mrb[178].mxu1 %vm1804_vm14, %v7614_v2  ;;  %v7782_v2 = vsel %vm1196_vm8, %v7779_v54, %v7781_v40 }
 0x48c   :  { %12606 = vmatmul.mubr.msk.f32.gmra.mrb[162].mxu0 %vm1804_vm14, %v7435_v24  ;;  %12651 = vmatprep.mubr.msk.f32.mxu1 %vm13707_vm11, %v17234_v14  ;;  %v7965_v24 = vrot.slane %v16124_v61, 7 }
 0x48d   :  { %12608 = vmatprep.mubr.msk.f32.mxu0 %vm13707_vm11, %v17234_v14 }
 0x48e   :  { %v7966_v21 = vsel %vm1386_vm9, %v7963_v27, %v7965_v24 }
 0x48f   :  { %12652 = vmatmul.mubr.msk.f32.gmra.mrb[180].mxu1 %vm1804_vm14, %v7616_v39  ;;  %v7785_v39 = vrot.slane %v16100_v1, 6 }
 0x490   :  { %12609 = vmatmul.mubr.msk.f32.gmra.mrb[164].mxu0 %vm1804_vm14, %v7437_v8  ;;  %12654 = vmatprep.mubr.msk.f32.mxu1 %vm13707_vm11, %v17234_v14 }
 0x491   :  { %12611 = vmatprep.mubr.msk.f32.mxu0 %vm13707_vm11, %v17234_v14  ;;  %v7786_v8 = vsel %vm1196_vm8, %v7783_v16, %v7785_v39 }
 0x493   :  { %12655 = vmatmul.mubr.msk.f32.gmra.mrb[182].mxu1 %vm1804_vm14, %v7618_v44  ;;  %v7968_v44 = vsel %vm1386_vm9, %v7965_v24, %v7967_v41 }
 0x494   :  { %12612 = vmatmul.mubr.msk.f32.gmra.mrb[166].mxu0 %vm1804_vm14, %v7439_v32  ;;  %12657 = vmatprep.mubr.msk.f32.mxu1 %vm13707_vm11, %v17234_v14  ;;  %v7788_v32 = vsel %vm1196_vm8, %v7785_v39, %v7787_v26 }
 0x495   :  { %12614 = vmatprep.mubr.msk.f32.mxu0 %vm13707_vm11, %v17234_v14 }
 0x497   :  { %12658 = vmatmul.mubr.msk.f32.gmra.mrb[184].mxu1 %vm1804_vm14, %v7620_v20  ;;  %v7970_v20 = vsel %vm1386_vm9, %v7967_v41, %v7969_v33 }
 0x498   :  { %12615 = vmatmul.mubr.msk.f32.gmra.mrb[168].mxu0 %vm1804_vm14, %v7441_v45  ;;  %12660 = vmatprep.mubr.msk.f32.mxu1 %vm13707_vm11, %v17234_v14  ;;  %v7790_v45 = vsel %vm1196_vm8, %v7787_v26, %v7789_v60 }
 0x499   :  { %12617 = vmatprep.mubr.msk.f32.mxu0 %vm13707_vm11, %v17234_v14 }
 0x49b   :  { %12661 = vmatmul.mubr.msk.f32.gmra.mrb[186].mxu1 %vm1804_vm14, %v7622_v31  ;;  %v7972_v31 = vsel %vm1386_vm9, %v7969_v33, %v7971_v19 }
 0x49c   :  { %12618 = vmatmul.mubr.msk.f32.gmra.mrb[170].mxu0 %vm1804_vm14, %v7443_v38  ;;  %12704 = vmatprep.mubr.msk.f32.mxu1 %vm13707_vm11, %v17234_v14  ;;  %v7793_v38 = vrot.slane %v16148_v9, 6 }
 0x49d   :  { %12620 = vmatprep.mubr.msk.f32.mxu0 %vm13707_vm11, %v17234_v14 }
 0x49f   :  { %12705 = vmatmul.mubr.msk.f32.vlgmr.msra.gmra.mrb[188].mxu1 %vm1804_vm14, %v7954_v28  ;;  %v7794_v28 = vsel %vm1196_vm8, %v7791_v48, %v7793_v38 }
 0x4a0   :  { %12621 = vmatmul.mubr.msk.f32.gmra.mrb[172].mxu0 %vm1804_vm14, %v7445_v43  ;;  %12707 = vmatprep.mubr.msk.f32.mxu1 %vm13707_vm11, %v17234_v14 }
 0x4a1   :  { %12623 = vmatprep.mubr.msk.f32.mxu0 %vm13707_vm11, %v17234_v14  ;;  %13234 = vmatpush3.bf16.msk.msra.mxu1 %vm14247_vm10, %v15053_v11  ;;  %v7958_v11 = vsel %vm1386_vm9, %v7955_v10, %v7957_v62  ;;  %v7795_v10 = vrot.slane %v16159_v25, 6 }
 0x4a2   :  { %13237 = vmatprep.subr.msk.bf16.mxu1 %vm14247_vm10, %v15190_v17 }
 0x4a3   :  { %12708 = vmatmul.mubr.msk.f32.gmra.mrb[190].mxu1 %vm1804_vm14, %v7956_v18  ;;  %v7796_v43 = vsel %vm1196_vm8, %v7793_v38, %v7795_v10  ;;  %v7797_v18 = vrot.slane %v16386_v55, 6 }
 0x4a4   :  { %12624 = vmatmul.mubr.msk.f32.gmra.mrb[174].mxu0 %vm1804_vm14, %v7444_v30  ;;  %12710 = vmatprep.mubr.msk.f32.mxu1 %vm13707_vm11, %v17234_v14  ;;  %v7974_v30 = vsel %vm1386_vm9, %v7971_v19, %v7973_v12 }
 0x4a5   :  { %12667 = vmatprep.mubr.msk.f32.mxu0 %vm13707_vm11, %v17234_v14  ;;  %v7798_v62 = vsel %vm1196_vm8, %v7795_v10, %v7797_v18 }
 0x4a7   :  { %12711 = vmatmul.mubr.msk.f32.gmra.mrb[192].mxu1 %vm1804_vm14, %v7958_v11 }
 0x4a8   :  { %12668 = vmatmul.mubr.msk.f32.vlgmr.msra.gmra.mrb[176].mxu0 %vm1804_vm14, %v7778_v22  ;;  %12713 = vmatprep.mubr.msk.f32.mxu1 %vm13707_vm11, %v17234_v14 }
 0x4a9   :  { %13228 = vmatpush3.bf16.msk.msra.mxu0 %vm14247_vm10, %v17236_v15  ;;  %12670 = vmatprep.mubr.msk.f32.mxu0 %vm13707_vm11, %v17234_v14 }
 0x4ab   :  { %12714 = vmatmul.mubr.msk.f32.gmra.mrb[194].mxu1 %vm1804_vm14, %v7960_v35 }
 0x4ac   :  { %12671 = vmatmul.mubr.msk.f32.gmra.mrb[178].mxu0 %vm1804_vm14, %v7780_v23  ;;  %12716 = vmatprep.mubr.msk.f32.mxu1 %vm13707_vm11, %v17234_v14 }
 0x4ad   :  { %12673 = vmatprep.mubr.msk.f32.mxu0 %vm13707_vm11, %v17234_v14 }
 0x4af   :  { %12717 = vmatmul.mubr.msk.f32.gmra.mrb[196].mxu1 %vm1804_vm14, %v7962_v56 }
 0x4b0   :  { %12674 = vmatmul.mubr.msk.f32.gmra.mrb[180].mxu0 %vm1804_vm14, %v7782_v2  ;;  %12719 = vmatprep.mubr.msk.f32.mxu1 %vm13707_vm11, %v17234_v14 }
 0x4b1   :  { %12676 = vmatprep.mubr.msk.f32.mxu0 %vm13707_vm11, %v17234_v14 }
 0x4b3   :  { %12720 = vmatmul.mubr.msk.f32.gmra.mrb[198].mxu1 %vm1804_vm14, %v7964_v47 }
 0x4b4   :  { %12677 = vmatmul.mubr.msk.f32.gmra.mrb[182].mxu0 %vm1804_vm14, %v7784_v58  ;;  %12722 = vmatprep.mubr.msk.f32.mxu1 %vm13707_vm11, %v17234_v14 }
 0x4b5   :  { %12679 = vmatprep.mubr.msk.f32.mxu0 %vm13707_vm11, %v17234_v14 }
 0x4b7   :  { %12723 = vmatmul.mubr.msk.f32.gmra.mrb[200].mxu1 %vm1804_vm14, %v7966_v21 }
 0x4b8   :  { %12680 = vmatmul.mubr.msk.f32.gmra.mrb[184].mxu0 %vm1804_vm14, %v7786_v8  ;;  %12725 = vmatprep.mubr.msk.f32.mxu1 %vm13707_vm11, %v17234_v14 }
 0x4b9   :  { %12682 = vmatprep.mubr.msk.f32.mxu0 %vm13707_vm11, %v17234_v14 }
 0x4bb   :  { %12726 = vmatmul.mubr.msk.f32.gmra.mrb[202].mxu1 %vm1804_vm14, %v7968_v44 }
 0x4bc   :  { %12683 = vmatmul.mubr.msk.f32.gmra.mrb[186].mxu0 %vm1804_vm14, %v7788_v32  ;;  %12728 = vmatprep.mubr.msk.f32.mxu1 %vm13707_vm11, %v17234_v14 }
 0x4bd   :  { %12685 = vmatprep.mubr.msk.f32.mxu0 %vm13707_vm11, %v17234_v14 }
 0x4bf   :  { %12729 = vmatmul.mubr.msk.f32.gmra.mrb[204].mxu1 %vm1804_vm14, %v7970_v20 }
 0x4c0   :  { %12686 = vmatmul.mubr.msk.f32.gmra.mrb[188].mxu0 %vm1804_vm14, %v7790_v45  ;;  %12731 = vmatprep.mubr.msk.f32.mxu1 %vm13707_vm11, %v17234_v14 }
 0x4c1   :  { %12688 = vmatprep.mubr.msk.f32.mxu0 %vm13707_vm11, %v17234_v14 }
 0x4c3   :  { %12732 = vmatmul.mubr.msk.f32.gmra.mrb[206].mxu1 %vm1804_vm14, %v7972_v31 }
 0x4c4   :  { %12689 = vmatmul.mubr.msk.f32.gmra.mrb[190].mxu0 %vm1804_vm14, %v7792_v59  ;;  %12734 = vmatprep.mubr.msk.f32.mxu1 %vm13707_vm11, %v17234_v14 }
 0x4c5   :  { %12691 = vmatprep.mubr.msk.f32.mxu0 %vm13707_vm11, %v17234_v14 }
 0x4c7   :  { %12735 = vmatmul.mubr.msk.f32.gmra.mrb[208].mxu1 %vm1804_vm14, %v7974_v30 }
 0x4c8   :  { %12692 = vmatmul.mubr.msk.f32.gmra.mrb[192].mxu0 %vm1804_vm14, %v7794_v28 }
 0x4c9   :  { %12694 = vmatprep.mubr.msk.f32.mxu0 %vm13707_vm11, %v17234_v14 }
 0x4cc   :  { %12695 = vmatmul.mubr.msk.f32.gmra.mrb[194].mxu0 %vm1804_vm14, %v7796_v43 }
 0x4cd   :  { %12697 = vmatprep.mubr.msk.f32.mxu0 %vm13707_vm11, %v17234_v14 }
 0x4d0   :  { %12698 = vmatmul.mubr.msk.f32.gmra.mrb[196].mxu0 %vm1804_vm14, %v7798_v62 }
 0x4d1   :  { %12741 = vmatprep.mubr.msk.f32.mxu0 %vm13707_vm11, %v17234_v14 }
 0x4d4   :  { %12742 = vmatmul.mubr.msk.f32.vlgmr.msra.gmra.mrb[198].mxu0 %vm1804_vm14, %v16039_v50  ;;  %v16558_v50 = vld [vmem:[%s17219_s6] ss:$0 sm:$0xff] }
 0x4d5   :  { %12744 = vmatprep.mubr.msk.f32.mxu0 %vm13707_vm11, %v17234_v14 }
 0x4d8   :  { %12745 = vmatmul.mubr.msk.f32.gmra.mrb[200].mxu0 %vm1804_vm14, %v16056_v4 }
 0x4d9   :  { %12747 = vmatprep.mubr.msk.f32.mxu0 %vm13707_vm11, %v17234_v14 }
 0x4dc   :  { %12748 = vmatmul.mubr.msk.f32.gmra.mrb[202].mxu0 %vm1804_vm14, %v16070_v0 }
 0x4dd   :  { %12750 = vmatprep.mubr.msk.f32.mxu0 %vm13707_vm11, %v17234_v14 }
 0x4e0   :  { %12751 = vmatmul.mubr.msk.f32.gmra.mrb[204].mxu0 %vm1804_vm14, %v16086_v34 }
 0x4e1   :  { %12753 = vmatprep.mubr.msk.f32.mxu0 %vm13707_vm11, %v17234_v14 }
 0x4e3   :  { %v12230_v4 = vpop.f32.mrb[100].mxu0 }
 0x4e4   :  { %v5065_v36 = vadd.f32 %v12230_v4, %v16558_v50  ;;  %v4999_v52 = vpop.f32.mrb[101].mxu0  ;;  %12754 = vmatmul.mubr.msk.f32.gmra.mrb[206].mxu0 %vm1804_vm14, %v16100_v1 }
 0x4e5   :  { %v5064_v0 = vadd.f32 %v16558_v50, %v4999_v52  ;;  %12756 = vmatprep.mubr.msk.f32.mxu0 %vm13707_vm11, %v17234_v14 }
 0x4e6   :  { %vm5075_vm12 = vcmp.ge.f32.partialorder %v5065_v36, 0.0  ;;  %v5085_v34 = vmul.f32 0.01, %v5065_v36 }
 0x4e7   :  { %vm5074_vm13 = vcmp.ge.f32.partialorder %v5064_v0, 0.0  ;;  %v5084_v11 = vmul.f32 0.01, %v5064_v0  ;;  %v12233_v53 = vpop.f32.mrb[102].mxu0 }
 0x4e8   :  { %v5095_v22 = vsel %vm5075_vm12, %v5065_v36, %v5085_v34  ;;  %v5067_v54 = vadd.f32 %v12233_v53, %v16558_v50  ;;  %v5009_v15 = vpop.f32.mrb[103].mxu0  ;;  %12757 = vmatmul.mubr.msk.f32.gmra.mrb[208].mxu0 %vm1804_vm14, %v16112_v29 }
 0x4e9   :  { %5106 = vst.msk [vmem:[%s17220_s7 + $0x8] sm:$0xff] %vm5104_vm2, %v5095_v22  ;;  %v5094_v1 = vsel %vm5074_vm13, %v5064_v0, %v5084_v11  ;;  %v5066_v35 = vadd.f32 %v16558_v50, %v5009_v15  ;;  %12759 = vmatprep.mubr.msk.f32.mxu0 %vm13707_vm11, %v17234_v14 }
 0x4ea   :  { %5105 = vst.msk [vmem:[%s17220_s7] sm:$0xff] %vm5104_vm2, %v5094_v1  ;;  %vm5077_vm15 = vcmp.ge.f32.partialorder %v5067_v54, 0.0  ;;  %v5087_v51 = vmul.f32 0.01, %v5067_v54 }
 0x4eb   :  { %vm5076_vm1 = vcmp.ge.f32.partialorder %v5066_v35, 0.0  ;;  %v5086_v29 = vmul.f32 0.01, %v5066_v35  ;;  %v12236_v23 = vpop.f32.mrb[104].mxu0 }
 0x4ec   :  { %v5097_v40 = vsel %vm5077_vm15, %v5067_v54, %v5087_v51  ;;  %v5069_v56 = vadd.f32 %v12236_v23, %v16558_v50  ;;  %v5019_v27 = vpop.f32.mrb[105].mxu0  ;;  %12760 = vmatmul.mubr.msk.f32.gmra.mrb[210].mxu0 %vm1804_vm14, %v16124_v61 }
 0x4ed   :  { %5108 = vst.msk [vmem:[%s17220_s7 + $0x18] sm:$0xff] %vm5104_vm2, %v5097_v40  ;;  %v5096_v2 = vsel %vm5076_vm1, %v5066_v35, %v5086_v29  ;;  %v5068_v16 = vadd.f32 %v16558_v50, %v5019_v27  ;;  %12762 = vmatprep.mubr.msk.f32.mxu0 %vm13707_vm11, %v17234_v14 }
 0x4ee   :  { %5107 = vst.msk [vmem:[%s17220_s7 + $0x10] sm:$0xff] %vm5104_vm2, %v5096_v2  ;;  %vm5079_vm4 = vcmp.ge.f32.partialorder %v5069_v56, 0.0  ;;  %v5089_v47 = vmul.f32 0.01, %v5069_v56  ;;  %v7023_v24 = vpop.f32.mrb[122].mxu1 }
 0x4ef   :  { %vm5078_vm12 = vcmp.ge.f32.partialorder %v5068_v16, 0.0  ;;  %v5088_v61 = vmul.f32 0.01, %v5068_v16  ;;  %v12239_v58 = vpop.f32.mrb[106].mxu0  ;;  %v12484_v39 = vpop.f32.mrb[123].mxu1 }
 0x4f0   :  { %v5099_v21 = vsel %vm5079_vm4, %v5069_v56, %v5089_v47  ;;  %v5071_v41 = vadd.f32 %v12239_v58, %v16558_v50  ;;  %v5029_v8 = vpop.f32.mrb[107].mxu0  ;;  %12763 = vmatmul.mubr.msk.f32.gmra.mrb[212].mxu0 %vm1804_vm14, %v16136_v49  ;;  %vm5114_vm4 = vcmask 74752  }
 0x4f1   :  { %5110 = vst.msk [vmem:[%s17220_s7 + $0x28] sm:$0xff] %vm5104_vm2, %v5099_v21  ;;  %v5098_v26 = vsel %vm5078_vm12, %v5068_v16, %v5088_v61  ;;  %v5070_v44 = vadd.f32 %v16558_v50, %v5029_v8  ;;  %12765 = vmatprep.mubr.msk.f32.mxu0 %vm13707_vm11, %v17234_v14 }
 0x4f2   :  { %5109 = vst.msk [vmem:[%s17220_s7 + $0x20] sm:$0xff] %vm5104_vm2, %v5098_v26  ;;  %vm5081_vm13 = vcmp.ge.f32.partialorder %v5071_v41, 0.0  ;;  %v5091_v33 = vmul.f32 0.01, %v5071_v41  ;;  %v7028_v32 = vpop.f32.mrb[124].mxu1 }
 0x4f3   :  { %vm5080_vm15 = vcmp.ge.f32.partialorder %v5070_v44, 0.0  ;;  %v5090_v49 = vmul.f32 0.01, %v5070_v44  ;;  %v12242_v60 = vpop.f32.mrb[108].mxu0  ;;  %v12487_v20 = vpop.f32.mrb[125].mxu1 }
 0x4f4   :  { %v5101_v19 = vsel %vm5081_vm13, %v5071_v41, %v5091_v33  ;;  %v5073_v45 = vadd.f32 %v12242_v60, %v16558_v50  ;;  %v5039_v48 = vpop.f32.mrb[109].mxu0  ;;  %12766 = vmatmul.mubr.msk.f32.gmra.mrb[214].mxu0 %vm1804_vm14, %v16148_v9 }
 0x4f5   :  { %5112 = vst.msk [vmem:[%s17220_s7 + $0x38] sm:$0xff] %vm5104_vm2, %v5101_v19  ;;  %v5100_v31 = vsel %vm5080_vm15, %v5070_v44, %v5090_v49  ;;  %v5072_v12 = vadd.f32 %v16558_v50, %v5039_v48  ;;  %12768 = vmatprep.mubr.msk.f32.mxu0 %vm13707_vm11, %v17234_v14 }
 0x4f6   :  { %5111 = vst.msk [vmem:[%s17220_s7 + $0x30] sm:$0xff] %vm5104_vm2, %v5100_v31  ;;  %vm5083_vm1 = vcmp.ge.f32.partialorder %v5073_v45, 0.0  ;;  %v5093_v59 = vmul.f32 0.01, %v5073_v45  ;;  %v7033_v9 = vpop.f32.mrb[126].mxu1 }
 0x4f7   :  { %vm5082_vm12 = vcmp.ge.f32.partialorder %v5072_v12, 0.0  ;;  %v5092_v38 = vmul.f32 0.01, %v5072_v12  ;;  %v6881_v30 = vpop.f32.mrb[110].mxu0  ;;  %v12490_v28 = vpop.f32.mrb[127].mxu1 }
 0x4f8   :  { %v5103_v10 = vsel %vm5083_vm1, %v5073_v45, %v5093_v59  ;;  %v7024_v43 = vadd.f32 %v7023_v24, %v6881_v30  ;;  %v12447_v18 = vpop.f32.mrb[111].mxu0  ;;  %12769 = vmatmul.mubr.msk.f32.gmra.mrb[216].mxu0 %vm1804_vm14, %v16159_v25 }
 0x4f9   :  { %5115 = vst.msk [vmem:[%s17220_s7 + $0x48] sm:$0x3] %vm5114_vm4, %v5103_v10  ;;  %v5102_v62 = vsel %vm5082_vm12, %v5072_v12, %v5092_v38  ;;  %12771 = vmatprep.mubr.msk.f32.mxu0 %vm13707_vm11, %v17234_v14 }
 0x4fa   :  { %5113 = vst.msk [vmem:[%s17220_s7 + $0x40] sm:$0xff] %vm5104_vm2, %v5102_v62  ;;  %v7038_v50 = vpop.f32.mrb[128].mxu1 }
 0x4fb   :  { %v6886_v4 = vpop.f32.mrb[112].mxu0  ;;  %v12493_v36 = vpop.f32.mrb[129].mxu1 }
 0x4fc   :  { %v7029_v52 = vadd.f32 %v7028_v32, %v6886_v4  ;;  %v12450_v0 = vpop.f32.mrb[113].mxu0  ;;  %12772 = vmatmul.mubr.msk.f32.gmra.mrb[218].mxu0 %vm1804_vm14, %v16386_v55 }
 0x4fe   :  { %v7043_v25 = vpop.f32.mrb[130].mxu1 }
 0x4ff   :  { %v6891_v34 = vpop.f32.mrb[114].mxu0  ;;  %v12496_v11 = vpop.f32.mrb[131].mxu1 }
 0x500   :  { %v7034_v53 = vadd.f32 %v7033_v9, %v6891_v34  ;;  %v12453_v22 = vpop.f32.mrb[115].mxu0 }
 0x502   :  { %v7048_v54 = vpop.f32.mrb[132].mxu1 }
 0x503   :  { %v6896_v14 = vpop.f32.mrb[116].mxu0  ;;  %v12499_v15 = vpop.f32.mrb[133].mxu1 }
 0x504   :  { %v7039_v1 = vadd.f32 %v7038_v50, %v6896_v14  ;;  %v12456_v35 = vpop.f32.mrb[117].mxu0 }
 0x506   :  { %v7053_v51 = vpop.f32.mrb[134].mxu1 }
 0x507   :  { %v6901_v29 = vpop.f32.mrb[118].mxu0  ;;  %v12502_v23 = vpop.f32.mrb[135].mxu1 }
 0x508   :  { %v7044_v40 = vadd.f32 %v7043_v25, %v6901_v29  ;;  %v12459_v56 = vpop.f32.mrb[119].mxu0 }
 0x50a   :  { %v7058_v27 = vpop.f32.mrb[136].mxu1 }
 0x50b   :  { %v6906_v2 = vpop.f32.mrb[120].mxu0  ;;  %v12505_v16 = vpop.f32.mrb[137].mxu1 }
 0x50c   :  { %v7049_v47 = vadd.f32 %v7048_v54, %v6906_v2  ;;  %v12462_v55 = vpop.f32.mrb[121].mxu0 }
 0x50e   :  { %v7063_v24 = vpop.f32.mrb[138].mxu1 }
 0x50f   :  { %v6911_v61 = vpop.f32.mrb[122].mxu0  ;;  %v12508_v58 = vpop.f32.mrb[139].mxu1 }
 0x510   :  { %v7054_v39 = vadd.f32 %v7053_v51, %v6911_v61  ;;  %v12465_v21 = vpop.f32.mrb[123].mxu0 }
 0x512   :  { %v7068_v41 = vpop.f32.mrb[140].mxu1 }
 0x513   :  { %v6916_v8 = vpop.f32.mrb[124].mxu0  ;;  %v12511_v26 = vpop.f32.mrb[141].mxu1 }
 0x514   :  { %v7059_v44 = vadd.f32 %v7058_v27, %v6916_v8  ;;  %v12468_v33 = vpop.f32.mrb[125].mxu0 }
 0x516   :  { %v7073_v32 = vpop.f32.mrb[142].mxu1 }
 0x517   :  { %v6921_v49 = vpop.f32.mrb[126].mxu0  ;;  %v12514_v60 = vpop.f32.mrb[143].mxu1 }
 0x518   :  { %v16638_v20 = vadd.f32 %v7063_v24, %v6921_v49  ;;  %v12471_v19 = vpop.f32.mrb[127].mxu0 }
 0x51a   :  { %v7360_v45 = vpop.f32.mrb[144].mxu1 }
 0x51b   :  { %v6926_v48 = vpop.f32.mrb[128].mxu0  ;;  %v12558_v31 = vpop.f32.mrb[145].mxu1 }
 0x51c   :  { %v16640_v12 = vadd.f32 %v7068_v41, %v6926_v48  ;;  %v12474_v59 = vpop.f32.mrb[129].mxu0 }
 0x51e   :  { %v7365_v9 = vpop.f32.mrb[146].mxu1 }
 0x51f   :  { %v6931_v38 = vpop.f32.mrb[130].mxu0  ;;  %v12561_v30 = vpop.f32.mrb[147].mxu1 }
 0x520   :  { %v16642_v28 = vadd.f32 %v7073_v32, %v6931_v38  ;;  %v12477_v10 = vpop.f32.mrb[131].mxu0 }
 0x522   :  { %v7370_v18 = vpop.f32.mrb[148].mxu1 }
 0x523   :  { %v7186_v62 = vpop.f32.mrb[132].mxu0  ;;  %v12564_v50 = vpop.f32.mrb[149].mxu1 }
 0x524   :  { %v7240_v4 = vadd.f32 %v7186_v62, %v7024_v43  ;;  %v12521_v36 = vpop.f32.mrb[133].mxu0 }
 0x526   :  { %v7375_v0 = vpop.f32.mrb[150].mxu1  ;;  %v16644_v25 = vadd.f32 %v7360_v45, %v7240_v4 }
 0x527   :  { %v7191_v34 = vpop.f32.mrb[134].mxu0  ;;  %v12567_v11 = vpop.f32.mrb[151].mxu1 }
 0x528   :  { %v7241_v22 = vadd.f32 %v7191_v34, %v7029_v52  ;;  %v12524_v54 = vpop.f32.mrb[135].mxu0 }
 0x52a   :  { %v7380_v14 = vpop.f32.mrb[152].mxu1  ;;  %v16646_v15 = vadd.f32 %v7365_v9, %v7241_v22 }
 0x52b   :  { %v7196_v35 = vpop.f32.mrb[136].mxu0  ;;  %v12570_v51 = vpop.f32.mrb[153].mxu1 }
 0x52c   :  { %v7242_v29 = vadd.f32 %v7196_v35, %v7034_v53  ;;  %v12527_v23 = vpop.f32.mrb[137].mxu0 }
 0x52e   :  { %v7385_v56 = vpop.f32.mrb[154].mxu1  ;;  %v16648_v27 = vadd.f32 %v7370_v18, %v7242_v29 }
 0x52f   :  { %v7201_v2 = vpop.f32.mrb[138].mxu0  ;;  %v12573_v43 = vpop.f32.mrb[155].mxu1 }
 0x530   :  { %v7243_v16 = vadd.f32 %v7201_v2, %v7039_v1  ;;  %v12530_v55 = vpop.f32.mrb[139].mxu0 }
 0x532   :  { %v7390_v24 = vpop.f32.mrb[156].mxu1  ;;  %v16650_v61 = vadd.f32 %v7375_v0, %v7243_v16 }
 0x533   :  { %v7206_v58 = vpop.f32.mrb[140].mxu0  ;;  %v12576_v52 = vpop.f32.mrb[157].mxu1 }
 0x534   :  { %v7244_v21 = vadd.f32 %v7206_v58, %v7044_v40  ;;  %v12533_v41 = vpop.f32.mrb[141].mxu0 }
 0x536   :  { %v7395_v8 = vpop.f32.mrb[158].mxu1  ;;  %v16652_v26 = vadd.f32 %v7380_v14, %v7244_v21 }
 0x537   :  { %v7211_v33 = vpop.f32.mrb[142].mxu0  ;;  %v12579_v53 = vpop.f32.mrb[159].mxu1 }
 0x538   :  { %v7245_v32 = vadd.f32 %v7211_v33, %v7049_v47  ;;  %v12536_v49 = vpop.f32.mrb[143].mxu0 }
 0x53a   :  { %v7400_v60 = vpop.f32.mrb[160].mxu1  ;;  %v16654_v19 = vadd.f32 %v7385_v56, %v7245_v32 }
 0x53b   :  { %v7216_v45 = vpop.f32.mrb[144].mxu0  ;;  %v12582_v1 = vpop.f32.mrb[161].mxu1 }
 0x53c   :  { %v7246_v48 = vadd.f32 %v7216_v45, %v7054_v39  ;;  %v12539_v31 = vpop.f32.mrb[145].mxu0 }
 0x53e   :  { %v7405_v59 = vpop.f32.mrb[162].mxu1  ;;  %v16656_v9 = vadd.f32 %v7390_v24, %v7246_v48 }
 0x53f   :  { %v7221_v38 = vpop.f32.mrb[146].mxu0  ;;  %v12585_v40 = vpop.f32.mrb[163].mxu1 }
 0x540   :  { %v7247_v30 = vadd.f32 %v7221_v38, %v7059_v44  ;;  %v12542_v10 = vpop.f32.mrb[147].mxu0 }
 0x542   :  { %v7410_v18 = vpop.f32.mrb[164].mxu1  ;;  %v16658_v62 = vadd.f32 %v7395_v8, %v7247_v30 }
 0x543   :  { %v7226_v50 = vpop.f32.mrb[148].mxu0  ;;  %v12588_v47 = vpop.f32.mrb[165].mxu1 }
 0x544   :  { %v7248_v4 = vadd.f32 %v7226_v50, %v16638_v20  ;;  %v12545_v36 = vpop.f32.mrb[149].mxu0 }
 0x546   :  { %v7711_v0 = vpop.f32.mrb[166].mxu1  ;;  %v16661_v34 = vadd.f32 %v7400_v60, %v7248_v4 }
 0x547   :  { %v7231_v39 = vpop.f32.mrb[150].mxu0  ;;  %v12632_v11 = vpop.f32.mrb[167].mxu1 }
 0x548   :  { %v7249_v22 = vadd.f32 %v7231_v39, %v16640_v12  ;;  %v12548_v54 = vpop.f32.mrb[151].mxu0 }
 0x54a   :  { %v7716_v14 = vpop.f32.mrb[168].mxu1  ;;  %v16664_v35 = vadd.f32 %v7405_v59, %v7249_v22 }
 0x54b   :  { %v7236_v44 = vpop.f32.mrb[152].mxu0  ;;  %v12635_v51 = vpop.f32.mrb[169].mxu1 }
 0x54c   :  { %v7250_v29 = vadd.f32 %v7236_v44, %v16642_v28  ;;  %v12551_v23 = vpop.f32.mrb[153].mxu0 }
 0x54e   :  { %v7721_v56 = vpop.f32.mrb[170].mxu1  ;;  %v16667_v2 = vadd.f32 %v7410_v18, %v7250_v29 }
 0x54f   :  { %v7534_v20 = vpop.f32.mrb[154].mxu0  ;;  %v12638_v43 = vpop.f32.mrb[171].mxu1 }
 0x550   :  { %v7588_v16 = vadd.f32 %v7534_v20, %v16644_v25  ;;  %v12595_v55 = vpop.f32.mrb[155].mxu0 }
 0x552   :  { %v7726_v24 = vpop.f32.mrb[172].mxu1  ;;  %v16670_v58 = vadd.f32 %v7711_v0, %v7588_v16 }
 0x553   :  { %v7539_v12 = vpop.f32.mrb[156].mxu0  ;;  %v12641_v52 = vpop.f32.mrb[173].mxu1 }
 0x554   :  { %v7589_v21 = vadd.f32 %v7539_v12, %v16646_v15  ;;  %v12598_v41 = vpop.f32.mrb[157].mxu0 }
 0x556   :  { %v7731_v8 = vpop.f32.mrb[174].mxu1  ;;  %v16673_v33 = vadd.f32 %v7716_v14, %v7589_v21 }
 0x557   :  { %v7544_v28 = vpop.f32.mrb[158].mxu0  ;;  %v12644_v53 = vpop.f32.mrb[175].mxu1 }
 0x558   :  { %v7590_v32 = vadd.f32 %v7544_v28, %v16648_v27  ;;  %v12601_v49 = vpop.f32.mrb[159].mxu0 }
 0x55a   :  { %v7736_v60 = vpop.f32.mrb[176].mxu1  ;;  %v16676_v45 = vadd.f32 %v7721_v56, %v7590_v32 }
 0x55b   :  { %v7549_v25 = vpop.f32.mrb[160].mxu0  ;;  %v12647_v1 = vpop.f32.mrb[177].mxu1 }
 0x55c   :  { %v7591_v48 = vadd.f32 %v7549_v25, %v16650_v61  ;;  %v12604_v31 = vpop.f32.mrb[161].mxu0 }
 0x55e   :  { %v7741_v59 = vpop.f32.mrb[178].mxu1  ;;  %v16679_v38 = vadd.f32 %v7726_v24, %v7591_v48 }
 0x55f   :  { %v7554_v15 = vpop.f32.mrb[162].mxu0  ;;  %v12650_v40 = vpop.f32.mrb[179].mxu1 }
 0x560   :  { %v7592_v30 = vadd.f32 %v7554_v15, %v16652_v26  ;;  %v12607_v10 = vpop.f32.mrb[163].mxu0 }
 0x562   :  { %v7746_v18 = vpop.f32.mrb[180].mxu1  ;;  %v16682_v50 = vadd.f32 %v7731_v8, %v7592_v30 }
 0x563   :  { %v7559_v27 = vpop.f32.mrb[164].mxu0  ;;  %v12653_v47 = vpop.f32.mrb[181].mxu1 }
 0x564   :  { %v7593_v4 = vadd.f32 %v7559_v27, %v16654_v19  ;;  %v12610_v36 = vpop.f32.mrb[165].mxu0 }
 0x566   :  { %v7751_v0 = vpop.f32.mrb[182].mxu1  ;;  %v16685_v39 = vadd.f32 %v7736_v60, %v7593_v4 }
 0x567   :  { %v7564_v61 = vpop.f32.mrb[166].mxu0  ;;  %v12656_v11 = vpop.f32.mrb[183].mxu1 }
 0x568   :  { %v7594_v22 = vadd.f32 %v7564_v61, %v16656_v9  ;;  %v12613_v54 = vpop.f32.mrb[167].mxu0 }
 0x56a   :  { %v7756_v14 = vpop.f32.mrb[184].mxu1  ;;  %v16688_v44 = vadd.f32 %v7741_v59, %v7594_v22 }
 0x56b   :  { %v7569_v26 = vpop.f32.mrb[168].mxu0  ;;  %v12659_v51 = vpop.f32.mrb[185].mxu1 }
 0x56c   :  { %v7595_v29 = vadd.f32 %v7569_v26, %v16658_v62  ;;  %v12616_v23 = vpop.f32.mrb[169].mxu0 }
 0x56e   :  { %v7761_v56 = vpop.f32.mrb[186].mxu1  ;;  %v16691_v20 = vadd.f32 %v7746_v18, %v7595_v29 }
 0x56f   :  { %v7574_v19 = vpop.f32.mrb[170].mxu0  ;;  %v12662_v43 = vpop.f32.mrb[187].mxu1 }
 0x570   :  { %v7596_v16 = vadd.f32 %v7574_v19, %v16661_v34  ;;  %v12619_v55 = vpop.f32.mrb[171].mxu0 }
 0x572   :  { %v8063_v24 = vpop.f32.mrb[188].mxu1  ;;  %v16694_v12 = vadd.f32 %v7751_v0, %v7596_v16 }
 0x573   :  { %v7579_v9 = vpop.f32.mrb[172].mxu0  ;;  %v12706_v52 = vpop.f32.mrb[189].mxu1 }
 0x574   :  { %v7597_v21 = vadd.f32 %v7579_v9, %v16664_v35  ;;  %v12622_v41 = vpop.f32.mrb[173].mxu0 }
 0x576   :  { %v8068_v8 = vpop.f32.mrb[190].mxu1  ;;  %v7774_v28 = vadd.f32 %v7756_v14, %v7597_v21 }
 0x577   :  { %v7584_v62 = vpop.f32.mrb[174].mxu0  ;;  %v12709_v53 = vpop.f32.mrb[191].mxu1 }
 0x578   :  { %v7598_v32 = vadd.f32 %v7584_v62, %v16667_v2  ;;  %v12625_v49 = vpop.f32.mrb[175].mxu0 }
 0x57a   :  { %v8073_v60 = vpop.f32.mrb[192].mxu1  ;;  %v7775_v25 = vadd.f32 %v7761_v56, %v7598_v32 }
 0x57b   :  { %v7887_v1 = vpop.f32.mrb[176].mxu0  ;;  %v12712_v34 = vpop.f32.mrb[193].mxu1 }
 0x57c   :  { %v7941_v48 = vadd.f32 %v7887_v1, %v16670_v58  ;;  %v12669_v31 = vpop.f32.mrb[177].mxu0 }
 0x57e   :  { %v8078_v59 = vpop.f32.mrb[194].mxu1  ;;  %v8117_v15 = vadd.f32 %v8063_v24, %v7941_v48 }
 0x57f   :  { %v7892_v40 = vpop.f32.mrb[178].mxu0  ;;  %v12715_v30 = vpop.f32.mrb[195].mxu1 }
 0x580   :  { %v7942_v35 = vadd.f32 %v7892_v40, %v16673_v33  ;;  %v12672_v10 = vpop.f32.mrb[179].mxu0 }
 0x582   :  { %v8083_v18 = vpop.f32.mrb[196].mxu1  ;;  %v8118_v27 = vadd.f32 %v8068_v8, %v7942_v35 }
 0x583   :  { %v7897_v47 = vpop.f32.mrb[180].mxu0  ;;  %v12718_v4 = vpop.f32.mrb[197].mxu1 }
 0x584   :  { %v7943_v2 = vadd.f32 %v7897_v47, %v16676_v45  ;;  %v12675_v36 = vpop.f32.mrb[181].mxu0 }
 0x586   :  { %v8088_v0 = vpop.f32.mrb[198].mxu1  ;;  %v8119_v61 = vadd.f32 %v8073_v60, %v7943_v2 }
 0x587   :  { %v7902_v11 = vpop.f32.mrb[182].mxu0  ;;  %v12721_v22 = vpop.f32.mrb[199].mxu1 }
 0x588   :  { %v7944_v58 = vadd.f32 %v7902_v11, %v16679_v38  ;;  %v12678_v54 = vpop.f32.mrb[183].mxu0 }
 0x58a   :  { %v8093_v14 = vpop.f32.mrb[200].mxu1  ;;  %v8120_v26 = vadd.f32 %v8078_v59, %v7944_v58 }
 0x58b   :  { %v7907_v51 = vpop.f32.mrb[184].mxu0  ;;  %v12724_v29 = vpop.f32.mrb[201].mxu1 }
 0x58c   :  { %v7945_v33 = vadd.f32 %v7907_v51, %v16682_v50  ;;  %v12681_v23 = vpop.f32.mrb[185].mxu0 }
 0x58e   :  { %v8098_v56 = vpop.f32.mrb[202].mxu1  ;;  %v16703_v19 = vadd.f32 %v8083_v18, %v7945_v33 }
 0x58f   :  { %v7912_v43 = vpop.f32.mrb[186].mxu0  ;;  %v12727_v45 = vpop.f32.mrb[203].mxu1 }
 0x590   :  { %v7946_v16 = vadd.f32 %v7912_v43, %v16685_v39  ;;  %v12684_v55 = vpop.f32.mrb[187].mxu0 }
 0x592   :  { %v8103_v24 = vpop.f32.mrb[204].mxu1  ;;  %v16706_v9 = vadd.f32 %v8088_v0, %v7946_v16 }
 0x593   :  { %v7917_v38 = vpop.f32.mrb[188].mxu0  ;;  %v12730_v52 = vpop.f32.mrb[205].mxu1 }
 0x594   :  { %v7947_v21 = vadd.f32 %v7917_v38, %v16688_v44  ;;  %v12687_v41 = vpop.f32.mrb[189].mxu0 }
 0x596   :  { %v8108_v8 = vpop.f32.mrb[206].mxu1  ;;  %v16709_v62 = vadd.f32 %v8093_v14, %v7947_v21 }
 0x597   :  { %v7922_v50 = vpop.f32.mrb[190].mxu0  ;;  %v12733_v53 = vpop.f32.mrb[207].mxu1 }
 0x598   :  { %v7948_v32 = vadd.f32 %v7922_v50, %v16691_v20  ;;  %v12690_v49 = vpop.f32.mrb[191].mxu0 }
 0x59a   :  { %v8113_v60 = vpop.f32.mrb[208].mxu1  ;;  %v16712_v1 = vadd.f32 %v8098_v56, %v7948_v32 }
 0x59b   :  { %v7927_v39 = vpop.f32.mrb[192].mxu0  ;;  %v12736_v34 = vpop.f32.mrb[209].mxu1 }
 0x59c   :  { %v7949_v48 = vadd.f32 %v7927_v39, %v16694_v12  ;;  %v12693_v31 = vpop.f32.mrb[193].mxu0  ;;  %v16724_v12 = vld [vmem:[%s17218_s4] ss:$0 sm:$0xff] }
 0x59e   :  { %v16715_v59 = vadd.f32 %v8103_v24, %v7949_v48 }
 0x59f   :  { %v7932_v44 = vpop.f32.mrb[194].mxu0 }
 0x5a0   :  { %v7950_v40 = vadd.f32 %v7932_v44, %v7774_v28  ;;  %v12696_v30 = vpop.f32.mrb[195].mxu0 }
 0x5a2   :  { %v16717_v35 = vadd.f32 %v8108_v8, %v7950_v40 }
 0x5a3   :  { %v7937_v10 = vpop.f32.mrb[196].mxu0 }
 0x5a4   :  { %v7951_v18 = vadd.f32 %v7937_v10, %v7775_v25  ;;  %v12699_v47 = vpop.f32.mrb[197].mxu0 }
 0x5a6   :  { %v16719_v20 = vadd.f32 %v8113_v60, %v7951_v18 }
 0x5a7   :  { %v8196_v4 = vpop.f32.mrb[198].mxu0 }
 0x5a8   :  { %v8250_v2 = vadd.f32 %v8196_v4, %v8117_v15  ;;  %v12743_v36 = vpop.f32.mrb[199].mxu0 }
 0x5aa   :  { %v8261_v0 = vadd.f32 %v16724_v12, %v8250_v2 }
 0x5ab   :  { %v8201_v11 = vpop.f32.mrb[200].mxu0 }
 0x5ac   :  { %v8283_v28 = vmul.f32 0.01, %v8261_v0  ;;  %v8251_v22 = vadd.f32 %v8201_v11, %v8118_v27  ;;  %v12746_v58 = vpop.f32.mrb[201].mxu0  ;;  %vm8272_vm11 = vcmp.ge.f32.partialorder %v8261_v0, 0.0 }
 0x5ae   :  { %v8262_v25 = vadd.f32 %v16724_v12, %v8251_v22  ;;  %v16728_v14 = vsel %vm8272_vm11, %v8261_v0, %v8283_v28 }
 0x5af   :  { %v8206_v54 = vpop.f32.mrb[202].mxu0  ;;  %v8315_v43 = vrot.slane %v16728_v14, 1 }
 0x5b0   :  { %vm8273_vm13 = vcmp.ge.f32.partialorder %v8262_v25, 0.0  ;;  %v8284_v15 = vmul.f32 0.01, %v8262_v25  ;;  %v8252_v51 = vadd.f32 %v8206_v54, %v8119_v61  ;;  %v12749_v29 = vpop.f32.mrb[203].mxu0 }
 0x5b2   :  { %v16730_v33 = vsel %vm8273_vm13, %v8262_v25, %v8284_v15  ;;  %v8263_v23 = vadd.f32 %v16724_v12, %v8252_v51 }
 0x5b3   :  { %v8211_v56 = vpop.f32.mrb[204].mxu0  ;;  %v8316_v27 = vrot.slane %v16730_v33, 1 }
 0x5b4   :  { %vm8274_vm15 = vcmp.ge.f32.partialorder %v8263_v23, 0.0  ;;  %v8285_v45 = vmul.f32 0.01, %v8263_v23  ;;  %v8253_v16 = vadd.f32 %v8211_v56, %v8120_v26  ;;  %v12752_v55 = vpop.f32.mrb[205].mxu0 }
 0x5b5   :  { %v8317_v24 = vsel %vm112_vm3, %v8315_v43, %v8316_v27 }
 0x5b6   :  { %v16736_v38 = vsel %vm8274_vm15, %v8263_v23, %v8285_v45  ;;  %v8264_v61 = vadd.f32 %v16724_v12, %v8253_v16  ;;  %12778 = vmatprep.mubr.msk.f32.mxu1 %vm1804_vm14, %v8317_v24 }
 0x5b7   :  { %v8216_v52 = vpop.f32.mrb[206].mxu0  ;;  %v8318_v21 = vrot.slane %v16736_v38, 1 }
 0x5b8   :  { %vm8275_vm1 = vcmp.ge.f32.partialorder %v8264_v61, 0.0  ;;  %v8286_v41 = vmul.f32 0.01, %v8264_v61  ;;  %v8254_v8 = vadd.f32 %v8216_v52, %v16703_v19  ;;  %v12755_v50 = vpop.f32.mrb[207].mxu0 }
 0x5b9   :  { %v16743_v53 = vsel %vm112_vm3, %v8316_v27, %v8318_v21 }
 0x5ba   :  { %v16745_v26 = vsel %vm8275_vm1, %v8264_v61, %v8286_v41  ;;  %v8265_v32 = vadd.f32 %v16724_v12, %v8254_v8  ;;  %12779 = vmatmul.mubr.msk.f32.vlgmr.msra.gmra.mrb[210].mxu1 %vm1804_vm14, %v16743_v53 }
 0x5bb   :  { %v8221_v49 = vpop.f32.mrb[208].mxu0  ;;  %v8320_v60 = vrot.slane %v16745_v26, 1  ;;  %13240 = vmatpush3.bf16.msk.msra.mxu1 %vm14247_vm10, %v15190_v17 }
 0x5bc   :  { %vm8276_vm12 = vcmp.ge.f32.partialorder %v8265_v32, 0.0  ;;  %v8287_v19 = vmul.f32 0.01, %v8265_v32  ;;  %v8255_v39 = vadd.f32 %v8221_v49, %v16706_v9  ;;  %v12758_v34 = vpop.f32.mrb[209].mxu0  ;;  %13243 = vmatprep.subr.msk.bf16.mxu1 %vm14247_vm10, %v15482_v13 }
 0x5bd   :  { %v16759_v48 = vsel %vm112_vm3, %v8318_v21, %v8320_v60 }
 0x5be   :  { %v16761_v31 = vsel %vm8276_vm12, %v8265_v32, %v8287_v19  ;;  %v8266_v44 = vadd.f32 %v16724_v12, %v8255_v39  ;;  %12781 = vmatprep.mubr.msk.f32.mxu1 %vm1804_vm14, %v16759_v48 }
 0x5bf   :  { %v8226_v17 = vpop.f32.mrb[210].mxu0  ;;  %v8322_v40 = vrot.slane %v16761_v31, 1 }
 0x5c0   :  { %vm8277_vm11 = vcmp.ge.f32.partialorder %v8266_v44, 0.0  ;;  %v8288_v9 = vmul.f32 0.01, %v8266_v44  ;;  %v8256_v30 = vadd.f32 %v8226_v17, %v16709_v62  ;;  %v12761_v10 = vpop.f32.mrb[211].mxu0 }
 0x5c1   :  { %v16769_v18 = vsel %vm112_vm3, %v8320_v60, %v8322_v40 }
 0x5c2   :  { %v16771_v47 = vsel %vm8277_vm11, %v8266_v44, %v8288_v9  ;;  %v8267_v4 = vadd.f32 %v16724_v12, %v8256_v30  ;;  %12782 = vmatmul.mubr.msk.f32.gmra.mrb[212].mxu1 %vm1804_vm14, %v16769_v18  ;;  %v8604_v9 = vrot.slane %v16728_v14, 2  ;;  %v8607_v30 = vrot.slane %v16736_v38, 2 }
 0x5c3   :  { %v8231_v2 = vpop.f32.mrb[212].mxu0  ;;  %v8324_v36 = vrot.slane %v16771_v47, 1 }
 0x5c4   :  { %vm8278_vm13 = vcmp.ge.f32.partialorder %v8267_v4, 0.0  ;;  %v8289_v0 = vmul.f32 0.01, %v8267_v4  ;;  %v8257_v11 = vadd.f32 %v8231_v2, %v16712_v1  ;;  %v12764_v28 = vpop.f32.mrb[213].mxu0 }
 0x5c5   :  { %v16779_v62 = vsel %vm112_vm3, %v8322_v40, %v8324_v36 }
 0x5c6   :  { %v16781_v22 = vsel %vm8278_vm13, %v8267_v4, %v8289_v0  ;;  %v8268_v58 = vadd.f32 %v16724_v12, %v8257_v11  ;;  %12784 = vmatprep.mubr.msk.f32.mxu1 %vm1804_vm14, %v16779_v62  ;;  %v8609_v4 = vrot.slane %v16745_v26, 2  ;;  %v8613_v11 = vrot.slane %v16771_v47, 2 }
 0x5c7   :  { %v8236_v25 = vpop.f32.mrb[214].mxu0  ;;  %v8326_v54 = vrot.slane %v16781_v22, 1 }
 0x5c8   :  { %vm8279_vm15 = vcmp.ge.f32.partialorder %v8268_v58, 0.0  ;;  %v8290_v15 = vmul.f32 0.01, %v8268_v58  ;;  %v8258_v51 = vadd.f32 %v8236_v25, %v16715_v59  ;;  %v12767_v29 = vpop.f32.mrb[215].mxu0  ;;  %v16877_v0 = vsel %vm442_vm5, %v8607_v30, %v8609_v4 }
 0x5c9   :  { %v16789_v1 = vsel %vm112_vm3, %v8324_v36, %v8326_v54  ;;  %v8611_v36 = vrot.slane %v16761_v31, 2 }
 0x5ca   :  { %v16791_v23 = vsel %vm8279_vm15, %v8268_v58, %v8290_v15  ;;  %v8269_v56 = vadd.f32 %v16724_v12, %v8258_v51  ;;  %12785 = vmatmul.mubr.msk.f32.gmra.mrb[214].mxu1 %vm1804_vm14, %v16789_v1  ;;  %v8615_v58 = vrot.slane %v16781_v22, 2 }
 0x5cb   :  { %v8241_v43 = vpop.f32.mrb[216].mxu0  ;;  %v8328_v27 = vrot.slane %v16791_v23, 1  ;;  %v16889_v28 = vsel %vm442_vm5, %v8609_v4, %v8611_v36  ;;  %v16895_v25 = vsel %vm442_vm5, %v8611_v36, %v8613_v11  ;;  %v8932_v4 = vrot.slane %v16728_v14, 4 }
 0x5cc   :  { %vm8280_vm1 = vcmp.ge.f32.partialorder %v8269_v56, 0.0  ;;  %v8291_v45 = vmul.f32 0.01, %v8269_v56  ;;  %v8259_v16 = vadd.f32 %v8241_v43, %v16717_v35  ;;  %v12770_v55 = vpop.f32.mrb[217].mxu0  ;;  %v8769_v43 = vrot.slane %v16730_v33, 3 }
 0x5cd   :  { %v16799_v59 = vsel %vm112_vm3, %v8326_v54, %v8328_v27  ;;  %v8617_v54 = vrot.slane %v16791_v23, 2  ;;  %v8773_v55 = vrot.slane %v16745_v26, 3  ;;  %v8935_v36 = vrot.slane %v16736_v38, 4 }
 0x5ce   :  { %v16801_v24 = vsel %vm8280_vm1, %v8269_v56, %v8291_v45  ;;  %v8270_v61 = vadd.f32 %v16724_v12, %v8259_v16  ;;  %12787 = vmatprep.mubr.msk.f32.mxu1 %vm1804_vm14, %v16799_v59  ;;  %v8771_v45 = vrot.slane %v16736_v38, 3 }
 0x5cf   :  { %v8246_v52 = vpop.f32.mrb[218].mxu0  ;;  %v8330_v21 = vrot.slane %v16801_v24, 1  ;;  %v8619_v15 = vrot.slane %v16801_v24, 2  ;;  %v16907_v51 = vsel %vm442_vm5, %v8615_v58, %v8617_v54 }
 0x5d0   :  { %vm8281_vm12 = vcmp.ge.f32.partialorder %v8270_v61, 0.0  ;;  %v8292_v41 = vmul.f32 0.01, %v8270_v61  ;;  %v8260_v8 = vadd.f32 %v8246_v52, %v16719_v20  ;;  %v12773_v50 = vpop.f32.mrb[219].mxu0  ;;  %v8775_v52 = vrot.slane %v16761_v31, 3 }
 0x5d1   :  { %v16809_v35 = vsel %vm112_vm3, %v8328_v27, %v8330_v21  ;;  %v16912_v29 = vsel %vm442_vm5, %v8617_v54, %v8619_v15  ;;  %v8768_v27 = vrot.slane %v16728_v14, 3  ;;  %v8779_v50 = vrot.slane %v16781_v22, 3 }
 0x5d2   :  { %v16811_v32 = vsel %vm8281_vm12, %v8270_v61, %v8292_v41  ;;  %v8271_v49 = vadd.f32 %v16724_v12, %v8260_v8  ;;  %12788 = vmatmul.mubr.msk.f32.gmra.mrb[216].mxu1 %vm1804_vm14, %v16809_v35  ;;  %v8772_v61 = vsel %vm630_vm6, %v8769_v43, %v8771_v45  ;;  %v8777_v41 = vrot.slane %v16771_v47, 3 }
 0x5d3   :  { %v8332_v60 = vrot.slane %v16811_v32, 1  ;;  %v8621_v12 = vrot.slane %v16811_v32, 2  ;;  %v8770_v16 = vsel %vm630_vm6, %v8768_v27, %v8769_v43  ;;  %v8776_v8 = vsel %vm630_vm6, %v8773_v55, %v8775_v52 }
 0x5d4   :  { %v8293_v19 = vmul.f32 0.01, %v8271_v49  ;;  %vm8282_vm11 = vcmp.ge.f32.partialorder %v8271_v49, 0.0  ;;  %v8941_v27 = vrot.slane %v16771_v47, 4 }
 0x5d5   :  { %v16818_v39 = vsel %vm112_vm3, %v8330_v21, %v8332_v60  ;;  %v16917_v56 = vsel %vm442_vm5, %v8619_v15, %v8621_v12  ;;  %v8774_v21 = vsel %vm630_vm6, %v8771_v45, %v8773_v55  ;;  %v8939_v15 = vrot.slane %v16761_v31, 4 }
 0x5d6   :  { %12790 = vmatprep.mubr.msk.f32.mxu1 %vm1804_vm14, %v16818_v39  ;;  %v16825_v20 = vsel %vm8282_vm11, %v8271_v49, %v8293_v19  ;;  %v8778_v49 = vsel %vm630_vm6, %v8775_v52, %v8777_v41  ;;  %v8780_v19 = vsel %vm630_vm6, %v8777_v41, %v8779_v50  ;;  %v8949_v41 = vrot.slane %v16811_v32, 4 }
 0x5d7   :  { %12791 = vmatmul.mubr.msk.f32.gmra.mrb[218].mxu1 %vm1804_vm14, %v8332_v60  ;;  %v9718_v34 = vrot.slane %v16825_v20, 1  ;;  %v9849_v44 = vrot.slane %v16825_v20, 2  ;;  %v8942_v55 = vsel %vm161_vm0, %v8939_v15, %v8941_v27 }
 0x5d8   :  { %12797 = vmatprep.mubr.msk.f32.mxu1 %vm1804_vm14, %v16728_v14 }
 0x5d9   :  { %v16843_v17 = vsel %vm112_vm3, %v8332_v60, %v9718_v34  ;;  %v16848_v40 = vsel %vm442_vm5, %v8621_v12, %v9849_v44  ;;  %v8781_v60 = vrot.slane %v16791_v23, 3 }
 0x5db   :  { %12798 = vmatmul.mubr.msk.f32.vlgmr.msra.gmra.mrb[210].mxu1 %vm1804_vm14, %v16730_v33 }
 0x5dc   :  { %12800 = vmatprep.mubr.msk.f32.mxu1 %vm1804_vm14, %v16736_v38  ;;  %13246 = vmatpush3.bf16.msk.msra.mxu1 %vm14247_vm10, %v15482_v13  ;;  %v8605_v13 = vrot.slane %v16730_v33, 2 }
 0x5dd   :  { %13249 = vmatprep.subr.msk.bf16.mxu1 %vm14247_vm10, %v15626_v6 }
 0x5de   :  { %v8606_v10 = vsel %vm442_vm5, %v8604_v9, %v8605_v13  ;;  %v16871_v2 = vsel %vm442_vm5, %v8605_v13, %v8607_v30  ;;  %v8785_v13 = vrot.slane %v16811_v32, 3 }
 0x5df   :  { %12801 = vmatmul.mubr.msk.f32.gmra.mrb[212].mxu1 %vm1804_vm14, %v16745_v26 }
 0x5e0   :  { %12803 = vmatprep.mubr.msk.f32.mxu1 %vm1804_vm14, %v16761_v31 }
 0x5e3   :  { %12804 = vmatmul.mubr.msk.f32.gmra.mrb[214].mxu1 %vm1804_vm14, %v16771_v47 }
 0x5e4   :  { %12806 = vmatprep.mubr.msk.f32.mxu1 %vm1804_vm14, %v16781_v22 }
 0x5e7   :  { %12807 = vmatmul.mubr.msk.f32.gmra.mrb[216].mxu1 %vm1804_vm14, %v16791_v23 }
 0x5e8   :  { %12809 = vmatprep.mubr.msk.f32.mxu1 %vm1804_vm14, %v16801_v24 }
 0x5eb   :  { %12810 = vmatmul.mubr.msk.f32.gmra.mrb[218].mxu1 %vm1804_vm14, %v16811_v32 }
 0x5ec   :  { %12816 = vmatprep.mubr.msk.f32.mxu1 %vm1804_vm14, %v8606_v10  ;;  %v8933_v10 = vrot.slane %v16730_v33, 4 }
 0x5ee   :  { %v8936_v54 = vsel %vm161_vm0, %v8933_v10, %v8935_v36 }
 0x5ef   :  { %12817 = vmatmul.mubr.msk.f32.vlgmr.msra.gmra.mrb[210].mxu1 %vm1804_vm14, %v16871_v2 }
 0x5f0   :  { %12819 = vmatprep.mubr.msk.f32.mxu1 %vm1804_vm14, %v16877_v0  ;;  %13252 = vmatpush3.bf16.msk.msra.mxu1 %vm14247_vm10, %v15626_v6  ;;  %v16901_v6 = vsel %vm442_vm5, %v8613_v11, %v8615_v58  ;;  %v8934_v11 = vsel %vm161_vm0, %v8932_v4, %v8933_v10  ;;  %v8937_v58 = vrot.slane %v16745_v26, 4  ;;  %v9105_v10 = vrot.slane %v16771_v47, 5 }
 0x5f1   :  { %13255 = vmatprep.subr.msk.bf16.mxu1 %vm14247_vm10, %v15679_v42 }
 0x5f2   :  { %v8938_v43 = vsel %vm161_vm0, %v8935_v36, %v8937_v58  ;;  %v8940_v45 = vsel %vm161_vm0, %v8937_v58, %v8939_v15  ;;  %v9107_v36 = vrot.slane %v16781_v22, 5  ;;  %v9109_v58 = vrot.slane %v16791_v23, 5 }
 0x5f3   :  { %12820 = vmatmul.mubr.msk.f32.gmra.mrb[212].mxu1 %vm1804_vm14, %v16889_v28 }
 0x5f4   :  { %12822 = vmatprep.mubr.msk.f32.mxu1 %vm1804_vm14, %v16895_v25  ;;  %v9110_v15 = vsel %vm1006_vm7, %v9107_v36, %v9109_v58 }
 0x5f7   :  { %12823 = vmatmul.mubr.msk.f32.gmra.mrb[214].mxu1 %vm1804_vm14, %v16901_v6 }
 0x5f8   :  { %12825 = vmatprep.mubr.msk.f32.mxu1 %vm1804_vm14, %v16907_v51 }
 0x5fb   :  { %12826 = vmatmul.mubr.msk.f32.gmra.mrb[216].mxu1 %vm1804_vm14, %v16912_v29 }
 0x5fc   :  { %12828 = vmatprep.mubr.msk.f32.mxu1 %vm1804_vm14, %v16917_v56 }
 0x5ff   :  { %12829 = vmatmul.mubr.msk.f32.gmra.mrb[218].mxu1 %vm1804_vm14, %v8621_v12  ;;  %v8782_v12 = vsel %vm630_vm6, %v8779_v50, %v8781_v60 }
 0x600   :  { %12835 = vmatprep.mubr.msk.f32.mxu1 %vm1804_vm14, %v8770_v16  ;;  %v8943_v16 = vrot.slane %v16781_v22, 4 }
 0x602   :  { %v8944_v52 = vsel %vm161_vm0, %v8941_v27, %v8943_v16 }
 0x603   :  { %12836 = vmatmul.mubr.msk.f32.vlgmr.msra.gmra.mrb[210].mxu1 %vm1804_vm14, %v8772_v61  ;;  %v8945_v61 = vrot.slane %v16791_v23, 4 }
 0x604   :  { %12838 = vmatprep.mubr.msk.f32.mxu1 %vm1804_vm14, %v8774_v21  ;;  %13258 = vmatpush3.bf16.msk.msra.mxu1 %vm14247_vm10, %v15679_v42  ;;  %v8783_v42 = vrot.slane %v16801_v24, 3 }
 0x605   :  { %13261 = vmatprep.subr.msk.bf16.mxu1 %vm14247_vm10, %v15745_v63  ;;  %v8946_v21 = vsel %vm161_vm0, %v8943_v16, %v8945_v61  ;;  %v9261_v16 = vrot.slane %v16730_v33, 6 }
 0x606   :  { %v8784_v9 = vsel %vm630_vm6, %v8781_v60, %v8783_v42  ;;  %v8786_v30 = vsel %vm630_vm6, %v8783_v42, %v8785_v13  ;;  %v9096_v60 = vrot.slane %v16728_v14, 5 }
 0x607   :  { %12839 = vmatmul.mubr.msk.f32.gmra.mrb[212].mxu1 %vm1804_vm14, %v8776_v8 }
 0x608   :  { %12841 = vmatprep.mubr.msk.f32.mxu1 %vm1804_vm14, %v8778_v49  ;;  %v9097_v49 = vrot.slane %v16730_v33, 5 }
 0x60a   :  { %v9098_v42 = vsel %vm1006_vm7, %v9096_v60, %v9097_v49  ;;  %v9271_v60 = vrot.slane %v16781_v22, 6 }
 0x60b   :  { %12842 = vmatmul.mubr.msk.f32.gmra.mrb[214].mxu1 %vm1804_vm14, %v8780_v19  ;;  %v9099_v19 = vrot.slane %v16736_v38, 5 }
 0x60c   :  { %12844 = vmatprep.mubr.msk.f32.mxu1 %vm1804_vm14, %v8782_v12  ;;  %v9101_v12 = vrot.slane %v16745_v26, 5 }
 0x60f   :  { %12845 = vmatmul.mubr.msk.f32.gmra.mrb[216].mxu1 %vm1804_vm14, %v8784_v9  ;;  %v9103_v9 = vrot.slane %v16761_v31, 5 }
 0x610   :  { %12847 = vmatprep.mubr.msk.f32.mxu1 %vm1804_vm14, %v8786_v30  ;;  %v9102_v30 = vsel %vm1006_vm7, %v9099_v19, %v9101_v12 }
 0x611   :  { %v9104_v4 = vsel %vm1006_vm7, %v9101_v12, %v9103_v9 }
 0x613   :  { %12848 = vmatmul.mubr.msk.f32.gmra.mrb[218].mxu1 %vm1804_vm14, %v8785_v13  ;;  %v9100_v13 = vsel %vm1006_vm7, %v9097_v49, %v9099_v19 }
 0x614   :  { %12854 = vmatprep.mubr.msk.f32.mxu1 %vm1804_vm14, %v8934_v11  ;;  %v9106_v11 = vsel %vm1006_vm7, %v9103_v9, %v9105_v10  ;;  %v9277_v9 = vrot.slane %v16811_v32, 6 }
 0x617   :  { %12855 = vmatmul.mubr.msk.f32.vlgmr.msra.gmra.mrb[210].mxu1 %vm1804_vm14, %v8936_v54  ;;  %v9108_v54 = vsel %vm1006_vm7, %v9105_v10, %v9107_v36  ;;  %v9425_v36 = vrot.slane %v16728_v14, 7 }
 0x618   :  { %12857 = vmatprep.mubr.msk.f32.mxu1 %vm1804_vm14, %v8938_v43  ;;  %13264 = vmatpush3.bf16.msk.msra.mxu1 %vm14247_vm10, %v15745_v63  ;;  %v8947_v63 = vrot.slane %v16801_v24, 4  ;;  %v9113_v43 = vrot.slane %v16811_v32, 5 }
 0x619   :  { %13267 = vmatprep.subr.msk.bf16.mxu1 %vm14247_vm10, %v15788_v46 }
 0x61a   :  { %v8948_v8 = vsel %vm161_vm0, %v8945_v61, %v8947_v63  ;;  %v8950_v50 = vsel %vm161_vm0, %v8947_v63, %v8949_v41  ;;  %v9263_v61 = vrot.slane %v16736_v38, 6  ;;  %v9265_v63 = vrot.slane %v16745_v26, 6 }
 0x61b   :  { %12858 = vmatmul.mubr.msk.f32.gmra.mrb[212].mxu1 %vm1804_vm14, %v8940_v45 }
 0x61c   :  { %12860 = vmatprep.mubr.msk.f32.mxu1 %vm1804_vm14, %v8942_v55  ;;  %v9260_v55 = vrot.slane %v16728_v14, 6  ;;  %v9434_v14 = vrot.slane %v16771_v47, 7 }
 0x61f   :  { %12861 = vmatmul.mubr.msk.f32.gmra.mrb[214].mxu1 %vm1804_vm14, %v8944_v52  ;;  %v9262_v52 = vsel %vm1196_vm8, %v9260_v55, %v9261_v16  ;;  %v9438_v55 = vrot.slane %v16791_v23, 7 }
 0x620   :  { %12863 = vmatprep.mubr.msk.f32.mxu1 %vm1804_vm14, %v8946_v21  ;;  %v9264_v21 = vsel %vm1196_vm8, %v9261_v16, %v9263_v61 }
 0x623   :  { %12864 = vmatmul.mubr.msk.f32.gmra.mrb[216].mxu1 %vm1804_vm14, %v8948_v8  ;;  %v9266_v8 = vsel %vm1196_vm8, %v9263_v61, %v9265_v63 }
 0x624   :  { %12866 = vmatprep.mubr.msk.f32.mxu1 %vm1804_vm14, %v8950_v50  ;;  %v9269_v50 = vrot.slane %v16771_v47, 6 }
 0x626   :  { %v9272_v12 = vsel %vm1196_vm8, %v9269_v50, %v9271_v60 }
 0x627   :  { %12867 = vmatmul.mubr.msk.f32.gmra.mrb[218].mxu1 %vm1804_vm14, %v8949_v41  ;;  %v9267_v41 = vrot.slane %v16761_v31, 6 }
 0x628   :  { %12873 = vmatprep.mubr.msk.f32.mxu1 %vm1804_vm14, %v9098_v42  ;;  %v9273_v42 = vrot.slane %v16791_v23, 6 }
 0x629   :  { %v9268_v49 = vsel %vm1196_vm8, %v9265_v63, %v9267_v41  ;;  %v9270_v19 = vsel %vm1196_vm8, %v9267_v41, %v9269_v50  ;;  %v9442_v63 = vrot.slane %v16811_v32, 7  ;;  %v9444_v41 = vrot.slane %v16825_v20, 7 }
 0x62b   :  { %12874 = vmatmul.mubr.msk.f32.vlgmr.msra.gmra.mrb[210].mxu1 %vm1804_vm14, %v9100_v13  ;;  %v9274_v13 = vsel %vm1196_vm8, %v9271_v60, %v9273_v42  ;;  %v9445_v50 = vsel %vm1386_vm9, %v9442_v63, %v9444_v41 }
 0x62c   :  { %12876 = vmatprep.mubr.msk.f32.mxu1 %vm1804_vm14, %v9102_v30  ;;  %13270 = vmatpush3.bf16.msk.msra.mxu1 %vm14247_vm10, %v15788_v46  ;;  %v9111_v46 = vrot.slane %v16801_v24, 5 }
 0x62d   :  { %13273 = vmatprep.subr.msk.bf16.mxu1 %vm14247_vm10, %v15831_v57 }
 0x62e   :  { %v9112_v27 = vsel %vm1006_vm7, %v9109_v58, %v9111_v46  ;;  %v9114_v45 = vsel %vm1006_vm7, %v9111_v46, %v9113_v43 }
 0x62f   :  { %12877 = vmatmul.mubr.msk.f32.gmra.mrb[212].mxu1 %vm1804_vm14, %v9104_v4  ;;  %v9426_v4 = vrot.slane %v16730_v33, 7 }
 0x630   :  { %12879 = vmatprep.mubr.msk.f32.mxu1 %vm1804_vm14, %v9106_v11  ;;  %v9428_v11 = vrot.slane %v16736_v38, 7 }
 0x631   :  { %v9427_v58 = vsel %vm1386_vm9, %v9425_v36, %v9426_v4 }
 0x632   :  { %v9429_v46 = vsel %vm1386_vm9, %v9426_v4, %v9428_v11 }
 0x633   :  { %12880 = vmatmul.mubr.msk.f32.gmra.mrb[214].mxu1 %vm1804_vm14, %v9108_v54  ;;  %v9430_v54 = vrot.slane %v16745_v26, 7 }
 0x634   :  { %12882 = vmatprep.mubr.msk.f32.mxu1 %vm1804_vm14, %v9110_v15  ;;  %v9432_v15 = vrot.slane %v16761_v31, 7 }
 0x636   :  { %v9435_v16 = vsel %vm1386_vm9, %v9432_v15, %v9434_v14 }
 0x637   :  { %12883 = vmatmul.mubr.msk.f32.gmra.mrb[216].mxu1 %vm1804_vm14, %v9112_v27  ;;  %v9433_v27 = vsel %vm1386_vm9, %v9430_v54, %v9432_v15 }
 0x638   :  { %12885 = vmatprep.mubr.msk.f32.mxu1 %vm1804_vm14, %v9114_v45  ;;  %v9436_v45 = vrot.slane %v16781_v22, 7 }
 0x63a   :  { %v9437_v61 = vsel %vm1386_vm9, %v9434_v14, %v9436_v45 }
 0x63b   :  { %12886 = vmatmul.mubr.msk.f32.gmra.mrb[218].mxu1 %vm1804_vm14, %v9113_v43  ;;  %v9431_v43 = vsel %vm1386_vm9, %v9428_v11, %v9430_v54 }
 0x63c   :  { %12892 = vmatprep.mubr.msk.f32.mxu1 %vm1804_vm14, %v9262_v52  ;;  %v9439_v52 = vsel %vm1386_vm9, %v9436_v45, %v9438_v55 }
 0x63f   :  { %12893 = vmatmul.mubr.msk.f32.vlgmr.msra.gmra.mrb[210].mxu1 %vm1804_vm14, %v9264_v21 }
 0x640   :  { %12895 = vmatprep.mubr.msk.f32.mxu1 %vm1804_vm14, %v9266_v8  ;;  %13276 = vmatpush3.bf16.msk.msra.mxu1 %vm14247_vm10, %v15831_v57  ;;  %v9275_v57 = vrot.slane %v16801_v24, 6 }
 0x641   :  { %13279 = vmatprep.subr.msk.bf16.mxu1 %vm14247_vm10, %v15874_v37 }
 0x642   :  { %v9276_v30 = vsel %vm1196_vm8, %v9273_v42, %v9275_v57  ;;  %v9278_v10 = vsel %vm1196_vm8, %v9275_v57, %v9277_v9 }
 0x643   :  { %12896 = vmatmul.mubr.msk.f32.gmra.mrb[212].mxu1 %vm1804_vm14, %v9268_v49 }
 0x644   :  { %12898 = vmatprep.mubr.msk.f32.mxu1 %vm1804_vm14, %v9270_v19 }
 0x647   :  { %12899 = vmatmul.mubr.msk.f32.gmra.mrb[214].mxu1 %vm1804_vm14, %v9272_v12 }
 0x648   :  { %12901 = vmatprep.mubr.msk.f32.mxu1 %vm1804_vm14, %v9274_v13 }
 0x64b   :  { %12902 = vmatmul.mubr.msk.f32.gmra.mrb[216].mxu1 %vm1804_vm14, %v9276_v30 }
 0x64c   :  { %12904 = vmatprep.mubr.msk.f32.mxu1 %vm1804_vm14, %v9278_v10 }
 0x64f   :  { %12905 = vmatmul.mubr.msk.f32.gmra.mrb[218].mxu1 %vm1804_vm14, %v9277_v9 }
 0x650   :  { %12911 = vmatprep.mubr.msk.f32.mxu1 %vm1804_vm14, %v9427_v58 }
 0x653   :  { %12912 = vmatmul.mubr.msk.f32.vlgmr.msra.gmra.mrb[210].mxu1 %vm1804_vm14, %v9429_v46 }
 0x654   :  { %12914 = vmatprep.mubr.msk.f32.mxu1 %vm1804_vm14, %v9431_v43  ;;  %13282 = vmatpush3.bf16.msk.msra.mxu1 %vm14247_vm10, %v15874_v37  ;;  %v9440_v37 = vrot.slane %v16801_v24, 7 }
 0x655   :  { %13285 = vmatprep.subr.msk.bf16.mxu1 %vm14247_vm10, %v15917_v3 }
 0x656   :  { %v9441_v21 = vsel %vm1386_vm9, %v9438_v55, %v9440_v37  ;;  %v9443_v8 = vsel %vm1386_vm9, %v9440_v37, %v9442_v63 }
 0x657   :  { %12915 = vmatmul.mubr.msk.f32.gmra.mrb[212].mxu1 %vm1804_vm14, %v9433_v27 }
 0x658   :  { %12917 = vmatprep.mubr.msk.f32.mxu1 %vm1804_vm14, %v9435_v16 }
 0x65b   :  { %12918 = vmatmul.mubr.msk.f32.gmra.mrb[214].mxu1 %vm1804_vm14, %v9437_v61 }
 0x65c   :  { %12920 = vmatprep.mubr.msk.f32.mxu1 %vm1804_vm14, %v9439_v52 }
 0x65f   :  { %12921 = vmatmul.mubr.msk.f32.gmra.mrb[216].mxu1 %vm1804_vm14, %v9441_v21 }
 0x660   :  { %12923 = vmatprep.mubr.msk.f32.mxu1 %vm1804_vm14, %v9443_v8 }
 0x663   :  { %12924 = vmatmul.mubr.msk.f32.gmra.mrb[218].mxu1 %vm1804_vm14, %v9445_v50 }
 0x664   :  { %12930 = vmatprep.mubr.msk.f32.mxu1 %vm1804_vm14, %v16730_v33 }
 0x667   :  { %12931 = vmatmul.mubr.msk.f32.vlgmr.msra.gmra.mrb[210].mxu1 %vm1804_vm14, %v16736_v38 }
 0x668   :  { %12933 = vmatprep.mubr.msk.f32.mxu1 %vm1804_vm14, %v16745_v26  ;;  %13288 = vmatpush3.bf16.msk.msra.mxu1 %vm14247_vm10, %v15917_v3  ;;  %v13704_v3 = vld [vmem:[%s17219_s6] ss:$0 sm:$0xff] }
 0x669   :  { %13291 = vmatprep.subr.msk.bf16.mxu1 %vm14247_vm10, %v15958_v7 }
 0x66b   :  { %12934 = vmatmul.mubr.msk.f32.gmra.mrb[212].mxu1 %vm1804_vm14, %v16761_v31 }
 0x66c   :  { %12936 = vmatprep.mubr.msk.f32.mxu1 %vm1804_vm14, %v16771_v47 }
 0x66f   :  { %12937 = vmatmul.mubr.msk.f32.gmra.mrb[214].mxu1 %vm1804_vm14, %v16781_v22 }
 0x670   :  { %12939 = vmatprep.mubr.msk.f32.mxu1 %vm1804_vm14, %v16791_v23 }
 0x673   :  { %12940 = vmatmul.mubr.msk.f32.gmra.mrb[216].mxu1 %vm1804_vm14, %v16801_v24 }
 0x674   :  { %12942 = vmatprep.mubr.msk.f32.mxu1 %vm1804_vm14, %v16811_v32 }
 0x677   :  { %12943 = vmatmul.mubr.msk.f32.gmra.mrb[218].mxu1 %vm1804_vm14, %v16825_v20 }
 0x678   :  { %12949 = vmatprep.mubr.msk.f32.mxu1 %vm1804_vm14, %v16743_v53 }
 0x67b   :  { %12950 = vmatmul.mubr.msk.f32.vlgmr.msra.gmra.mrb[210].mxu1 %vm1804_vm14, %v16759_v48 }
 0x67c   :  { %12952 = vmatprep.mubr.msk.f32.mxu1 %vm1804_vm14, %v16769_v18  ;;  %13294 = vmatpush3.bf16.msk.msra.mxu1 %vm14247_vm10, %v15958_v7 }
 0x67f   :  { %12953 = vmatmul.mubr.msk.f32.gmra.mrb[212].mxu1 %vm1804_vm14, %v16779_v62 }
 0x680   :  { %12955 = vmatprep.mubr.msk.f32.mxu1 %vm1804_vm14, %v16789_v1 }
 0x683   :  { %12956 = vmatmul.mubr.msk.f32.gmra.mrb[214].mxu1 %vm1804_vm14, %v16799_v59 }
 0x684   :  { %12958 = vmatprep.mubr.msk.f32.mxu1 %vm1804_vm14, %v16809_v35 }
 0x687   :  { %12959 = vmatmul.mubr.msk.f32.gmra.mrb[216].mxu1 %vm1804_vm14, %v16818_v39 }
 0x688   :  { %12961 = vmatprep.mubr.msk.f32.mxu1 %vm1804_vm14, %v16843_v17 }
 0x68b   :  { %12962 = vmatmul.mubr.msk.f32.gmra.mrb[218].mxu1 %vm1804_vm14, %v9718_v34 }
 0x68c   :  { %12968 = vmatprep.mubr.msk.f32.mxu1 %vm1804_vm14, %v16871_v2 }
 0x68f   :  { %12969 = vmatmul.mubr.msk.f32.vlgmr.msra.gmra.mrb[210].mxu1 %vm1804_vm14, %v16877_v0 }
 0x690   :  { %12971 = vmatprep.mubr.msk.f32.mxu1 %vm1804_vm14, %v16889_v28 }
 0x693   :  { %12972 = vmatmul.mubr.msk.f32.gmra.mrb[212].mxu1 %vm1804_vm14, %v16895_v25 }
 0x694   :  { %12974 = vmatprep.mubr.msk.f32.mxu1 %vm1804_vm14, %v16901_v6 }
 0x697   :  { %12975 = vmatmul.mubr.msk.f32.gmra.mrb[214].mxu1 %vm1804_vm14, %v16907_v51 }
 0x698   :  { %12977 = vmatprep.mubr.msk.f32.mxu1 %vm1804_vm14, %v16912_v29 }
 0x69b   :  { %12978 = vmatmul.mubr.msk.f32.gmra.mrb[216].mxu1 %vm1804_vm14, %v16917_v56 }
 0x69c   :  { %12980 = vmatprep.mubr.msk.f32.mxu1 %vm1804_vm14, %v16848_v40 }
 0x69f   :  { %12981 = vmatmul.mubr.msk.f32.gmra.mrb[218].mxu1 %vm1804_vm14, %v9849_v44 }
 0x762   :  { %v12970_v5 = vpop.f32.mrb[210].mxu1 }
 0x763   :  { %v9981_v7 = vadd.f32 %v13704_v3, %v12970_v5  ;;  %v9921_v33 = vpop.f32.mrb[211].mxu1 }
 0x764   :  { %v9980_v38 = vadd.f32 %v13704_v3, %v9921_v33 }
 0x765   :  { %vm9991_vm0 = vcmp.ge.f32.partialorder %v9981_v7, 0.0  ;;  %v10001_v53 = vmul.f32 0.01, %v9981_v7 }
 0x766   :  { %vm9990_vm3 = vcmp.ge.f32.partialorder %v9980_v38, 0.0  ;;  %v10000_v26 = vmul.f32 0.01, %v9980_v38  ;;  %v12973_v48 = vpop.f32.mrb[212].mxu1 }
 0x767   :  { %v10011_v31 = vsel %vm9991_vm0, %v9981_v7, %v10001_v53  ;;  %v9983_v18 = vadd.f32 %v13704_v3, %v12973_v48  ;;  %v9931_v47 = vpop.f32.mrb[213].mxu1 }
 0x768   :  { %10744 = vst.msk [vmem:[%s17220_s7 + $0x58] sm:$0xff] %vm5104_vm2, %v10011_v31  ;;  %v10010_v62 = vsel %vm9990_vm3, %v9980_v38, %v10000_v26  ;;  %v9982_v22 = vadd.f32 %v13704_v3, %v9931_v47 }
 0x769   :  { %10743 = vst.msk [vmem:[%s17220_s7 + $0x50] sm:$0xff] %vm5104_vm2, %v10010_v62  ;;  %vm9993_vm5 = vcmp.ge.f32.partialorder %v9983_v18, 0.0  ;;  %v10003_v1 = vmul.f32 0.01, %v9983_v18 }
 0x76a   :  { %vm9992_vm6 = vcmp.ge.f32.partialorder %v9982_v22, 0.0  ;;  %v10002_v23 = vmul.f32 0.01, %v9982_v22  ;;  %v12976_v59 = vpop.f32.mrb[214].mxu1 }
 0x76b   :  { %v10013_v24 = vsel %vm9993_vm5, %v9983_v18, %v10003_v1  ;;  %v9985_v35 = vadd.f32 %v13704_v3, %v12976_v59  ;;  %v9941_v32 = vpop.f32.mrb[215].mxu1 }
 0x76c   :  { %10746 = vst.msk [vmem:[%s17220_s7 + $0x68] sm:$0xff] %vm5104_vm2, %v10013_v24  ;;  %v10012_v39 = vsel %vm9992_vm6, %v9982_v22, %v10002_v23  ;;  %v9984_v20 = vadd.f32 %v13704_v3, %v9941_v32 }
 0x76d   :  { %10745 = vst.msk [vmem:[%s17220_s7 + $0x60] sm:$0xff] %vm5104_vm2, %v10012_v39  ;;  %vm9995_vm7 = vcmp.ge.f32.partialorder %v9985_v35, 0.0  ;;  %v10005_v34 = vmul.f32 0.01, %v9985_v35 }
 0x76e   :  { %vm9994_vm8 = vcmp.ge.f32.partialorder %v9984_v20, 0.0  ;;  %v10004_v44 = vmul.f32 0.01, %v9984_v20  ;;  %v12979_v17 = vpop.f32.mrb[216].mxu1 }
 0x76f   :  { %v10015_v40 = vsel %vm9995_vm7, %v9985_v35, %v10005_v34  ;;  %v9987_v2 = vadd.f32 %v13704_v3, %v12979_v17  ;;  %v9951_v0 = vpop.f32.mrb[217].mxu1 }
 0x770   :  { %10748 = vst.msk [vmem:[%s17220_s7 + $0x78] sm:$0xff] %vm5104_vm2, %v10015_v40  ;;  %v10014_v28 = vsel %vm9994_vm8, %v9984_v20, %v10004_v44  ;;  %v9986_v25 = vadd.f32 %v13704_v3, %v9951_v0 }
 0x771   :  { %10747 = vst.msk [vmem:[%s17220_s7 + $0x70] sm:$0xff] %vm5104_vm2, %v10014_v28  ;;  %vm9997_vm9 = vcmp.ge.f32.partialorder %v9987_v2, 0.0  ;;  %v10007_v6 = vmul.f32 0.01, %v9987_v2 }
 0x772   :  { %vm9996_vm10 = vcmp.ge.f32.partialorder %v9986_v25, 0.0  ;;  %v10006_v51 = vmul.f32 0.01, %v9986_v25  ;;  %v12982_v29 = vpop.f32.mrb[218].mxu1 }
 0x773   :  { %v10017_v56 = vsel %vm9997_vm9, %v9987_v2, %v10007_v6  ;;  %v9989_v49 = vadd.f32 %v13704_v3, %v12982_v29  ;;  %v9961_v60 = vpop.f32.mrb[219].mxu1 }
 0x774   :  { %10750 = vst.msk [vmem:[%s17220_s7 + $0x88] sm:$0xff] %vm5104_vm2, %v10017_v56  ;;  %v10016_v19 = vsel %vm9996_vm10, %v9986_v25, %v10006_v51  ;;  %v9988_v42 = vadd.f32 %v13704_v3, %v9961_v60 }
 0x775   :  { %10749 = vst.msk [vmem:[%s17220_s7 + $0x80] sm:$0xff] %vm5104_vm2, %v10016_v19  ;;  %vm9999_vm14 = vcmp.ge.f32.partialorder %v9989_v49, 0.0  ;;  %v10009_v12 = vmul.f32 0.01, %v9989_v49 }
 0x776   :  { %vm9998_vm13 = vcmp.ge.f32.partialorder %v9988_v42, 0.0  ;;  %v10008_v57 = vmul.f32 0.01, %v9988_v42 }
 0x777   :  { %v10019_v13 = vsel %vm9999_vm14, %v9989_v49, %v10009_v12 }
 0x778   :  { %10752 = vst.msk [vmem:[%s17220_s7 + $0x98] sm:$0x3] %vm5114_vm4, %v10019_v13  ;;  %v10018_v9 = vsel %vm9998_vm13, %v9988_v42, %v10008_v57 }
 0x779   :  { %10751 = vst.msk [vmem:[%s17220_s7 + $0x90] sm:$0xff] %vm5104_vm2, %v10018_v9 }

// kernel: grammar_vae_forward.3
= control target key start
LH: loop header
LB: loop body
LE: loop exit
PB: predicated region body
PF: predicated region fallthrough
CT: control target
= control target key end

     0   :  { %s11759_s0 = inlined_call_operand.vmem [shape: f32[2,740], index: 0, kind: input, shape index: {}]   ;;  %s11760_s1 = inlined_call_operand.vmem [shape: f32[2,16], index: 1, kind: input, shape index: {}]   ;;  %s11761_s2 = inlined_call_operand.vmem [shape: bf16[740,435], index: 2, kind: input, shape index: {}]   ;;  %s11762_s3 = inlined_call_operand.vmem [shape: f32[1,435], index: 3, kind: input, shape index: {}]   ;;  %s11763_s4 = inlined_call_operand.vmem [shape: f32[435,16], index: 4, kind: input, shape index: {}]   ;;  %s11764_s5 = inlined_call_operand.vmem [shape: f32[1,16], index: 5, kind: input, shape index: {}]   ;;  %s11765_s6 = inlined_call_operand.vmem [shape: f32[435,16], index: 6, kind: input, shape index: {}]   ;;  %s11766_s7 = inlined_call_operand.vmem [shape: f32[1,16], index: 7, kind: input, shape index: {}]   ;;  %s11767_s8 = inlined_call_operand.vmem [shape: f32[16,16], index: 8, kind: input, shape index: {}]   ;;  %s11768_s9 = inlined_call_operand.vmem [shape: f32[1,16], index: 9, kind: input, shape index: {}]   ;;  %s11769_s10 = inlined_call_operand.vmem [shape: f32[16,1536], index: 10, kind: input, shape index: {}]   ;;  %s11770_s11 = inlined_call_operand.vmem [shape: f32[1,1536], index: 11, kind: input, shape index: {}]   ;;  %s11771_s12 = inlined_call_operand.vmem [shape: bf16[512,1536], index: 12, kind: input, shape index: {}]   ;;  %s11772_s13 = inlined_call_operand.vmem [shape: f32[1,512], index: 13, kind: input, shape index: {}]   ;;  %s11773_s14 = inlined_call_operand.vmem [shape: f32[512,12], index: 14, kind: input, shape index: {}]   ;;  %s11774_s15 = inlined_call_operand.vmem [shape: f32[1,12], index: 15, kind: input, shape index: {}]   ;;  %s11775_s16 = inlined_call_operand.hbm [shape: f32[2,16], index: 16, kind: output, shape index: {0}]   ;;  %s11776_s17 = inlined_call_operand.hbm [shape: f32[2,16], index: 17, kind: output, shape index: {1}]   ;;  %s11777_s18 = inlined_call_operand.hbm [shape: f32[2,16], index: 18, kind: output, shape index: {2}]   ;;  %s11778_s19 = inlined_call_operand.vmem [shape: f32[2,100,12], index: 19, kind: output, shape index: {3}]  }
   0x1   :  { %11781 = sst [smem:[#allocation10_spill]] %s11759_s0 }
   0x2   :  { %11782 = sst [smem:[#allocation11_spill]] %s11760_s1 }
   0x3   :  { %11783 = sst [smem:[#allocation12_spill]] %s11761_s2 }
   0x4   :  { %11784 = sst [smem:[#allocation13_spill]] %s11762_s3 }
   0x5   :  { %25 = vsyncpa [#allocation4], 0 }
   0x6   :  { %26 = vsyncpa [#allocation6], 0  ;;  %s11785_s20 = sld [smem:[#allocation12_spill]]  ;;  %v8740_v36 = vmov 1983009808   ;;  %v68_v38 = vlaneseq  ;;  %s11786_s26 = sld [smem:[#allocation10_spill]] }
   0x7   :  { %v66_v37 = vunpack.c.l.s4 %v8740_v36  ;;  %vm1239_vm0 = vcmask 818176   ;;  %vm1243_vm1 = vcmask 1041408   ;;  %vm1580_vm2 = vcmask 1042432   ;;  %s11787_s24 = sld [smem:[#allocation13_spill]]  ;;  %s11788_s1 = sld [smem:[#allocation11_spill]] }
   0x8   :  { %v8966_v43 = vshrl.u32 %v68_v38, 7  ;;  %vm1576_vm3 = vcmask 416768   ;;  %vm8743_vm8 = vmmov 0   ;;  %vm1929_vm9 = vcmask 123904  }
   0x9   :  { %v67_v42 = vunpack.c.0.s8 %v66_v37  ;;  %vm1948_vm10 = vcmask 130048  }
   0xb   :  { %v70_v49 = vsub.s32 %v67_v42, %v8966_v43 }
   0xc   :  { %v7731_v0 = vld [vmem:[%s11785_s20 + $0x4] ss:$16 sps:$4 sm:$0xff]   ;;  %v7733_v1 = vld [vmem:[%s11785_s20 + $0xc] ss:$16 sps:$4 sm:$0xff]   ;;  %v7735_v2 = vld [vmem:[%s11785_s20] ss:$16 sps:$4 sm:$0xff]  }
   0xd   :  { %v7736_v3 = vld [vmem:[%s11785_s20 + $0x8] ss:$16 sps:$4 sm:$0xff]   ;;  %1256 = vmatprep.subr.bf16.mxu0 %v7731_v0  ;;  %v7737_v4 = vld [vmem:[%s11785_s20 + $0x24] ss:$16 sps:$4 sm:$0xff]   ;;  %1379 = vmatprep.subr.bf16.mxu1 %v7733_v1  ;;  %v7739_v5 = vld [vmem:[%s11785_s20 + $0x2c] ss:$16 sps:$4 sm:$0xff]  }
   0xe   :  { %1257 = vmatpush1.bf16.msra.mxu0 %v7735_v2  ;;  %1380 = vmatpush1.bf16.msra.mxu1 %v7736_v3  ;;  %v7741_v6 = vld [vmem:[%s11785_s20 + $0x20] ss:$16 sps:$4 sm:$0xff]   ;;  %v7742_v7 = vld [vmem:[%s11785_s20 + $0x28] ss:$16 sps:$4 sm:$0xff]   ;;  %v7743_v8 = vld [vmem:[%s11785_s20 + $0x44] ss:$16 sps:$4 sm:$0xff]  }
   0xf   :  { %1258 = vmatprep.subr.bf16.mxu0 %v7737_v4  ;;  %1381 = vmatprep.subr.bf16.mxu1 %v7739_v5  ;;  %v7745_v9 = vld [vmem:[%s11785_s20 + $0x4c] ss:$16 sps:$4 sm:$0xff]   ;;  %v7747_v10 = vld [vmem:[%s11785_s20 + $0x40] ss:$16 sps:$4 sm:$0xff]   ;;  %v7748_v11 = vld [vmem:[%s11785_s20 + $0x48] ss:$16 sps:$4 sm:$0xff]  }
  0x10   :  { %v7749_v12 = vld [vmem:[%s11785_s20 + $0x64] ss:$16 sps:$4 sm:$0xff]   ;;  %v7751_v13 = vld [vmem:[%s11785_s20 + $0x6c] ss:$16 sps:$4 sm:$0xff]   ;;  %v7753_v14 = vld [vmem:[%s11785_s20 + $0x60] ss:$16 sps:$4 sm:$0xff]  }
  0x11   :  { %v7754_v15 = vld [vmem:[%s11785_s20 + $0x68] ss:$16 sps:$4 sm:$0xff]   ;;  %v7755_v16 = vld [vmem:[%s11785_s20 + $0x84] ss:$16 sps:$4 sm:$0xff]   ;;  %v7757_v17 = vld [vmem:[%s11785_s20 + $0x8c] ss:$16 sps:$4 sm:$0xff]  }
  0x12   :  { %1259 = vmatpush1.bf16.msra.mxu0 %v7741_v6  ;;  %1382 = vmatpush1.bf16.msra.mxu1 %v7742_v7  ;;  %v7759_v18 = vld [vmem:[%s11785_s20 + $0x80] ss:$16 sps:$4 sm:$0xff]   ;;  %v7760_v19 = vld [vmem:[%s11785_s20 + $0x88] ss:$16 sps:$4 sm:$0xff]   ;;  %v7761_v20 = vld [vmem:[%s11785_s20 + $0xa4] ss:$16 sps:$4 sm:$0xff]  }
  0x13   :  { %1260 = vmatprep.subr.bf16.mxu0 %v7743_v8  ;;  %1383 = vmatprep.subr.bf16.mxu1 %v7745_v9  ;;  %v7763_v21 = vld [vmem:[%s11785_s20 + $0xac] ss:$16 sps:$4 sm:$0xff]   ;;  %v7765_v22 = vld [vmem:[%s11785_s20 + $0xa0] ss:$16 sps:$4 sm:$0xff]   ;;  %v7766_v23 = vld [vmem:[%s11785_s20 + $0xa8] ss:$16 sps:$4 sm:$0xff]  }
  0x14   :  { %v7767_v24 = vld [vmem:[%s11785_s20 + $0xc4] ss:$16 sps:$4 sm:$0xff]   ;;  %v7769_v25 = vld [vmem:[%s11785_s20 + $0xcc] ss:$16 sps:$4 sm:$0xff]   ;;  %v7771_v26 = vld [vmem:[%s11785_s20 + $0xc0] ss:$16 sps:$4 sm:$0xff]  }
  0x15   :  { %v7772_v27 = vld [vmem:[%s11785_s20 + $0xc8] ss:$16 sps:$4 sm:$0xff]   ;;  %v7773_v28 = vld [vmem:[%s11785_s20 + $0xe4] ss:$16 sps:$4 sm:$0xff]   ;;  %v7775_v29 = vld [vmem:[%s11785_s20 + $0xec] ss:$16 sps:$4 sm:$0xff]  }
  0x16   :  { %1261 = vmatpush1.bf16.msra.mxu0 %v7747_v10  ;;  %1384 = vmatpush1.bf16.msra.mxu1 %v7748_v11  ;;  %v7777_v30 = vld [vmem:[%s11785_s20 + $0xe0] ss:$16 sps:$4 sm:$0xff]   ;;  %v7778_v31 = vld [vmem:[%s11785_s20 + $0xe8] ss:$16 sps:$4 sm:$0xff]   ;;  %v7779_v32 = vld [vmem:[%s11785_s20 + $0x104] ss:$16 sps:$4 sm:$0xff]  }
  0x17   :  { %1262 = vmatprep.subr.bf16.mxu0 %v7749_v12  ;;  %1385 = vmatprep.subr.bf16.mxu1 %v7751_v13  ;;  %v7781_v33 = vld [vmem:[%s11785_s20 + $0x10c] ss:$16 sps:$4 sm:$0xff]   ;;  %v7783_v34 = vld [vmem:[%s11785_s20 + $0x100] ss:$16 sps:$4 sm:$0xff]   ;;  %v7784_v35 = vld [vmem:[%s11785_s20 + $0x108] ss:$16 sps:$4 sm:$0xff]  }
  0x18   :  { %v7785_v39 = vld [vmem:[%s11785_s20 + $0x124] ss:$16 sps:$4 sm:$0xff]   ;;  %v7787_v40 = vld [vmem:[%s11785_s20 + $0x12c] ss:$16 sps:$4 sm:$0xff]   ;;  %v7789_v41 = vld [vmem:[%s11785_s20 + $0x120] ss:$16 sps:$4 sm:$0xff]  }
  0x19   :  { %v7790_v44 = vld [vmem:[%s11785_s20 + $0x128] ss:$16 sps:$4 sm:$0xff]   ;;  %v7791_v45 = vld [vmem:[%s11785_s20 + $0x144] ss:$16 sps:$4 sm:$0xff]   ;;  %v7793_v46 = vld [vmem:[%s11785_s20 + $0x14c] ss:$16 sps:$4 sm:$0xff]  }
  0x1a   :  { %1263 = vmatpush1.bf16.msra.mxu0 %v7753_v14  ;;  %1386 = vmatpush1.bf16.msra.mxu1 %v7754_v15  ;;  %v7795_v47 = vld [vmem:[%s11785_s20 + $0x140] ss:$16 sps:$4 sm:$0xff]   ;;  %v7796_v48 = vld [vmem:[%s11785_s20 + $0x148] ss:$16 sps:$4 sm:$0xff]   ;;  %v7797_v50 = vld [vmem:[%s11785_s20 + $0x164] ss:$16 sps:$4 sm:$0xff]  }
  0x1b   :  { %1264 = vmatprep.subr.bf16.mxu0 %v7755_v16  ;;  %1387 = vmatprep.subr.bf16.mxu1 %v7757_v17  ;;  %v7799_v51 = vld [vmem:[%s11785_s20 + $0x16c] ss:$16 sps:$4 sm:$0xff]   ;;  %v60_v52 = vld [vmem:[%s11786_s26] sm:$0xff]  ;;  %v7802_v55 = vld [vmem:[%s11785_s20 + $0x168] ss:$16 sps:$4 sm:$0xff]  }
  0x1c   :  { %v7801_v53 = vld [vmem:[%s11785_s20 + $0x160] ss:$16 sps:$4 sm:$0xff]   ;;  %v71_v54 = vrot.slane %v60_v52, %v70_v49  ;;  %v7803_v56 = vld [vmem:[%s11785_s20 + $0x184] ss:$16 sps:$4 sm:$0xff]   ;;  %v7805_v57 = vld [vmem:[%s11785_s20 + $0x18c] ss:$16 sps:$4 sm:$0xff]   ;;  %v64_v4 = vcombine.high %v60_v52, %v60_v52 }
  0x1d   :  { %v7807_v59 = vld [vmem:[%s11785_s20 + $0x180] ss:$16 sps:$4 sm:$0xff]   ;;  %v7808_v61 = vld [vmem:[%s11785_s20 + $0x188] ss:$16 sps:$4 sm:$0xff]   ;;  %v7809_v62 = vld [vmem:[%s11785_s20 + $0x1a4] ss:$16 sps:$4 sm:$0xff]  }
  0x1e   :  { %1265 = vmatpush1.bf16.msra.mxu0 %v7759_v18  ;;  %1388 = vmatpush1.bf16.msra.mxu1 %v7760_v19  ;;  %v79_v58 = vcombine.high %v71_v54, %v71_v54  ;;  %v7811_v63 = vld [vmem:[%s11785_s20 + $0x1ac] ss:$16 sps:$4 sm:$0xff]   ;;  %v7813_v0 = vld [vmem:[%s11785_s20 + $0x1a0] ss:$16 sps:$4 sm:$0xff]   ;;  %v7814_v1 = vld [vmem:[%s11785_s20 + $0x1a8] ss:$16 sps:$4 sm:$0xff]   ;;  %v9041_v9 = vrot.slane %v64_v4, %v70_v49  ;;  %v95_v15 = vpack.c.bf16 %v71_v54, %v71_v54 }
  0x1f   :  { %1266 = vmatprep.subr.bf16.mxu0 %v7761_v20  ;;  %1389 = vmatprep.subr.bf16.mxu1 %v7763_v21  ;;  %v7815_v2 = vld [vmem:[%s11785_s20 + $0x1c4] ss:$16 sps:$4 sm:$0xff]   ;;  %v7817_v3 = vld [vmem:[%s11785_s20 + $0x1cc] ss:$16 sps:$4 sm:$0xff]   ;;  %v7819_v5 = vld [vmem:[%s11785_s20 + $0x1c0] ss:$16 sps:$4 sm:$0xff]  }
  0x20   :  { %v96_v60 = vpack.c.bf16 %v79_v58, %v79_v58  ;;  %v7820_v6 = vld [vmem:[%s11785_s20 + $0x1c8] ss:$16 sps:$4 sm:$0xff]   ;;  %v7821_v7 = vld [vmem:[%s11785_s20 + $0x1e4] ss:$16 sps:$4 sm:$0xff]   ;;  %v7823_v8 = vld [vmem:[%s11785_s20 + $0x1ec] ss:$16 sps:$4 sm:$0xff]   ;;  %v80_v14 = vcombine.high %v9041_v9, %v9041_v9 }
  0x21   :  { %v7825_v10 = vld [vmem:[%s11785_s20 + $0x1e0] ss:$16 sps:$4 sm:$0xff]   ;;  %v7826_v11 = vld [vmem:[%s11785_s20 + $0x1e8] ss:$16 sps:$4 sm:$0xff]   ;;  %v7830_v12 = vld [vmem:[%s11785_s20 + $0x204] ss:$16 sps:$4 sm:$0xff]  }
  0x22   :  { %1267 = vmatpush1.bf16.msra.mxu0 %v7765_v22  ;;  %1390 = vmatpush1.bf16.msra.mxu1 %v7766_v23  ;;  %v7833_v13 = vld [vmem:[%s11785_s20 + $0x20c] ss:$16 sps:$4 sm:$0xff]   ;;  %v7828_v16 = vld [vmem:[%s11785_s20 + $0x200] ss:$16 sps:$4 sm:$0xff]   ;;  %v7831_v17 = vld [vmem:[%s11785_s20 + $0x208] ss:$16 sps:$4 sm:$0xff]   ;;  %v98_v20 = vpack.c.bf16 %v80_v14, %v80_v14 }
  0x23   :  { %1268 = vmatprep.subr.bf16.mxu0 %v7767_v24  ;;  %1391 = vmatprep.subr.bf16.mxu1 %v7769_v25  ;;  %v7836_v18 = vld [vmem:[%s11785_s20 + $0x224] ss:$16 sps:$4 sm:$0xff]   ;;  %v7839_v19 = vld [vmem:[%s11785_s20 + $0x22c] ss:$16 sps:$4 sm:$0xff]   ;;  %v7834_v21 = vld [vmem:[%s11785_s20 + $0x220] ss:$16 sps:$4 sm:$0xff]  }
  0x24   :  { %1288 = vmatprep.mubr.bf16.mxu0 %v96_v60  ;;  %1411 = vmatprep.mubr.bf16.mxu1 %v96_v60  ;;  %v7837_v22 = vld [vmem:[%s11785_s20 + $0x228] ss:$16 sps:$4 sm:$0xff]   ;;  %v7842_v23 = vld [vmem:[%s11785_s20 + $0x244] ss:$16 sps:$4 sm:$0xff]   ;;  %v7845_v24 = vld [vmem:[%s11785_s20 + $0x24c] ss:$16 sps:$4 sm:$0xff]  }
  0x25   :  { %v7840_v25 = vld [vmem:[%s11785_s20 + $0x240] ss:$16 sps:$4 sm:$0xff]   ;;  %v7863_v36 = vld [vmem:[%s11785_s20 + $0x2ac] ss:$16 sps:$4 sm:$0xff]   ;;  %v7878_v49 = vld [vmem:[%s11785_s20 + $0x304] ss:$16 sps:$4 sm:$0xff]  }
  0x26   :  { %1269 = vmatpush1.bf16.msra.mxu0 %v7771_v26  ;;  %1392 = vmatpush1.bf16.msra.mxu1 %v7772_v27  ;;  %v7843_v26 = vld [vmem:[%s11785_s20 + $0x248] ss:$16 sps:$4 sm:$0xff]   ;;  %v7848_v27 = vld [vmem:[%s11785_s20 + $0x264] ss:$16 sps:$4 sm:$0xff]   ;;  %v7858_v37 = vld [vmem:[%s11785_s20 + $0x2a0] ss:$16 sps:$4 sm:$0xff]  }
  0x27   :  { %1270 = vmatprep.subr.bf16.mxu0 %v7773_v28  ;;  %1393 = vmatprep.subr.bf16.mxu1 %v7775_v29  ;;  %v7851_v28 = vld [vmem:[%s11785_s20 + $0x26c] ss:$16 sps:$4 sm:$0xff]   ;;  %v7846_v29 = vld [vmem:[%s11785_s20 + $0x260] ss:$16 sps:$4 sm:$0xff]   ;;  %v7879_v52 = vld [vmem:[%s11785_s20 + $0x308] ss:$16 sps:$4 sm:$0xff]  }
  0x28   :  { %v7864_v42 = vld [vmem:[%s11785_s20 + $0x2c0] ss:$16 sps:$4 sm:$0xff]   ;;  %v7887_v54 = vld [vmem:[%s11785_s20 + $0x32c] ss:$16 sps:$4 sm:$0xff]   ;;  %v7891_v60 = vld [vmem:[%s11785_s20 + $0x348] ss:$16 sps:$4 sm:$0xff]  }
  0x29   :  { %v7893_v58 = vld [vmem:[%s11785_s20 + $0x34c] ss:$16 sps:$4 sm:$0xff]   ;;  %v7903_v4 = vld [vmem:[%s11785_s20 + $0x388] ss:$16 sps:$4 sm:$0xff]   ;;  %v7920_v14 = vld [vmem:[%s11785_s20 + $0x3e4] ss:$16 sps:$4 sm:$0xff]  }
  0x2a   :  { %1271 = vmatpush1.bf16.msra.mxu0 %v7777_v30  ;;  %1394 = vmatpush1.bf16.msra.mxu1 %v7778_v31  ;;  %v7849_v30 = vld [vmem:[%s11785_s20 + $0x268] ss:$16 sps:$4 sm:$0xff]   ;;  %v7854_v31 = vld [vmem:[%s11785_s20 + $0x284] ss:$16 sps:$4 sm:$0xff]  }
  0x2b   :  { %1272 = vmatprep.subr.bf16.mxu0 %v7779_v32  ;;  %1395 = vmatprep.subr.bf16.mxu1 %v7781_v33  ;;  %v7857_v32 = vld [vmem:[%s11785_s20 + $0x28c] ss:$16 sps:$4 sm:$0xff]   ;;  %v7852_v33 = vld [vmem:[%s11785_s20 + $0x280] ss:$16 sps:$4 sm:$0xff]  }
  0x2e   :  { %1273 = vmatpush1.bf16.msra.mxu0 %v7783_v34  ;;  %1396 = vmatpush1.bf16.msra.mxu1 %v7784_v35  ;;  %v7855_v34 = vld [vmem:[%s11785_s20 + $0x288] ss:$16 sps:$4 sm:$0xff]   ;;  %v7860_v35 = vld [vmem:[%s11785_s20 + $0x2a4] ss:$16 sps:$4 sm:$0xff]  }
  0x2f   :  { %1274 = vmatprep.subr.bf16.mxu0 %v7785_v39  ;;  %1397 = vmatprep.subr.bf16.mxu1 %v7787_v40  ;;  %v7861_v39 = vld [vmem:[%s11785_s20 + $0x2a8] ss:$16 sps:$4 sm:$0xff]   ;;  %v7866_v40 = vld [vmem:[%s11785_s20 + $0x2c4] ss:$16 sps:$4 sm:$0xff]  }
  0x32   :  { %1275 = vmatpush1.bf16.msra.mxu0 %v7789_v41  ;;  %1398 = vmatpush1.bf16.msra.mxu1 %v7790_v44  ;;  %v7869_v41 = vld [vmem:[%s11785_s20 + $0x2cc] ss:$16 sps:$4 sm:$0xff]   ;;  %v7867_v44 = vld [vmem:[%s11785_s20 + $0x2c8] ss:$16 sps:$4 sm:$0xff]  }
  0x33   :  { %1276 = vmatprep.subr.bf16.mxu0 %v7791_v45  ;;  %1399 = vmatprep.subr.bf16.mxu1 %v7793_v46  ;;  %v7872_v45 = vld [vmem:[%s11785_s20 + $0x2e4] ss:$16 sps:$4 sm:$0xff]   ;;  %v7875_v46 = vld [vmem:[%s11785_s20 + $0x2ec] ss:$16 sps:$4 sm:$0xff]  }
  0x36   :  { %1277 = vmatpush1.bf16.msra.mxu0 %v7795_v47  ;;  %1400 = vmatpush1.bf16.msra.mxu1 %v7796_v48  ;;  %v7870_v47 = vld [vmem:[%s11785_s20 + $0x2e0] ss:$16 sps:$4 sm:$0xff]   ;;  %v7873_v48 = vld [vmem:[%s11785_s20 + $0x2e8] ss:$16 sps:$4 sm:$0xff]  }
  0x37   :  { %1278 = vmatprep.subr.bf16.mxu0 %v7797_v50  ;;  %1401 = vmatprep.subr.bf16.mxu1 %v7799_v51  ;;  %v7881_v50 = vld [vmem:[%s11785_s20 + $0x30c] ss:$16 sps:$4 sm:$0xff]   ;;  %v7876_v51 = vld [vmem:[%s11785_s20 + $0x300] ss:$16 sps:$4 sm:$0xff]  }
  0x3a   :  { %1279 = vmatpush1.bf16.msra.mxu0 %v7801_v53  ;;  %1402 = vmatpush1.bf16.msra.mxu1 %v7802_v55  ;;  %v7884_v53 = vld [vmem:[%s11785_s20 + $0x324] ss:$16 sps:$4 sm:$0xff]   ;;  %v7882_v55 = vld [vmem:[%s11785_s20 + $0x320] ss:$16 sps:$4 sm:$0xff]  }
  0x3b   :  { %1280 = vmatprep.subr.bf16.mxu0 %v7803_v56  ;;  %1403 = vmatprep.subr.bf16.mxu1 %v7805_v57  ;;  %v7885_v56 = vld [vmem:[%s11785_s20 + $0x328] ss:$16 sps:$4 sm:$0xff]   ;;  %v7890_v57 = vld [vmem:[%s11785_s20 + $0x344] ss:$16 sps:$4 sm:$0xff]  }
  0x3e   :  { %1281 = vmatpush1.bf16.msra.mxu0 %v7807_v59  ;;  %1404 = vmatpush1.bf16.msra.mxu1 %v7808_v61  ;;  %v7888_v59 = vld [vmem:[%s11785_s20 + $0x340] ss:$16 sps:$4 sm:$0xff]   ;;  %v7896_v61 = vld [vmem:[%s11785_s20 + $0x364] ss:$16 sps:$4 sm:$0xff]  }
  0x3f   :  { %1282 = vmatprep.subr.bf16.mxu0 %v7809_v62  ;;  %1405 = vmatprep.subr.bf16.mxu1 %v7811_v63  ;;  %v7899_v62 = vld [vmem:[%s11785_s20 + $0x36c] ss:$16 sps:$4 sm:$0xff]   ;;  %v7894_v63 = vld [vmem:[%s11785_s20 + $0x360] ss:$16 sps:$4 sm:$0xff]  }
  0x42   :  { %1283 = vmatpush1.bf16.msra.mxu0 %v7813_v0  ;;  %1406 = vmatpush1.bf16.msra.mxu1 %v7814_v1  ;;  %v7897_v0 = vld [vmem:[%s11785_s20 + $0x368] ss:$16 sps:$4 sm:$0xff]   ;;  %v7902_v1 = vld [vmem:[%s11785_s20 + $0x384] ss:$16 sps:$4 sm:$0xff]  }
  0x43   :  { %1284 = vmatprep.subr.bf16.mxu0 %v7815_v2  ;;  %1407 = vmatprep.subr.bf16.mxu1 %v7817_v3  ;;  %v7905_v2 = vld [vmem:[%s11785_s20 + $0x38c] ss:$16 sps:$4 sm:$0xff]   ;;  %v7900_v3 = vld [vmem:[%s11785_s20 + $0x380] ss:$16 sps:$4 sm:$0xff]  }
  0x46   :  { %1285 = vmatpush1.bf16.msra.mxu0 %v7819_v5  ;;  %1408 = vmatpush1.bf16.msra.mxu1 %v7820_v6  ;;  %v7908_v5 = vld [vmem:[%s11785_s20 + $0x3a4] ss:$16 sps:$4 sm:$0xff]   ;;  %v7911_v6 = vld [vmem:[%s11785_s20 + $0x3ac] ss:$16 sps:$4 sm:$0xff]  }
  0x47   :  { %1286 = vmatprep.subr.bf16.mxu0 %v7821_v7  ;;  %1409 = vmatprep.subr.bf16.mxu1 %v7823_v8  ;;  %v7906_v7 = vld [vmem:[%s11785_s20 + $0x3a0] ss:$16 sps:$4 sm:$0xff]   ;;  %v7909_v8 = vld [vmem:[%s11785_s20 + $0x3a8] ss:$16 sps:$4 sm:$0xff]  }
  0x4a   :  { %1287 = vmatpush1.bf16.msra.mxu0 %v7825_v10  ;;  %1410 = vmatpush1.bf16.msra.mxu1 %v7826_v11  ;;  %v7914_v10 = vld [vmem:[%s11785_s20 + $0x3c4] ss:$16 sps:$4 sm:$0xff]   ;;  %v7917_v11 = vld [vmem:[%s11785_s20 + $0x3cc] ss:$16 sps:$4 sm:$0xff]  }
  0x4b   :  { %1297 = vmatprep.subr.bf16.mxu0 %v7830_v12  ;;  %1420 = vmatprep.subr.bf16.mxu1 %v7833_v13  ;;  %v7912_v12 = vld [vmem:[%s11785_s20 + $0x3c0] ss:$16 sps:$4 sm:$0xff]   ;;  %v7915_v13 = vld [vmem:[%s11785_s20 + $0x3c8] ss:$16 sps:$4 sm:$0xff]  }
  0x4d   :  { %1289 = vmatmul.mubr.bf16.vlgmr.msra.gmra.mrb[0].mxu0 %v95_v15  ;;  %1412 = vmatmul.mubr.bf16.vlgmr.msra.gmra.mrb[0].mxu1 %v95_v15  ;;  %v7923_v15 = vld [vmem:[%s11785_s20 + $0x3ec] ss:$16 sps:$4 sm:$0xff]  }
  0x4e   :  { %1298 = vmatpush1.bf16.msra.mxu0 %v7828_v16  ;;  %1421 = vmatpush1.bf16.msra.mxu1 %v7831_v17  ;;  %v7918_v16 = vld [vmem:[%s11785_s20 + $0x3e0] ss:$16 sps:$4 sm:$0xff]   ;;  %v9243_v17 = vld.sshfl [vmem:[%s11786_s26 + $0x8] sm:$0x33 pattern:$0x76325410] }
  0x4f   :  { %1299 = vmatprep.subr.bf16.mxu0 %v7836_v18  ;;  %1422 = vmatprep.subr.bf16.mxu1 %v7839_v19  ;;  %v7921_v18 = vld [vmem:[%s11785_s20 + $0x3e8] ss:$16 sps:$4 sm:$0xff]   ;;  %v7926_v19 = vld [vmem:[%s11785_s20 + $0x404] ss:$16 sps:$4 sm:$0xff]  }
  0x50   :  { %1329 = vmatprep.mubr.bf16.mxu0 %v98_v20  ;;  %1452 = vmatprep.mubr.bf16.mxu1 %v98_v20  ;;  %v7929_v20 = vld [vmem:[%s11785_s20 + $0x40c] ss:$16 sps:$4 sm:$0xff]  }
  0x52   :  { %1300 = vmatpush1.bf16.msra.mxu0 %v7834_v21  ;;  %1423 = vmatpush1.bf16.msra.mxu1 %v7837_v22  ;;  %v88_v21 = vcombine.high %v9243_v17, %v9243_v17  ;;  %v97_v22 = vpack.c.bf16 %v9041_v9, %v9041_v9  ;;  %v7935_v9 = vld [vmem:[%s11785_s20 + $0x42c] ss:$16 sps:$4 sm:$0xff]  }
  0x53   :  { %1301 = vmatprep.subr.bf16.mxu0 %v7842_v23  ;;  %1424 = vmatprep.subr.bf16.mxu1 %v7845_v24  ;;  %v7924_v23 = vld [vmem:[%s11785_s20 + $0x400] ss:$16 sps:$4 sm:$0xff]   ;;  %v7927_v24 = vld [vmem:[%s11785_s20 + $0x408] ss:$16 sps:$4 sm:$0xff]  }
  0x56   :  { %1302 = vmatpush1.bf16.msra.mxu0 %v7840_v25  ;;  %1425 = vmatpush1.bf16.msra.mxu1 %v7843_v26  ;;  %v7932_v25 = vld [vmem:[%s11785_s20 + $0x424] ss:$16 sps:$4 sm:$0xff]   ;;  %v100_v26 = vpack.c.bf16 %v88_v21, %v88_v21 }
  0x57   :  { %1303 = vmatprep.subr.bf16.mxu0 %v7848_v27  ;;  %1426 = vmatprep.subr.bf16.mxu1 %v7851_v28  ;;  %v7930_v27 = vld [vmem:[%s11785_s20 + $0x420] ss:$16 sps:$4 sm:$0xff]   ;;  %v7933_v28 = vld [vmem:[%s11785_s20 + $0x428] ss:$16 sps:$4 sm:$0xff]  }
  0x5a   :  { %1304 = vmatpush1.bf16.msra.mxu0 %v7846_v29  ;;  %1427 = vmatpush1.bf16.msra.mxu1 %v7849_v30  ;;  %v7938_v29 = vld [vmem:[%s11785_s20 + $0x444] ss:$16 sps:$4 sm:$0xff]   ;;  %v7941_v30 = vld [vmem:[%s11785_s20 + $0x44c] ss:$16 sps:$4 sm:$0xff]  }
  0x5b   :  { %1305 = vmatprep.subr.bf16.mxu0 %v7854_v31  ;;  %1428 = vmatprep.subr.bf16.mxu1 %v7857_v32  ;;  %v7936_v31 = vld [vmem:[%s11785_s20 + $0x440] ss:$16 sps:$4 sm:$0xff]   ;;  %v7939_v32 = vld [vmem:[%s11785_s20 + $0x448] ss:$16 sps:$4 sm:$0xff]  }
  0x5e   :  { %1306 = vmatpush1.bf16.msra.mxu0 %v7852_v33  ;;  %1429 = vmatpush1.bf16.msra.mxu1 %v7855_v34  ;;  %v7944_v33 = vld [vmem:[%s11785_s20 + $0x464] ss:$16 sps:$4 sm:$0xff]   ;;  %v7947_v34 = vld [vmem:[%s11785_s20 + $0x46c] ss:$16 sps:$4 sm:$0xff]  }
  0x5f   :  { %1307 = vmatprep.subr.bf16.mxu0 %v7860_v35  ;;  %1430 = vmatprep.subr.bf16.mxu1 %v7863_v36  ;;  %v7942_v35 = vld [vmem:[%s11785_s20 + $0x460] ss:$16 sps:$4 sm:$0xff]   ;;  %v7945_v36 = vld [vmem:[%s11785_s20 + $0x468] ss:$16 sps:$4 sm:$0xff]  }
  0x62   :  { %1308 = vmatpush1.bf16.msra.mxu0 %v7858_v37  ;;  %1431 = vmatpush1.bf16.msra.mxu1 %v7861_v39  ;;  %v7950_v37 = vld [vmem:[%s11785_s20 + $0x484] ss:$16 sps:$4 sm:$0xff]   ;;  %v7953_v39 = vld [vmem:[%s11785_s20 + $0x48c] ss:$16 sps:$4 sm:$0xff]  }
  0x63   :  { %1309 = vmatprep.subr.bf16.mxu0 %v7866_v40  ;;  %1432 = vmatprep.subr.bf16.mxu1 %v7869_v41  ;;  %v7948_v40 = vld [vmem:[%s11785_s20 + $0x480] ss:$16 sps:$4 sm:$0xff]   ;;  %v7951_v41 = vld [vmem:[%s11785_s20 + $0x488] ss:$16 sps:$4 sm:$0xff]  }
  0x66   :  { %1310 = vmatpush1.bf16.msra.mxu0 %v7864_v42  ;;  %1433 = vmatpush1.bf16.msra.mxu1 %v7867_v44  ;;  %v7956_v42 = vld [vmem:[%s11785_s20 + $0x4a4] ss:$16 sps:$4 sm:$0xff]   ;;  %v7959_v44 = vld [vmem:[%s11785_s20 + $0x4ac] ss:$16 sps:$4 sm:$0xff]  }
  0x67   :  { %1311 = vmatprep.subr.bf16.mxu0 %v7872_v45  ;;  %1434 = vmatprep.subr.bf16.mxu1 %v7875_v46  ;;  %v7954_v45 = vld [vmem:[%s11785_s20 + $0x4a0] ss:$16 sps:$4 sm:$0xff]   ;;  %v7957_v46 = vld [vmem:[%s11785_s20 + $0x4a8] ss:$16 sps:$4 sm:$0xff]  }
  0x6a   :  { %1312 = vmatpush1.bf16.msra.mxu0 %v7870_v47  ;;  %1435 = vmatpush1.bf16.msra.mxu1 %v7873_v48  ;;  %v7962_v47 = vld [vmem:[%s11785_s20 + $0x4c4] ss:$16 sps:$4 sm:$0xff]   ;;  %v7965_v48 = vld [vmem:[%s11785_s20 + $0x4cc] ss:$16 sps:$4 sm:$0xff]  }
  0x6b   :  { %1313 = vmatprep.subr.bf16.mxu0 %v7878_v49  ;;  %1436 = vmatprep.subr.bf16.mxu1 %v7881_v50  ;;  %v7960_v49 = vld [vmem:[%s11785_s20 + $0x4c0] ss:$16 sps:$4 sm:$0xff]   ;;  %v7963_v50 = vld [vmem:[%s11785_s20 + $0x4c8] ss:$16 sps:$4 sm:$0xff]  }
  0x6e   :  { %1314 = vmatpush1.bf16.msra.mxu0 %v7876_v51  ;;  %1437 = vmatpush1.bf16.msra.mxu1 %v7879_v52  ;;  %v7968_v51 = vld [vmem:[%s11785_s20 + $0x4e4] ss:$16 sps:$4 sm:$0xff]   ;;  %v7971_v52 = vld [vmem:[%s11785_s20 + $0x4ec] ss:$16 sps:$4 sm:$0xff]  }
  0x6f   :  { %1315 = vmatprep.subr.bf16.mxu0 %v7884_v53  ;;  %1438 = vmatprep.subr.bf16.mxu1 %v7887_v54  ;;  %v7966_v53 = vld [vmem:[%s11785_s20 + $0x4e0] ss:$16 sps:$4 sm:$0xff]   ;;  %v7969_v54 = vld [vmem:[%s11785_s20 + $0x4e8] ss:$16 sps:$4 sm:$0xff]  }
  0x72   :  { %1316 = vmatpush1.bf16.msra.mxu0 %v7882_v55  ;;  %1439 = vmatpush1.bf16.msra.mxu1 %v7885_v56  ;;  %v7974_v55 = vld [vmem:[%s11785_s20 + $0x504] ss:$16 sps:$4 sm:$0xff]   ;;  %v7977_v56 = vld [vmem:[%s11785_s20 + $0x50c] ss:$16 sps:$4 sm:$0xff]  }
  0x73   :  { %1317 = vmatprep.subr.bf16.mxu0 %v7890_v57  ;;  %1440 = vmatprep.subr.bf16.mxu1 %v7893_v58  ;;  %v7972_v57 = vld [vmem:[%s11785_s20 + $0x500] ss:$16 sps:$4 sm:$0xff]   ;;  %v7975_v58 = vld [vmem:[%s11785_s20 + $0x508] ss:$16 sps:$4 sm:$0xff]  }
  0x76   :  { %1318 = vmatpush1.bf16.msra.mxu0 %v7888_v59  ;;  %1441 = vmatpush1.bf16.msra.mxu1 %v7891_v60  ;;  %v7980_v59 = vld [vmem:[%s11785_s20 + $0x524] ss:$16 sps:$4 sm:$0xff]   ;;  %v7983_v60 = vld [vmem:[%s11785_s20 + $0x52c] ss:$16 sps:$4 sm:$0xff]  }
  0x77   :  { %1319 = vmatprep.subr.bf16.mxu0 %v7896_v61  ;;  %1442 = vmatprep.subr.bf16.mxu1 %v7899_v62  ;;  %v7978_v61 = vld [vmem:[%s11785_s20 + $0x520] ss:$16 sps:$4 sm:$0xff]   ;;  %v7981_v62 = vld [vmem:[%s11785_s20 + $0x528] ss:$16 sps:$4 sm:$0xff]  }
  0x7a   :  { %1320 = vmatpush1.bf16.msra.mxu0 %v7894_v63  ;;  %1443 = vmatpush1.bf16.msra.mxu1 %v7897_v0  ;;  %v7986_v63 = vld [vmem:[%s11785_s20 + $0x544] ss:$16 sps:$4 sm:$0xff]   ;;  %v7989_v0 = vld [vmem:[%s11785_s20 + $0x54c] ss:$16 sps:$4 sm:$0xff]  }
  0x7b   :  { %1321 = vmatprep.subr.bf16.mxu0 %v7902_v1  ;;  %1444 = vmatprep.subr.bf16.mxu1 %v7905_v2  ;;  %v7984_v1 = vld [vmem:[%s11785_s20 + $0x540] ss:$16 sps:$4 sm:$0xff]   ;;  %v7987_v2 = vld [vmem:[%s11785_s20 + $0x548] ss:$16 sps:$4 sm:$0xff]  }
  0x7e   :  { %1322 = vmatpush1.bf16.msra.mxu0 %v7900_v3  ;;  %1445 = vmatpush1.bf16.msra.mxu1 %v7903_v4  ;;  %v7992_v3 = vld [vmem:[%s11785_s20 + $0x564] ss:$16 sps:$4 sm:$0xff]   ;;  %v7995_v4 = vld [vmem:[%s11785_s20 + $0x56c] ss:$16 sps:$4 sm:$0xff]  }
  0x7f   :  { %1323 = vmatprep.subr.bf16.mxu0 %v7908_v5  ;;  %1446 = vmatprep.subr.bf16.mxu1 %v7911_v6  ;;  %v7990_v5 = vld [vmem:[%s11785_s20 + $0x560] ss:$16 sps:$4 sm:$0xff]   ;;  %v7993_v6 = vld [vmem:[%s11785_s20 + $0x568] ss:$16 sps:$4 sm:$0xff]  }
  0x82   :  { %1324 = vmatpush1.bf16.msra.mxu0 %v7906_v7  ;;  %1447 = vmatpush1.bf16.msra.mxu1 %v7909_v8  ;;  %v7998_v7 = vld [vmem:[%s11785_s20 + $0x584] ss:$16 sps:$4 sm:$0xff]   ;;  %v8001_v8 = vld [vmem:[%s11785_s20 + $0x58c] ss:$16 sps:$4 sm:$0xff]  }
  0x83   :  { %1325 = vmatprep.subr.bf16.mxu0 %v7914_v10  ;;  %1448 = vmatprep.subr.bf16.mxu1 %v7917_v11  ;;  %v7996_v10 = vld [vmem:[%s11785_s20 + $0x580] ss:$16 sps:$4 sm:$0xff]   ;;  %v7999_v11 = vld [vmem:[%s11785_s20 + $0x588] ss:$16 sps:$4 sm:$0xff]  }
  0x86   :  { %1326 = vmatpush1.bf16.msra.mxu0 %v7912_v12  ;;  %1449 = vmatpush1.bf16.msra.mxu1 %v7915_v13  ;;  %v8004_v12 = vld [vmem:[%s11785_s20 + $0x5a4] ss:$16 sps:$4 sm:$0xff]   ;;  %v8007_v13 = vld [vmem:[%s11785_s20 + $0x5ac] ss:$16 sps:$4 sm:$0xff]  }
  0x87   :  { %1327 = vmatprep.subr.bf16.mxu0 %v7920_v14  ;;  %1450 = vmatprep.subr.bf16.mxu1 %v7923_v15  ;;  %v285_v14 = vld [vmem:[%s11785_s20 + $0x5c0] sm:$0x33]  ;;  %v286_v15 = vld [vmem:[%s11785_s20 + $0x5c8] sm:$0x33] }
  0x88   :  { %v6583_v21 = vcombine.high %v286_v15, %v286_v15 }
  0x8a   :  { %1328 = vmatpush1.bf16.msra.mxu0 %v7918_v16  ;;  %1451 = vmatpush1.bf16.msra.mxu1 %v7921_v18  ;;  %v8002_v16 = vld [vmem:[%s11785_s20 + $0x5a0] ss:$16 sps:$4 sm:$0xff]   ;;  %v8005_v18 = vld [vmem:[%s11785_s20 + $0x5a8] ss:$16 sps:$4 sm:$0xff]  }
  0x8b   :  { %1338 = vmatprep.subr.bf16.mxu0 %v7926_v19  ;;  %1461 = vmatprep.subr.bf16.mxu1 %v7929_v20  ;;  %v6581_v19 = vcombine.high %v285_v14, %v285_v14  ;;  %v6580_v20 = vcombine.low %v285_v14, %v285_v14  ;;  %v1525_v14 = vld [vmem:[%s11763_s4 + $0x58] sm:$0xff] }
  0x8d   :  { %1330 = vmatmul.mubr.bf16.vlgmr.msra.gmra.mrb[0].mxu0 %v97_v22  ;;  %1453 = vmatmul.mubr.bf16.vlgmr.msra.gmra.mrb[0].mxu1 %v97_v22  ;;  %v6582_v22 = vcombine.low %v286_v15, %v286_v15  ;;  %v1557_v15 = vld [vmem:[%s11763_s4 + $0x158] sm:$0xff] }
  0x8e   :  { %1339 = vmatpush1.bf16.msra.mxu0 %v7924_v23  ;;  %1462 = vmatpush1.bf16.msra.mxu1 %v7927_v24  ;;  %v1530_v23 = vld [vmem:[%s11763_s4 + $0x80] sm:$0xff]  ;;  %v1531_v24 = vld [vmem:[%s11763_s4 + $0x88] sm:$0xff] }
  0x8f   :  { %1340 = vmatprep.subr.bf16.mxu0 %v7932_v25  ;;  %1463 = vmatprep.subr.bf16.mxu1 %v7935_v9  ;;  %v1245_v25 = vsel %vm1243_vm1, %v6580_v20, 0  ;;  %v1546_v9 = vld [vmem:[%s11763_s4 + $0x100] sm:$0xff] }
  0x90   :  { %6585 = vmatprep.mubr.msk.bf16.mxu0 %vm1239_vm0, %v100_v26  ;;  %6587 = vmatprep.mubr.msk.bf16.mxu1 %vm1239_vm0, %v100_v26  ;;  %v7378_v26 = vpack.c.bf16 %v1531_v24, %v1530_v23  ;;  %v1559_v23 = vld [vmem:[%s11763_s4 + $0x168] sm:$0xff] }
  0x92   :  { %1341 = vmatpush1.bf16.msra.mxu0 %v7930_v27  ;;  %1464 = vmatpush1.bf16.msra.mxu1 %v7933_v28  ;;  %v1514_v27 = vld [vmem:[%s11763_s4] sm:$0xff]  ;;  %v1515_v28 = vld [vmem:[%s11763_s4 + $0x8] sm:$0xff] }
  0x93   :  { %1342 = vmatprep.subr.bf16.mxu0 %v7938_v29  ;;  %1465 = vmatprep.subr.bf16.mxu1 %v7941_v30  ;;  %v1251_v29 = vsel %vm1243_vm1, %v6582_v22, 0  ;;  %v1547_v30 = vld [vmem:[%s11763_s4 + $0x108] sm:$0xff]  ;;  %v1558_v22 = vld [vmem:[%s11763_s4 + $0x160] sm:$0xff] }
  0x94   :  { %v7429_v24 = vpack.c.bf16 %v1559_v23, %v1558_v22 }
  0x96   :  { %1343 = vmatpush1.bf16.msra.mxu0 %v7936_v31  ;;  %1466 = vmatpush1.bf16.msra.mxu1 %v7939_v32  ;;  %v1532_v31 = vld [vmem:[%s11763_s4 + $0x90] sm:$0xff]  ;;  %v1533_v32 = vld [vmem:[%s11763_s4 + $0x98] sm:$0xff] }
  0x97   :  { %1344 = vmatprep.subr.bf16.mxu0 %v7944_v33  ;;  %1467 = vmatprep.subr.bf16.mxu1 %v7947_v34  ;;  %v99_v33 = vpack.c.bf16 %v9243_v17, %v9243_v17  ;;  %v7380_v34 = vpack.c.bf16 %v1515_v28, %v1514_v27  ;;  %v1549_v17 = vld [vmem:[%s11763_s4 + $0x118] sm:$0xff]  ;;  %v1562_v27 = vld [vmem:[%s11763_s4 + $0x180] sm:$0xff]  ;;  %v1563_v28 = vld [vmem:[%s11763_s4 + $0x188] sm:$0xff] }
  0x9a   :  { %1345 = vmatpush1.bf16.msra.mxu0 %v7942_v35  ;;  %1468 = vmatpush1.bf16.msra.mxu1 %v7945_v36  ;;  %v7411_v35 = vpack.c.bf16 %v1547_v30, %v1546_v9  ;;  %v1548_v36 = vld [vmem:[%s11763_s4 + $0x110] sm:$0xff]  ;;  %v1561_v9 = vld [vmem:[%s11763_s4 + $0x178] sm:$0xff] }
  0x9b   :  { %1346 = vmatprep.subr.bf16.mxu0 %v7950_v37  ;;  %1469 = vmatprep.subr.bf16.mxu1 %v7953_v39  ;;  %v7382_v37 = vpack.c.bf16 %v1533_v32, %v1532_v31  ;;  %v1516_v39 = vld [vmem:[%s11763_s4 + $0x10] sm:$0xff]  ;;  %v1565_v31 = vld [vmem:[%s11763_s4 + $0x198] sm:$0xff] }
  0x9c   :  { %v1564_v30 = vld [vmem:[%s11763_s4 + $0x190] sm:$0xff] }
  0x9d   :  { %v7438_v32 = vpack.c.bf16 %v1565_v31, %v1564_v30  ;;  %v1758_v30 = vld [vmem:[%s11765_s6 + $0x110] sm:$0xff] }
  0x9e   :  { %1347 = vmatpush1.bf16.msra.mxu0 %v7948_v40  ;;  %1470 = vmatpush1.bf16.msra.mxu1 %v7951_v41  ;;  %v1517_v40 = vld [vmem:[%s11763_s4 + $0x18] sm:$0xff]  ;;  %v8741_v41 = vmov 0.0|0.0  }
  0x9f   :  { %1348 = vmatprep.subr.bf16.mxu0 %v7956_v42  ;;  %1471 = vmatprep.subr.bf16.mxu1 %v7959_v44  ;;  %v1534_v42 = vld [vmem:[%s11763_s4 + $0xa0] sm:$0xff]  ;;  %v1535_v44 = vld [vmem:[%s11763_s4 + $0xa8] sm:$0xff] }
  0xa2   :  { %1349 = vmatpush1.bf16.msra.mxu0 %v7954_v45  ;;  %1472 = vmatpush1.bf16.msra.mxu1 %v7957_v46  ;;  %v7384_v45 = vpack.c.bf16 %v1517_v40, %v1516_v39  ;;  %v7414_v46 = vpack.c.bf16 %v1549_v17, %v1548_v36  ;;  %v1566_v36 = vld [vmem:[%s11763_s4 + $0x1a0] sm:$0xff]  ;;  %v1544_v40 = vld [vmem:[%s11763_s4 + $0xf0] sm:$0xff]  ;;  %v1545_v17 = vld [vmem:[%s11763_s4 + $0xf8] sm:$0xff] }
  0xa3   :  { %1350 = vmatprep.subr.bf16.mxu0 %v7962_v47  ;;  %1473 = vmatprep.subr.bf16.mxu1 %v7965_v48  ;;  %v1550_v47 = vld [vmem:[%s11763_s4 + $0x120] sm:$0xff]  ;;  %v7386_v48 = vpack.c.bf16 %v1535_v44, %v1534_v42  ;;  %v9596_v42 = vsub.s32 0, %v8966_v43  ;;  %v9599_v44 = vsub.s32 2, %v8966_v43 }
  0xa6   :  { %1351 = vmatpush1.bf16.msra.mxu0 %v7960_v49  ;;  %1474 = vmatpush1.bf16.msra.mxu1 %v7963_v50  ;;  %v1518_v49 = vld [vmem:[%s11763_s4 + $0x20] sm:$0xff]  ;;  %v1519_v50 = vld [vmem:[%s11763_s4 + $0x28] sm:$0xff] }
  0xa7   :  { %1352 = vmatprep.subr.bf16.mxu0 %v7968_v51  ;;  %1475 = vmatprep.subr.bf16.mxu1 %v7971_v52  ;;  %v1551_v51 = vld [vmem:[%s11763_s4 + $0x128] sm:$0xff]  ;;  %v1536_v52 = vld [vmem:[%s11763_s4 + $0xb0] sm:$0xff] }
  0xaa   :  { %1353 = vmatpush1.bf16.msra.mxu0 %v7966_v53  ;;  %1476 = vmatpush1.bf16.msra.mxu1 %v7969_v54  ;;  %v1537_v53 = vld [vmem:[%s11763_s4 + $0xb8] sm:$0xff]  ;;  %v7388_v54 = vpack.c.bf16 %v1519_v50, %v1518_v49  ;;  %v9613_v49 = vld [vmem:[%s11772_s13] sm:$0xf]  ;;  %v9616_v50 = vsub.s32 3, %v8966_v43 }
  0xab   :  { %1354 = vmatprep.subr.bf16.mxu0 %v7974_v55  ;;  %1477 = vmatprep.subr.bf16.mxu1 %v7977_v56  ;;  %v7417_v55 = vpack.c.bf16 %v1551_v51, %v1550_v47  ;;  %v1552_v56 = vld [vmem:[%s11763_s4 + $0x130] sm:$0xff] }
  0xac   :  { %v1528_v47 = vld [vmem:[%s11763_s4 + $0x70] sm:$0xff] }
  0xae   :  { %1355 = vmatpush1.bf16.msra.mxu0 %v7972_v57  ;;  %1478 = vmatpush1.bf16.msra.mxu1 %v7975_v58  ;;  %v7390_v57 = vpack.c.bf16 %v1537_v53, %v1536_v52  ;;  %v1520_v58 = vld [vmem:[%s11763_s4 + $0x30] sm:$0xff]  ;;  %v2547_v52 = vrot.slane %v9613_v49, %v9596_v42  ;;  %v2555_v53 = vrot.slane %v9613_v49, %v9599_v44 }
  0xaf   :  { %1356 = vmatprep.subr.bf16.mxu0 %v7980_v59  ;;  %1479 = vmatprep.subr.bf16.mxu1 %v7983_v60  ;;  %v1521_v59 = vld [vmem:[%s11763_s4 + $0x38] sm:$0xff] }
  0xb0   :  { %v1553_v60 = vld [vmem:[%s11763_s4 + $0x138] sm:$0xff] }
  0xb2   :  { %1357 = vmatpush1.bf16.msra.mxu0 %v7978_v61  ;;  %1480 = vmatpush1.bf16.msra.mxu1 %v7981_v62  ;;  %v1538_v61 = vld [vmem:[%s11763_s4 + $0xc0] sm:$0xff]  ;;  %v1539_v62 = vld [vmem:[%s11763_s4 + $0xc8] sm:$0xff] }
  0xb3   :  { %1358 = vmatprep.subr.bf16.mxu0 %v7986_v63  ;;  %1481 = vmatprep.subr.bf16.mxu1 %v7989_v0  ;;  %v7392_v63 = vpack.c.bf16 %v1521_v59, %v1520_v58  ;;  %v7420_v0 = vpack.c.bf16 %v1553_v60, %v1552_v56  ;;  %v1568_v56 = vld [vmem:[%s11763_s4 + $0x1b0] sm:$0x7]  ;;  %v1741_v58 = vld [vmem:[%s11765_s6 + $0x88] sm:$0xff]  ;;  %v8742_v59 = vmov 0.0  }
  0xb6   :  { %1359 = vmatpush1.bf16.msra.mxu0 %v7984_v1  ;;  %1482 = vmatpush1.bf16.msra.mxu1 %v7987_v2  ;;  %v1554_v1 = vld [vmem:[%s11763_s4 + $0x140] sm:$0xff]  ;;  %v7394_v2 = vpack.c.bf16 %v1539_v62, %v1538_v61 }
  0xb7   :  { %1360 = vmatprep.subr.bf16.mxu0 %v7992_v3  ;;  %1483 = vmatprep.subr.bf16.mxu1 %v7995_v4  ;;  %v1522_v3 = vld [vmem:[%s11763_s4 + $0x40] sm:$0xff]  ;;  %v1523_v4 = vld [vmem:[%s11763_s4 + $0x48] sm:$0xff] }
  0xb8   :  { %v287_v61 = vld [vmem:[%s11787_s24] sm:$0xf] }
  0xb9   :  { %v292_v62 = vrot.slane %v287_v61, %v9596_v42 }
  0xba   :  { %1361 = vmatpush1.bf16.msra.mxu0 %v7990_v5  ;;  %1484 = vmatpush1.bf16.msra.mxu1 %v7993_v6  ;;  %v1555_v5 = vld [vmem:[%s11763_s4 + $0x148] sm:$0xff]  ;;  %v1540_v6 = vld [vmem:[%s11763_s4 + $0xd0] sm:$0xff] }
  0xbb   :  { %1362 = vmatprep.subr.bf16.mxu0 %v7998_v7  ;;  %1485 = vmatprep.subr.bf16.mxu1 %v8001_v8  ;;  %v1541_v7 = vld [vmem:[%s11763_s4 + $0xd8] sm:$0xff]  ;;  %v7396_v8 = vpack.c.bf16 %v1523_v4, %v1522_v3 }
  0xbe   :  { %1363 = vmatpush1.bf16.msra.mxu0 %v7996_v10  ;;  %1486 = vmatpush1.bf16.msra.mxu1 %v7999_v11  ;;  %v7423_v10 = vpack.c.bf16 %v1555_v5, %v1554_v1  ;;  %v1556_v11 = vld [vmem:[%s11763_s4 + $0x150] sm:$0xff]  ;;  %v304_v1 = vrot.slane %v287_v61, %v9616_v50 }
  0xbf   :  { %1364 = vmatprep.subr.bf16.mxu0 %v8004_v12  ;;  %1487 = vmatprep.subr.bf16.mxu1 %v8007_v13  ;;  %v7398_v12 = vpack.c.bf16 %v1541_v7, %v1540_v6  ;;  %v1524_v13 = vld [vmem:[%s11763_s4 + $0x50] sm:$0xff]  ;;  %v7426_v20 = vpack.c.bf16 %v1557_v15, %v1556_v11  ;;  %v1724_v6 = vld [vmem:[%s11765_s6] sm:$0xff]  ;;  %v1725_v7 = vld [vmem:[%s11765_s6 + $0x8] sm:$0xff] }
  0xc2   :  { %1365 = vmatpush1.bf16.msra.mxu0 %v8002_v16  ;;  %1488 = vmatpush1.bf16.msra.mxu1 %v8005_v18  ;;  %v1542_v16 = vld [vmem:[%s11763_s4 + $0xe0] sm:$0xff]  ;;  %v1543_v18 = vld [vmem:[%s11763_s4 + $0xe8] sm:$0xff] }
  0xc3   :  { %6584 = vmatprep.subr.msk.bf16.mxu0 %vm1243_vm1, %v6581_v19  ;;  %6586 = vmatprep.subr.msk.bf16.mxu1 %vm1243_vm1, %v6583_v21  ;;  %v7400_v19 = vpack.c.bf16 %v1525_v14, %v1524_v13  ;;  %v7402_v21 = vpack.c.bf16 %v1543_v18, %v1542_v16  ;;  %v1756_v13 = vld [vmem:[%s11765_s6 + $0x100] sm:$0xff]  ;;  %v1757_v14 = vld [vmem:[%s11765_s6 + $0x108] sm:$0xff] }
  0xc6   :  { %1367 = vmatpush1.bf16.msra.mxu0 %v1245_v25  ;;  %1490 = vmatpush1.bf16.msra.mxu1 %v1251_v29  ;;  %v1560_v25 = vld [vmem:[%s11763_s4 + $0x170] sm:$0xff]  ;;  %v7435_v29 = vpack.c.bf16 %v1563_v28, %v1562_v27  ;;  %v7476_v27 = vpack.c.bf16 %v1757_v14, %v1756_v13  ;;  %v1751_v13 = vld [vmem:[%s11765_s6 + $0xd8] sm:$0xff] }
  0xc7   :  { %7379 = vmatprep.subr.bf16.mxu0 %v7378_v26  ;;  %7410 = vmatprep.subr.bf16.mxu1 %v8741_v41  ;;  %v7432_v26 = vpack.c.bf16 %v1561_v9, %v1560_v25  ;;  %v7445_v25 = vpack.c.bf16 %v1725_v7, %v1724_v6  ;;  %v1726_v28 = vld [vmem:[%s11765_s6 + $0x10] sm:$0xff]  ;;  %v1732_v7 = vld [vmem:[%s11765_s6 + $0x40] sm:$0xff] }
  0xc9   :  { %1371 = vmatmul.mubr.bf16.vlgmr.msra.gmra.mrb[0].mxu0 %v99_v33  ;;  %1494 = vmatmul.mubr.bf16.vlgmr.msra.gmra.mrb[0].mxu1 %v99_v33  ;;  %v1526_v33 = vld [vmem:[%s11763_s4 + $0x60] sm:$0xff] }
  0xca   :  { %7381 = vmatpush3.bf16.msra.mxu0 %v7380_v34  ;;  %7412 = vmatpush1.bf16.msra.mxu1 %v7411_v35  ;;  %v1527_v34 = vld [vmem:[%s11763_s4 + $0x68] sm:$0xff] }
  0xcb   :  { %7383 = vmatprep.subr.bf16.mxu0 %v7382_v37  ;;  %7413 = vmatprep.subr.bf16.mxu1 %v8741_v41  ;;  %v7404_v35 = vpack.c.bf16 %v1527_v34, %v1526_v33  ;;  %v1567_v37 = vld [vmem:[%s11763_s4 + $0x1a8] sm:$0xff]  ;;  %v1759_v34 = vld [vmem:[%s11765_s6 + $0x118] sm:$0xff] }
  0xcc   :  { %v7441_v39 = vpack.c.bf16 %v1567_v37, %v1566_v36  ;;  %v1745_v36 = vld [vmem:[%s11765_s6 + $0xa8] sm:$0xff] }
  0xce   :  { %7385 = vmatpush3.bf16.msra.mxu0 %v7384_v45  ;;  %7415 = vmatpush1.bf16.msra.mxu1 %v7414_v46  ;;  %v9602_v45 = vsub.s32 1, %v8966_v43  ;;  %v7406_v46 = vpack.c.bf16 %v1545_v17, %v1544_v40  ;;  %v7479_v40 = vpack.c.bf16 %v1759_v34, %v1758_v30  ;;  %v1754_v30 = vld [vmem:[%s11765_s6 + $0xf0] sm:$0xff] }
  0xcf   :  { %7387 = vmatprep.subr.bf16.mxu0 %v7386_v48  ;;  %7416 = vmatprep.subr.bf16.mxu1 %v8741_v41  ;;  %v1529_v48 = vld [vmem:[%s11763_s4 + $0x78] sm:$0xff] }
  0xd0   :  { %v7408_v51 = vpack.c.bf16 %v1529_v48, %v1528_v47  ;;  %v1729_v47 = vld [vmem:[%s11765_s6 + $0x28] sm:$0xff]  ;;  %v1760_v48 = vld [vmem:[%s11765_s6 + $0x120] sm:$0xff] }
  0xd2   :  { %7389 = vmatpush3.bf16.msra.mxu0 %v7388_v54  ;;  %7418 = vmatpush1.bf16.msra.mxu1 %v7417_v55  ;;  %v2551_v54 = vrot.slane %v9613_v49, %v9602_v45  ;;  %v2559_v55 = vrot.slane %v9613_v49, %v9616_v50 }
  0xd3   :  { %7391 = vmatprep.subr.bf16.mxu0 %v7390_v57  ;;  %7419 = vmatprep.subr.bf16.mxu1 %v8741_v41  ;;  %v1740_v57 = vld [vmem:[%s11765_s6 + $0x80] sm:$0xff] }
  0xd4   :  { %v7443_v60 = vpack.c.bf16 %v1741_v58, %v1740_v57  ;;  %v1747_v57 = vld [vmem:[%s11765_s6 + $0xb8] sm:$0xff] }
  0xd6   :  { %7393 = vmatpush3.bf16.msra.mxu0 %v7392_v63  ;;  %7421 = vmatpush1.bf16.msra.mxu1 %v7420_v0  ;;  %v300_v63 = vrot.slane %v287_v61, %v9599_v44  ;;  %v296_v0 = vrot.slane %v287_v61, %v9602_v45 }
  0xd7   :  { %7395 = vmatprep.subr.bf16.mxu0 %v7394_v2  ;;  %7422 = vmatprep.subr.bf16.mxu1 %v8741_v41 }
  0xda   :  { %7397 = vmatpush3.bf16.msra.mxu0 %v7396_v8  ;;  %7424 = vmatpush1.bf16.msra.mxu1 %v7423_v10 }
  0xdb   :  { %7399 = vmatprep.subr.bf16.mxu0 %v7398_v12  ;;  %7425 = vmatprep.subr.bf16.mxu1 %v8741_v41 }
  0xde   :  { %7401 = vmatpush3.bf16.msra.mxu0 %v7400_v19  ;;  %7427 = vmatpush1.bf16.msra.mxu1 %v7426_v20  ;;  %v1742_v20 = vld [vmem:[%s11765_s6 + $0x90] sm:$0xff] }
  0xdf   :  { %7403 = vmatprep.subr.bf16.mxu0 %v7402_v21  ;;  %7428 = vmatprep.subr.bf16.mxu1 %v8741_v41  ;;  %v1743_v21 = vld [vmem:[%s11765_s6 + $0x98] sm:$0xff] }
  0xe0   :  { %v7447_v33 = vpack.c.bf16 %v1743_v21, %v1742_v20  ;;  %v1766_v20 = vld [vmem:[%s11765_s6 + $0x150] sm:$0xff]  ;;  %v1767_v21 = vld [vmem:[%s11765_s6 + $0x158] sm:$0xff] }
  0xe2   :  { %7430 = vmatpush1.bf16.msra.mxu1 %v7429_v24  ;;  %7405 = vmatpush3.bf16.msra.mxu0 %v7404_v35  ;;  %v1744_v35 = vld [vmem:[%s11765_s6 + $0xa0] sm:$0xff] }
  0xe3   :  { %7431 = vmatprep.subr.bf16.mxu1 %v8741_v41  ;;  %7407 = vmatprep.subr.bf16.mxu0 %v7406_v46  ;;  %v7451_v17 = vpack.c.bf16 %v1745_v36, %v1744_v35  ;;  %v1728_v46 = vld [vmem:[%s11765_s6 + $0x20] sm:$0xff]  ;;  %v1738_v36 = vld [vmem:[%s11765_s6 + $0x70] sm:$0xff] }
  0xe4   :  { %v7453_v58 = vpack.c.bf16 %v1729_v47, %v1728_v46 }
  0xe6   :  { %7433 = vmatpush1.bf16.msra.mxu1 %v7432_v26  ;;  %7409 = vmatpush3.bf16.msra.mxu0 %v7408_v51  ;;  %v1761_v51 = vld [vmem:[%s11765_s6 + $0x128] sm:$0xff] }
  0xe7   :  { %7434 = vmatprep.subr.bf16.mxu1 %v8741_v41  ;;  %7444 = vmatprep.subr.bf16.mxu0 %v7443_v60  ;;  %v7482_v60 = vpack.c.bf16 %v1761_v51, %v1760_v48  ;;  %v1772_v48 = vld [vmem:[%s11765_s6 + $0x180] sm:$0xff]  ;;  %v1773_v51 = vld [vmem:[%s11765_s6 + $0x188] sm:$0xff] }
  0xea   :  { %7436 = vmatpush1.bf16.msra.mxu1 %v7435_v29  ;;  %v1727_v29 = vld [vmem:[%s11765_s6 + $0x18] sm:$0xff] }
  0xeb   :  { %7437 = vmatprep.subr.bf16.mxu1 %v8741_v41 }
  0xee   :  { %7439 = vmatpush1.bf16.msra.mxu1 %v7438_v32 }
  0xef   :  { %7440 = vmatprep.subr.bf16.mxu1 %v8741_v41 }
  0xf2   :  { %7442 = vmatpush1.bf16.msra.mxu1 %v7441_v39  ;;  %v7449_v39 = vpack.c.bf16 %v1727_v29, %v1726_v28  ;;  %v1768_v28 = vld [vmem:[%s11765_s6 + $0x160] sm:$0xff]  ;;  %v1769_v29 = vld [vmem:[%s11765_s6 + $0x168] sm:$0xff] }
  0xf3   :  { %1698 = vmatprep.subr.mxu1 %v8742_v59  ;;  %v7494_v34 = vpack.c.bf16 %v1769_v29, %v1768_v28  ;;  %v2037_v28 = vld [vmem:[%s11769_s10 + $0x60] sm:$0xff] }
  0xf6   :  { %6589 = vmatpush1.msk.msra.mxu1 %vm1580_vm2, %v1568_v56  ;;  %v1746_v56 = vld [vmem:[%s11765_s6 + $0xb0] sm:$0xff] }
  0xf7   :  { %7475 = vmatprep.subr.bf16.mxu1 %v8741_v41  ;;  %v7455_v61 = vpack.c.bf16 %v1747_v57, %v1746_v56  ;;  %v7500_v56 = vpack.c.bf16 %v1773_v51, %v1772_v48  ;;  %v1774_v57 = vld [vmem:[%s11765_s6 + $0x190] sm:$0xff] }
 0x19c   :  { %v1372_v2 = vpop.f32.mrb[0].mxu0  ;;  %v1495_v4 = vpop.f32.mrb[0].mxu1 }
 0x19d   :  { %v7663_v3 = vadd.f32 %v1372_v2, %v292_v62  ;;  %v1374_v5 = vpop.f32.mrb[1].mxu0  ;;  %v7665_v8 = vadd.f32 %v1495_v4, %v300_v63  ;;  %v1497_v11 = vpop.f32.mrb[1].mxu1  ;;  %v1730_v62 = vld [vmem:[%s11765_s6 + $0x30] sm:$0xff]  ;;  %v1731_v63 = vld [vmem:[%s11765_s6 + $0x38] sm:$0xff]  ;;  %v1748_v2 = vld [vmem:[%s11765_s6 + $0xc0] sm:$0xff] }
 0x19e   :  { %v7664_v10 = vadd.f32 %v1374_v5, %v296_v0  ;;  %v1376_v12 = vpop.f32.mrb[2].mxu0  ;;  %v7666_v16 = vadd.f32 %v1497_v11, %v304_v1  ;;  %v1499_v18 = vpop.f32.mrb[2].mxu1  ;;  %v1762_v0 = vld [vmem:[%s11765_s6 + $0x130] sm:$0xff]  ;;  %v1763_v1 = vld [vmem:[%s11765_s6 + $0x138] sm:$0xff]  ;;  %v7457_v4 = vpack.c.bf16 %v1731_v63, %v1730_v62  ;;  %v1765_v11 = vld [vmem:[%s11765_s6 + $0x148] sm:$0xff] }
 0x19f   :  { %v1506_v15 = vmul.f32 0.01, %v7663_v3  ;;  %v1377_v19 = vpop.f32.mrb[3].mxu0  ;;  %vm1502_vm4 = vcmp.ge.f32.partialorder %v7663_v3, 0.0  ;;  %v1508_v22 = vmul.f32 0.01, %v7665_v8  ;;  %v7485_v5 = vpack.c.bf16 %v1763_v1, %v1762_v0 }
 0x1a0   :  { %v1507_v23 = vmul.f32 0.01, %v7664_v10  ;;  %v1500_v24 = vpop.f32.mrb[3].mxu1  ;;  %vm1504_vm5 = vcmp.ge.f32.partialorder %v7665_v8, 0.0  ;;  %vm1505_vm6 = vcmp.ge.f32.partialorder %v7666_v16, 0.0  ;;  %vm1503_vm7 = vcmp.ge.f32.partialorder %v7664_v10, 0.0 }
 0x1a1   :  { %v1509_v9 = vmul.f32 0.01, %v7666_v16  ;;  %v9673_v32 = vsel %vm1502_vm4, %v7663_v3, %v1506_v15  ;;  %v9687_v37 = vsel %vm1504_vm5, %v7665_v8, %v1508_v22  ;;  %v1749_v3 = vld [vmem:[%s11765_s6 + $0xc8] sm:$0xff]  ;;  %v1750_v12 = vld [vmem:[%s11765_s6 + $0xd0] sm:$0xff]  ;;  %v1735_v19 = vld [vmem:[%s11765_s6 + $0x58] sm:$0xff] }
 0x1a2   :  { %v1511_v26 = vsel %vm1503_vm7, %v7664_v10, %v1507_v23  ;;  %v7459_v6 = vpack.c.bf16 %v1749_v3, %v1748_v2  ;;  %v1733_v8 = vld [vmem:[%s11765_s6 + $0x48] sm:$0xff]  ;;  %v1764_v10 = vld [vmem:[%s11765_s6 + $0x140] sm:$0xff]  ;;  %v1734_v18 = vld [vmem:[%s11765_s6 + $0x50] sm:$0xff] }
 0x1a3   :  { %1648 = vmatprep.mubr.f32.mxu0 %v1511_v26  ;;  %v1513_v31 = vsel %vm1505_vm6, %v7666_v16, %v1509_v9  ;;  %v7461_v14 = vpack.c.bf16 %v1733_v8, %v1732_v7  ;;  %v7488_v15 = vpack.c.bf16 %v1765_v11, %v1764_v10  ;;  %v7463_v16 = vpack.c.bf16 %v1751_v13, %v1750_v12  ;;  %v1752_v22 = vld [vmem:[%s11765_s6 + $0xe0] sm:$0xff]  ;;  %v1753_v23 = vld [vmem:[%s11765_s6 + $0xe8] sm:$0xff] }
 0x1a4   :  { %6590 = vmatprep.mubr.msk.f32.mxu1 %vm1576_vm3, %v1513_v31  ;;  %1649 = vmatmul.mubr.f32.vlgmr.msra.gmra.mrb[4].mxu0 %v9673_v32  ;;  %v7465_v24 = vpack.c.bf16 %v1735_v19, %v1734_v18  ;;  %v7467_v9 = vpack.c.bf16 %v1753_v23, %v1752_v22  ;;  %v1777_v62 = vld [vmem:[%s11765_s6 + $0x1a8] sm:$0xff]  ;;  %v1939_v0 = vld [vmem:[%s11767_s8] sm:$0xff] }
 0x1a5   :  { %1719 = vmatmul.mubr.f32.vlgmr.msra.gmra.mrb[4].mxu1 %v9687_v37  ;;  %7446 = vmatpush3.bf16.msra.mxu0 %v7445_v25  ;;  %v7491_v25 = vpack.c.bf16 %v1767_v21, %v1766_v20  ;;  %v1940_v1 = vld [vmem:[%s11767_s8 + $0x8] sm:$0xff]  ;;  %v6591_v13 = vld [vmem:[%s11766_s7] ss:$0 sm:$0xff] }
 0x1a6   :  { %7477 = vmatpush1.bf16.msra.mxu1 %v7476_v27  ;;  %1853 = vmatprep.mubr.f32.mxu0 %v1511_v26  ;;  %v1736_v26 = vld [vmem:[%s11765_s6 + $0x60] sm:$0xff]  ;;  %v1737_v27 = vld [vmem:[%s11765_s6 + $0x68] sm:$0xff] }
 0x1a7   :  { %6593 = vmatprep.mubr.msk.f32.mxu1 %vm1576_vm3, %v1513_v31  ;;  %7448 = vmatprep.subr.bf16.mxu0 %v7447_v33  ;;  %v1755_v31 = vld [vmem:[%s11765_s6 + $0xf8] sm:$0xff]  ;;  %v7469_v33 = vpack.c.bf16 %v1737_v27, %v1736_v26  ;;  %v1935_v21 = vld [vmem:[%s11788_s1] sm:$0x3] }
 0x1a8   :  { %7478 = vmatprep.subr.bf16.mxu1 %v8741_v41  ;;  %v7471_v35 = vpack.c.bf16 %v1755_v31, %v1754_v30  ;;  %v2025_v27 = vld [vmem:[%s11769_s10] sm:$0xff]  ;;  %v2028_v30 = vld [vmem:[%s11769_s10 + $0x18] sm:$0xff] }
 0x1a9   :  { %7450 = vmatpush3.bf16.msra.mxu0 %v7449_v39  ;;  %v1739_v39 = vld [vmem:[%s11765_s6 + $0x78] sm:$0xff]  ;;  %v7513_v29 = vpack.c.bf16 %v2037_v28, %v2025_v27  ;;  %v2079_v28 = vsub.s32 6, %v8966_v43 }
 0x1aa   :  { %7480 = vmatpush1.bf16.msra.mxu1 %v7479_v40  ;;  %7452 = vmatprep.subr.bf16.mxu0 %v7451_v17  ;;  %v1770_v40 = vld [vmem:[%s11765_s6 + $0x170] sm:$0xff]  ;;  %v1771_v17 = vld [vmem:[%s11765_s6 + $0x178] sm:$0xff]  ;;  %v7473_v46 = vpack.c.bf16 %v1739_v39, %v1738_v36 }
 0x1ab   :  { %7481 = vmatprep.subr.bf16.mxu1 %v8741_v41  ;;  %v7497_v47 = vpack.c.bf16 %v1771_v17, %v1770_v40  ;;  %v2040_v31 = vld [vmem:[%s11769_s10 + $0x78] sm:$0xff]  ;;  %v2027_v36 = vld [vmem:[%s11769_s10 + $0x10] sm:$0xff] }
 0x1ac   :  { %v2039_v39 = vld [vmem:[%s11769_s10 + $0x70] sm:$0xff] }
 0x1ad   :  { %7454 = vmatpush3.bf16.msra.mxu0 %v7453_v58  ;;  %v1775_v58 = vld [vmem:[%s11765_s6 + $0x198] sm:$0xff]  ;;  %v7517_v51 = vpack.c.bf16 %v2039_v39, %v2027_v36 }
 0x1ae   :  { %7483 = vmatpush1.bf16.msra.mxu1 %v7482_v60  ;;  %7456 = vmatprep.subr.bf16.mxu0 %v7455_v61  ;;  %v7503_v60 = vpack.c.bf16 %v1775_v58, %v1774_v57  ;;  %v1776_v61 = vld [vmem:[%s11765_s6 + $0x1a0] sm:$0xff] }
 0x1af   :  { %7484 = vmatprep.subr.bf16.mxu1 %v8741_v41  ;;  %v7506_v63 = vpack.c.bf16 %v1777_v62, %v1776_v61  ;;  %v2029_v57 = vld [vmem:[%s11769_s10 + $0x20] sm:$0xff]  ;;  %v2032_v61 = vld [vmem:[%s11769_s10 + $0x38] sm:$0xff] }
 0x1b0   :  { %v2041_v58 = vld [vmem:[%s11769_s10 + $0x80] sm:$0xff]  ;;  %v2044_v62 = vld [vmem:[%s11769_s10 + $0x98] sm:$0xff] }
 0x1b1   :  { %7458 = vmatpush3.bf16.msra.mxu0 %v7457_v4  ;;  %v6588_v4 = vld [vmem:[%s11764_s5] ss:$0 sm:$0xff] }
 0x1b2   :  { %7486 = vmatpush1.bf16.msra.mxu1 %v7485_v5  ;;  %7460 = vmatprep.subr.bf16.mxu0 %v7459_v6 }
 0x1b3   :  { %7487 = vmatprep.subr.bf16.mxu1 %v8741_v41 }
 0x1b5   :  { %7462 = vmatpush3.bf16.msra.mxu0 %v7461_v14 }
 0x1b6   :  { %7489 = vmatpush1.bf16.msra.mxu1 %v7488_v15  ;;  %7464 = vmatprep.subr.bf16.mxu0 %v7463_v16 }
 0x1b7   :  { %7490 = vmatprep.subr.bf16.mxu1 %v8741_v41 }
 0x1b9   :  { %7466 = vmatpush3.bf16.msra.mxu0 %v7465_v24 }
 0x1ba   :  { %7492 = vmatpush1.bf16.msra.mxu1 %v7491_v25  ;;  %7468 = vmatprep.subr.bf16.mxu0 %v7467_v9  ;;  %v2026_v25 = vld [vmem:[%s11769_s10 + $0x8] sm:$0xff] }
 0x1bb   :  { %7493 = vmatprep.subr.bf16.mxu1 %v8741_v41  ;;  %v2038_v9 = vld [vmem:[%s11769_s10 + $0x68] sm:$0xff] }
 0x1bc   :  { %v7511_v26 = vpack.c.bf16 %v2038_v9, %v2026_v25 }
 0x1bd   :  { %7470 = vmatpush3.bf16.msra.mxu0 %v7469_v33  ;;  %v7515_v33 = vpack.c.bf16 %v2040_v31, %v2028_v30  ;;  %v2083_v31 = vsub.s32 7, %v8966_v43 }
 0x1be   :  { %7495 = vmatpush1.bf16.msra.mxu1 %v7494_v34  ;;  %7472 = vmatprep.subr.bf16.mxu0 %v7471_v35  ;;  %v6594_v34 = vld [vmem:[%s11768_s9] ss:$0 sm:$0xff] }
 0x1bf   :  { %7496 = vmatprep.subr.bf16.mxu1 %v8741_v41 }
 0x1c1   :  { %7474 = vmatpush3.bf16.msra.mxu0 %v7473_v46  ;;  %v2030_v46 = vld [vmem:[%s11769_s10 + $0x28] sm:$0xff] }
 0x1c2   :  { %7498 = vmatpush1.bf16.msra.mxu1 %v7497_v47  ;;  %7508 = vmatprep.subr.bf16.mxu0 %v8741_v41  ;;  %v2042_v47 = vld [vmem:[%s11769_s10 + $0x88] sm:$0xff] }
 0x1c3   :  { %7499 = vmatprep.subr.bf16.mxu1 %v8741_v41 }
 0x1c4   :  { %1854 = vmatmul.mubr.f32.vlgmr.msra.gmra.mrb[6].mxu0 %v9673_v32  ;;  %v1778_v32 = vld [vmem:[%s11765_s6 + $0x1b0] sm:$0x7] }
 0x1c5   :  { %7375 = vmatprep.mubr.msk.f32.mxu0 %vm8743_vm8, %v8742_v59 }
 0x1c6   :  { %7501 = vmatpush1.bf16.msra.mxu1 %v7500_v56  ;;  %v7519_v56 = vpack.c.bf16 %v2042_v47, %v2030_v46 }
 0x1c7   :  { %7502 = vmatprep.subr.bf16.mxu1 %v8741_v41 }
 0x1ca   :  { %7504 = vmatpush1.bf16.msra.mxu1 %v7503_v60 }
 0x1cb   :  { %7505 = vmatprep.subr.bf16.mxu1 %v8741_v41  ;;  %v7509_v41 = vpack.c.bf16 %v1940_v1, %v1939_v0  ;;  %v2031_v0 = vld [vmem:[%s11769_s10 + $0x30] sm:$0xff] }
 0x1cc   :  { %v2043_v1 = vld [vmem:[%s11769_s10 + $0x90] sm:$0xff] }
 0x1cd   :  { %7510 = vmatpush3.bf16.msra.mxu0 %v7509_v41  ;;  %v2034_v41 = vld [vmem:[%s11769_s10 + $0x48] sm:$0xff] }
 0x1ce   :  { %7507 = vmatpush1.bf16.msra.mxu1 %v7506_v63  ;;  %7512 = vmatprep.subr.bf16.mxu0 %v7511_v26  ;;  %v7521_v63 = vpack.c.bf16 %v2041_v58, %v2029_v57 }
 0x1cf   :  { %1903 = vmatprep.subr.mxu1 %v8742_v59 }
 0x1d2   :  { %6592 = vmatpush1.msk.msra.mxu1 %vm1580_vm2, %v1778_v32  ;;  %v7523_v32 = vpack.c.bf16 %v2044_v62, %v2032_v61 }
 0x1d3   :  { %1924 = vmatmul.mubr.f32.vlgmr.msra.gmra.mrb[6].mxu1 %v9687_v37 }
 0x277   :  { %v7046_v2 = vpop.f32.mrb[4].mxu0 }
 0x278   :  { %v1720_v3 = vpop.f32.mrb[4].mxu1  ;;  %v7047_v37 = vpop.f32.mrb[5].mxu0 }
 0x279   :  { %v7048_v5 = vadd.f32 %v7047_v37, %v7046_v2  ;;  %v1722_v6 = vpop.f32.mrb[5].mxu1  ;;  %v2046_v2 = vld [vmem:[%s11769_s10 + $0xa8] sm:$0xff]  ;;  %v2033_v37 = vld [vmem:[%s11769_s10 + $0x40] sm:$0xff] }
 0x27a   :  { %v2036_v6 = vld [vmem:[%s11769_s10 + $0x58] sm:$0xff] }
 0x27b   :  { %v1651_v7 = vadd.f32 %v7048_v5, %v6588_v4  ;;  %v7527_v4 = vpack.c.bf16 %v2046_v2, %v2034_v41  ;;  %v2045_v5 = vld [vmem:[%s11769_s10 + $0xa0] sm:$0xff] }
 0x27d   :  { %v1721_v8 = vadd.f32 %v1720_v3, %v1651_v7  ;;  %v7525_v3 = vpack.c.bf16 %v2043_v1, %v2031_v0  ;;  %v2048_v7 = vld [vmem:[%s11769_s10 + $0xb8] sm:$0xff] }
 0x27f   :  { %1930 = vst.msk [vmem:[#allocation3] sm:$0x3] %vm1929_vm9, %v1721_v8 }
 0x297   :  { %v7081_v10 = vpop.f32.mrb[6].mxu0 }
 0x298   :  { %v7082_v11 = vpop.f32.mrb[7].mxu0 }
 0x299   :  { %v7083_v12 = vadd.f32 %v7082_v11, %v7081_v10  ;;  %v7531_v10 = vpack.c.bf16 %v2048_v7, %v2036_v6  ;;  %v2035_v11 = vld [vmem:[%s11769_s10 + $0x50] sm:$0xff] }
 0x29b   :  { %v1856_v14 = vadd.f32 %v7083_v12, %v6591_v13  ;;  %v2047_v12 = vld [vmem:[%s11769_s10 + $0xb0] sm:$0xff] }
 0x29c   :  { %v7533_v13 = vpack.c.bf16 %v2047_v12, %v2035_v11 }
 0x2a6   :  { %v1925_v15 = vpop.f32.mrb[6].mxu1 }
 0x2a7   :  { %v1926_v16 = vadd.f32 %v1925_v15, %v1856_v14  ;;  %v1927_v18 = vpop.f32.mrb[7].mxu1  ;;  %v2049_v14 = vld [vmem:[%s11770_s11] sm:$0xff] }
 0x2a8   :  { %v2056_v15 = vrot.slane %v2049_v14, %v9596_v42  ;;  %v2080_v36 = vrot.slane %v2049_v14, %v2079_v28 }
 0x2a9   :  { %1931 = vst.msk [vmem:[#allocation5] sm:$0x3] %vm1929_vm9, %v1926_v16  ;;  %v1932_v19 = vmul.f32 0.5, %v1926_v16  ;;  %v2060_v16 = vrot.slane %v2049_v14, %v9602_v45 }
 0x2ab   :  { %v1933_v20 = vmul.f32 1.442695, %v1932_v19 }
 0x2ad   :  { %8012 = vpow2.f32 %v1933_v20 }
 0x2b7   :  { %v8013_v22 = vpop.eup %8012 }
 0x2b8   :  { %v1936_v23 = vmul.f32 %v8013_v22, %v1935_v21  ;;  %v2064_v21 = vrot.slane %v2049_v14, %v9599_v44  ;;  %v2071_v22 = vsub.s32 4, %v8966_v43 }
 0x2ba   :  { %v1937_v24 = vadd.f32 %v1936_v23, %v1721_v8  ;;  %v7529_v8 = vpack.c.bf16 %v2045_v5, %v2033_v37  ;;  %v2072_v27 = vrot.slane %v2049_v14, %v2071_v22  ;;  %v9982_v37 = vmov 0.0  }
 0x2bb   :  { %v9984_v5 = vmov 0.0  }
 0x2bc   :  { %1938 = vst.msk [vmem:[#allocation7] sm:$0x3] %vm1929_vm9, %v1937_v24  ;;  %7376 = vmatmul.mubr.msk.f32.vlgmr.msra.gmra.mrb[8].mxu0 %vm1948_vm10, %v1937_v24  ;;  %v2075_v24 = vsub.s32 5, %v8966_v43 }
 0x2bd   :  { %2180 = vmatprep.mubr.f32.mxu0 %v8742_v59  ;;  %7514 = vmatpush1.bf16.msra.mxu0 %v7513_v29 }
 0x2be   :  { %7516 = vmatprep.subr.bf16.mxu0 %v7515_v33  ;;  %v2076_v30 = vrot.slane %v2049_v14, %v2075_v24 }
 0x38f   :  { %v2018_v35 = vpop.f32.mrb[8].mxu0 }
 0x390   :  { %v2019_v40 = vadd.f32 %v6594_v34, %v2018_v35  ;;  %v7377_v17 = vpop.f32.mrb[9].mxu0 }
 0x391   :  { %v2050_v17 = vld [vmem:[%s11770_s11 + $0x8] sm:$0xf]  ;;  %s9986_s11 = smov 0  }
 0x392   :  { %vm2022_vm11 = vcmp.ge.f32.partialorder %v2019_v40, 0.0  ;;  %v2023_v48 = vmul.f32 0.01, %v2019_v40  ;;  %v2092_v57 = vrot.slane %v2050_v17, %v9602_v45  ;;  %v2096_v62 = vrot.slane %v2050_v17, %v9599_v44 }
 0x394   :  { %v2024_v60 = vsel %vm2022_vm11, %v2019_v40, %v2023_v48  ;;  %v2084_v40 = vrot.slane %v2049_v14, %v2083_v31 }
 0x395   :  { %6596 = vmatmul.mubr.msk.f32.vlgmr.msra.gmra.mrb[10].mxu0 %vm1948_vm10, %v2024_v60 }
 0x396   :  { %7518 = vmatpush1.bf16.msra.mxu0 %v7517_v51  ;;  %2251 = vmatprep.mubr.f32.mxu0 %v8742_v59  ;;  %v2088_v51 = vrot.slane %v2050_v17, %v9596_v42 }
 0x397   :  { %7520 = vmatprep.subr.bf16.mxu0 %v7519_v56 }
 0x399   :  { %6597 = vmatmul.mubr.msk.f32.vlgmr.msra.gmra.mrb[12].mxu0 %vm1948_vm10, %v2024_v60 }
 0x39a   :  { %7522 = vmatpush1.bf16.msra.mxu0 %v7521_v63  ;;  %2322 = vmatprep.mubr.f32.mxu0 %v8742_v59 }
 0x39b   :  { %7524 = vmatprep.subr.bf16.mxu0 %v7523_v32  ;;  %v2100_v32 = vrot.slane %v2050_v17, %v9616_v50 }
 0x39d   :  { %6598 = vmatmul.mubr.msk.f32.vlgmr.msra.gmra.mrb[14].mxu0 %vm1948_vm10, %v2024_v60 }
 0x39e   :  { %7526 = vmatpush1.bf16.msra.mxu0 %v7525_v3  ;;  %2393 = vmatprep.mubr.f32.mxu0 %v8742_v59  ;;  %v9978_v3 = vmov 0.0  }
 0x39f   :  { %7528 = vmatprep.subr.bf16.mxu0 %v7527_v4  ;;  %v9980_v4 = vmov 0.0  }
 0x3a1   :  { %6599 = vmatmul.mubr.msk.f32.vlgmr.msra.gmra.mrb[16].mxu0 %vm1948_vm10, %v2024_v60 }
 0x3a2   :  { %7530 = vmatpush1.bf16.msra.mxu0 %v7529_v8  ;;  %2464 = vmatprep.mubr.f32.mxu0 %v8742_v59 }
 0x3a3   :  { %7532 = vmatprep.subr.bf16.mxu0 %v7531_v10 }
 0x3a5   :  { %6600 = vmatmul.mubr.msk.f32.vlgmr.msra.gmra.mrb[18].mxu0 %vm1948_vm10, %v2024_v60 }
 0x3a6   :  { %7534 = vmatpush1.bf16.msra.mxu0 %v7533_v13  ;;  %2535 = vmatprep.mubr.f32.mxu0 %v8742_v59  ;;  %v2068_v59 = vrot.slane %v2049_v14, %v9616_v50 }
 0x3a9   :  { %6601 = vmatmul.mubr.msk.f32.vlgmr.msra.gmra.mrb[20].mxu0 %vm1948_vm10, %v2024_v60 }
 0x468   :  { %v2182_v18 = vpop.f32.mrb[10].mxu0 }
 0x469   :  { %v9941_v19 = vadd.f32 %v2182_v18, %v2056_v15  ;;  %v2184_v20 = vpop.f32.mrb[11].mxu0 }
 0x46a   :  { %v9945_v23 = vadd.f32 %v2184_v20, %v2060_v16 }
 0x46c   :  { %v2253_v25 = vpop.f32.mrb[12].mxu0 }
 0x46d   :  { %v9949_v9 = vadd.f32 %v2253_v25, %v2064_v21  ;;  %v2255_v26 = vpop.f32.mrb[13].mxu0 }
 0x46e   :  { %v9952_v29 = vadd.f32 %v2255_v26, %v2068_v59 }
 0x470   :  { %v2324_v33 = vpop.f32.mrb[14].mxu0 }
 0x471   :  { %v9955_v34 = vadd.f32 %v2324_v33, %v2072_v27  ;;  %v2326_v35 = vpop.f32.mrb[15].mxu0 }
 0x472   :  { %v9957_v39 = vadd.f32 %v2326_v35, %v2076_v30 }
 0x474   :  { %v2395_v46 = vpop.f32.mrb[16].mxu0 }
 0x475   :  { %v9962_v47 = vadd.f32 %v2395_v46, %v2080_v36  ;;  %v2397_v48 = vpop.f32.mrb[17].mxu0 }
 0x476   :  { %v9965_v56 = vadd.f32 %v2397_v48, %v2084_v40 }
 0x478   :  { %v2466_v58 = vpop.f32.mrb[18].mxu0 }
 0x479   :  { %v9968_v60 = vadd.f32 %v2466_v58, %v2088_v51  ;;  %v2468_v61 = vpop.f32.mrb[19].mxu0 }
 0x47a   :  { %v9971_v63 = vadd.f32 %v2468_v61, %v2092_v57 }
 0x47c   :  { %v2537_v0 = vpop.f32.mrb[20].mxu0 }
 0x47d   :  { %v9974_v1 = vadd.f32 %v2537_v0, %v2096_v62  ;;  %v2539_v41 = vpop.f32.mrb[21].mxu0 }
 0x47e   :  { %v9976_v2 = vadd.f32 %v2539_v41, %v2100_v32 }
 0x47f LB: > { %v8014_v6 = vld [vmem:[%s11771_s12 + $0x4] ss:$48 sps:$4 sm:$0xff]   ;;  %v8018_v8 = vld [vmem:[%s11771_s12] ss:$48 sps:$4 sm:$0xff]   ;;  %v10017_v11 = vpack.c.bf16 %v8730_v37, %v8730_v37  ;;  %v10021_v12 = vpack.c.bf16 %v8722_v3, %v8722_v3  ;;  %s5505_s5 = sadd.s32 128, %s8738_s11  ;;  %s5495_s21 = sshra.s32 %s8738_s11, 3  ;;  %s8738_s11 = sphi %s9986_s11, %s2569_s11   ;;  %v8734_v5 = vphi %v9984_v5, %v11223_v5   ;;  %v8730_v37 = vphi %v9982_v37, %v11225_v37   ;;  %v8726_v4 = vphi %v9980_v4, %v5460_v4   ;;  %v8722_v3 = vphi %v9978_v3, %v5461_v3  }
 0x480   : > { %v8016_v7 = vld [vmem:[%s11771_s12 + $0x604] ss:$48 sps:$4 sm:$0xff]   ;;  %4882 = vmatprep.subr.bf16.mxu0 %v8014_v6  ;;  %v8019_v10 = vld [vmem:[%s11771_s12 + $0x600] ss:$48 sps:$4 sm:$0xff]   ;;  %s5515_s1 = sshra.s32 %s5505_s5, 3  ;;  %s5498_s7 = sand.u32 7, %s8738_s11 }
 0x481   : > { %4923 = vmatprep.subr.bf16.mxu1 %v8016_v7  ;;  %v8020_v13 = vld [vmem:[%s11771_s12 + $0x64] ss:$48 sps:$4 sm:$0xff]   ;;  %4883 = vmatpush1.bf16.msra.mxu0 %v8018_v8  ;;  %v8024_v15 = vld [vmem:[%s11771_s12 + $0x60] ss:$48 sps:$4 sm:$0xff]   ;;  %s7012_s9 = sshll.u32 %s5495_s21, 5  ;;  %s5518_s22 = sand.u32 7, %s5505_s5 }
 0x482   : > { %4924 = vmatpush1.bf16.msra.mxu1 %v8019_v10  ;;  %v8022_v14 = vld [vmem:[%s11771_s12 + $0x664] ss:$48 sps:$4 sm:$0xff]   ;;  %4884 = vmatprep.subr.bf16.mxu0 %v8020_v13  ;;  %v8025_v16 = vld [vmem:[%s11771_s12 + $0x660] ss:$48 sps:$4 sm:$0xff]   ;;  %s7013_s2 = sshll.u32 %s5515_s1, 5  ;;  %s5501_s23 = sadd.s32 %s7012_s9, %s5498_s7  ;;  %vm5493_vm12 = vcmp.lt.s32.totalorder %v68_v38, 512 }
 0x483   : > { %4914 = vmatprep.mubr.bf16.mxu0 %v10017_v11  ;;  %4925 = vmatprep.subr.bf16.mxu1 %v8022_v14  ;;  %v8026_v18 = vld [vmem:[%s11771_s12 + $0xc4] ss:$48 sps:$4 sm:$0xff]   ;;  %v8030_v21 = vld [vmem:[%s11771_s12 + $0xc0] ss:$48 sps:$4 sm:$0xff]   ;;  %s5521_s4 = sadd.s32 %s7013_s2, %s5518_s22  ;;  %s5502_s24 = scalar_lea.vmem [#allocation2], %s5501_s23 }
 0x484   : > { %4955 = vmatprep.mubr.bf16.mxu1 %v10021_v12  ;;  %v8028_v20 = vld [vmem:[%s11771_s12 + $0x6c4] ss:$48 sps:$4 sm:$0xff]   ;;  %v8031_v22 = vld [vmem:[%s11771_s12 + $0x6c0] ss:$48 sps:$4 sm:$0xff]   ;;  %s5522_s25 = scalar_lea.vmem [#allocation2], %s5521_s4  ;;  %s2569_s11 = sadd.s32 1, %s8738_s11  }
 0x485   : > { %4885 = vmatpush1.bf16.msra.mxu0 %v8024_v15  ;;  %v8032_v59 = vld [vmem:[%s11771_s12 + $0x124] ss:$48 sps:$4 sm:$0xff]   ;;  %v8036_v25 = vld [vmem:[%s11771_s12 + $0x120] ss:$48 sps:$4 sm:$0xff]   ;;  %p2566_p0 = scmp.ge.s32.totalorder %s2569_s11, 100  }
 0x486   : > { %4926 = vmatpush1.bf16.msra.mxu1 %v8025_v16  ;;  %4886 = vmatprep.subr.bf16.mxu0 %v8026_v18  ;;  %v8034_v24 = vld [vmem:[%s11771_s12 + $0x724] ss:$48 sps:$4 sm:$0xff]   ;;  %v8037_v26 = vld [vmem:[%s11771_s12 + $0x720] ss:$48 sps:$4 sm:$0xff]   ;;  %v5558_v49 = vld [vmem:[%s11773_s14 + $0x108] sm:$0xff] (%p2566_p0)  ;;  %s8746_s28 = smov (%p2566_p0), [#allocation3]  }
 0x487   : > { %4927 = vmatprep.subr.bf16.mxu1 %v8028_v20  ;;  %v8038_v27 = vld [vmem:[%s11771_s12 + $0x184] ss:$48 sps:$4 sm:$0xff]   ;;  %v8042_v30 = vld [vmem:[%s11771_s12 + $0x180] ss:$48 sps:$4 sm:$0xff]   ;;  %s6333_s29 = sshll.u32 (%p2566_p0), %s8746_s28, 4  ;;  %s6334_s29 = int_to_ptr.vmem [resolvable:$true] %s6333_s29 }
 0x488   : > { %v8040_v28 = vld [vmem:[%s11771_s12 + $0x784] ss:$48 sps:$4 sm:$0xff]   ;;  %v8043_v31 = vld [vmem:[%s11771_s12 + $0x780] ss:$48 sps:$4 sm:$0xff]  }
 0x489   : > { %4887 = vmatpush1.bf16.msra.mxu0 %v8030_v21  ;;  %v8044_v33 = vld [vmem:[%s11771_s12 + $0x1e4] ss:$48 sps:$4 sm:$0xff]   ;;  %v8048_v36 = vld [vmem:[%s11771_s12 + $0x1e0] ss:$48 sps:$4 sm:$0xff]  }
 0x48a   : > { %4928 = vmatpush1.bf16.msra.mxu1 %v8031_v22  ;;  %4888 = vmatprep.subr.bf16.mxu0 %v8032_v59  ;;  %v8046_v35 = vld [vmem:[%s11771_s12 + $0x7e4] ss:$48 sps:$4 sm:$0xff]   ;;  %v8049_v40 = vld [vmem:[%s11771_s12 + $0x7e0] ss:$48 sps:$4 sm:$0xff]  }
 0x48b   : > { %4929 = vmatprep.subr.bf16.mxu1 %v8034_v24  ;;  %v8050_v17 = vld [vmem:[%s11771_s12 + $0x244] ss:$48 sps:$4 sm:$0xff]   ;;  %v8054_v48 = vld [vmem:[%s11771_s12 + $0x240] ss:$48 sps:$4 sm:$0xff]  }
 0x48c   : > { %v8052_v46 = vld [vmem:[%s11771_s12 + $0x844] ss:$48 sps:$4 sm:$0xff]   ;;  %v8055_v51 = vld [vmem:[%s11771_s12 + $0x840] ss:$48 sps:$4 sm:$0xff]  }
 0x48d   : > { %4889 = vmatpush1.bf16.msra.mxu0 %v8036_v25  ;;  %v8056_v57 = vld [vmem:[%s11771_s12 + $0x2a4] ss:$48 sps:$4 sm:$0xff]   ;;  %v8060_v61 = vld [vmem:[%s11771_s12 + $0x2a0] ss:$48 sps:$4 sm:$0xff]  }
 0x48e   : > { %4930 = vmatpush1.bf16.msra.mxu1 %v8037_v26  ;;  %4890 = vmatprep.subr.bf16.mxu0 %v8038_v27  ;;  %v8058_v58 = vld [vmem:[%s11771_s12 + $0x8a4] ss:$48 sps:$4 sm:$0xff]   ;;  %v8061_v62 = vld [vmem:[%s11771_s12 + $0x8a0] ss:$48 sps:$4 sm:$0xff]  }
 0x48f   : > { %4931 = vmatprep.subr.bf16.mxu1 %v8040_v28  ;;  %v8062_v32 = vld [vmem:[%s11771_s12 + $0x304] ss:$48 sps:$4 sm:$0xff]   ;;  %v8066_v41 = vld [vmem:[%s11771_s12 + $0x300] ss:$48 sps:$4 sm:$0xff]  }
 0x490   : > { %v8064_v0 = vld [vmem:[%s11771_s12 + $0x904] ss:$48 sps:$4 sm:$0xff]   ;;  %v8067_v6 = vld [vmem:[%s11771_s12 + $0x900] ss:$48 sps:$4 sm:$0xff]  }
 0x491   : > { %4891 = vmatpush1.bf16.msra.mxu0 %v8042_v30  ;;  %v8068_v7 = vld [vmem:[%s11771_s12 + $0x364] ss:$48 sps:$4 sm:$0xff]   ;;  %v8072_v10 = vld [vmem:[%s11771_s12 + $0x360] ss:$48 sps:$4 sm:$0xff]  }
 0x492   : > { %4932 = vmatpush1.bf16.msra.mxu1 %v8043_v31  ;;  %4892 = vmatprep.subr.bf16.mxu0 %v8044_v33  ;;  %v8070_v8 = vld [vmem:[%s11771_s12 + $0x964] ss:$48 sps:$4 sm:$0xff]   ;;  %v8073_v13 = vld [vmem:[%s11771_s12 + $0x960] ss:$48 sps:$4 sm:$0xff]  }
 0x493   : > { %4933 = vmatprep.subr.bf16.mxu1 %v8046_v35  ;;  %v8074_v14 = vld [vmem:[%s11771_s12 + $0x3c4] ss:$48 sps:$4 sm:$0xff]   ;;  %v8078_v16 = vld [vmem:[%s11771_s12 + $0x3c0] ss:$48 sps:$4 sm:$0xff]  }
 0x494   : > { %v8076_v15 = vld [vmem:[%s11771_s12 + $0x9c4] ss:$48 sps:$4 sm:$0xff]   ;;  %v8079_v18 = vld [vmem:[%s11771_s12 + $0x9c0] ss:$48 sps:$4 sm:$0xff]  }
 0x495   : > { %4893 = vmatpush1.bf16.msra.mxu0 %v8048_v36  ;;  %v8080_v20 = vld [vmem:[%s11771_s12 + $0x424] ss:$48 sps:$4 sm:$0xff]   ;;  %v8084_v22 = vld [vmem:[%s11771_s12 + $0x420] ss:$48 sps:$4 sm:$0xff]  }
 0x496   : > { %4934 = vmatpush1.bf16.msra.mxu1 %v8049_v40  ;;  %4894 = vmatprep.subr.bf16.mxu0 %v8050_v17  ;;  %v8082_v21 = vld [vmem:[%s11771_s12 + $0xa24] ss:$48 sps:$4 sm:$0xff]   ;;  %v8085_v59 = vld [vmem:[%s11771_s12 + $0xa20] ss:$48 sps:$4 sm:$0xff]  }
 0x497   : > { %4935 = vmatprep.subr.bf16.mxu1 %v8052_v46  ;;  %v8086_v24 = vld [vmem:[%s11771_s12 + $0x484] ss:$48 sps:$4 sm:$0xff]   ;;  %v8090_v26 = vld [vmem:[%s11771_s12 + $0x480] ss:$48 sps:$4 sm:$0xff]  }
 0x498   : > { %v8088_v25 = vld [vmem:[%s11771_s12 + $0xa84] ss:$48 sps:$4 sm:$0xff]   ;;  %v8091_v27 = vld [vmem:[%s11771_s12 + $0xa80] ss:$48 sps:$4 sm:$0xff]  }
 0x499   : > { %4895 = vmatpush1.bf16.msra.mxu0 %v8054_v48  ;;  %v8092_v28 = vld [vmem:[%s11771_s12 + $0x4e4] ss:$48 sps:$4 sm:$0xff]   ;;  %v8096_v31 = vld [vmem:[%s11771_s12 + $0x4e0] ss:$48 sps:$4 sm:$0xff]  }
 0x49a   : > { %4936 = vmatpush1.bf16.msra.mxu1 %v8055_v51  ;;  %4896 = vmatprep.subr.bf16.mxu0 %v8056_v57  ;;  %v8094_v30 = vld [vmem:[%s11771_s12 + $0xae4] ss:$48 sps:$4 sm:$0xff]   ;;  %v8097_v33 = vld [vmem:[%s11771_s12 + $0xae0] ss:$48 sps:$4 sm:$0xff]  }
 0x49b   : > { %4937 = vmatprep.subr.bf16.mxu1 %v8058_v58  ;;  %v8098_v35 = vld [vmem:[%s11771_s12 + $0x544] ss:$48 sps:$4 sm:$0xff]   ;;  %v8102_v40 = vld [vmem:[%s11771_s12 + $0x540] ss:$48 sps:$4 sm:$0xff]   ;;  %v8112_v58 = vld [vmem:[%s11771_s12 + $0xc] ss:$48 sps:$4 sm:$0xff]  }
 0x49c   : > { %v8100_v36 = vld [vmem:[%s11771_s12 + $0xb44] ss:$48 sps:$4 sm:$0xff]   ;;  %v8103_v17 = vld [vmem:[%s11771_s12 + $0xb40] ss:$48 sps:$4 sm:$0xff]  }
 0x49d   : > { %4897 = vmatpush1.bf16.msra.mxu0 %v8060_v61  ;;  %v8104_v46 = vld [vmem:[%s11771_s12 + $0x5a4] ss:$48 sps:$4 sm:$0xff]   ;;  %v8108_v51 = vld [vmem:[%s11771_s12 + $0x5a0] ss:$48 sps:$4 sm:$0xff]   ;;  %v8115_v61 = vld [vmem:[%s11771_s12 + $0x60c] ss:$48 sps:$4 sm:$0xff]  }
 0x49e   : > { %4938 = vmatpush1.bf16.msra.mxu1 %v8061_v62  ;;  %4898 = vmatprep.subr.bf16.mxu0 %v8062_v32  ;;  %v8106_v48 = vld [vmem:[%s11771_s12 + $0xba4] ss:$48 sps:$4 sm:$0xff]   ;;  %v8109_v57 = vld [vmem:[%s11771_s12 + $0xba0] ss:$48 sps:$4 sm:$0xff]   ;;  %v10213_v62 = vpack.c.bf16 %v8734_v5, %v8734_v5  ;;  %v10217_v32 = vpack.c.bf16 %v8726_v4, %v8726_v4 }
 0x49f   : > { %4939 = vmatprep.subr.bf16.mxu1 %v8064_v0  ;;  %v8110_v0 = vld [vmem:[%s11771_s12 + $0x8] ss:$48 sps:$4 sm:$0xff]   ;;  %v5573_v38 = vld [vmem:[%s11773_s14 + $0x180] sm:$0xff] (%p2566_p0)  ;;  %v5543_v50 = vld [vmem:[%s11773_s14 + $0x90] sm:$0xff] (%p2566_p0) }
 0x4a0   :  { %v5557_v45 = vld [vmem:[%s11773_s14 + $0x100] sm:$0xff] (%p2566_p0) }
 0x4a1   : > { %4899 = vmatpush1.bf16.msra.mxu0 %v8066_v41  ;;  %v8113_v41 = vld [vmem:[%s11771_s12 + $0x608] ss:$48 sps:$4 sm:$0xff]  }
 0x4a2   : > { %4940 = vmatpush1.bf16.msra.mxu1 %v8067_v6  ;;  %4900 = vmatprep.subr.bf16.mxu0 %v8068_v7  ;;  %v8118_v6 = vld [vmem:[%s11771_s12 + $0x6c] ss:$48 sps:$4 sm:$0xff]  }
 0x4a3   : > { %4941 = vmatprep.subr.bf16.mxu1 %v8070_v8  ;;  %v8121_v7 = vld [vmem:[%s11771_s12 + $0x66c] ss:$48 sps:$4 sm:$0xff]   ;;  %v8116_v8 = vld [vmem:[%s11771_s12 + $0x68] ss:$48 sps:$4 sm:$0xff]  }
 0x4a5   : > { %4901 = vmatpush1.bf16.msra.mxu0 %v8072_v10  ;;  %v8119_v10 = vld [vmem:[%s11771_s12 + $0x668] ss:$48 sps:$4 sm:$0xff]  }
 0x4a6   : > { %4942 = vmatpush1.bf16.msra.mxu1 %v8073_v13  ;;  %4902 = vmatprep.subr.bf16.mxu0 %v8074_v14  ;;  %v8124_v13 = vld [vmem:[%s11771_s12 + $0xcc] ss:$48 sps:$4 sm:$0xff]  }
 0x4a7   : > { %4943 = vmatprep.subr.bf16.mxu1 %v8076_v15  ;;  %v8127_v14 = vld [vmem:[%s11771_s12 + $0x6cc] ss:$48 sps:$4 sm:$0xff]   ;;  %v8122_v15 = vld [vmem:[%s11771_s12 + $0xc8] ss:$48 sps:$4 sm:$0xff]  }
 0x4a9   : > { %4903 = vmatpush1.bf16.msra.mxu0 %v8078_v16  ;;  %v8125_v16 = vld [vmem:[%s11771_s12 + $0x6c8] ss:$48 sps:$4 sm:$0xff]  }
 0x4aa   : > { %4944 = vmatpush1.bf16.msra.mxu1 %v8079_v18  ;;  %4904 = vmatprep.subr.bf16.mxu0 %v8080_v20  ;;  %v8130_v18 = vld [vmem:[%s11771_s12 + $0x12c] ss:$48 sps:$4 sm:$0xff]  }
 0x4ab   : > { %4945 = vmatprep.subr.bf16.mxu1 %v8082_v21  ;;  %v8133_v20 = vld [vmem:[%s11771_s12 + $0x72c] ss:$48 sps:$4 sm:$0xff]   ;;  %v8128_v21 = vld [vmem:[%s11771_s12 + $0x128] ss:$48 sps:$4 sm:$0xff]  }
 0x4ad   : > { %4905 = vmatpush1.bf16.msra.mxu0 %v8084_v22  ;;  %v8131_v22 = vld [vmem:[%s11771_s12 + $0x728] ss:$48 sps:$4 sm:$0xff]  }
 0x4ae   : > { %4946 = vmatpush1.bf16.msra.mxu1 %v8085_v59  ;;  %4906 = vmatprep.subr.bf16.mxu0 %v8086_v24  ;;  %v8136_v59 = vld [vmem:[%s11771_s12 + $0x18c] ss:$48 sps:$4 sm:$0xff]  }
 0x4af   : > { %4947 = vmatprep.subr.bf16.mxu1 %v8088_v25  ;;  %v8139_v24 = vld [vmem:[%s11771_s12 + $0x78c] ss:$48 sps:$4 sm:$0xff]   ;;  %v8134_v25 = vld [vmem:[%s11771_s12 + $0x188] ss:$48 sps:$4 sm:$0xff]  }
 0x4b1   : > { %4907 = vmatpush1.bf16.msra.mxu0 %v8090_v26  ;;  %v8137_v26 = vld [vmem:[%s11771_s12 + $0x788] ss:$48 sps:$4 sm:$0xff]  }
 0x4b2   : > { %4948 = vmatpush1.bf16.msra.mxu1 %v8091_v27  ;;  %4908 = vmatprep.subr.bf16.mxu0 %v8092_v28  ;;  %v8142_v27 = vld [vmem:[%s11771_s12 + $0x1ec] ss:$48 sps:$4 sm:$0xff]  }
 0x4b3   : > { %4949 = vmatprep.subr.bf16.mxu1 %v8094_v30  ;;  %v8145_v28 = vld [vmem:[%s11771_s12 + $0x7ec] ss:$48 sps:$4 sm:$0xff]   ;;  %v8140_v30 = vld [vmem:[%s11771_s12 + $0x1e8] ss:$48 sps:$4 sm:$0xff]  }
 0x4b5   : > { %4909 = vmatpush1.bf16.msra.mxu0 %v8096_v31  ;;  %v8143_v31 = vld [vmem:[%s11771_s12 + $0x7e8] ss:$48 sps:$4 sm:$0xff]  }
 0x4b6   : > { %4950 = vmatpush1.bf16.msra.mxu1 %v8097_v33  ;;  %4910 = vmatprep.subr.bf16.mxu0 %v8098_v35  ;;  %v8148_v33 = vld [vmem:[%s11771_s12 + $0x24c] ss:$48 sps:$4 sm:$0xff]  }
 0x4b7   : > { %4951 = vmatprep.subr.bf16.mxu1 %v8100_v36  ;;  %v8151_v35 = vld [vmem:[%s11771_s12 + $0x84c] ss:$48 sps:$4 sm:$0xff]   ;;  %v8146_v36 = vld [vmem:[%s11771_s12 + $0x248] ss:$48 sps:$4 sm:$0xff]  }
 0x4b9   : > { %4911 = vmatpush1.bf16.msra.mxu0 %v8102_v40  ;;  %v8149_v40 = vld [vmem:[%s11771_s12 + $0x848] ss:$48 sps:$4 sm:$0xff]  }
 0x4ba   : > { %4952 = vmatpush1.bf16.msra.mxu1 %v8103_v17  ;;  %4912 = vmatprep.subr.bf16.mxu0 %v8104_v46  ;;  %v8154_v17 = vld [vmem:[%s11771_s12 + $0x2ac] ss:$48 sps:$4 sm:$0xff]  }
 0x4bb   : > { %4953 = vmatprep.subr.bf16.mxu1 %v8106_v48  ;;  %v8157_v46 = vld [vmem:[%s11771_s12 + $0x8ac] ss:$48 sps:$4 sm:$0xff]   ;;  %v8152_v48 = vld [vmem:[%s11771_s12 + $0x2a8] ss:$48 sps:$4 sm:$0xff]  }
 0x4bd   : > { %4913 = vmatpush1.bf16.msra.mxu0 %v8108_v51  ;;  %v8155_v51 = vld [vmem:[%s11771_s12 + $0x8a8] ss:$48 sps:$4 sm:$0xff]  }
 0x4be   : > { %4954 = vmatpush1.bf16.msra.mxu1 %v8109_v57  ;;  %4964 = vmatprep.subr.bf16.mxu0 %v8112_v58  ;;  %v8160_v57 = vld [vmem:[%s11771_s12 + $0x30c] ss:$48 sps:$4 sm:$0xff]  }
 0x4bf   : > { %5005 = vmatprep.subr.bf16.mxu1 %v8115_v61  ;;  %v8163_v58 = vld [vmem:[%s11771_s12 + $0x90c] ss:$48 sps:$4 sm:$0xff]   ;;  %v8158_v61 = vld [vmem:[%s11771_s12 + $0x308] ss:$48 sps:$4 sm:$0xff]  }
 0x4c0   : > { %4915 = vmatmul.mubr.bf16.vlgmr.msra.gmra.mrb[0].mxu0 %v10213_v62 }
 0x4c1   : > { %4956 = vmatmul.mubr.bf16.vlgmr.msra.gmra.mrb[0].mxu1 %v10217_v32  ;;  %4965 = vmatpush1.bf16.msra.mxu0 %v8110_v0  ;;  %v8161_v0 = vld [vmem:[%s11771_s12 + $0x908] ss:$48 sps:$4 sm:$0xff]  }
 0x4c2   : > { %5006 = vmatpush1.bf16.msra.mxu1 %v8113_v41  ;;  %4966 = vmatprep.subr.bf16.mxu0 %v8118_v6  ;;  %v8166_v41 = vld [vmem:[%s11771_s12 + $0x36c] ss:$48 sps:$4 sm:$0xff]  }
 0x4c3   : > { %5007 = vmatprep.subr.bf16.mxu1 %v8121_v7  ;;  %4996 = vmatprep.mubr.bf16.mxu0 %v10017_v11  ;;  %v8169_v6 = vld [vmem:[%s11771_s12 + $0x96c] ss:$48 sps:$4 sm:$0xff]   ;;  %v8164_v7 = vld [vmem:[%s11771_s12 + $0x368] ss:$48 sps:$4 sm:$0xff]  }
 0x4c4   : > { %5037 = vmatprep.mubr.bf16.mxu1 %v10021_v12 }
 0x4c5   : > { %4967 = vmatpush1.bf16.msra.mxu0 %v8116_v8  ;;  %v8167_v8 = vld [vmem:[%s11771_s12 + $0x968] ss:$48 sps:$4 sm:$0xff]  }
 0x4c6   : > { %5008 = vmatpush1.bf16.msra.mxu1 %v8119_v10  ;;  %4968 = vmatprep.subr.bf16.mxu0 %v8124_v13  ;;  %v8172_v10 = vld [vmem:[%s11771_s12 + $0x3cc] ss:$48 sps:$4 sm:$0xff]  }
 0x4c7   : > { %5009 = vmatprep.subr.bf16.mxu1 %v8127_v14  ;;  %v8175_v13 = vld [vmem:[%s11771_s12 + $0x9cc] ss:$48 sps:$4 sm:$0xff]   ;;  %v8170_v14 = vld [vmem:[%s11771_s12 + $0x3c8] ss:$48 sps:$4 sm:$0xff]  }
 0x4c9   : > { %4969 = vmatpush1.bf16.msra.mxu0 %v8122_v15  ;;  %v8173_v15 = vld [vmem:[%s11771_s12 + $0x9c8] ss:$48 sps:$4 sm:$0xff]  }
 0x4ca   : > { %5010 = vmatpush1.bf16.msra.mxu1 %v8125_v16  ;;  %4970 = vmatprep.subr.bf16.mxu0 %v8130_v18  ;;  %v8178_v16 = vld [vmem:[%s11771_s12 + $0x42c] ss:$48 sps:$4 sm:$0xff]  }
 0x4cb   : > { %5011 = vmatprep.subr.bf16.mxu1 %v8133_v20  ;;  %v8181_v18 = vld [vmem:[%s11771_s12 + $0xa2c] ss:$48 sps:$4 sm:$0xff]   ;;  %v8176_v20 = vld [vmem:[%s11771_s12 + $0x428] ss:$48 sps:$4 sm:$0xff]  }
 0x4cd   : > { %4971 = vmatpush1.bf16.msra.mxu0 %v8128_v21  ;;  %v8179_v21 = vld [vmem:[%s11771_s12 + $0xa28] ss:$48 sps:$4 sm:$0xff]  }
 0x4ce   : > { %5012 = vmatpush1.bf16.msra.mxu1 %v8131_v22  ;;  %4972 = vmatprep.subr.bf16.mxu0 %v8136_v59  ;;  %v8184_v22 = vld [vmem:[%s11771_s12 + $0x48c] ss:$48 sps:$4 sm:$0xff]  }
 0x4cf   : > { %5013 = vmatprep.subr.bf16.mxu1 %v8139_v24  ;;  %v8187_v59 = vld [vmem:[%s11771_s12 + $0xa8c] ss:$48 sps:$4 sm:$0xff]   ;;  %v8182_v24 = vld [vmem:[%s11771_s12 + $0x488] ss:$48 sps:$4 sm:$0xff]  }
 0x4d1   : > { %4973 = vmatpush1.bf16.msra.mxu0 %v8134_v25  ;;  %v8185_v25 = vld [vmem:[%s11771_s12 + $0xa88] ss:$48 sps:$4 sm:$0xff]  }
 0x4d2   : > { %5014 = vmatpush1.bf16.msra.mxu1 %v8137_v26  ;;  %4974 = vmatprep.subr.bf16.mxu0 %v8142_v27  ;;  %v8190_v26 = vld [vmem:[%s11771_s12 + $0x4ec] ss:$48 sps:$4 sm:$0xff]  }
 0x4d3   : > { %5015 = vmatprep.subr.bf16.mxu1 %v8145_v28  ;;  %v8193_v27 = vld [vmem:[%s11771_s12 + $0xaec] ss:$48 sps:$4 sm:$0xff]   ;;  %v8188_v28 = vld [vmem:[%s11771_s12 + $0x4e8] ss:$48 sps:$4 sm:$0xff]  }
 0x4d5   : > { %4975 = vmatpush1.bf16.msra.mxu0 %v8140_v30  ;;  %v8191_v30 = vld [vmem:[%s11771_s12 + $0xae8] ss:$48 sps:$4 sm:$0xff]  }
 0x4d6   : > { %5016 = vmatpush1.bf16.msra.mxu1 %v8143_v31  ;;  %4976 = vmatprep.subr.bf16.mxu0 %v8148_v33  ;;  %v8196_v31 = vld [vmem:[%s11771_s12 + $0x54c] ss:$48 sps:$4 sm:$0xff]  }
 0x4d7   : > { %5017 = vmatprep.subr.bf16.mxu1 %v8151_v35  ;;  %v8199_v33 = vld [vmem:[%s11771_s12 + $0xb4c] ss:$48 sps:$4 sm:$0xff]   ;;  %v8194_v35 = vld [vmem:[%s11771_s12 + $0x548] ss:$48 sps:$4 sm:$0xff]  }
 0x4d9   : > { %4977 = vmatpush1.bf16.msra.mxu0 %v8146_v36  ;;  %v8197_v36 = vld [vmem:[%s11771_s12 + $0xb48] ss:$48 sps:$4 sm:$0xff]  }
 0x4da   : > { %5018 = vmatpush1.bf16.msra.mxu1 %v8149_v40  ;;  %4978 = vmatprep.subr.bf16.mxu0 %v8154_v17  ;;  %v8202_v40 = vld [vmem:[%s11771_s12 + $0x5ac] ss:$48 sps:$4 sm:$0xff]  }
 0x4db   : > { %5019 = vmatprep.subr.bf16.mxu1 %v8157_v46  ;;  %v8205_v17 = vld [vmem:[%s11771_s12 + $0xbac] ss:$48 sps:$4 sm:$0xff]   ;;  %v8200_v46 = vld [vmem:[%s11771_s12 + $0x5a8] ss:$48 sps:$4 sm:$0xff]  }
 0x4dd   : > { %4979 = vmatpush1.bf16.msra.mxu0 %v8152_v48  ;;  %v8203_v48 = vld [vmem:[%s11771_s12 + $0xba8] ss:$48 sps:$4 sm:$0xff]  }
 0x4de   : > { %5020 = vmatpush1.bf16.msra.mxu1 %v8155_v51  ;;  %4980 = vmatprep.subr.bf16.mxu0 %v8160_v57  ;;  %v8208_v51 = vld [vmem:[%s11771_s12 + $0x14] ss:$48 sps:$4 sm:$0xff]  }
 0x4df   : > { %5021 = vmatprep.subr.bf16.mxu1 %v8163_v58  ;;  %v8211_v57 = vld [vmem:[%s11771_s12 + $0x614] ss:$48 sps:$4 sm:$0xff]   ;;  %v8206_v58 = vld [vmem:[%s11771_s12 + $0x10] ss:$48 sps:$4 sm:$0xff]  }
 0x4e1   : > { %4981 = vmatpush1.bf16.msra.mxu0 %v8158_v61  ;;  %v8209_v61 = vld [vmem:[%s11771_s12 + $0x610] ss:$48 sps:$4 sm:$0xff]  }
 0x4e2   : > { %5022 = vmatpush1.bf16.msra.mxu1 %v8161_v0  ;;  %4982 = vmatprep.subr.bf16.mxu0 %v8166_v41  ;;  %v8214_v0 = vld [vmem:[%s11771_s12 + $0x74] ss:$48 sps:$4 sm:$0xff]  }
 0x4e3   : > { %5023 = vmatprep.subr.bf16.mxu1 %v8169_v6  ;;  %v8217_v41 = vld [vmem:[%s11771_s12 + $0x674] ss:$48 sps:$4 sm:$0xff]   ;;  %v8212_v6 = vld [vmem:[%s11771_s12 + $0x70] ss:$48 sps:$4 sm:$0xff]  }
 0x4e5   : > { %4983 = vmatpush1.bf16.msra.mxu0 %v8164_v7  ;;  %v8215_v7 = vld [vmem:[%s11771_s12 + $0x670] ss:$48 sps:$4 sm:$0xff]  }
 0x4e6   : > { %5024 = vmatpush1.bf16.msra.mxu1 %v8167_v8  ;;  %4984 = vmatprep.subr.bf16.mxu0 %v8172_v10  ;;  %v8220_v8 = vld [vmem:[%s11771_s12 + $0xd4] ss:$48 sps:$4 sm:$0xff]  }
 0x4e7   : > { %5025 = vmatprep.subr.bf16.mxu1 %v8175_v13  ;;  %v8223_v10 = vld [vmem:[%s11771_s12 + $0x6d4] ss:$48 sps:$4 sm:$0xff]   ;;  %v8218_v13 = vld [vmem:[%s11771_s12 + $0xd0] ss:$48 sps:$4 sm:$0xff]  }
 0x4e9   : > { %4985 = vmatpush1.bf16.msra.mxu0 %v8170_v14  ;;  %v8221_v14 = vld [vmem:[%s11771_s12 + $0x6d0] ss:$48 sps:$4 sm:$0xff]  }
 0x4ea   : > { %5026 = vmatpush1.bf16.msra.mxu1 %v8173_v15  ;;  %4986 = vmatprep.subr.bf16.mxu0 %v8178_v16  ;;  %v8226_v15 = vld [vmem:[%s11771_s12 + $0x134] ss:$48 sps:$4 sm:$0xff]  }
 0x4eb   : > { %5027 = vmatprep.subr.bf16.mxu1 %v8181_v18  ;;  %v8229_v16 = vld [vmem:[%s11771_s12 + $0x734] ss:$48 sps:$4 sm:$0xff]   ;;  %v8224_v18 = vld [vmem:[%s11771_s12 + $0x130] ss:$48 sps:$4 sm:$0xff]  }
 0x4ed   : > { %4987 = vmatpush1.bf16.msra.mxu0 %v8176_v20  ;;  %v8227_v20 = vld [vmem:[%s11771_s12 + $0x730] ss:$48 sps:$4 sm:$0xff]  }
 0x4ee   : > { %5028 = vmatpush1.bf16.msra.mxu1 %v8179_v21  ;;  %4988 = vmatprep.subr.bf16.mxu0 %v8184_v22  ;;  %v8232_v21 = vld [vmem:[%s11771_s12 + $0x194] ss:$48 sps:$4 sm:$0xff]  }
 0x4ef   : > { %5029 = vmatprep.subr.bf16.mxu1 %v8187_v59  ;;  %v8235_v22 = vld [vmem:[%s11771_s12 + $0x794] ss:$48 sps:$4 sm:$0xff]   ;;  %v8230_v59 = vld [vmem:[%s11771_s12 + $0x190] ss:$48 sps:$4 sm:$0xff]  }
 0x4f1   : > { %4989 = vmatpush1.bf16.msra.mxu0 %v8182_v24  ;;  %v8233_v24 = vld [vmem:[%s11771_s12 + $0x790] ss:$48 sps:$4 sm:$0xff]  }
 0x4f2   : > { %5030 = vmatpush1.bf16.msra.mxu1 %v8185_v25  ;;  %4990 = vmatprep.subr.bf16.mxu0 %v8190_v26  ;;  %v8238_v25 = vld [vmem:[%s11771_s12 + $0x1f4] ss:$48 sps:$4 sm:$0xff]  }
 0x4f3   : > { %5031 = vmatprep.subr.bf16.mxu1 %v8193_v27  ;;  %v8241_v26 = vld [vmem:[%s11771_s12 + $0x7f4] ss:$48 sps:$4 sm:$0xff]   ;;  %v8236_v27 = vld [vmem:[%s11771_s12 + $0x1f0] ss:$48 sps:$4 sm:$0xff]  }
 0x4f5   : > { %4991 = vmatpush1.bf16.msra.mxu0 %v8188_v28  ;;  %v8239_v28 = vld [vmem:[%s11771_s12 + $0x7f0] ss:$48 sps:$4 sm:$0xff]  }
 0x4f6   : > { %5032 = vmatpush1.bf16.msra.mxu1 %v8191_v30  ;;  %4992 = vmatprep.subr.bf16.mxu0 %v8196_v31  ;;  %v8244_v30 = vld [vmem:[%s11771_s12 + $0x254] ss:$48 sps:$4 sm:$0xff]  }
 0x4f7   : > { %5033 = vmatprep.subr.bf16.mxu1 %v8199_v33  ;;  %v8247_v31 = vld [vmem:[%s11771_s12 + $0x854] ss:$48 sps:$4 sm:$0xff]   ;;  %v8242_v33 = vld [vmem:[%s11771_s12 + $0x250] ss:$48 sps:$4 sm:$0xff]  }
 0x4f9   : > { %4993 = vmatpush1.bf16.msra.mxu0 %v8194_v35  ;;  %v8245_v35 = vld [vmem:[%s11771_s12 + $0x850] ss:$48 sps:$4 sm:$0xff]  }
 0x4fa   : > { %5034 = vmatpush1.bf16.msra.mxu1 %v8197_v36  ;;  %4994 = vmatprep.subr.bf16.mxu0 %v8202_v40  ;;  %v8250_v36 = vld [vmem:[%s11771_s12 + $0x2b4] ss:$48 sps:$4 sm:$0xff]  }
 0x4fb   : > { %5035 = vmatprep.subr.bf16.mxu1 %v8205_v17  ;;  %v8253_v40 = vld [vmem:[%s11771_s12 + $0x8b4] ss:$48 sps:$4 sm:$0xff]   ;;  %v8248_v17 = vld [vmem:[%s11771_s12 + $0x2b0] ss:$48 sps:$4 sm:$0xff]  }
 0x4fd   : > { %4995 = vmatpush1.bf16.msra.mxu0 %v8200_v46  ;;  %v8251_v46 = vld [vmem:[%s11771_s12 + $0x8b0] ss:$48 sps:$4 sm:$0xff]  }
 0x4fe   : > { %5036 = vmatpush1.bf16.msra.mxu1 %v8203_v48  ;;  %5046 = vmatprep.subr.bf16.mxu0 %v8208_v51  ;;  %v8256_v48 = vld [vmem:[%s11771_s12 + $0x314] ss:$48 sps:$4 sm:$0xff]  }
 0x4ff   : > { %5087 = vmatprep.subr.bf16.mxu1 %v8211_v57  ;;  %v8259_v51 = vld [vmem:[%s11771_s12 + $0x914] ss:$48 sps:$4 sm:$0xff]   ;;  %v8254_v57 = vld [vmem:[%s11771_s12 + $0x310] ss:$48 sps:$4 sm:$0xff]  }
 0x500   : > { %4997 = vmatmul.mubr.bf16.vlgmr.msra.gmra.mrb[4].mxu0 %v10213_v62 }
 0x501   : > { %5038 = vmatmul.mubr.bf16.vlgmr.msra.gmra.mrb[4].mxu1 %v10217_v32  ;;  %5047 = vmatpush1.bf16.msra.mxu0 %v8206_v58  ;;  %v8257_v58 = vld [vmem:[%s11771_s12 + $0x910] ss:$48 sps:$4 sm:$0xff]  }
 0x502   : > { %5088 = vmatpush1.bf16.msra.mxu1 %v8209_v61  ;;  %5048 = vmatprep.subr.bf16.mxu0 %v8214_v0  ;;  %v8262_v61 = vld [vmem:[%s11771_s12 + $0x374] ss:$48 sps:$4 sm:$0xff]  }
 0x503   : > { %5089 = vmatprep.subr.bf16.mxu1 %v8217_v41  ;;  %5078 = vmatprep.mubr.bf16.mxu0 %v10017_v11  ;;  %v8265_v0 = vld [vmem:[%s11771_s12 + $0x974] ss:$48 sps:$4 sm:$0xff]   ;;  %v8260_v41 = vld [vmem:[%s11771_s12 + $0x370] ss:$48 sps:$4 sm:$0xff]  }
 0x504   : > { %5119 = vmatprep.mubr.bf16.mxu1 %v10021_v12 }
 0x505   : > { %5049 = vmatpush1.bf16.msra.mxu0 %v8212_v6  ;;  %v8263_v6 = vld [vmem:[%s11771_s12 + $0x970] ss:$48 sps:$4 sm:$0xff]  }
 0x506   : > { %5090 = vmatpush1.bf16.msra.mxu1 %v8215_v7  ;;  %5050 = vmatprep.subr.bf16.mxu0 %v8220_v8  ;;  %v8268_v7 = vld [vmem:[%s11771_s12 + $0x3d4] ss:$48 sps:$4 sm:$0xff]  }
 0x507   : > { %5091 = vmatprep.subr.bf16.mxu1 %v8223_v10  ;;  %v8271_v8 = vld [vmem:[%s11771_s12 + $0x9d4] ss:$48 sps:$4 sm:$0xff]   ;;  %v8266_v10 = vld [vmem:[%s11771_s12 + $0x3d0] ss:$48 sps:$4 sm:$0xff]  }
 0x509   : > { %5051 = vmatpush1.bf16.msra.mxu0 %v8218_v13  ;;  %v8269_v13 = vld [vmem:[%s11771_s12 + $0x9d0] ss:$48 sps:$4 sm:$0xff]  }
 0x50a   : > { %5092 = vmatpush1.bf16.msra.mxu1 %v8221_v14  ;;  %5052 = vmatprep.subr.bf16.mxu0 %v8226_v15  ;;  %v8274_v14 = vld [vmem:[%s11771_s12 + $0x434] ss:$48 sps:$4 sm:$0xff]  }
 0x50b   : > { %5093 = vmatprep.subr.bf16.mxu1 %v8229_v16  ;;  %v8277_v15 = vld [vmem:[%s11771_s12 + $0xa34] ss:$48 sps:$4 sm:$0xff]   ;;  %v8272_v16 = vld [vmem:[%s11771_s12 + $0x430] ss:$48 sps:$4 sm:$0xff]  }
 0x50d   : > { %5053 = vmatpush1.bf16.msra.mxu0 %v8224_v18  ;;  %v8275_v18 = vld [vmem:[%s11771_s12 + $0xa30] ss:$48 sps:$4 sm:$0xff]  }
 0x50e   : > { %5094 = vmatpush1.bf16.msra.mxu1 %v8227_v20  ;;  %5054 = vmatprep.subr.bf16.mxu0 %v8232_v21  ;;  %v8280_v20 = vld [vmem:[%s11771_s12 + $0x494] ss:$48 sps:$4 sm:$0xff]  }
 0x50f   : > { %5095 = vmatprep.subr.bf16.mxu1 %v8235_v22  ;;  %v8283_v21 = vld [vmem:[%s11771_s12 + $0xa94] ss:$48 sps:$4 sm:$0xff]   ;;  %v8278_v22 = vld [vmem:[%s11771_s12 + $0x490] ss:$48 sps:$4 sm:$0xff]  }
 0x511   : > { %5055 = vmatpush1.bf16.msra.mxu0 %v8230_v59  ;;  %v8281_v59 = vld [vmem:[%s11771_s12 + $0xa90] ss:$48 sps:$4 sm:$0xff]  }
 0x512   : > { %5096 = vmatpush1.bf16.msra.mxu1 %v8233_v24  ;;  %5056 = vmatprep.subr.bf16.mxu0 %v8238_v25  ;;  %v8286_v24 = vld [vmem:[%s11771_s12 + $0x4f4] ss:$48 sps:$4 sm:$0xff]  }
 0x513   : > { %5097 = vmatprep.subr.bf16.mxu1 %v8241_v26  ;;  %v8289_v25 = vld [vmem:[%s11771_s12 + $0xaf4] ss:$48 sps:$4 sm:$0xff]   ;;  %v8284_v26 = vld [vmem:[%s11771_s12 + $0x4f0] ss:$48 sps:$4 sm:$0xff]  }
 0x515   : > { %5057 = vmatpush1.bf16.msra.mxu0 %v8236_v27  ;;  %v8287_v27 = vld [vmem:[%s11771_s12 + $0xaf0] ss:$48 sps:$4 sm:$0xff]  }
 0x516   : > { %5098 = vmatpush1.bf16.msra.mxu1 %v8239_v28  ;;  %5058 = vmatprep.subr.bf16.mxu0 %v8244_v30  ;;  %v8292_v28 = vld [vmem:[%s11771_s12 + $0x554] ss:$48 sps:$4 sm:$0xff]  }
 0x517   : > { %5099 = vmatprep.subr.bf16.mxu1 %v8247_v31  ;;  %v8295_v30 = vld [vmem:[%s11771_s12 + $0xb54] ss:$48 sps:$4 sm:$0xff]   ;;  %v8290_v31 = vld [vmem:[%s11771_s12 + $0x550] ss:$48 sps:$4 sm:$0xff]  }
 0x519   : > { %5059 = vmatpush1.bf16.msra.mxu0 %v8242_v33  ;;  %v8293_v33 = vld [vmem:[%s11771_s12 + $0xb50] ss:$48 sps:$4 sm:$0xff]  }
 0x51a   : > { %5100 = vmatpush1.bf16.msra.mxu1 %v8245_v35  ;;  %5060 = vmatprep.subr.bf16.mxu0 %v8250_v36  ;;  %v8298_v35 = vld [vmem:[%s11771_s12 + $0x5b4] ss:$48 sps:$4 sm:$0xff]  }
 0x51b   : > { %5101 = vmatprep.subr.bf16.mxu1 %v8253_v40  ;;  %v8301_v36 = vld [vmem:[%s11771_s12 + $0xbb4] ss:$48 sps:$4 sm:$0xff]   ;;  %v8296_v40 = vld [vmem:[%s11771_s12 + $0x5b0] ss:$48 sps:$4 sm:$0xff]  }
 0x51d   : > { %5061 = vmatpush1.bf16.msra.mxu0 %v8248_v17  ;;  %v8299_v17 = vld [vmem:[%s11771_s12 + $0xbb0] ss:$48 sps:$4 sm:$0xff]  }
 0x51e   : > { %5102 = vmatpush1.bf16.msra.mxu1 %v8251_v46  ;;  %5062 = vmatprep.subr.bf16.mxu0 %v8256_v48  ;;  %v8304_v46 = vld [vmem:[%s11771_s12 + $0x1c] ss:$48 sps:$4 sm:$0xff]  }
 0x51f   : > { %5103 = vmatprep.subr.bf16.mxu1 %v8259_v51  ;;  %v8307_v48 = vld [vmem:[%s11771_s12 + $0x61c] ss:$48 sps:$4 sm:$0xff]   ;;  %v8302_v51 = vld [vmem:[%s11771_s12 + $0x18] ss:$48 sps:$4 sm:$0xff]  }
 0x521   : > { %5063 = vmatpush1.bf16.msra.mxu0 %v8254_v57  ;;  %v8305_v57 = vld [vmem:[%s11771_s12 + $0x618] ss:$48 sps:$4 sm:$0xff]  }
 0x522   : > { %5104 = vmatpush1.bf16.msra.mxu1 %v8257_v58  ;;  %5064 = vmatprep.subr.bf16.mxu0 %v8262_v61  ;;  %v8310_v58 = vld [vmem:[%s11771_s12 + $0x7c] ss:$48 sps:$4 sm:$0xff]  }
 0x523   : > { %5105 = vmatprep.subr.bf16.mxu1 %v8265_v0  ;;  %v8313_v61 = vld [vmem:[%s11771_s12 + $0x67c] ss:$48 sps:$4 sm:$0xff]   ;;  %v8308_v0 = vld [vmem:[%s11771_s12 + $0x78] ss:$48 sps:$4 sm:$0xff]  }
 0x525   : > { %5065 = vmatpush1.bf16.msra.mxu0 %v8260_v41  ;;  %v8311_v41 = vld [vmem:[%s11771_s12 + $0x678] ss:$48 sps:$4 sm:$0xff]  }
 0x526   : > { %5106 = vmatpush1.bf16.msra.mxu1 %v8263_v6  ;;  %5066 = vmatprep.subr.bf16.mxu0 %v8268_v7  ;;  %v8316_v6 = vld [vmem:[%s11771_s12 + $0xdc] ss:$48 sps:$4 sm:$0xff]  }
 0x527   : > { %5107 = vmatprep.subr.bf16.mxu1 %v8271_v8  ;;  %v8319_v7 = vld [vmem:[%s11771_s12 + $0x6dc] ss:$48 sps:$4 sm:$0xff]   ;;  %v8314_v8 = vld [vmem:[%s11771_s12 + $0xd8] ss:$48 sps:$4 sm:$0xff]  }
 0x529   : > { %5067 = vmatpush1.bf16.msra.mxu0 %v8266_v10  ;;  %v8317_v10 = vld [vmem:[%s11771_s12 + $0x6d8] ss:$48 sps:$4 sm:$0xff]  }
 0x52a   : > { %5108 = vmatpush1.bf16.msra.mxu1 %v8269_v13  ;;  %5068 = vmatprep.subr.bf16.mxu0 %v8274_v14  ;;  %v8322_v13 = vld [vmem:[%s11771_s12 + $0x13c] ss:$48 sps:$4 sm:$0xff]  }
 0x52b   : > { %5109 = vmatprep.subr.bf16.mxu1 %v8277_v15  ;;  %v8325_v14 = vld [vmem:[%s11771_s12 + $0x73c] ss:$48 sps:$4 sm:$0xff]   ;;  %v8320_v15 = vld [vmem:[%s11771_s12 + $0x138] ss:$48 sps:$4 sm:$0xff]  }
 0x52d   : > { %5069 = vmatpush1.bf16.msra.mxu0 %v8272_v16  ;;  %v8323_v16 = vld [vmem:[%s11771_s12 + $0x738] ss:$48 sps:$4 sm:$0xff]  }
 0x52e   : > { %5110 = vmatpush1.bf16.msra.mxu1 %v8275_v18  ;;  %5070 = vmatprep.subr.bf16.mxu0 %v8280_v20  ;;  %v8328_v18 = vld [vmem:[%s11771_s12 + $0x19c] ss:$48 sps:$4 sm:$0xff]  }
 0x52f   : > { %5111 = vmatprep.subr.bf16.mxu1 %v8283_v21  ;;  %v8331_v20 = vld [vmem:[%s11771_s12 + $0x79c] ss:$48 sps:$4 sm:$0xff]   ;;  %v8326_v21 = vld [vmem:[%s11771_s12 + $0x198] ss:$48 sps:$4 sm:$0xff]  }
 0x531   : > { %5071 = vmatpush1.bf16.msra.mxu0 %v8278_v22  ;;  %v8329_v22 = vld [vmem:[%s11771_s12 + $0x798] ss:$48 sps:$4 sm:$0xff]  }
 0x532   : > { %5112 = vmatpush1.bf16.msra.mxu1 %v8281_v59  ;;  %5072 = vmatprep.subr.bf16.mxu0 %v8286_v24  ;;  %v8334_v59 = vld [vmem:[%s11771_s12 + $0x1fc] ss:$48 sps:$4 sm:$0xff]  }
 0x533   : > { %5113 = vmatprep.subr.bf16.mxu1 %v8289_v25  ;;  %v8337_v24 = vld [vmem:[%s11771_s12 + $0x7fc] ss:$48 sps:$4 sm:$0xff]   ;;  %v8332_v25 = vld [vmem:[%s11771_s12 + $0x1f8] ss:$48 sps:$4 sm:$0xff]  }
 0x535   : > { %5073 = vmatpush1.bf16.msra.mxu0 %v8284_v26  ;;  %v8335_v26 = vld [vmem:[%s11771_s12 + $0x7f8] ss:$48 sps:$4 sm:$0xff]  }
 0x536   : > { %5114 = vmatpush1.bf16.msra.mxu1 %v8287_v27  ;;  %5074 = vmatprep.subr.bf16.mxu0 %v8292_v28  ;;  %v8340_v27 = vld [vmem:[%s11771_s12 + $0x25c] ss:$48 sps:$4 sm:$0xff]  }
 0x537   : > { %5115 = vmatprep.subr.bf16.mxu1 %v8295_v30  ;;  %v8343_v28 = vld [vmem:[%s11771_s12 + $0x85c] ss:$48 sps:$4 sm:$0xff]   ;;  %v8338_v30 = vld [vmem:[%s11771_s12 + $0x258] ss:$48 sps:$4 sm:$0xff]  }
 0x539   : > { %5075 = vmatpush1.bf16.msra.mxu0 %v8290_v31  ;;  %v8341_v31 = vld [vmem:[%s11771_s12 + $0x858] ss:$48 sps:$4 sm:$0xff]  }
 0x53a   : > { %5116 = vmatpush1.bf16.msra.mxu1 %v8293_v33  ;;  %5076 = vmatprep.subr.bf16.mxu0 %v8298_v35  ;;  %v8346_v33 = vld [vmem:[%s11771_s12 + $0x2bc] ss:$48 sps:$4 sm:$0xff]  }
 0x53b   : > { %5117 = vmatprep.subr.bf16.mxu1 %v8301_v36  ;;  %v8349_v35 = vld [vmem:[%s11771_s12 + $0x8bc] ss:$48 sps:$4 sm:$0xff]   ;;  %v8344_v36 = vld [vmem:[%s11771_s12 + $0x2b8] ss:$48 sps:$4 sm:$0xff]  }
 0x53d   : > { %5077 = vmatpush1.bf16.msra.mxu0 %v8296_v40  ;;  %v8347_v40 = vld [vmem:[%s11771_s12 + $0x8b8] ss:$48 sps:$4 sm:$0xff]  }
 0x53e   : > { %5118 = vmatpush1.bf16.msra.mxu1 %v8299_v17  ;;  %5128 = vmatprep.subr.bf16.mxu0 %v8304_v46  ;;  %v8352_v17 = vld [vmem:[%s11771_s12 + $0x31c] ss:$48 sps:$4 sm:$0xff]  }
 0x53f   : > { %5169 = vmatprep.subr.bf16.mxu1 %v8307_v48  ;;  %v8355_v46 = vld [vmem:[%s11771_s12 + $0x91c] ss:$48 sps:$4 sm:$0xff]   ;;  %v8350_v48 = vld [vmem:[%s11771_s12 + $0x318] ss:$48 sps:$4 sm:$0xff]  }
 0x540   : > { %5079 = vmatmul.mubr.bf16.vlgmr.msra.gmra.mrb[8].mxu0 %v10213_v62 }
 0x541   : > { %5120 = vmatmul.mubr.bf16.vlgmr.msra.gmra.mrb[8].mxu1 %v10217_v32  ;;  %5129 = vmatpush1.bf16.msra.mxu0 %v8302_v51  ;;  %v8353_v51 = vld [vmem:[%s11771_s12 + $0x918] ss:$48 sps:$4 sm:$0xff]  }
 0x542   : > { %5170 = vmatpush1.bf16.msra.mxu1 %v8305_v57  ;;  %5130 = vmatprep.subr.bf16.mxu0 %v8310_v58  ;;  %v8358_v57 = vld [vmem:[%s11771_s12 + $0x37c] ss:$48 sps:$4 sm:$0xff]  }
 0x543   : > { %5171 = vmatprep.subr.bf16.mxu1 %v8313_v61  ;;  %5160 = vmatprep.mubr.bf16.mxu0 %v10017_v11  ;;  %v8361_v58 = vld [vmem:[%s11771_s12 + $0x97c] ss:$48 sps:$4 sm:$0xff]   ;;  %v8356_v61 = vld [vmem:[%s11771_s12 + $0x378] ss:$48 sps:$4 sm:$0xff]  }
 0x544   : > { %5201 = vmatprep.mubr.bf16.mxu1 %v10021_v12 }
 0x545   : > { %5131 = vmatpush1.bf16.msra.mxu0 %v8308_v0  ;;  %v8359_v0 = vld [vmem:[%s11771_s12 + $0x978] ss:$48 sps:$4 sm:$0xff]  }
 0x546   : > { %5172 = vmatpush1.bf16.msra.mxu1 %v8311_v41  ;;  %5132 = vmatprep.subr.bf16.mxu0 %v8316_v6  ;;  %v8364_v41 = vld [vmem:[%s11771_s12 + $0x3dc] ss:$48 sps:$4 sm:$0xff]  }
 0x547   : > { %5173 = vmatprep.subr.bf16.mxu1 %v8319_v7  ;;  %v8367_v6 = vld [vmem:[%s11771_s12 + $0x9dc] ss:$48 sps:$4 sm:$0xff]   ;;  %v8362_v7 = vld [vmem:[%s11771_s12 + $0x3d8] ss:$48 sps:$4 sm:$0xff]  }
 0x549   : > { %5133 = vmatpush1.bf16.msra.mxu0 %v8314_v8  ;;  %v8365_v8 = vld [vmem:[%s11771_s12 + $0x9d8] ss:$48 sps:$4 sm:$0xff]  }
 0x54a   : > { %5174 = vmatpush1.bf16.msra.mxu1 %v8317_v10  ;;  %5134 = vmatprep.subr.bf16.mxu0 %v8322_v13  ;;  %v8370_v10 = vld [vmem:[%s11771_s12 + $0x43c] ss:$48 sps:$4 sm:$0xff]  }
 0x54b   : > { %5175 = vmatprep.subr.bf16.mxu1 %v8325_v14  ;;  %v8373_v13 = vld [vmem:[%s11771_s12 + $0xa3c] ss:$48 sps:$4 sm:$0xff]   ;;  %v8368_v14 = vld [vmem:[%s11771_s12 + $0x438] ss:$48 sps:$4 sm:$0xff]  }
 0x54d   : > { %5135 = vmatpush1.bf16.msra.mxu0 %v8320_v15  ;;  %v8371_v15 = vld [vmem:[%s11771_s12 + $0xa38] ss:$48 sps:$4 sm:$0xff]  }
 0x54e   : > { %5176 = vmatpush1.bf16.msra.mxu1 %v8323_v16  ;;  %5136 = vmatprep.subr.bf16.mxu0 %v8328_v18  ;;  %v8376_v16 = vld [vmem:[%s11771_s12 + $0x49c] ss:$48 sps:$4 sm:$0xff]  }
 0x54f   : > { %5177 = vmatprep.subr.bf16.mxu1 %v8331_v20  ;;  %v8379_v18 = vld [vmem:[%s11771_s12 + $0xa9c] ss:$48 sps:$4 sm:$0xff]   ;;  %v8374_v20 = vld [vmem:[%s11771_s12 + $0x498] ss:$48 sps:$4 sm:$0xff]  }
 0x551   : > { %5137 = vmatpush1.bf16.msra.mxu0 %v8326_v21  ;;  %v8377_v21 = vld [vmem:[%s11771_s12 + $0xa98] ss:$48 sps:$4 sm:$0xff]  }
 0x552   : > { %5178 = vmatpush1.bf16.msra.mxu1 %v8329_v22  ;;  %5138 = vmatprep.subr.bf16.mxu0 %v8334_v59  ;;  %v8382_v22 = vld [vmem:[%s11771_s12 + $0x4fc] ss:$48 sps:$4 sm:$0xff]  }
 0x553   : > { %5179 = vmatprep.subr.bf16.mxu1 %v8337_v24  ;;  %v8385_v59 = vld [vmem:[%s11771_s12 + $0xafc] ss:$48 sps:$4 sm:$0xff]   ;;  %v8380_v24 = vld [vmem:[%s11771_s12 + $0x4f8] ss:$48 sps:$4 sm:$0xff]  }
 0x555   : > { %5139 = vmatpush1.bf16.msra.mxu0 %v8332_v25  ;;  %v8383_v25 = vld [vmem:[%s11771_s12 + $0xaf8] ss:$48 sps:$4 sm:$0xff]  }
 0x556   : > { %5180 = vmatpush1.bf16.msra.mxu1 %v8335_v26  ;;  %5140 = vmatprep.subr.bf16.mxu0 %v8340_v27  ;;  %v8388_v26 = vld [vmem:[%s11771_s12 + $0x55c] ss:$48 sps:$4 sm:$0xff]  }
 0x557   : > { %5181 = vmatprep.subr.bf16.mxu1 %v8343_v28  ;;  %v8391_v27 = vld [vmem:[%s11771_s12 + $0xb5c] ss:$48 sps:$4 sm:$0xff]   ;;  %v8386_v28 = vld [vmem:[%s11771_s12 + $0x558] ss:$48 sps:$4 sm:$0xff]  }
 0x559   : > { %5141 = vmatpush1.bf16.msra.mxu0 %v8338_v30  ;;  %v8389_v30 = vld [vmem:[%s11771_s12 + $0xb58] ss:$48 sps:$4 sm:$0xff]  }
 0x55a   : > { %5182 = vmatpush1.bf16.msra.mxu1 %v8341_v31  ;;  %5142 = vmatprep.subr.bf16.mxu0 %v8346_v33  ;;  %v8394_v31 = vld [vmem:[%s11771_s12 + $0x5bc] ss:$48 sps:$4 sm:$0xff]  }
 0x55b   : > { %5183 = vmatprep.subr.bf16.mxu1 %v8349_v35  ;;  %v8397_v33 = vld [vmem:[%s11771_s12 + $0xbbc] ss:$48 sps:$4 sm:$0xff]   ;;  %v8392_v35 = vld [vmem:[%s11771_s12 + $0x5b8] ss:$48 sps:$4 sm:$0xff]  }
 0x55d   : > { %5143 = vmatpush1.bf16.msra.mxu0 %v8344_v36  ;;  %v8395_v36 = vld [vmem:[%s11771_s12 + $0xbb8] ss:$48 sps:$4 sm:$0xff]  }
 0x55e   : > { %5184 = vmatpush1.bf16.msra.mxu1 %v8347_v40  ;;  %5144 = vmatprep.subr.bf16.mxu0 %v8352_v17  ;;  %v8400_v40 = vld [vmem:[%s11771_s12 + $0x24] ss:$48 sps:$4 sm:$0xff]  }
 0x55f   : > { %5185 = vmatprep.subr.bf16.mxu1 %v8355_v46  ;;  %v8403_v17 = vld [vmem:[%s11771_s12 + $0x624] ss:$48 sps:$4 sm:$0xff]   ;;  %v8398_v46 = vld [vmem:[%s11771_s12 + $0x20] ss:$48 sps:$4 sm:$0xff]  }
 0x561   : > { %5145 = vmatpush1.bf16.msra.mxu0 %v8350_v48  ;;  %v8401_v48 = vld [vmem:[%s11771_s12 + $0x620] ss:$48 sps:$4 sm:$0xff]  }
 0x562   : > { %5186 = vmatpush1.bf16.msra.mxu1 %v8353_v51  ;;  %5146 = vmatprep.subr.bf16.mxu0 %v8358_v57  ;;  %v8406_v51 = vld [vmem:[%s11771_s12 + $0x84] ss:$48 sps:$4 sm:$0xff]  }
 0x563   : > { %5187 = vmatprep.subr.bf16.mxu1 %v8361_v58  ;;  %v8409_v57 = vld [vmem:[%s11771_s12 + $0x684] ss:$48 sps:$4 sm:$0xff]   ;;  %v8404_v58 = vld [vmem:[%s11771_s12 + $0x80] ss:$48 sps:$4 sm:$0xff]  }
 0x565   : > { %5147 = vmatpush1.bf16.msra.mxu0 %v8356_v61  ;;  %v8407_v61 = vld [vmem:[%s11771_s12 + $0x680] ss:$48 sps:$4 sm:$0xff]  }
 0x566   : > { %5188 = vmatpush1.bf16.msra.mxu1 %v8359_v0  ;;  %5148 = vmatprep.subr.bf16.mxu0 %v8364_v41  ;;  %v8412_v0 = vld [vmem:[%s11771_s12 + $0xe4] ss:$48 sps:$4 sm:$0xff]  }
 0x567   : > { %5189 = vmatprep.subr.bf16.mxu1 %v8367_v6  ;;  %v8415_v41 = vld [vmem:[%s11771_s12 + $0x6e4] ss:$48 sps:$4 sm:$0xff]   ;;  %v8410_v6 = vld [vmem:[%s11771_s12 + $0xe0] ss:$48 sps:$4 sm:$0xff]  }
 0x569   : > { %5149 = vmatpush1.bf16.msra.mxu0 %v8362_v7  ;;  %v8413_v7 = vld [vmem:[%s11771_s12 + $0x6e0] ss:$48 sps:$4 sm:$0xff]  }
 0x56a   : > { %5190 = vmatpush1.bf16.msra.mxu1 %v8365_v8  ;;  %5150 = vmatprep.subr.bf16.mxu0 %v8370_v10  ;;  %v8418_v8 = vld [vmem:[%s11771_s12 + $0x144] ss:$48 sps:$4 sm:$0xff]  }
 0x56b   : > { %5191 = vmatprep.subr.bf16.mxu1 %v8373_v13  ;;  %v8421_v10 = vld [vmem:[%s11771_s12 + $0x744] ss:$48 sps:$4 sm:$0xff]   ;;  %v8416_v13 = vld [vmem:[%s11771_s12 + $0x140] ss:$48 sps:$4 sm:$0xff]  }
 0x56d   : > { %5151 = vmatpush1.bf16.msra.mxu0 %v8368_v14  ;;  %v8419_v14 = vld [vmem:[%s11771_s12 + $0x740] ss:$48 sps:$4 sm:$0xff]  }
 0x56e   : > { %5192 = vmatpush1.bf16.msra.mxu1 %v8371_v15  ;;  %5152 = vmatprep.subr.bf16.mxu0 %v8376_v16  ;;  %v8424_v15 = vld [vmem:[%s11771_s12 + $0x1a4] ss:$48 sps:$4 sm:$0xff]  }
 0x56f   : > { %5193 = vmatprep.subr.bf16.mxu1 %v8379_v18  ;;  %v8427_v16 = vld [vmem:[%s11771_s12 + $0x7a4] ss:$48 sps:$4 sm:$0xff]   ;;  %v8422_v18 = vld [vmem:[%s11771_s12 + $0x1a0] ss:$48 sps:$4 sm:$0xff]  }
 0x571   : > { %5153 = vmatpush1.bf16.msra.mxu0 %v8374_v20  ;;  %v8425_v20 = vld [vmem:[%s11771_s12 + $0x7a0] ss:$48 sps:$4 sm:$0xff]  }
 0x572   : > { %5194 = vmatpush1.bf16.msra.mxu1 %v8377_v21  ;;  %5154 = vmatprep.subr.bf16.mxu0 %v8382_v22  ;;  %v8430_v21 = vld [vmem:[%s11771_s12 + $0x204] ss:$48 sps:$4 sm:$0xff]  }
 0x573   : > { %5195 = vmatprep.subr.bf16.mxu1 %v8385_v59  ;;  %v8433_v22 = vld [vmem:[%s11771_s12 + $0x804] ss:$48 sps:$4 sm:$0xff]   ;;  %v8428_v59 = vld [vmem:[%s11771_s12 + $0x200] ss:$48 sps:$4 sm:$0xff]  }
 0x575   : > { %5155 = vmatpush1.bf16.msra.mxu0 %v8380_v24  ;;  %v8431_v24 = vld [vmem:[%s11771_s12 + $0x800] ss:$48 sps:$4 sm:$0xff]  }
 0x576   : > { %5196 = vmatpush1.bf16.msra.mxu1 %v8383_v25  ;;  %5156 = vmatprep.subr.bf16.mxu0 %v8388_v26  ;;  %v8436_v25 = vld [vmem:[%s11771_s12 + $0x264] ss:$48 sps:$4 sm:$0xff]  }
 0x577   : > { %5197 = vmatprep.subr.bf16.mxu1 %v8391_v27  ;;  %v8439_v26 = vld [vmem:[%s11771_s12 + $0x864] ss:$48 sps:$4 sm:$0xff]  }
 0x579   : > { %5157 = vmatpush1.bf16.msra.mxu0 %v8386_v28 }
 0x57a   : > { %5198 = vmatpush1.bf16.msra.mxu1 %v8389_v30  ;;  %5158 = vmatprep.subr.bf16.mxu0 %v8394_v31 }
 0x57b   : > { %5199 = vmatprep.subr.bf16.mxu1 %v8397_v33 }
 0x57d   : > { %5159 = vmatpush1.bf16.msra.mxu0 %v8392_v35 }
 0x57e   : > { %5200 = vmatpush1.bf16.msra.mxu1 %v8395_v36  ;;  %5210 = vmatprep.subr.bf16.mxu0 %v8400_v40 }
 0x57f   : > { %5251 = vmatprep.subr.bf16.mxu1 %v8403_v17  ;;  %v8434_v17 = vld [vmem:[%s11771_s12 + $0x260] ss:$48 sps:$4 sm:$0xff]  }
 0x580   : > { %5161 = vmatmul.mubr.bf16.vlgmr.msra.gmra.mrb[12].mxu0 %v10213_v62 }
 0x581   : > { %5202 = vmatmul.mubr.bf16.vlgmr.msra.gmra.mrb[12].mxu1 %v10217_v32  ;;  %5211 = vmatpush1.bf16.msra.mxu0 %v8398_v46  ;;  %v8437_v46 = vld [vmem:[%s11771_s12 + $0x860] ss:$48 sps:$4 sm:$0xff]  }
 0x582   : > { %5252 = vmatpush1.bf16.msra.mxu1 %v8401_v48  ;;  %5212 = vmatprep.subr.bf16.mxu0 %v8406_v51 }
 0x583   : > { %5253 = vmatprep.subr.bf16.mxu1 %v8409_v57  ;;  %5242 = vmatprep.mubr.bf16.mxu0 %v10017_v11  ;;  %v8442_v57 = vld [vmem:[%s11771_s12 + $0x2c4] ss:$48 sps:$4 sm:$0xff]  }
 0x584   : > { %5283 = vmatprep.mubr.bf16.mxu1 %v10021_v12 }
 0x585   : > { %5213 = vmatpush1.bf16.msra.mxu0 %v8404_v58  ;;  %v8445_v58 = vld [vmem:[%s11771_s12 + $0x8c4] ss:$48 sps:$4 sm:$0xff]  }
 0x586   : > { %5254 = vmatpush1.bf16.msra.mxu1 %v8407_v61  ;;  %5214 = vmatprep.subr.bf16.mxu0 %v8412_v0  ;;  %v8440_v61 = vld [vmem:[%s11771_s12 + $0x2c0] ss:$48 sps:$4 sm:$0xff]  }
 0x587   : > { %5255 = vmatprep.subr.bf16.mxu1 %v8415_v41  ;;  %v8443_v0 = vld [vmem:[%s11771_s12 + $0x8c0] ss:$48 sps:$4 sm:$0xff]   ;;  %v8448_v41 = vld [vmem:[%s11771_s12 + $0x324] ss:$48 sps:$4 sm:$0xff]  }
 0x589   : > { %5215 = vmatpush1.bf16.msra.mxu0 %v8410_v6  ;;  %v8451_v6 = vld [vmem:[%s11771_s12 + $0x924] ss:$48 sps:$4 sm:$0xff]  }
 0x58a   : > { %5256 = vmatpush1.bf16.msra.mxu1 %v8413_v7  ;;  %5216 = vmatprep.subr.bf16.mxu0 %v8418_v8  ;;  %v8446_v7 = vld [vmem:[%s11771_s12 + $0x320] ss:$48 sps:$4 sm:$0xff]  }
 0x58b   : > { %5257 = vmatprep.subr.bf16.mxu1 %v8421_v10  ;;  %v8449_v8 = vld [vmem:[%s11771_s12 + $0x920] ss:$48 sps:$4 sm:$0xff]   ;;  %v8454_v10 = vld [vmem:[%s11771_s12 + $0x384] ss:$48 sps:$4 sm:$0xff]  }
 0x58d   : > { %5217 = vmatpush1.bf16.msra.mxu0 %v8416_v13  ;;  %v8457_v13 = vld [vmem:[%s11771_s12 + $0x984] ss:$48 sps:$4 sm:$0xff]  }
 0x58e   : > { %5258 = vmatpush1.bf16.msra.mxu1 %v8419_v14  ;;  %5218 = vmatprep.subr.bf16.mxu0 %v8424_v15  ;;  %v8452_v14 = vld [vmem:[%s11771_s12 + $0x380] ss:$48 sps:$4 sm:$0xff]  }
 0x58f   : > { %5259 = vmatprep.subr.bf16.mxu1 %v8427_v16  ;;  %v8455_v15 = vld [vmem:[%s11771_s12 + $0x980] ss:$48 sps:$4 sm:$0xff]   ;;  %v8460_v16 = vld [vmem:[%s11771_s12 + $0x3e4] ss:$48 sps:$4 sm:$0xff]  }
 0x591   : > { %5219 = vmatpush1.bf16.msra.mxu0 %v8422_v18  ;;  %v8463_v18 = vld [vmem:[%s11771_s12 + $0x9e4] ss:$48 sps:$4 sm:$0xff]  }
 0x592   : > { %5260 = vmatpush1.bf16.msra.mxu1 %v8425_v20  ;;  %5220 = vmatprep.subr.bf16.mxu0 %v8430_v21  ;;  %v8458_v20 = vld [vmem:[%s11771_s12 + $0x3e0] ss:$48 sps:$4 sm:$0xff]  }
 0x593   : > { %5261 = vmatprep.subr.bf16.mxu1 %v8433_v22  ;;  %v4916_v27 = vpop.f32.mrb[0].mxu0  ;;  %v8461_v21 = vld [vmem:[%s11771_s12 + $0x9e0] ss:$48 sps:$4 sm:$0xff]   ;;  %v8466_v22 = vld [vmem:[%s11771_s12 + $0x444] ss:$48 sps:$4 sm:$0xff]  }
 0x594   : > { %v4957_v28 = vpop.f32.mrb[0].mxu1  ;;  %v4918_v31 = vpop.f32.mrb[1].mxu0 }
 0x595   : > { %v10883_v30 = vadd.f32 %v4957_v28, %v4916_v27  ;;  %v4959_v33 = vpop.f32.mrb[1].mxu1  ;;  %v4920_v36 = vpop.f32.mrb[2].mxu0  ;;  %5221 = vmatpush1.bf16.msra.mxu0 %v8428_v59  ;;  %v8469_v59 = vld [vmem:[%s11771_s12 + $0xa44] ss:$48 sps:$4 sm:$0xff]   ;;  %v8470_v28 = vld [vmem:[%s11771_s12 + $0x4a0] ss:$48 sps:$4 sm:$0xff]  }
 0x596   : > { %v10885_v35 = vadd.f32 %v4959_v33, %v4918_v31  ;;  %v4961_v40 = vpop.f32.mrb[2].mxu1  ;;  %5262 = vmatpush1.bf16.msra.mxu1 %v8431_v24  ;;  %v4921_v48 = vpop.f32.mrb[3].mxu0  ;;  %5222 = vmatprep.subr.bf16.mxu0 %v8436_v25  ;;  %v8464_v24 = vld [vmem:[%s11771_s12 + $0x440] ss:$48 sps:$4 sm:$0xff]   ;;  %v8475_v27 = vld [vmem:[%s11771_s12 + $0xaa4] ss:$48 sps:$4 sm:$0xff]  }
 0x597   : > { %v4962_v51 = vpop.f32.mrb[3].mxu1  ;;  %5263 = vmatprep.subr.bf16.mxu1 %v8439_v26  ;;  %v8467_v25 = vld [vmem:[%s11771_s12 + $0xa40] ss:$48 sps:$4 sm:$0xff]   ;;  %v8472_v26 = vld [vmem:[%s11771_s12 + $0x4a4] ss:$48 sps:$4 sm:$0xff]  }
 0x598   : > { %v8473_v31 = vld [vmem:[%s11771_s12 + $0xaa0] ss:$48 sps:$4 sm:$0xff]   ;;  %v8478_v33 = vld [vmem:[%s11771_s12 + $0x504] ss:$48 sps:$4 sm:$0xff]  }
 0x599   : > { %5223 = vmatpush1.bf16.msra.mxu0 %v8434_v17  ;;  %v8481_v36 = vld [vmem:[%s11771_s12 + $0xb04] ss:$48 sps:$4 sm:$0xff]   ;;  %v8476_v40 = vld [vmem:[%s11771_s12 + $0x500] ss:$48 sps:$4 sm:$0xff]  }
 0x59a   : > { %5264 = vmatpush1.bf16.msra.mxu1 %v8437_v46  ;;  %5224 = vmatprep.subr.bf16.mxu0 %v8442_v57  ;;  %v8479_v17 = vld [vmem:[%s11771_s12 + $0xb00] ss:$48 sps:$4 sm:$0xff]   ;;  %v8484_v46 = vld [vmem:[%s11771_s12 + $0x564] ss:$48 sps:$4 sm:$0xff]  }
 0x59b   : > { %5265 = vmatprep.subr.bf16.mxu1 %v8445_v58  ;;  %v8487_v48 = vld [vmem:[%s11771_s12 + $0xb64] ss:$48 sps:$4 sm:$0xff]   ;;  %v8482_v51 = vld [vmem:[%s11771_s12 + $0x560] ss:$48 sps:$4 sm:$0xff]  }
 0x59c   : > { %v8485_v57 = vld [vmem:[%s11771_s12 + $0xb60] ss:$48 sps:$4 sm:$0xff]   ;;  %v8490_v58 = vld [vmem:[%s11771_s12 + $0x5c4] ss:$48 sps:$4 sm:$0xff]  }
 0x59d   : > { %5225 = vmatpush1.bf16.msra.mxu0 %v8440_v61  ;;  %v8493_v61 = vld [vmem:[%s11771_s12 + $0xbc4] ss:$48 sps:$4 sm:$0xff]  }
 0x59e   : > { %5266 = vmatpush1.bf16.msra.mxu1 %v8443_v0  ;;  %5226 = vmatprep.subr.bf16.mxu0 %v8448_v41  ;;  %v8488_v0 = vld [vmem:[%s11771_s12 + $0x5c0] ss:$48 sps:$4 sm:$0xff]  }
 0x59f   : > { %5267 = vmatprep.subr.bf16.mxu1 %v8451_v6  ;;  %v8491_v41 = vld [vmem:[%s11771_s12 + $0xbc0] ss:$48 sps:$4 sm:$0xff]   ;;  %v8496_v6 = vld [vmem:[%s11771_s12 + $0x2c] ss:$48 sps:$4 sm:$0xff]  }
 0x5a1   : > { %5227 = vmatpush1.bf16.msra.mxu0 %v8446_v7  ;;  %v8499_v7 = vld [vmem:[%s11771_s12 + $0x62c] ss:$48 sps:$4 sm:$0xff]  }
 0x5a2   : > { %5268 = vmatpush1.bf16.msra.mxu1 %v8449_v8  ;;  %5228 = vmatprep.subr.bf16.mxu0 %v8454_v10  ;;  %v8494_v8 = vld [vmem:[%s11771_s12 + $0x28] ss:$48 sps:$4 sm:$0xff]  }
 0x5a3   : > { %5269 = vmatprep.subr.bf16.mxu1 %v8457_v13  ;;  %v8497_v10 = vld [vmem:[%s11771_s12 + $0x628] ss:$48 sps:$4 sm:$0xff]   ;;  %v8502_v13 = vld [vmem:[%s11771_s12 + $0x8c] ss:$48 sps:$4 sm:$0xff]  }
 0x5a5   : > { %5229 = vmatpush1.bf16.msra.mxu0 %v8452_v14  ;;  %v8505_v14 = vld [vmem:[%s11771_s12 + $0x68c] ss:$48 sps:$4 sm:$0xff]  }
 0x5a6   : > { %5270 = vmatpush1.bf16.msra.mxu1 %v8455_v15  ;;  %5230 = vmatprep.subr.bf16.mxu0 %v8460_v16  ;;  %v8500_v15 = vld [vmem:[%s11771_s12 + $0x88] ss:$48 sps:$4 sm:$0xff]  }
 0x5a7   : > { %5271 = vmatprep.subr.bf16.mxu1 %v8463_v18  ;;  %v8503_v16 = vld [vmem:[%s11771_s12 + $0x688] ss:$48 sps:$4 sm:$0xff]   ;;  %v8508_v18 = vld [vmem:[%s11771_s12 + $0xec] ss:$48 sps:$4 sm:$0xff]  }
 0x5a9   : > { %5231 = vmatpush1.bf16.msra.mxu0 %v8458_v20  ;;  %v8511_v20 = vld [vmem:[%s11771_s12 + $0x6ec] ss:$48 sps:$4 sm:$0xff]  }
 0x5aa   : > { %5272 = vmatpush1.bf16.msra.mxu1 %v8461_v21  ;;  %5232 = vmatprep.subr.bf16.mxu0 %v8466_v22  ;;  %v8506_v21 = vld [vmem:[%s11771_s12 + $0xe8] ss:$48 sps:$4 sm:$0xff]  }
 0x5ab   : > { %5273 = vmatprep.subr.bf16.mxu1 %v8469_v59  ;;  %v8509_v22 = vld [vmem:[%s11771_s12 + $0x6e8] ss:$48 sps:$4 sm:$0xff]   ;;  %v8514_v59 = vld [vmem:[%s11771_s12 + $0x14c] ss:$48 sps:$4 sm:$0xff]  }
 0x5ad   : > { %5233 = vmatpush1.bf16.msra.mxu0 %v8464_v24  ;;  %v8515_v24 = vld [vmem:[%s11771_s12 + $0x748] ss:$48 sps:$4 sm:$0xff]  }
 0x5ae   : > { %5274 = vmatpush1.bf16.msra.mxu1 %v8467_v25  ;;  %5234 = vmatprep.subr.bf16.mxu0 %v8472_v26  ;;  %v8520_v25 = vld [vmem:[%s11771_s12 + $0x1ac] ss:$48 sps:$4 sm:$0xff]  }
 0x5af   : > { %5275 = vmatprep.subr.bf16.mxu1 %v8475_v27  ;;  %v8523_v26 = vld [vmem:[%s11771_s12 + $0x7ac] ss:$48 sps:$4 sm:$0xff]   ;;  %v8518_v27 = vld [vmem:[%s11771_s12 + $0x1a8] ss:$48 sps:$4 sm:$0xff]  }
 0x5b1   : > { %5235 = vmatpush1.bf16.msra.mxu0 %v8470_v28  ;;  %v8521_v28 = vld [vmem:[%s11771_s12 + $0x7a8] ss:$48 sps:$4 sm:$0xff]  }
 0x5b2   : > { %5276 = vmatpush1.bf16.msra.mxu1 %v8473_v31  ;;  %5236 = vmatprep.subr.bf16.mxu0 %v8478_v33  ;;  %v8526_v31 = vld [vmem:[%s11771_s12 + $0x20c] ss:$48 sps:$4 sm:$0xff]  }
 0x5b3   : > { %5277 = vmatprep.subr.bf16.mxu1 %v8481_v36  ;;  %v8529_v33 = vld [vmem:[%s11771_s12 + $0x80c] ss:$48 sps:$4 sm:$0xff]   ;;  %v8524_v36 = vld [vmem:[%s11771_s12 + $0x208] ss:$48 sps:$4 sm:$0xff]  }
 0x5b5   : > { %5237 = vmatpush1.bf16.msra.mxu0 %v8476_v40  ;;  %v8527_v40 = vld [vmem:[%s11771_s12 + $0x808] ss:$48 sps:$4 sm:$0xff]  }
 0x5b6   : > { %5278 = vmatpush1.bf16.msra.mxu1 %v8479_v17  ;;  %5238 = vmatprep.subr.bf16.mxu0 %v8484_v46  ;;  %v8532_v17 = vld [vmem:[%s11771_s12 + $0x26c] ss:$48 sps:$4 sm:$0xff]  }
 0x5b7   : > { %5279 = vmatprep.subr.bf16.mxu1 %v8487_v48  ;;  %v8535_v46 = vld [vmem:[%s11771_s12 + $0x86c] ss:$48 sps:$4 sm:$0xff]  }
 0x5b9   : > { %5239 = vmatpush1.bf16.msra.mxu0 %v8482_v51 }
 0x5ba   : > { %5280 = vmatpush1.bf16.msra.mxu1 %v8485_v57  ;;  %5240 = vmatprep.subr.bf16.mxu0 %v8490_v58 }
 0x5bb   : > { %5281 = vmatprep.subr.bf16.mxu1 %v8493_v61 }
 0x5bd   : > { %5241 = vmatpush1.bf16.msra.mxu0 %v8488_v0 }
 0x5be   : > { %5282 = vmatpush1.bf16.msra.mxu1 %v8491_v41  ;;  %5292 = vmatprep.subr.bf16.mxu0 %v8496_v6 }
 0x5bf   : > { %5333 = vmatprep.subr.bf16.mxu1 %v8499_v7  ;;  %v8530_v7 = vld [vmem:[%s11771_s12 + $0x268] ss:$48 sps:$4 sm:$0xff]  }
 0x5c0   : > { %5243 = vmatmul.mubr.bf16.vlgmr.msra.gmra.mrb[16].mxu0 %v10213_v62 }
 0x5c1   : > { %5284 = vmatmul.mubr.bf16.vlgmr.msra.gmra.mrb[16].mxu1 %v10217_v32  ;;  %5293 = vmatpush1.bf16.msra.mxu0 %v8494_v8  ;;  %v8533_v8 = vld [vmem:[%s11771_s12 + $0x868] ss:$48 sps:$4 sm:$0xff]  }
 0x5c2   : > { %5334 = vmatpush1.bf16.msra.mxu1 %v8497_v10  ;;  %5294 = vmatprep.subr.bf16.mxu0 %v8502_v13 }
 0x5c3   : > { %5335 = vmatprep.subr.bf16.mxu1 %v8505_v14  ;;  %5324 = vmatprep.mubr.bf16.mxu0 %v10017_v11  ;;  %v8517_v11 = vld [vmem:[%s11771_s12 + $0x74c] ss:$48 sps:$4 sm:$0xff]  }
 0x5c4   : > { %5365 = vmatprep.mubr.bf16.mxu1 %v10021_v12  ;;  %v8512_v12 = vld [vmem:[%s11771_s12 + $0x148] ss:$48 sps:$4 sm:$0xff]   ;;  %v8538_v14 = vld [vmem:[%s11771_s12 + $0x2cc] ss:$48 sps:$4 sm:$0xff]  }
 0x5c5   : > { %5295 = vmatpush1.bf16.msra.mxu0 %v8500_v15  ;;  %v8541_v15 = vld [vmem:[%s11771_s12 + $0x8cc] ss:$48 sps:$4 sm:$0xff]  }
 0x5c6   : > { %5336 = vmatpush1.bf16.msra.mxu1 %v8503_v16  ;;  %5296 = vmatprep.subr.bf16.mxu0 %v8508_v18  ;;  %v8536_v16 = vld [vmem:[%s11771_s12 + $0x2c8] ss:$48 sps:$4 sm:$0xff]  }
 0x5c7   : > { %5337 = vmatprep.subr.bf16.mxu1 %v8511_v20  ;;  %v8539_v18 = vld [vmem:[%s11771_s12 + $0x8c8] ss:$48 sps:$4 sm:$0xff]   ;;  %v8544_v20 = vld [vmem:[%s11771_s12 + $0x32c] ss:$48 sps:$4 sm:$0xff]  }
 0x5c9   : > { %5297 = vmatpush1.bf16.msra.mxu0 %v8506_v21  ;;  %v8547_v21 = vld [vmem:[%s11771_s12 + $0x92c] ss:$48 sps:$4 sm:$0xff]  }
 0x5ca   : > { %5338 = vmatpush1.bf16.msra.mxu1 %v8509_v22  ;;  %5298 = vmatprep.subr.bf16.mxu0 %v8514_v59  ;;  %v8542_v22 = vld [vmem:[%s11771_s12 + $0x328] ss:$48 sps:$4 sm:$0xff]  }
 0x5cb   : > { %5339 = vmatprep.subr.bf16.mxu1 %v8517_v11  ;;  %v8545_v59 = vld [vmem:[%s11771_s12 + $0x928] ss:$48 sps:$4 sm:$0xff]   ;;  %v8550_v11 = vld [vmem:[%s11771_s12 + $0x38c] ss:$48 sps:$4 sm:$0xff]  }
 0x5cd   : > { %5299 = vmatpush1.bf16.msra.mxu0 %v8512_v12  ;;  %v8553_v12 = vld [vmem:[%s11771_s12 + $0x98c] ss:$48 sps:$4 sm:$0xff]  }
 0x5ce   : > { %5340 = vmatpush1.bf16.msra.mxu1 %v8515_v24  ;;  %5300 = vmatprep.subr.bf16.mxu0 %v8520_v25  ;;  %v8548_v24 = vld [vmem:[%s11771_s12 + $0x388] ss:$48 sps:$4 sm:$0xff]  }
 0x5cf   : > { %5341 = vmatprep.subr.bf16.mxu1 %v8523_v26  ;;  %v8551_v25 = vld [vmem:[%s11771_s12 + $0x988] ss:$48 sps:$4 sm:$0xff]   ;;  %v8556_v26 = vld [vmem:[%s11771_s12 + $0x3ec] ss:$48 sps:$4 sm:$0xff]  }
 0x5d1   : > { %5301 = vmatpush1.bf16.msra.mxu0 %v8518_v27  ;;  %v8559_v27 = vld [vmem:[%s11771_s12 + $0x9ec] ss:$48 sps:$4 sm:$0xff]  }
 0x5d2   : > { %5342 = vmatpush1.bf16.msra.mxu1 %v8521_v28  ;;  %5302 = vmatprep.subr.bf16.mxu0 %v8526_v31  ;;  %v8554_v28 = vld [vmem:[%s11771_s12 + $0x3e8] ss:$48 sps:$4 sm:$0xff]  }
 0x5d3   : > { %5343 = vmatprep.subr.bf16.mxu1 %v8529_v33  ;;  %v4998_v48 = vpop.f32.mrb[4].mxu0  ;;  %v8557_v31 = vld [vmem:[%s11771_s12 + $0x9e8] ss:$48 sps:$4 sm:$0xff]   ;;  %v8562_v33 = vld [vmem:[%s11771_s12 + $0x44c] ss:$48 sps:$4 sm:$0xff]  }
 0x5d4   : > { %v5039_v51 = vpop.f32.mrb[4].mxu1  ;;  %v5000_v58 = vpop.f32.mrb[5].mxu0 }
 0x5d5   : > { %v11083_v57 = vadd.f32 %v5039_v51, %v4998_v48  ;;  %v5041_v61 = vpop.f32.mrb[5].mxu1  ;;  %v5002_v41 = vpop.f32.mrb[6].mxu0  ;;  %5303 = vmatpush1.bf16.msra.mxu0 %v8524_v36  ;;  %v8565_v36 = vld [vmem:[%s11771_s12 + $0xa4c] ss:$48 sps:$4 sm:$0xff]   ;;  %v8566_v51 = vld [vmem:[%s11771_s12 + $0x4a8] ss:$48 sps:$4 sm:$0xff]  }
 0x5d6   : > { %v11085_v0 = vadd.f32 %v5041_v61, %v5000_v58  ;;  %v5043_v6 = vpop.f32.mrb[6].mxu1  ;;  %5344 = vmatpush1.bf16.msra.mxu1 %v8527_v40  ;;  %v5003_v10 = vpop.f32.mrb[7].mxu0  ;;  %5304 = vmatprep.subr.bf16.mxu0 %v8532_v17  ;;  %v8560_v40 = vld [vmem:[%s11771_s12 + $0x448] ss:$48 sps:$4 sm:$0xff]   ;;  %v8571_v48 = vld [vmem:[%s11771_s12 + $0xaac] ss:$48 sps:$4 sm:$0xff]  }
 0x5d7   : > { %v5044_v13 = vpop.f32.mrb[7].mxu1  ;;  %5345 = vmatprep.subr.bf16.mxu1 %v8535_v46  ;;  %v8563_v17 = vld [vmem:[%s11771_s12 + $0xa48] ss:$48 sps:$4 sm:$0xff]   ;;  %v8568_v46 = vld [vmem:[%s11771_s12 + $0x4ac] ss:$48 sps:$4 sm:$0xff]  }
 0x5d8   : > { %v8569_v58 = vld [vmem:[%s11771_s12 + $0xaa8] ss:$48 sps:$4 sm:$0xff]   ;;  %v8574_v61 = vld [vmem:[%s11771_s12 + $0x50c] ss:$48 sps:$4 sm:$0xff]  }
 0x5d9   : > { %5305 = vmatpush1.bf16.msra.mxu0 %v8530_v7  ;;  %v8577_v41 = vld [vmem:[%s11771_s12 + $0xb0c] ss:$48 sps:$4 sm:$0xff]   ;;  %v8572_v6 = vld [vmem:[%s11771_s12 + $0x508] ss:$48 sps:$4 sm:$0xff]  }
 0x5da   : > { %5346 = vmatpush1.bf16.msra.mxu1 %v8533_v8  ;;  %5306 = vmatprep.subr.bf16.mxu0 %v8538_v14  ;;  %v8575_v7 = vld [vmem:[%s11771_s12 + $0xb08] ss:$48 sps:$4 sm:$0xff]   ;;  %v8580_v8 = vld [vmem:[%s11771_s12 + $0x56c] ss:$48 sps:$4 sm:$0xff]  }
 0x5db   : > { %5347 = vmatprep.subr.bf16.mxu1 %v8541_v15  ;;  %v8583_v10 = vld [vmem:[%s11771_s12 + $0xb6c] ss:$48 sps:$4 sm:$0xff]   ;;  %v8578_v13 = vld [vmem:[%s11771_s12 + $0x568] ss:$48 sps:$4 sm:$0xff]  }
 0x5dc   : > { %v8581_v14 = vld [vmem:[%s11771_s12 + $0xb68] ss:$48 sps:$4 sm:$0xff]   ;;  %v8586_v15 = vld [vmem:[%s11771_s12 + $0x5cc] ss:$48 sps:$4 sm:$0xff]  }
 0x5dd   : > { %5307 = vmatpush1.bf16.msra.mxu0 %v8536_v16  ;;  %v8589_v16 = vld [vmem:[%s11771_s12 + $0xbcc] ss:$48 sps:$4 sm:$0xff]  }
 0x5de   : > { %5348 = vmatpush1.bf16.msra.mxu1 %v8539_v18  ;;  %5308 = vmatprep.subr.bf16.mxu0 %v8544_v20  ;;  %v8584_v18 = vld [vmem:[%s11771_s12 + $0x5c8] ss:$48 sps:$4 sm:$0xff]  }
 0x5df   : > { %5349 = vmatprep.subr.bf16.mxu1 %v8547_v21  ;;  %v8587_v20 = vld [vmem:[%s11771_s12 + $0xbc8] ss:$48 sps:$4 sm:$0xff]  }
 0x5e1   : > { %5309 = vmatpush1.bf16.msra.mxu0 %v8542_v22 }
 0x5e2   : > { %5350 = vmatpush1.bf16.msra.mxu1 %v8545_v59  ;;  %5310 = vmatprep.subr.bf16.mxu0 %v8550_v11 }
 0x5e3   : > { %5351 = vmatprep.subr.bf16.mxu1 %v8553_v12 }
 0x5e5   : > { %5311 = vmatpush1.bf16.msra.mxu0 %v8548_v24 }
 0x5e6   : > { %5352 = vmatpush1.bf16.msra.mxu1 %v8551_v25  ;;  %5312 = vmatprep.subr.bf16.mxu0 %v8556_v26 }
 0x5e7   : > { %5353 = vmatprep.subr.bf16.mxu1 %v8559_v27 }
 0x5e9   : > { %5313 = vmatpush1.bf16.msra.mxu0 %v8554_v28 }
 0x5ea   : > { %5354 = vmatpush1.bf16.msra.mxu1 %v8557_v31  ;;  %5314 = vmatprep.subr.bf16.mxu0 %v8562_v33 }
 0x5eb   : > { %5355 = vmatprep.subr.bf16.mxu1 %v8565_v36 }
 0x5ed   : > { %5315 = vmatpush1.bf16.msra.mxu0 %v8560_v40 }
 0x5ee   : > { %5356 = vmatpush1.bf16.msra.mxu1 %v8563_v17  ;;  %5316 = vmatprep.subr.bf16.mxu0 %v8568_v46 }
 0x5ef   : > { %5357 = vmatprep.subr.bf16.mxu1 %v8571_v48 }
 0x5f1   : > { %5317 = vmatpush1.bf16.msra.mxu0 %v8566_v51 }
 0x5f2   : > { %5358 = vmatpush1.bf16.msra.mxu1 %v8569_v58  ;;  %5318 = vmatprep.subr.bf16.mxu0 %v8574_v61  ;;  %v5374_v58 = vadd.f32 %v10883_v30, %v9941_v19  ;;  %v5375_v61 = vadd.f32 %v10885_v35, %v9945_v23 }
 0x5f3   : > { %5359 = vmatprep.subr.bf16.mxu1 %v8577_v41 }
 0x5f4   : > { %v6986_v41 = vmul.f32 -1.442695, %v5374_v58 }
 0x5f5   : > { %5319 = vmatpush1.bf16.msra.mxu0 %v8572_v6  ;;  %v6987_v6 = vmul.f32 -1.442695, %v5375_v61 }
 0x5f6   : > { %5360 = vmatpush1.bf16.msra.mxu1 %v8575_v7  ;;  %5320 = vmatprep.subr.bf16.mxu0 %v8580_v8  ;;  %8590 = vpow2.f32 %v6986_v41 }
 0x5f7   : > { %5361 = vmatprep.subr.bf16.mxu1 %v8583_v10  ;;  %8592 = vpow2.f32 %v6987_v6 }
 0x5f9   : > { %5321 = vmatpush1.bf16.msra.mxu0 %v8578_v13 }
 0x5fa   : > { %5362 = vmatpush1.bf16.msra.mxu1 %v8581_v14  ;;  %5322 = vmatprep.subr.bf16.mxu0 %v8586_v15 }
 0x5fb   : > { %5363 = vmatprep.subr.bf16.mxu1 %v8589_v16 }
 0x5fd   : > { %5323 = vmatpush1.bf16.msra.mxu0 %v8584_v18 }
 0x5fe   : > { %5364 = vmatpush1.bf16.msra.mxu1 %v8587_v20 }
 0x600   : > { %5325 = vmatmul.mubr.bf16.vlgmr.msra.gmra.mrb[20].mxu0 %v10213_v62  ;;  %v8591_v14 = vpop.eup %8590 }
 0x601   : > { %5366 = vmatmul.mubr.bf16.vlgmr.msra.gmra.mrb[20].mxu1 %v10217_v32  ;;  %v8593_v15 = vpop.eup %8592  ;;  %v5390_v16 = vadd.f32 1.0, %v8591_v14 }
 0x602   : > { %v5391_v18 = vadd.f32 1.0, %v8593_v15 }
 0x613   : > { %v5080_v21 = vpop.f32.mrb[8].mxu0 }
 0x614   : > { %v5121_v22 = vpop.f32.mrb[8].mxu1  ;;  %v5082_v11 = vpop.f32.mrb[9].mxu0 }
 0x615   : > { %v5122_v59 = vadd.f32 %v5121_v22, %v5080_v21  ;;  %v5123_v12 = vpop.f32.mrb[9].mxu1  ;;  %v5084_v25 = vpop.f32.mrb[10].mxu0 }
 0x616   : > { %v5124_v24 = vadd.f32 %v5123_v12, %v5082_v11  ;;  %v5125_v26 = vpop.f32.mrb[10].mxu1  ;;  %v5085_v27 = vpop.f32.mrb[11].mxu0 }
 0x617   : > { %v5126_v28 = vpop.f32.mrb[11].mxu1  ;;  %v5402_v7 = vadd.f32 %v5122_v59, %v9955_v34  ;;  %v5559_v34 = vld [vmem:[%s11773_s14 + $0x110] sm:$0xff] (%p2566_p0) }
 0x618   : > { %v5403_v8 = vadd.f32 %v5124_v24, %v9957_v39 }
 0x619   : > { %v6990_v10 = vmul.f32 -1.442695, %v5402_v7 }
 0x61a   : > { %v6991_v13 = vmul.f32 -1.442695, %v5403_v8 }
 0x61b   : > { %8594 = vpow2.f32 %v6990_v10 }
 0x61c   : > { %8596 = vpow2.f32 %v6991_v13 }
 0x61d   : > { %8598 = vrcp.f32 %v5390_v16 }
 0x61e   : > { %8600 = vrcp.f32 %v5391_v18 }
 0x625   : > { %v8595_v30 = vpop.eup %8594 }
 0x626   : > { %v8597_v35 = vpop.eup %8596  ;;  %v5418_v22 = vadd.f32 1.0, %v8595_v30  ;;  %v5376_v30 = vadd.f32 %v11083_v57, %v9949_v9  ;;  %v5575_v9 = vld [vmem:[%s11773_s14 + $0x190] sm:$0xff] (%p2566_p0) }
 0x627   : > { %v5419_v25 = vadd.f32 1.0, %v8597_v35  ;;  %v5377_v35 = vadd.f32 %v11085_v0, %v9952_v29  ;;  %v5576_v29 = vld [vmem:[%s11773_s14 + $0x198] sm:$0xff] (%p2566_p0) }
 0x628   : > { %8602 = vrcp.f32 %v5418_v22  ;;  %v11329_v39 = vpack.c.bf16 (%p2566_p0), %v5576_v29, %v5575_v9 }
 0x629   : > { %8604 = vrcp.f32 %v5419_v25 }
 0x653   : > { %v5162_v31 = vpop.f32.mrb[12].mxu0 }
 0x654   : > { %v5203_v33 = vpop.f32.mrb[12].mxu1  ;;  %v5164_v40 = vpop.f32.mrb[13].mxu0 }
 0x655   : > { %v11203_v36 = vadd.f32 %v5203_v33, %v5162_v31  ;;  %v5205_v17 = vpop.f32.mrb[13].mxu1  ;;  %v5166_v62 = vpop.f32.mrb[14].mxu0 }
 0x656   : > { %v11205_v46 = vadd.f32 %v5205_v17, %v5164_v40  ;;  %v5207_v32 = vpop.f32.mrb[14].mxu1  ;;  %v5167_v48 = vpop.f32.mrb[15].mxu0 }
 0x657   : > { %v5208_v51 = vpop.f32.mrb[15].mxu1  ;;  %v8599_v40 = vpop.eup %8598  ;;  %v5404_v22 = vadd.f32 %v11203_v36, %v9962_v47  ;;  %v5560_v47 = vld [vmem:[%s11773_s14 + $0x118] sm:$0xff] (%p2566_p0) }
 0x658   : > { %v8601_v62 = vpop.eup %8600 }
 0x659   : > { %v8603_v61 = vpop.eup %8602 }
 0x65a   : > { %v8605_v41 = vpop.eup %8604  ;;  %v5446_v6 = vsub.f32 1.0, %v8603_v61  ;;  %v5454_v13 = vmul.f32 %v8734_v5, %v8603_v61 }
 0x65b   : > { %v5447_v8 = vsub.f32 1.0, %v8605_v41  ;;  %v5455_v15 = vmul.f32 %v8730_v37, %v8605_v41 }
 0x693   : > { %v5244_v20 = vpop.f32.mrb[16].mxu0 }
 0x694   : > { %v5285_v21 = vpop.f32.mrb[16].mxu1  ;;  %v5246_v12 = vpop.f32.mrb[17].mxu0 }
 0x695   : > { %v5286_v11 = vadd.f32 %v5285_v21, %v5244_v20  ;;  %v5287_v59 = vpop.f32.mrb[17].mxu1  ;;  %v5248_v26 = vpop.f32.mrb[18].mxu0  ;;  %v6988_v20 = vmul.f32 -1.442695, %v5376_v30  ;;  %v6989_v21 = vmul.f32 -1.442695, %v5377_v35 }
 0x696   : > { %v5288_v24 = vadd.f32 %v5287_v59, %v5246_v12  ;;  %v5289_v27 = vpop.f32.mrb[18].mxu1  ;;  %v5249_v31 = vpop.f32.mrb[19].mxu0  ;;  %v6992_v12 = vmul.f32 -1.442695, %v5404_v22 }
 0x697   : > { %v5430_v28 = vadd.f32 %v5286_v11, %v2547_v52  ;;  %v5290_v33 = vpop.f32.mrb[19].mxu1  ;;  %v5405_v11 = vadd.f32 %v11205_v46, %v9965_v56  ;;  %v11302_v52 = vpack.c.bf16 (%p2566_p0), %v5558_v49, %v5557_v45  ;;  %v5545_v56 = vld [vmem:[%s11773_s14 + $0xa0] sm:$0xff] (%p2566_p0)  ;;  %v5554_v49 = vld [vmem:[%s11773_s14 + $0xe8] sm:$0xff] (%p2566_p0) }
 0x698   : > { %v5431_v17 = vadd.f32 %v5288_v24, %v2551_v54  ;;  %v5527_v54 = vld [vmem:[%s11773_s14 + $0x10] sm:$0xff] (%p2566_p0)  ;;  %v5553_v45 = vld [vmem:[%s11773_s14 + $0xe0] sm:$0xff] (%p2566_p0) }
 0x699   : > { %v5434_v32 = vmul.f32 %v8599_v40, %v5430_v28  ;;  %v6993_v59 = vmul.f32 -1.442695, %v5405_v11 }
 0x69a   : > { %v5435_v48 = vmul.f32 %v8601_v62, %v5431_v17 }
 0x69b   : > { %v5438_v51 = vadd.f32 %v5434_v32, %v9968_v60  ;;  %v5546_v60 = vld [vmem:[%s11773_s14 + $0xa8] sm:$0xff] (%p2566_p0) }
 0x69c   : > { %v5439_v58 = vadd.f32 %v5435_v48, %v9971_v63  ;;  %v11341_v63 = vpack.c.bf16 (%p2566_p0), %v5560_v47, %v5559_v34  ;;  %v11496_v34 = vpack.c.bf16 (%p2566_p0), %v5554_v49, %v5553_v45  ;;  %v5538_v47 = vld [vmem:[%s11773_s14 + $0x68] sm:$0xff] (%p2566_p0) }
 0x69d   : > { %8606 = vtanh.f32 %v5438_v51 }
 0x69e   : > { %8608 = vtanh.f32 %v5439_v58 }
 0x69f   : > { %8610 = vpow2.f32 %v6988_v20 }
 0x6a0   : > { %8612 = vpow2.f32 %v6989_v21 }
 0x6a1   : > { %8614 = vpow2.f32 %v6992_v12 }
 0x6a2   : > { %8616 = vpow2.f32 %v6993_v59 }
 0x6a7   : > { %v8607_v7 = vpop.eup %8606 }
 0x6a8   : > { %v8609_v10 = vpop.eup %8608  ;;  %v5450_v14 = vmul.f32 %v8607_v7, %v5446_v6 }
 0x6a9   : > { %v5451_v16 = vmul.f32 %v8609_v10, %v5447_v8  ;;  %v8611_v25 = vpop.eup %8610 }
 0x6aa   : > { %v11223_v5 = vadd.f32 %v5454_v13, %v5450_v14   ;;  %v8613_v24 = vpop.eup %8612  ;;  %v5392_v57 = vadd.f32 1.0, %v8611_v25 }
 0x6ab   : > { %v11225_v37 = vadd.f32 %v5455_v15, %v5451_v16   ;;  %v5393_v26 = vadd.f32 1.0, %v8613_v24  ;;  %v8615_v0 = vpop.eup %8614  ;;  %v8744_v16 = vmov 1966171168  }
 0x6ac   : > { %8618 = vrcp.f32 %v5392_v57  ;;  %v8617_v27 = vpop.eup %8616  ;;  %v5420_v33 = vadd.f32 1.0, %v8615_v0  ;;  %v5469_v30 = vunpack.c.l.s4 %v8744_v16  ;;  %v5563_v16 = vld [vmem:[%s11773_s14 + $0x130] sm:$0xff] (%p2566_p0) }
 0x6ad   : > { %v5466_v18 = vcombine.low %v11223_v5, %v11225_v37  ;;  %8620 = vrcp.f32 %v5393_v26  ;;  %v5421_v62 = vadd.f32 1.0, %v8617_v27  ;;  %v5526_v5 = vld [vmem:[%s11773_s14 + $0x8] sm:$0xff] (%p2566_p0) }
 0x6ae   : > { %8622 = vrcp.f32 %v5420_v33  ;;  %v5470_v11 = vunpack.c.0.s8 %v5469_v30  ;;  %v5578_v37 = vld [vmem:[%s11773_s14 + $0x1a8] sm:$0xff] (%p2566_p0)  ;;  %v5564_v30 = vld [vmem:[%s11773_s14 + $0x138] sm:$0xff] (%p2566_p0) }
 0x6af   : > { %8624 = vrcp.f32 %v5421_v62  ;;  %v5525_v62 = vld [vmem:[%s11773_s14] sm:$0xff] (%p2566_p0) }
 0x6b0   : > { %v5473_v26 = vsub.s32 %v5470_v11, %v8966_v43  ;;  %v5574_v43 = vld [vmem:[%s11773_s14 + $0x188] sm:$0xff] (%p2566_p0)  ;;  %v11288_v42 = vpack.c.bf16 (%p2566_p0), %v5526_v5, %v5525_v62  ;;  %v5536_v62 = vld [vmem:[%s11773_s14 + $0x58] sm:$0xff] (%p2566_p0)  ;;  %v5567_v5 = vld [vmem:[%s11773_s14 + $0x150] sm:$0xff] (%p2566_p0) }
 0x6b1   :  { %v11290_v44 = vpack.c.bf16 (%p2566_p0), %v5574_v43, %v5573_v38  ;;  %v5582_v11 = vld [vmem:[%s11773_s14 + $0x1c8] sm:$0xff] (%p2566_p0)  ;;  %v5568_v43 = vld [vmem:[%s11773_s14 + $0x158] sm:$0xff] (%p2566_p0) }
 0x6b2   : > { %v5474_v27 = vrot.slane %v5466_v18, %v5473_v26  ;;  %v5541_v18 = vld [vmem:[%s11773_s14 + $0x80] sm:$0xff] (%p2566_p0)  ;;  %v11494_v29 = vpack.c.bf16 (%p2566_p0), %v5568_v43, %v5567_v5 }
 0x6b3   :  { %7568 = vmatprep.subr.bf16.mxu1 (%p2566_p0), %v11290_v44 }
 0x6b4   :  { %7570 = vmatpush3.bf16.msra.mxu1 (%p2566_p0), %v11302_v52 }
 0x6b5   :  { %7572 = vmatprep.subr.bf16.mxu1 (%p2566_p0), %v11329_v39 }
 0x6b6   : > { %v8619_v41 = vpop.eup %8618 }
 0x6b7   : > { %v8621_v7 = vpop.eup %8620 }
 0x6b8   : > { %v8623_v15 = vpop.eup %8622  ;;  %7574 = vmatpush3.bf16.msra.mxu1 (%p2566_p0), %v11341_v63 }
 0x6b9   : > { %v8625_v35 = vpop.eup %8624  ;;  %v5448_v20 = vsub.f32 1.0, %v8623_v15  ;;  %v5456_v59 = vmul.f32 %v8726_v4, %v8623_v15 }
 0x6ba   : > { %v5449_v22 = vsub.f32 1.0, %v8625_v35  ;;  %v5457_v24 = vmul.f32 %v8722_v3, %v8625_v35  ;;  %v5549_v35 = vld [vmem:[%s11773_s14 + $0xc0] sm:$0xff] (%p2566_p0) }
 0x6d3   : > { %v5326_v28 = vpop.f32.mrb[20].mxu0 }
 0x6d4   : > { %v5367_v31 = vpop.f32.mrb[20].mxu1  ;;  %v5328_v36 = vpop.f32.mrb[21].mxu0 }
 0x6d5   : > { %v5368_v40 = vadd.f32 %v5367_v31, %v5326_v28  ;;  %v5369_v17 = vpop.f32.mrb[21].mxu1  ;;  %v5330_v32 = vpop.f32.mrb[22].mxu0 }
 0x6d6   : > { %v5370_v46 = vadd.f32 %v5369_v17, %v5328_v36  ;;  %v5371_v48 = vpop.f32.mrb[22].mxu1  ;;  %v5331_v58 = vpop.f32.mrb[23].mxu0  ;;  %v5542_v17 = vld [vmem:[%s11773_s14 + $0x88] sm:$0xff] (%p2566_p0)  ;;  %v5561_v32 = vld [vmem:[%s11773_s14 + $0x120] sm:$0xff] (%p2566_p0) }
 0x6d7   : > { %v5432_v51 = vadd.f32 %v5368_v40, %v2555_v53  ;;  %v5372_v61 = vpop.f32.mrb[23].mxu1  ;;  %v5544_v53 = vld [vmem:[%s11773_s14 + $0x98] sm:$0xff] (%p2566_p0)  ;;  %v5562_v48 = vld [vmem:[%s11773_s14 + $0x128] sm:$0xff] (%p2566_p0) }
 0x6d8   : > { %v5433_v6 = vadd.f32 %v5370_v46, %v2559_v55  ;;  %v11277_v46 = vpack.c.bf16 (%p2566_p0), %v5542_v17, %v5541_v18  ;;  %v5528_v55 = vld [vmem:[%s11773_s14 + $0x18] sm:$0xff] (%p2566_p0)  ;;  %v11315_v19 = vpack.c.bf16 (%p2566_p0), %v5544_v53, %v5543_v50  ;;  %v5547_v61 = vld [vmem:[%s11773_s14 + $0xb0] sm:$0xff] (%p2566_p0)  ;;  %v5585_v50 = vld [vmem:[%s11773_s14 + $0x1e0] sm:$0xff] (%p2566_p0) }
 0x6d9   : > { %v5436_v8 = vmul.f32 %v8619_v41, %v5432_v51  ;;  %v11317_v23 = vpack.c.bf16 (%p2566_p0), %v5528_v55, %v5527_v54  ;;  %v5548_v41 = vld [vmem:[%s11773_s14 + $0xb8] sm:$0xff] (%p2566_p0)  ;;  %v5535_v17 = vld [vmem:[%s11773_s14 + $0x50] sm:$0xff] (%p2566_p0)  ;;  %v5586_v53 = vld [vmem:[%s11773_s14 + $0x1e8] sm:$0xff] (%p2566_p0) }
 0x6da   : > { %v5437_v10 = vmul.f32 %v8621_v7, %v5433_v6  ;;  %7536 = vmatprep.subr.bf16.mxu0 (%p2566_p0), %v11277_v46  ;;  %v5531_v6 = vld [vmem:[%s11773_s14 + $0x30] sm:$0xff] (%p2566_p0)  ;;  %v11380_v7 = vpack.c.bf16 (%p2566_p0), %v5562_v48, %v5561_v32  ;;  %v11487_v54 = vpack.c.bf16 (%p2566_p0), %v5536_v62, %v5535_v17  ;;  %v5537_v55 = vld [vmem:[%s11773_s14 + $0x60] sm:$0xff] (%p2566_p0)  ;;  %v5588_v48 = vld [vmem:[%s11773_s14 + $0x1f8] sm:$0xff] (%p2566_p0) }
 0x6db   : > { %v5440_v13 = vadd.f32 %v5436_v8, %v9974_v1  ;;  %7538 = vmatpush3.bf16.msra.mxu0 (%p2566_p0), %v11288_v42  ;;  %v11343_v1 = vpack.c.bf16 (%p2566_p0), %v5546_v60, %v5545_v56  ;;  %v11382_v8 = vpack.c.bf16 (%p2566_p0), %v5548_v41, %v5547_v61  ;;  %v5569_v56 = vld [vmem:[%s11773_s14 + $0x160] sm:$0xff] (%p2566_p0)  ;;  %v5570_v60 = vld [vmem:[%s11773_s14 + $0x168] sm:$0xff] (%p2566_p0)  ;;  %v5587_v32 = vld [vmem:[%s11773_s14 + $0x1f0] sm:$0xff] (%p2566_p0)  ;;  %v11523_v61 = vpack.c.bf16 (%p2566_p0), %v5538_v47, %v5537_v55 }
 0x6dc   : > { %v5441_v14 = vadd.f32 %v5437_v10, %v9976_v2  ;;  %7540 = vmatprep.subr.bf16.mxu0 (%p2566_p0), %v11315_v19  ;;  %v5529_v2 = vld [vmem:[%s11773_s14 + $0x20] sm:$0xff] (%p2566_p0)  ;;  %v5532_v10 = vld [vmem:[%s11773_s14 + $0x38] sm:$0xff] (%p2566_p0)  ;;  %v11527_v41 = vpack.c.bf16 (%p2566_p0), %v5570_v60, %v5569_v56 }
 0x6dd   : > { %8626 = vtanh.f32 %v5440_v13  ;;  %v5579_v13 = vld [vmem:[%s11773_s14 + $0x1b0] sm:$0xff] (%p2566_p0) }
 0x6de   : > { %8628 = vtanh.f32 %v5441_v14  ;;  %v5580_v14 = vld [vmem:[%s11773_s14 + $0x1b8] sm:$0xff] (%p2566_p0) }
 0x6df   :  { %7542 = vmatpush3.bf16.msra.mxu0 (%p2566_p0), %v11317_v23  ;;  %v11394_v15 = vpack.c.bf16 (%p2566_p0), %v5580_v14, %v5579_v13  ;;  %v5540_v13 = vld [vmem:[%s11773_s14 + $0x78] sm:$0xff] (%p2566_p0)  ;;  %v11538_v14 = vpack.c.bf16 (%p2566_p0), %v5588_v48, %v5587_v32 }
 0x6e0   :  { %7544 = vmatprep.subr.bf16.mxu0 (%p2566_p0), %v11343_v1 }
 0x6e7   : > { %v8627_v21 = vpop.eup %8626 }
 0x6e8   : > { %v8629_v12 = vpop.eup %8628  ;;  %v5452_v25 = vmul.f32 %v8627_v21, %v5448_v20  ;;  %v5550_v20 = vld [vmem:[%s11773_s14 + $0xc8] sm:$0xff] (%p2566_p0)  ;;  %v11409_v21 = vpack.c.bf16 (%p2566_p0), %v5532_v10, %v5531_v6  ;;  %v5539_v10 = vld [vmem:[%s11773_s14 + $0x70] sm:$0xff] (%p2566_p0) }
 0x6e9   : > { %v5453_v57 = vmul.f32 %v8629_v12, %v5449_v22  ;;  %v5581_v22 = vld [vmem:[%s11773_s14 + $0x1c0] sm:$0xff] (%p2566_p0)  ;;  %v11419_v12 = vpack.c.bf16 (%p2566_p0), %v5564_v30, %v5563_v16  ;;  %v5571_v16 = vld [vmem:[%s11773_s14 + $0x170] sm:$0xff] (%p2566_p0)  ;;  %v5572_v30 = vld [vmem:[%s11773_s14 + $0x178] sm:$0xff] (%p2566_p0) }
 0x6ea   : > { %v5460_v4 = vadd.f32 %v5456_v59, %v5452_v25   ;;  %v11421_v59 = vpack.c.bf16 (%p2566_p0), %v5550_v20, %v5549_v35  ;;  %v5533_v25 = vld [vmem:[%s11773_s14 + $0x40] sm:$0xff] (%p2566_p0)  ;;  %v11547_v35 = vpack.c.bf16 (%p2566_p0), %v5540_v13, %v5539_v10  ;;  %v11551_v20 = vpack.c.bf16 (%p2566_p0), %v5572_v30, %v5571_v16 }
 0x6eb   : > { %v5461_v3 = vadd.f32 %v5457_v24, %v5453_v57   ;;  %v5534_v24 = vld [vmem:[%s11773_s14 + $0x48] sm:$0xff] (%p2566_p0)  ;;  %v5565_v57 = vld [vmem:[%s11773_s14 + $0x140] sm:$0xff] (%p2566_p0) }
 0x6ed   : > { %v5467_v0 = vcombine.low %v5460_v4, %v5461_v3  ;;  %v5530_v3 = vld [vmem:[%s11773_s14 + $0x28] sm:$0xff] (%p2566_p0)  ;;  %v5577_v4 = vld [vmem:[%s11773_s14 + $0x1a0] sm:$0xff] (%p2566_p0) }
 0x6ee   :  { %v11365_v51 = vpack.c.bf16 (%p2566_p0), %v5530_v3, %v5529_v2  ;;  %v11367_v58 = vpack.c.bf16 (%p2566_p0), %v5578_v37, %v5577_v4  ;;  %v11508_v2 = vpack.c.bf16 (%p2566_p0), %v5586_v53, %v5585_v50  ;;  %v5555_v3 = vld [vmem:[%s11773_s14 + $0xf0] sm:$0xff] (%p2566_p0)  ;;  %v5556_v4 = vld [vmem:[%s11773_s14 + $0xf8] sm:$0xff] (%p2566_p0) }
 0x6ef   : > { %v5481_v28 = vrot.slane %v5467_v0, %v5473_v26  ;;  %v5566_v0 = vld [vmem:[%s11773_s14 + $0x148] sm:$0xff] (%p2566_p0)  ;;  %v11529_v6 = vpack.c.bf16 (%p2566_p0), %v5556_v4, %v5555_v3 }
 0x6f0   :  { %2568 = sbr.rel (!%p2566_p0) target bundleno = 1151 (0x47f), region = 118  ;;  %7576 = vmatprep.subr.bf16.mxu1 (%p2566_p0), %v11367_v58  ;;  %7546 = vmatpush3.bf16.msra.mxu0 (%p2566_p0), %v11365_v51 }
 0x6f1   : > { %v5482_v31 = vcombine.low %v5474_v27, %v5481_v28  ;;  %v5506_v33 = vcombine.high %v5474_v27, %v5481_v28  ;;  %7578 = vmatpush3.bf16.msra.mxu1 (%p2566_p0), %v11380_v7  ;;  %7548 = vmatprep.subr.bf16.mxu0 (%p2566_p0), %v11382_v8  ;;  %v5551_v27 = vld [vmem:[%s11773_s14 + $0xd0] sm:$0xff] (%p2566_p0)  ;;  %v5552_v28 = vld [vmem:[%s11773_s14 + $0xd8] sm:$0xff] (%p2566_p0) }
 0x6f2   :  { %7580 = vmatprep.subr.bf16.mxu1 (%p2566_p0), %v11394_v15  ;;  %v11457_v18 = vpack.c.bf16 (%p2566_p0), %v5552_v28, %v5551_v27 }
 0x6f3   : > { %v5489_v40 = vrot.slane %v5482_v31, %v5473_v26  ;;  %v5513_v36 = vrot.slane %v5506_v33, %v5473_v26  ;;  %v11433_v26 = vpack.c.bf16 (%p2566_p0), %v5582_v11, %v5581_v22  ;;  %v5583_v31 = vld [vmem:[%s11773_s14 + $0x1d0] sm:$0xff] (%p2566_p0)  ;;  %v5584_v33 = vld [vmem:[%s11773_s14 + $0x1d8] sm:$0xff] (%p2566_p0)  ;;  %s8745_s14 = smov (%p2566_p0), [#allocation5]  }
 0x6f4   :  { %7550 = vmatpush3.bf16.msra.mxu0 (%p2566_p0), %v11409_v21  ;;  %v11469_v38 = vpack.c.bf16 (%p2566_p0), %v5584_v33, %v5583_v31  ;;  %s6343_s26 = sshll.u32 (%p2566_p0), %s8745_s14, 4  ;;  %s6344_s26 = int_to_ptr.vmem [resolvable:$true] %s6343_s26 }
 0x6f5   : > { %5503 = vst.msk [vmem:[%s5502_s24] ss:$8 sm:$0xf] %vm5493_vm12, %v5489_v40  ;;  %v11451_v40 = vpack.c.bf16 (%p2566_p0), %v5534_v24, %v5533_v25  ;;  %7582 = vmatpush3.bf16.msra.mxu1 (%p2566_p0), %v11419_v12  ;;  %7552 = vmatprep.subr.bf16.mxu0 (%p2566_p0), %v11421_v59  ;;  %s8630_s0 = scalar_lea.vmem (%p2566_p0), %s6344_s26, 32  ;;  %p8635_p2 = scmp.lt.s32.totalorder (%p2566_p0), %s6344_s26, %s6344_s26 }
 0x6f6   : > { %5523 = vst.msk [vmem:[%s5522_s25] ss:$8 sm:$0xf] %vm5493_vm12, %v5513_v36  ;;  %v11455_v36 = vpack.c.bf16 (%p2566_p0), %v5566_v0, %v5565_v57  ;;  %7584 = vmatprep.subr.bf16.mxu1 (%p2566_p0), %v11433_v26  ;;  %p8631_p1 = scmp.ne.s32.totalorder (%p2566_p0), %s6344_s26, %s8630_s0  ;;  %p8636_p3 = scmp.lt.s32.totalorder (%p2566_p0), %s8630_s0, %s8630_s0 }
 0x6f8   :  { %7554 = vmatpush3.bf16.msra.mxu0 %v11451_v40  ;;  %p8637_p4 = por %p8636_p3, %p8635_p2 }
 0x6f9   :  { %7586 = vmatpush3.bf16.msra.mxu1 %v11455_v36  ;;  %7556 = vmatprep.subr.bf16.mxu0 %v11457_v18 }
 0x6fa   :  { %7588 = vmatprep.subr.bf16.mxu1 %v11469_v38  ;;  %p8638_p5 = pnand %p8637_p4, %p8631_p1 }
 0x6fc   :  { %7558 = vmatpush3.bf16.msra.mxu0 %v11487_v54 }
 0x6fd   :  { %v5591_v9 = vld [vmem:[#allocation2 + $0x8] sm:$0xff]  ;;  %v5593_v37 = vld [vmem:[#allocation2 + $0x18] sm:$0xff]  ;;  %7590 = vmatpush3.bf16.msra.mxu1 %v11494_v29  ;;  %7560 = vmatprep.subr.bf16.mxu0 %v11496_v34  ;;  %v5590_v22 = vld [vmem:[#allocation2] sm:$0xff] }
 0x6fe   :  { %5712 = vmatprep.mubr.f32.mxu0 %v5591_v9  ;;  %5842 = vmatprep.mubr.f32.mxu1 %v5593_v37  ;;  %v5592_v11 = vld [vmem:[#allocation2 + $0x10] sm:$0xff]  ;;  %v5595_v25 = vld [vmem:[#allocation2 + $0x28] sm:$0xff]  ;;  %v5597_v24 = vld [vmem:[#allocation2 + $0x38] sm:$0xff] }
 0x6ff   :  { %7592 = vmatprep.subr.bf16.mxu1 %v11508_v2  ;;  %v5594_v57 = vld [vmem:[#allocation2 + $0x20] sm:$0xff]  ;;  %v5596_v0 = vld [vmem:[#allocation2 + $0x30] sm:$0xff]  ;;  %v5599_v27 = vld [vmem:[#allocation2 + $0x48] sm:$0xff] }
 0x700   :  { %7562 = vmatpush3.bf16.msra.mxu0 %v11523_v61  ;;  %v5601_v28 = vld [vmem:[#allocation2 + $0x58] sm:$0xff]  ;;  %v5607_v31 = vld [vmem:[#allocation2 + $0x88] sm:$0xff]  ;;  %v5622_v62 = vld [vmem:[#allocation2 + $0x100] sm:$0xff] }
 0x701   :  { %7594 = vmatpush3.bf16.msra.mxu1 %v11527_v41  ;;  %7564 = vmatprep.subr.bf16.mxu0 %v11529_v6  ;;  %v5613_v33 = vld [vmem:[#allocation2 + $0xb8] sm:$0xff]  ;;  %v5624_v5 = vld [vmem:[#allocation2 + $0x110] sm:$0xff]  ;;  %v5626_v45 = vld [vmem:[#allocation2 + $0x120] sm:$0xff] }
 0x702   :  { %7596 = vmatprep.subr.bf16.mxu1 %v11538_v14  ;;  %v5625_v17 = vld [vmem:[#allocation2 + $0x118] sm:$0xff]  ;;  %v5628_v49 = vld [vmem:[#allocation2 + $0x130] sm:$0xff]  ;;  %v5631_v50 = vld [vmem:[#allocation2 + $0x148] sm:$0xff] }
 0x703   :  { %v5629_v43 = vld [vmem:[#allocation2 + $0x138] sm:$0xff]  ;;  %v5632_v55 = vld [vmem:[#allocation2 + $0x150] sm:$0xff]  ;;  %v5635_v9 = vld [vmem:[#allocation2 + $0x168] sm:$0xff] }
 0x704   :  { %7566 = vmatpush3.bf16.msra.mxu0 %v11547_v35  ;;  %v5633_v53 = vld [vmem:[#allocation2 + $0x158] sm:$0xff]  ;;  %v5636_v47 = vld [vmem:[#allocation2 + $0x170] sm:$0xff]  ;;  %v5639_v56 = vld [vmem:[#allocation2 + $0x188] sm:$0xf] }
 0x705   :  { %7598 = vmatpush3.bf16.msra.mxu1 %v11551_v20  ;;  %7600 = vmatprep.subr.bf16.mxu0 %v11277_v46  ;;  %v5598_v46 = vld [vmem:[#allocation2 + $0x40] sm:$0xff]  ;;  %v5641_v60 = vld [vmem:[#allocation2 + $0x198] sm:$0xf]  ;;  %v5640_v3 = vld [vmem:[#allocation2 + $0x190] sm:$0xf] }
 0x706   :  { %7632 = vmatprep.subr.bf16.mxu1 %v11290_v44  ;;  %v5603_v44 = vld [vmem:[#allocation2 + $0x68] sm:$0xff]  ;;  %v5965_v37 = vld [vmem:[#allocation2 + $0x218] sm:$0xff]  ;;  %v5962_v32 = vld [vmem:[#allocation2 + $0x200] sm:$0xff] }
 0x707   :  { %5713 = vmatmul.mubr.f32.vlgmr.msra.gmra.mrb[0].mxu0 %v5590_v22  ;;  %v5963_v4 = vld [vmem:[#allocation2 + $0x208] sm:$0xff]  ;;  %v5964_v48 = vld [vmem:[#allocation2 + $0x210] sm:$0xff]  ;;  %v5970_v16 = vld [vmem:[#allocation2 + $0x240] sm:$0xff] }
 0x708   :  { %7602 = vmatpush3.bf16.msra.mxu0 %v11288_v42  ;;  %5843 = vmatmul.mubr.f32.vlgmr.msra.gmra.mrb[0].mxu1 %v5592_v11  ;;  %v5600_v42 = vld [vmem:[#allocation2 + $0x50] sm:$0xff]  ;;  %v5971_v13 = vld [vmem:[#allocation2 + $0x248] sm:$0xff]  ;;  %v5974_v22 = vld [vmem:[#allocation2 + $0x260] sm:$0xff] }
 0x709   :  { %5717 = vmatprep.mubr.f32.mxu0 %v5595_v25  ;;  %7634 = vmatpush3.bf16.msra.mxu1 %v11302_v52  ;;  %v5605_v52 = vld [vmem:[#allocation2 + $0x78] sm:$0xff]  ;;  %v5968_v10 = vld [vmem:[#allocation2 + $0x230] sm:$0xff]  ;;  %v5979_v25 = vld [vmem:[#allocation2 + $0x288] sm:$0xff] }
 0x70a   :  { %5847 = vmatprep.mubr.f32.mxu1 %v5597_v24  ;;  %7604 = vmatprep.subr.bf16.mxu0 %v11315_v19  ;;  %v5602_v19 = vld [vmem:[#allocation2 + $0x60] sm:$0xff]  ;;  %v5972_v30 = vld [vmem:[#allocation2 + $0x250] sm:$0xff]  ;;  %v5981_v24 = vld [vmem:[#allocation2 + $0x298] sm:$0xff] }
 0x70b   :  { %5718 = vmatmul.mubr.f32.gmra.mrb[2].mxu0 %v5594_v57  ;;  %7636 = vmatprep.subr.bf16.mxu1 %v11329_v39  ;;  %v5604_v39 = vld [vmem:[#allocation2 + $0x70] sm:$0xff]  ;;  %v5978_v57 = vld [vmem:[#allocation2 + $0x280] sm:$0xff] }
 0x70c   :  { %5848 = vmatmul.mubr.f32.gmra.mrb[2].mxu1 %v5596_v0  ;;  %5722 = vmatprep.mubr.f32.mxu0 %v5599_v27  ;;  %v5976_v11 = vld [vmem:[#allocation2 + $0x270] sm:$0xff]  ;;  %v5983_v27 = vld [vmem:[#allocation2 + $0x2a8] sm:$0xff] }
 0x70d   :  { %7606 = vmatpush3.bf16.msra.mxu0 %v11317_v23  ;;  %5852 = vmatprep.mubr.f32.mxu1 %v5601_v28  ;;  %v5609_v23 = vld [vmem:[#allocation2 + $0x98] sm:$0xff]  ;;  %v5980_v0 = vld [vmem:[#allocation2 + $0x290] sm:$0xff] }
 0x70e   :  { %7638 = vmatpush3.bf16.msra.mxu1 %v11341_v63  ;;  %7608 = vmatprep.subr.bf16.mxu0 %v11343_v1  ;;  %v5606_v63 = vld [vmem:[#allocation2 + $0x80] sm:$0xff]  ;;  %v5608_v1 = vld [vmem:[#allocation2 + $0x90] sm:$0xff]  ;;  %v5985_v28 = vld [vmem:[#allocation2 + $0x2b8] sm:$0xff] }
 0x70f   :  { %5723 = vmatmul.mubr.f32.gmra.mrb[4].mxu0 %v5598_v46  ;;  %7640 = vmatprep.subr.bf16.mxu1 %v11367_v58  ;;  %v5611_v58 = vld [vmem:[#allocation2 + $0xa8] sm:$0xff]  ;;  %v5982_v46 = vld [vmem:[#allocation2 + $0x2a0] sm:$0xff] }
 0x710   :  { %5853 = vmatmul.mubr.f32.gmra.mrb[4].mxu1 %v5600_v42  ;;  %5727 = vmatprep.mubr.f32.mxu0 %v5603_v44  ;;  %v5984_v42 = vld [vmem:[#allocation2 + $0x2b0] sm:$0xff]  ;;  %v5987_v44 = vld [vmem:[#allocation2 + $0x2c8] sm:$0xff] }
 0x711   :  { %5857 = vmatprep.mubr.f32.mxu1 %v5605_v52  ;;  %7610 = vmatpush3.bf16.msra.mxu0 %v11365_v51  ;;  %v5610_v51 = vld [vmem:[#allocation2 + $0xa0] sm:$0xff]  ;;  %v5989_v52 = vld [vmem:[#allocation2 + $0x2d8] sm:$0xff] }
 0x712   :  { %7642 = vmatpush3.bf16.msra.mxu1 %v11380_v7  ;;  %7612 = vmatprep.subr.bf16.mxu0 %v11382_v8  ;;  %v5612_v7 = vld [vmem:[#allocation2 + $0xb0] sm:$0xff]  ;;  %v5615_v8 = vld [vmem:[#allocation2 + $0xc8] sm:$0xff] }
 0x713   :  { %5728 = vmatmul.mubr.f32.gmra.mrb[6].mxu0 %v5602_v19  ;;  %7644 = vmatprep.subr.bf16.mxu1 %v11394_v15  ;;  %v5617_v15 = vld [vmem:[#allocation2 + $0xd8] sm:$0xff]  ;;  %v5986_v19 = vld [vmem:[#allocation2 + $0x2c0] sm:$0xff] }
 0x714   :  { %5858 = vmatmul.mubr.f32.gmra.mrb[6].mxu1 %v5604_v39  ;;  %5732 = vmatprep.mubr.f32.mxu0 %v5607_v31  ;;  %v5988_v39 = vld [vmem:[#allocation2 + $0x2d0] sm:$0xff]  ;;  %v5991_v31 = vld [vmem:[#allocation2 + $0x2e8] sm:$0xff] }
 0x715   :  { %5862 = vmatprep.mubr.f32.mxu1 %v5609_v23  ;;  %7614 = vmatpush3.bf16.msra.mxu0 %v11409_v21  ;;  %v5614_v21 = vld [vmem:[#allocation2 + $0xc0] sm:$0xff]  ;;  %v5993_v23 = vld [vmem:[#allocation2 + $0x2f8] sm:$0xff] }
 0x716   :  { %7646 = vmatpush3.bf16.msra.mxu1 %v11419_v12  ;;  %7616 = vmatprep.subr.bf16.mxu0 %v11421_v59  ;;  %v5616_v12 = vld [vmem:[#allocation2 + $0xd0] sm:$0xff]  ;;  %v5619_v59 = vld [vmem:[#allocation2 + $0xe8] sm:$0xff] }
 0x717   :  { %5733 = vmatmul.mubr.f32.gmra.mrb[8].mxu0 %v5606_v63  ;;  %7648 = vmatprep.subr.bf16.mxu1 %v11433_v26  ;;  %v5621_v26 = vld [vmem:[#allocation2 + $0xf8] sm:$0xff]  ;;  %v5990_v63 = vld [vmem:[#allocation2 + $0x2e0] sm:$0xff] }
 0x718   :  { %5863 = vmatmul.mubr.f32.gmra.mrb[8].mxu1 %v5608_v1  ;;  %5737 = vmatprep.mubr.f32.mxu0 %v5611_v58  ;;  %v5992_v1 = vld [vmem:[#allocation2 + $0x2f0] sm:$0xff]  ;;  %v5995_v58 = vld [vmem:[#allocation2 + $0x308] sm:$0xff] }
 0x719   :  { %5867 = vmatprep.mubr.f32.mxu1 %v5613_v33  ;;  %7618 = vmatpush3.bf16.msra.mxu0 %v11451_v40  ;;  %v5618_v40 = vld [vmem:[#allocation2 + $0xe0] sm:$0xff]  ;;  %v5997_v33 = vld [vmem:[#allocation2 + $0x318] sm:$0xff] }
 0x71a   :  { %7650 = vmatpush3.bf16.msra.mxu1 %v11455_v36  ;;  %7620 = vmatprep.subr.bf16.mxu0 %v11457_v18  ;;  %v5620_v36 = vld [vmem:[#allocation2 + $0xf0] sm:$0xff]  ;;  %v5623_v18 = vld [vmem:[#allocation2 + $0x108] sm:$0xff] }
 0x71b   :  { %5738 = vmatmul.mubr.f32.gmra.mrb[10].mxu0 %v5610_v51  ;;  %7652 = vmatprep.subr.bf16.mxu1 %v11469_v38  ;;  %v5627_v38 = vld [vmem:[#allocation2 + $0x128] sm:$0xff]  ;;  %v5994_v51 = vld [vmem:[#allocation2 + $0x300] sm:$0xff] }
 0x71c   :  { %5868 = vmatmul.mubr.f32.gmra.mrb[10].mxu1 %v5612_v7  ;;  %5742 = vmatprep.mubr.f32.mxu0 %v5615_v8  ;;  %v5996_v7 = vld [vmem:[#allocation2 + $0x310] sm:$0xff]  ;;  %v5999_v8 = vld [vmem:[#allocation2 + $0x328] sm:$0xff] }
 0x71d   :  { %5872 = vmatprep.mubr.f32.mxu1 %v5617_v15  ;;  %7622 = vmatpush3.bf16.msra.mxu0 %v11487_v54  ;;  %v5630_v54 = vld [vmem:[#allocation2 + $0x140] sm:$0xff]  ;;  %v6001_v15 = vld [vmem:[#allocation2 + $0x338] sm:$0xff] }
 0x71e   :  { %7654 = vmatpush3.bf16.msra.mxu1 %v11494_v29  ;;  %7624 = vmatprep.subr.bf16.mxu0 %v11496_v34  ;;  %v5637_v29 = vld [vmem:[#allocation2 + $0x178] sm:$0xff]  ;;  %v5634_v34 = vld [vmem:[#allocation2 + $0x160] sm:$0xff] }
 0x71f   :  { %5743 = vmatmul.mubr.f32.gmra.mrb[12].mxu0 %v5614_v21  ;;  %7656 = vmatprep.subr.bf16.mxu1 %v11508_v2  ;;  %v5638_v2 = vld [vmem:[#allocation2 + $0x180] sm:$0xf] }
 0x720   :  { %5873 = vmatmul.mubr.f32.gmra.mrb[12].mxu1 %v5616_v12  ;;  %5747 = vmatprep.mubr.f32.mxu0 %v5619_v59  ;;  %v5998_v21 = vld [vmem:[#allocation2 + $0x320] sm:$0xff]  ;;  %v6000_v12 = vld [vmem:[#allocation2 + $0x330] sm:$0xff]  ;;  %v6003_v59 = vld [vmem:[#allocation2 + $0x348] sm:$0xff] }
 0x721   :  { %5877 = vmatprep.mubr.f32.mxu1 %v5621_v26  ;;  %7626 = vmatpush3.bf16.msra.mxu0 %v11523_v61  ;;  %v5967_v61 = vld [vmem:[#allocation2 + $0x228] sm:$0xff]  ;;  %v6005_v26 = vld [vmem:[#allocation2 + $0x358] sm:$0xff] }
 0x722   :  { %7658 = vmatpush3.bf16.msra.mxu1 %v11527_v41  ;;  %7628 = vmatprep.subr.bf16.mxu0 %v11529_v6  ;;  %v5969_v41 = vld [vmem:[#allocation2 + $0x238] sm:$0xff]  ;;  %v5966_v6 = vld [vmem:[#allocation2 + $0x220] sm:$0xff] }
 0x723   :  { %5748 = vmatmul.mubr.f32.gmra.mrb[14].mxu0 %v5618_v40  ;;  %7660 = vmatprep.subr.bf16.mxu1 %v11538_v14  ;;  %v5973_v14 = vld [vmem:[#allocation2 + $0x258] sm:$0xff]  ;;  %v6002_v40 = vld [vmem:[#allocation2 + $0x340] sm:$0xff] }
 0x724   :  { %5878 = vmatmul.mubr.f32.gmra.mrb[14].mxu1 %v5620_v36  ;;  %5752 = vmatprep.mubr.f32.mxu0 %v5623_v18  ;;  %v6004_v36 = vld [vmem:[#allocation2 + $0x350] sm:$0xff]  ;;  %v6007_v18 = vld [vmem:[#allocation2 + $0x368] sm:$0xff] }
 0x725   :  { %5882 = vmatprep.mubr.f32.mxu1 %v5625_v17  ;;  %7630 = vmatpush3.bf16.msra.mxu0 %v11547_v35  ;;  %v5975_v35 = vld [vmem:[#allocation2 + $0x268] sm:$0xff]  ;;  %v6009_v17 = vld [vmem:[#allocation2 + $0x378] sm:$0xff] }
 0x726   :  { %7662 = vmatpush3.bf16.msra.mxu1 %v11551_v20  ;;  %v5977_v20 = vld [vmem:[#allocation2 + $0x278] sm:$0xff] }
 0x727   :  { %5753 = vmatmul.mubr.f32.gmra.mrb[16].mxu0 %v5622_v62  ;;  %v6006_v62 = vld [vmem:[#allocation2 + $0x360] sm:$0xff] }
 0x728   :  { %5883 = vmatmul.mubr.f32.gmra.mrb[16].mxu1 %v5624_v5  ;;  %5757 = vmatprep.mubr.f32.mxu0 %v5627_v38  ;;  %v6008_v5 = vld [vmem:[#allocation2 + $0x370] sm:$0xff]  ;;  %v6011_v38 = vld [vmem:[#allocation2 + $0x388] sm:$0xf] }
 0x729   :  { %5887 = vmatprep.mubr.f32.mxu1 %v5629_v43  ;;  %v6013_v43 = vld [vmem:[#allocation2 + $0x398] sm:$0xf] }
 0x72b   :  { %5758 = vmatmul.mubr.f32.gmra.mrb[18].mxu0 %v5626_v45  ;;  %v6010_v45 = vld [vmem:[#allocation2 + $0x380] sm:$0xf] }
 0x72c   :  { %5888 = vmatmul.mubr.f32.gmra.mrb[18].mxu1 %v5628_v49  ;;  %5762 = vmatprep.mubr.f32.mxu0 %v5631_v50  ;;  %v6012_v49 = vld [vmem:[#allocation2 + $0x390] sm:$0xf] }
 0x72d   :  { %5892 = vmatprep.mubr.f32.mxu1 %v5633_v53 }
 0x72f   :  { %5763 = vmatmul.mubr.f32.gmra.mrb[20].mxu0 %v5630_v54 }
 0x730   :  { %5893 = vmatmul.mubr.f32.gmra.mrb[20].mxu1 %v5632_v55  ;;  %5767 = vmatprep.mubr.f32.mxu0 %v5635_v9 }
 0x731   :  { %5897 = vmatprep.mubr.f32.mxu1 %v5637_v29 }
 0x733   :  { %5768 = vmatmul.mubr.f32.gmra.mrb[22].mxu0 %v5634_v34 }
 0x734   :  { %5898 = vmatmul.mubr.f32.gmra.mrb[22].mxu1 %v5636_v47  ;;  %5772 = vmatprep.mubr.f32.mxu0 %v5639_v56 }
 0x735   :  { %5902 = vmatprep.mubr.f32.mxu1 %v5641_v60 }
 0x737   :  { %5773 = vmatmul.mubr.f32.gmra.mrb[24].mxu0 %v5638_v2 }
 0x738   :  { %5903 = vmatmul.mubr.f32.gmra.mrb[24].mxu1 %v5640_v3  ;;  %6078 = vmatprep.mubr.f32.mxu0 %v5963_v4 }
 0x739   :  { %6208 = vmatprep.mubr.f32.mxu1 %v5965_v37 }
 0x73b   :  { %6079 = vmatmul.mubr.f32.vlgmr.msra.gmra.mrb[26].mxu0 %v5962_v32 }
 0x73c   :  { %6209 = vmatmul.mubr.f32.vlgmr.msra.gmra.mrb[26].mxu1 %v5964_v48  ;;  %6083 = vmatprep.mubr.f32.mxu0 %v5967_v61 }
 0x73d   :  { %6213 = vmatprep.mubr.f32.mxu1 %v5969_v41 }
 0x73f   :  { %6084 = vmatmul.mubr.f32.gmra.mrb[28].mxu0 %v5966_v6 }
 0x740   :  { %6214 = vmatmul.mubr.f32.gmra.mrb[28].mxu1 %v5968_v10  ;;  %6088 = vmatprep.mubr.f32.mxu0 %v5971_v13 }
 0x741   :  { %6218 = vmatprep.mubr.f32.mxu1 %v5973_v14 }
 0x743   :  { %6089 = vmatmul.mubr.f32.gmra.mrb[30].mxu0 %v5970_v16 }
 0x744   :  { %6219 = vmatmul.mubr.f32.gmra.mrb[30].mxu1 %v5972_v30  ;;  %6093 = vmatprep.mubr.f32.mxu0 %v5975_v35 }
 0x745   :  { %6223 = vmatprep.mubr.f32.mxu1 %v5977_v20 }
 0x747   :  { %6094 = vmatmul.mubr.f32.gmra.mrb[32].mxu0 %v5974_v22 }
 0x748   :  { %6224 = vmatmul.mubr.f32.gmra.mrb[32].mxu1 %v5976_v11  ;;  %6098 = vmatprep.mubr.f32.mxu0 %v5979_v25 }
 0x749   :  { %6228 = vmatprep.mubr.f32.mxu1 %v5981_v24 }
 0x74b   :  { %6099 = vmatmul.mubr.f32.gmra.mrb[34].mxu0 %v5978_v57 }
 0x74c   :  { %6229 = vmatmul.mubr.f32.gmra.mrb[34].mxu1 %v5980_v0  ;;  %6103 = vmatprep.mubr.f32.mxu0 %v5983_v27 }
 0x74d   :  { %6233 = vmatprep.mubr.f32.mxu1 %v5985_v28 }
 0x74f   :  { %6104 = vmatmul.mubr.f32.gmra.mrb[36].mxu0 %v5982_v46 }
 0x750   :  { %6234 = vmatmul.mubr.f32.gmra.mrb[36].mxu1 %v5984_v42  ;;  %6108 = vmatprep.mubr.f32.mxu0 %v5987_v44 }
 0x751   :  { %6238 = vmatprep.mubr.f32.mxu1 %v5989_v52 }
 0x753   :  { %6109 = vmatmul.mubr.f32.gmra.mrb[38].mxu0 %v5986_v19 }
 0x754   :  { %6239 = vmatmul.mubr.f32.gmra.mrb[38].mxu1 %v5988_v39  ;;  %6113 = vmatprep.mubr.f32.mxu0 %v5991_v31 }
 0x755   :  { %6243 = vmatprep.mubr.f32.mxu1 %v5993_v23 }
 0x757   :  { %6114 = vmatmul.mubr.f32.gmra.mrb[40].mxu0 %v5990_v63 }
 0x758   :  { %6244 = vmatmul.mubr.f32.gmra.mrb[40].mxu1 %v5992_v1  ;;  %6118 = vmatprep.mubr.f32.mxu0 %v5995_v58 }
 0x759   :  { %6248 = vmatprep.mubr.f32.mxu1 %v5997_v33 }
 0x75b   :  { %6119 = vmatmul.mubr.f32.gmra.mrb[42].mxu0 %v5994_v51 }
 0x75c   :  { %6249 = vmatmul.mubr.f32.gmra.mrb[42].mxu1 %v5996_v7  ;;  %6123 = vmatprep.mubr.f32.mxu0 %v5999_v8 }
 0x75d   :  { %6253 = vmatprep.mubr.f32.mxu1 %v6001_v15 }
 0x75f   :  { %6124 = vmatmul.mubr.f32.gmra.mrb[44].mxu0 %v5998_v21 }
 0x760   :  { %6254 = vmatmul.mubr.f32.gmra.mrb[44].mxu1 %v6000_v12  ;;  %6128 = vmatprep.mubr.f32.mxu0 %v6003_v59 }
 0x761   :  { %6258 = vmatprep.mubr.f32.mxu1 %v6005_v26 }
 0x763   :  { %6129 = vmatmul.mubr.f32.gmra.mrb[46].mxu0 %v6002_v40 }
 0x764   :  { %6259 = vmatmul.mubr.f32.gmra.mrb[46].mxu1 %v6004_v36  ;;  %6133 = vmatprep.mubr.f32.mxu0 %v6007_v18 }
 0x765   :  { %6263 = vmatprep.mubr.f32.mxu1 %v6009_v17 }
 0x767   :  { %6134 = vmatmul.mubr.f32.gmra.mrb[48].mxu0 %v6006_v62 }
 0x768   :  { %6264 = vmatmul.mubr.f32.gmra.mrb[48].mxu1 %v6008_v5  ;;  %6138 = vmatprep.mubr.f32.mxu0 %v6011_v38 }
 0x769   :  { %6268 = vmatprep.mubr.f32.mxu1 %v6013_v43 }
 0x76b   :  { %6139 = vmatmul.mubr.f32.gmra.mrb[50].mxu0 %v6010_v45 }
 0x76c   :  { %6269 = vmatmul.mubr.f32.gmra.mrb[50].mxu1 %v6012_v49 }
 0x76d   :  { %8641 = shalt.err (!%p8638_p5)
}
 0x76e   :  { %s8642_s6 = scalar_lea.hbm %s11776_s17, 32 }
 0x76f   :  { %p8643_p6 = scmp.ne.s32.totalorder %s11776_s17, %s8642_s6  ;;  %p8646_p7 = scmp.lt.u32.totalorder %s8642_s6, %s11776_s17 }
 0x771   :  { %p8648_p8 = pnand %p8646_p7, %p8643_p6 }
 0x773   :  { %8651 = shalt.err (!%p8648_p8)
}
 0x774   :  { %6346 = dma.vmem_to_hbm [thread:$0]  %s6344_s26, 32, %s11776_s17, [#allocation6]  }
 0x775   :  { %s8652_s1 = scalar_lea.vmem %s6334_s29, 32  ;;  %p8657_p10 = scmp.lt.s32.totalorder %s6334_s29, %s6334_s29 }
 0x776   :  { %p8653_p9 = scmp.ne.s32.totalorder %s6334_s29, %s8652_s1  ;;  %p8658_p11 = scmp.lt.s32.totalorder %s8652_s1, %s8652_s1 }
 0x778   :  { %p8659_p12 = por %p8658_p11, %p8657_p10 }
 0x77a   :  { %p8660_p13 = pnand %p8659_p12, %p8653_p9 }
 0x77c   :  { %8663 = shalt.err (!%p8660_p13)
}
 0x77d   :  { %s8664_s22 = scalar_lea.hbm %s11775_s16, 32 }
 0x77e   :  { %p8665_p0 = scmp.ne.s32.totalorder %s11775_s16, %s8664_s22  ;;  %p8668_p1 = scmp.lt.u32.totalorder %s8664_s22, %s11775_s16 }
 0x780   :  { %p8670_p2 = pnand %p8668_p1, %p8665_p0 }
 0x782   :  { %8673 = shalt.err (!%p8670_p2)
}
 0x783   :  { %6336 = dma.vmem_to_hbm [thread:$0]  %s6334_s29, 32, %s11775_s16, [#allocation4]  }
 0x784   :  { %s8747_s3 = smov [#allocation7]  }
 0x785   :  { %s6353_s10 = sshll.u32 %s8747_s3, 4  ;;  %s6354_s10 = int_to_ptr.vmem [resolvable:$true] %s6353_s10 }
 0x786   :  { %s8674_s27 = scalar_lea.vmem %s6354_s10, 32  ;;  %p8679_p4 = scmp.lt.s32.totalorder %s6354_s10, %s6354_s10 }
 0x787   :  { %p8675_p3 = scmp.ne.s32.totalorder %s6354_s10, %s8674_s27  ;;  %p8680_p5 = scmp.lt.s32.totalorder %s8674_s27, %s8674_s27 }
 0x789   :  { %p8681_p6 = por %p8680_p5, %p8679_p4 }
 0x78b   :  { %p8682_p7 = pnand %p8681_p6, %p8675_p3 }
 0x78d   :  { %8685 = shalt.err (!%p8682_p7)
}
 0x78e   :  { %s8686_s28 = scalar_lea.hbm %s11777_s18, 32 }
 0x78f   :  { %p8687_p8 = scmp.ne.s32.totalorder %s11777_s18, %s8686_s28  ;;  %p8690_p9 = scmp.lt.u32.totalorder %s8686_s28, %s11777_s18 }
 0x791   :  { %p8692_p10 = pnand %p8690_p9, %p8687_p8 }
 0x793   :  { %8695 = shalt.err (!%p8692_p10)
}
 0x794   :  { %6356 = dma.vmem_to_hbm [thread:$0]  %s6354_s10, 32, %s11777_s18, [#allocation6]   ;;  %v11627_v53 = vld [vmem:[%s11774_s15] ss:$0 sm:$0xff]  ;;  %vm5947_vm14 = vcmask 97280   ;;  %vm5960_vm11 = vcmask 93184  }
 0x7da   :  { %v7119_v50 = vpop.f32.mrb[0].mxu0 }
 0x7db   :  { %v7120_v54 = vpop.f32.mrb[1].mxu0  ;;  %v7190_v55 = vpop.f32.mrb[0].mxu1 }
 0x7dc   :  { %v7121_v9 = vadd.f32 %v7120_v54, %v7119_v50  ;;  %v7191_v29 = vpop.f32.mrb[1].mxu1 }
 0x7dd   :  { %v7192_v34 = vadd.f32 %v7191_v29, %v7190_v55 }
 0x7de   :  { %v5715_v47 = vadd.f32 %v7121_v9, %v11627_v53  ;;  %v7122_v56 = vpop.f32.mrb[2].mxu0 }
 0x7df   :  { %v7123_v60 = vpop.f32.mrb[3].mxu0  ;;  %v7193_v2 = vpop.f32.mrb[2].mxu1 }
 0x7e0   :  { %v5845_v3 = vadd.f32 %v7192_v34, %v5715_v47  ;;  %v7124_v4 = vadd.f32 %v7123_v60, %v7122_v56  ;;  %v7194_v37 = vpop.f32.mrb[3].mxu1 }
 0x7e1   :  { %v7195_v32 = vadd.f32 %v7194_v37, %v7193_v2 }
 0x7e2   :  { %vm5908_vm13 = vcmp.ge.f32.partialorder %v5845_v3, 0.0  ;;  %v5921_v48 = vmul.f32 0.01, %v5845_v3  ;;  %v5720_v61 = vadd.f32 %v7124_v4, %v11627_v53  ;;  %v7125_v41 = vpop.f32.mrb[4].mxu0 }
 0x7e3   :  { %v7126_v6 = vpop.f32.mrb[5].mxu0  ;;  %v7196_v10 = vpop.f32.mrb[4].mxu1 }
 0x7e4   :  { %v5934_v13 = vsel %vm5908_vm13, %v5845_v3, %v5921_v48  ;;  %v5850_v14 = vadd.f32 %v7195_v32, %v5720_v61  ;;  %v7127_v16 = vadd.f32 %v7126_v6, %v7125_v41  ;;  %v7197_v30 = vpop.f32.mrb[5].mxu1 }
 0x7e5   :  { %5948 = vst.msk [vmem:[%s11778_s19] sm:$0xff] %vm5947_vm14, %v5934_v13  ;;  %v7198_v35 = vadd.f32 %v7197_v30, %v7196_v10 }
 0x7e6   :  { %vm5909_vm15 = vcmp.ge.f32.partialorder %v5850_v14, 0.0  ;;  %v5922_v20 = vmul.f32 0.01, %v5850_v14  ;;  %v5725_v22 = vadd.f32 %v7127_v16, %v11627_v53  ;;  %v7128_v11 = vpop.f32.mrb[6].mxu0 }
 0x7e7   :  { %v7129_v25 = vpop.f32.mrb[7].mxu0  ;;  %v7199_v24 = vpop.f32.mrb[6].mxu1 }
 0x7e8   :  { %v5935_v57 = vsel %vm5909_vm15, %v5850_v14, %v5922_v20  ;;  %v5855_v0 = vadd.f32 %v7198_v35, %v5725_v22  ;;  %v7130_v27 = vadd.f32 %v7129_v25, %v7128_v11  ;;  %v7200_v28 = vpop.f32.mrb[7].mxu1 }
 0x7e9   :  { %5949 = vst.msk [vmem:[%s11778_s19 + $0x8] sm:$0xff] %vm5947_vm14, %v5935_v57  ;;  %v7201_v46 = vadd.f32 %v7200_v28, %v7199_v24 }
 0x7ea   :  { %vm5910_vm0 = vcmp.ge.f32.partialorder %v5855_v0, 0.0  ;;  %v5923_v42 = vmul.f32 0.01, %v5855_v0  ;;  %v5730_v44 = vadd.f32 %v7130_v27, %v11627_v53  ;;  %v7131_v52 = vpop.f32.mrb[8].mxu0 }
 0x7eb   :  { %v7132_v19 = vpop.f32.mrb[9].mxu0  ;;  %v7202_v39 = vpop.f32.mrb[8].mxu1 }
 0x7ec   :  { %v5936_v31 = vsel %vm5910_vm0, %v5855_v0, %v5923_v42  ;;  %v5860_v23 = vadd.f32 %v7201_v46, %v5730_v44  ;;  %v7133_v63 = vadd.f32 %v7132_v19, %v7131_v52  ;;  %v7203_v1 = vpop.f32.mrb[9].mxu1 }
 0x7ed   :  { %5950 = vst.msk [vmem:[%s11778_s19 + $0x10] sm:$0xff] %vm5947_vm14, %v5936_v31  ;;  %v7204_v58 = vadd.f32 %v7203_v1, %v7202_v39 }
 0x7ee   :  { %vm5911_vm1 = vcmp.ge.f32.partialorder %v5860_v23, 0.0  ;;  %v5924_v33 = vmul.f32 0.01, %v5860_v23  ;;  %v5735_v51 = vadd.f32 %v7133_v63, %v11627_v53  ;;  %v7134_v7 = vpop.f32.mrb[10].mxu0 }
 0x7ef   :  { %v7135_v8 = vpop.f32.mrb[11].mxu0  ;;  %v7205_v15 = vpop.f32.mrb[10].mxu1 }
 0x7f0   :  { %v5937_v21 = vsel %vm5911_vm1, %v5860_v23, %v5924_v33  ;;  %v5865_v12 = vadd.f32 %v7204_v58, %v5735_v51  ;;  %v7136_v59 = vadd.f32 %v7135_v8, %v7134_v7  ;;  %v7206_v26 = vpop.f32.mrb[11].mxu1 }
 0x7f1   :  { %5951 = vst.msk [vmem:[%s11778_s19 + $0x18] sm:$0xff] %vm5947_vm14, %v5937_v21  ;;  %v7207_v40 = vadd.f32 %v7206_v26, %v7205_v15 }
 0x7f2   :  { %vm5912_vm2 = vcmp.ge.f32.partialorder %v5865_v12, 0.0  ;;  %v5925_v36 = vmul.f32 0.01, %v5865_v12  ;;  %v5740_v18 = vadd.f32 %v7136_v59, %v11627_v53  ;;  %v7137_v17 = vpop.f32.mrb[12].mxu0 }
 0x7f3   :  { %v7138_v62 = vpop.f32.mrb[13].mxu0  ;;  %v7208_v5 = vpop.f32.mrb[12].mxu1 }
 0x7f4   :  { %v5938_v38 = vsel %vm5912_vm2, %v5865_v12, %v5925_v36  ;;  %v5870_v43 = vadd.f32 %v7207_v40, %v5740_v18  ;;  %v7139_v45 = vadd.f32 %v7138_v62, %v7137_v17  ;;  %v7209_v49 = vpop.f32.mrb[13].mxu1 }
 0x7f5   :  { %5952 = vst.msk [vmem:[%s11778_s19 + $0x20] sm:$0xff] %vm5947_vm14, %v5938_v38  ;;  %v7210_v50 = vadd.f32 %v7209_v49, %v7208_v5 }
 0x7f6   :  { %vm5913_vm3 = vcmp.ge.f32.partialorder %v5870_v43, 0.0  ;;  %v5926_v54 = vmul.f32 0.01, %v5870_v43  ;;  %v5745_v55 = vadd.f32 %v7139_v45, %v11627_v53  ;;  %v7140_v9 = vpop.f32.mrb[14].mxu0 }
 0x7f7   :  { %v7141_v29 = vpop.f32.mrb[15].mxu0  ;;  %v7211_v34 = vpop.f32.mrb[14].mxu1 }
 0x7f8   :  { %v5939_v47 = vsel %vm5913_vm3, %v5870_v43, %v5926_v54  ;;  %v5875_v56 = vadd.f32 %v7210_v50, %v5745_v55  ;;  %v7142_v60 = vadd.f32 %v7141_v29, %v7140_v9  ;;  %v7212_v2 = vpop.f32.mrb[15].mxu1 }
 0x7f9   :  { %5953 = vst.msk [vmem:[%s11778_s19 + $0x28] sm:$0xff] %vm5947_vm14, %v5939_v47  ;;  %v7213_v3 = vadd.f32 %v7212_v2, %v7211_v34 }
 0x7fa   :  { %vm5914_vm4 = vcmp.ge.f32.partialorder %v5875_v56, 0.0  ;;  %v5927_v4 = vmul.f32 0.01, %v5875_v56  ;;  %v5750_v37 = vadd.f32 %v7142_v60, %v11627_v53  ;;  %v7143_v32 = vpop.f32.mrb[16].mxu0 }
 0x7fb   :  { %v7144_v48 = vpop.f32.mrb[17].mxu0  ;;  %v7214_v61 = vpop.f32.mrb[16].mxu1 }
 0x7fc   :  { %v5940_v41 = vsel %vm5914_vm4, %v5875_v56, %v5927_v4  ;;  %v5880_v6 = vadd.f32 %v7213_v3, %v5750_v37  ;;  %v7145_v10 = vadd.f32 %v7144_v48, %v7143_v32  ;;  %v7215_v13 = vpop.f32.mrb[17].mxu1 }
 0x7fd   :  { %5954 = vst.msk [vmem:[%s11778_s19 + $0x30] sm:$0xff] %vm5947_vm14, %v5940_v41  ;;  %v7216_v14 = vadd.f32 %v7215_v13, %v7214_v61 }
 0x7fe   :  { %vm5915_vm5 = vcmp.ge.f32.partialorder %v5880_v6, 0.0  ;;  %v5928_v16 = vmul.f32 0.01, %v5880_v6  ;;  %v5755_v30 = vadd.f32 %v7145_v10, %v11627_v53  ;;  %v7146_v35 = vpop.f32.mrb[18].mxu0 }
 0x7ff   :  { %v7147_v20 = vpop.f32.mrb[19].mxu0  ;;  %v7217_v22 = vpop.f32.mrb[18].mxu1 }
 0x800   :  { %v5941_v11 = vsel %vm5915_vm5, %v5880_v6, %v5928_v16  ;;  %v5885_v25 = vadd.f32 %v7216_v14, %v5755_v30  ;;  %v7148_v24 = vadd.f32 %v7147_v20, %v7146_v35  ;;  %v7218_v57 = vpop.f32.mrb[19].mxu1 }
 0x801   :  { %5955 = vst.msk [vmem:[%s11778_s19 + $0x38] sm:$0xff] %vm5947_vm14, %v5941_v11  ;;  %v7219_v0 = vadd.f32 %v7218_v57, %v7217_v22 }
 0x802   :  { %vm5916_vm6 = vcmp.ge.f32.partialorder %v5885_v25, 0.0  ;;  %v5929_v27 = vmul.f32 0.01, %v5885_v25  ;;  %v5760_v28 = vadd.f32 %v7148_v24, %v11627_v53  ;;  %v7149_v46 = vpop.f32.mrb[20].mxu0 }
 0x803   :  { %v7150_v42 = vpop.f32.mrb[21].mxu0  ;;  %v7220_v44 = vpop.f32.mrb[20].mxu1 }
 0x804   :  { %v5942_v52 = vsel %vm5916_vm6, %v5885_v25, %v5929_v27  ;;  %v5890_v19 = vadd.f32 %v7219_v0, %v5760_v28  ;;  %v7151_v39 = vadd.f32 %v7150_v42, %v7149_v46  ;;  %v7221_v31 = vpop.f32.mrb[21].mxu1 }
 0x805   :  { %5956 = vst.msk [vmem:[%s11778_s19 + $0x40] sm:$0xff] %vm5947_vm14, %v5942_v52  ;;  %v7222_v23 = vadd.f32 %v7221_v31, %v7220_v44 }
 0x806   :  { %vm5917_vm7 = vcmp.ge.f32.partialorder %v5890_v19, 0.0  ;;  %v5930_v63 = vmul.f32 0.01, %v5890_v19  ;;  %v5765_v1 = vadd.f32 %v7151_v39, %v11627_v53  ;;  %v7152_v58 = vpop.f32.mrb[22].mxu0 }
 0x807   :  { %v7153_v33 = vpop.f32.mrb[23].mxu0  ;;  %v7223_v51 = vpop.f32.mrb[22].mxu1 }
 0x808   :  { %v5943_v7 = vsel %vm5917_vm7, %v5890_v19, %v5930_v63  ;;  %v5895_v8 = vadd.f32 %v7222_v23, %v5765_v1  ;;  %v7154_v15 = vadd.f32 %v7153_v33, %v7152_v58  ;;  %v7224_v21 = vpop.f32.mrb[23].mxu1 }
 0x809   :  { %5957 = vst.msk [vmem:[%s11778_s19 + $0x48] sm:$0xff] %vm5947_vm14, %v5943_v7  ;;  %v7225_v12 = vadd.f32 %v7224_v21, %v7223_v51 }
 0x80a   :  { %vm5918_vm8 = vcmp.ge.f32.partialorder %v5895_v8, 0.0  ;;  %v5931_v59 = vmul.f32 0.01, %v5895_v8  ;;  %v5770_v26 = vadd.f32 %v7154_v15, %v11627_v53  ;;  %v7155_v40 = vpop.f32.mrb[24].mxu0 }
 0x80b   :  { %v7156_v36 = vpop.f32.mrb[25].mxu0  ;;  %v7226_v18 = vpop.f32.mrb[24].mxu1 }
 0x80c   :  { %v5944_v17 = vsel %vm5918_vm8, %v5895_v8, %v5931_v59  ;;  %v5900_v62 = vadd.f32 %v7225_v12, %v5770_v26  ;;  %v7157_v5 = vadd.f32 %v7156_v36, %v7155_v40  ;;  %v7227_v38 = vpop.f32.mrb[25].mxu1 }
 0x80d   :  { %5958 = vst.msk [vmem:[%s11778_s19 + $0x50] sm:$0xff] %vm5947_vm14, %v5944_v17  ;;  %v7228_v43 = vadd.f32 %v7227_v38, %v7226_v18 }
 0x80e   :  { %vm5919_vm9 = vcmp.ge.f32.partialorder %v5900_v62, 0.0  ;;  %v5932_v45 = vmul.f32 0.01, %v5900_v62  ;;  %v5775_v49 = vadd.f32 %v7157_v5, %v11627_v53  ;;  %v7261_v50 = vpop.f32.mrb[26].mxu0 }
 0x80f   :  { %v7262_v54 = vpop.f32.mrb[27].mxu0  ;;  %v7332_v55 = vpop.f32.mrb[26].mxu1 }
 0x810   :  { %v5945_v9 = vsel %vm5919_vm9, %v5900_v62, %v5932_v45  ;;  %v5905_v29 = vadd.f32 %v7228_v43, %v5775_v49  ;;  %v7263_v34 = vadd.f32 %v7262_v54, %v7261_v50  ;;  %v7333_v47 = vpop.f32.mrb[27].mxu1 }
 0x811   :  { %5959 = vst.msk [vmem:[%s11778_s19 + $0x58] sm:$0xff] %vm5947_vm14, %v5945_v9  ;;  %v7334_v56 = vadd.f32 %v7333_v47, %v7332_v55 }
 0x812   :  { %vm5920_vm10 = vcmp.ge.f32.partialorder %v5905_v29, 0.0  ;;  %v5933_v60 = vmul.f32 0.01, %v5905_v29  ;;  %v6081_v2 = vadd.f32 %v7263_v34, %v11627_v53  ;;  %v7264_v3 = vpop.f32.mrb[28].mxu0 }
 0x813   :  { %v7265_v4 = vpop.f32.mrb[29].mxu0  ;;  %v7335_v37 = vpop.f32.mrb[28].mxu1 }
 0x814   :  { %v5946_v32 = vsel %vm5920_vm10, %v5905_v29, %v5933_v60  ;;  %v6211_v48 = vadd.f32 %v7334_v56, %v6081_v2  ;;  %v7266_v61 = vadd.f32 %v7265_v4, %v7264_v3  ;;  %v7336_v41 = vpop.f32.mrb[29].mxu1 }
 0x815   :  { %5961 = vst.msk [vmem:[%s11778_s19 + $0x60] sm:$0xf] %vm5960_vm11, %v5946_v32  ;;  %v7337_v6 = vadd.f32 %v7336_v41, %v7335_v37 }
 0x816   :  { %vm6274_vm12 = vcmp.ge.f32.partialorder %v6211_v48, 0.0  ;;  %v6287_v10 = vmul.f32 0.01, %v6211_v48  ;;  %v6086_v13 = vadd.f32 %v7266_v61, %v11627_v53  ;;  %v7267_v14 = vpop.f32.mrb[30].mxu0 }
 0x817   :  { %v7268_v16 = vpop.f32.mrb[31].mxu0  ;;  %v7338_v30 = vpop.f32.mrb[30].mxu1 }
 0x818   :  { %v6300_v35 = vsel %vm6274_vm12, %v6211_v48, %v6287_v10  ;;  %v6216_v20 = vadd.f32 %v7337_v6, %v6086_v13  ;;  %v7269_v22 = vadd.f32 %v7268_v16, %v7267_v14  ;;  %v7339_v11 = vpop.f32.mrb[31].mxu1 }
 0x819   :  { %6999 = vst.msk [vmem:[%s11778_s19 + $0x68] sm:$0xff] %vm5947_vm14, %v6300_v35  ;;  %v7340_v25 = vadd.f32 %v7339_v11, %v7338_v30 }
 0x81a   :  { %vm6275_vm13 = vcmp.ge.f32.partialorder %v6216_v20, 0.0  ;;  %v6288_v24 = vmul.f32 0.01, %v6216_v20  ;;  %v6091_v57 = vadd.f32 %v7269_v22, %v11627_v53  ;;  %v7270_v0 = vpop.f32.mrb[32].mxu0 }
 0x81b   :  { %v7271_v27 = vpop.f32.mrb[33].mxu0  ;;  %v7341_v28 = vpop.f32.mrb[32].mxu1 }
 0x81c   :  { %v6301_v46 = vsel %vm6275_vm13, %v6216_v20, %v6288_v24  ;;  %v6221_v42 = vadd.f32 %v7340_v25, %v6091_v57  ;;  %v7272_v44 = vadd.f32 %v7271_v27, %v7270_v0  ;;  %v7342_v52 = vpop.f32.mrb[33].mxu1 }
 0x81d   :  { %7000 = vst.msk [vmem:[%s11778_s19 + $0x70] sm:$0xff] %vm5947_vm14, %v6301_v46  ;;  %v7343_v19 = vadd.f32 %v7342_v52, %v7341_v28 }
 0x81e   :  { %vm6276_vm15 = vcmp.ge.f32.partialorder %v6221_v42, 0.0  ;;  %v6289_v39 = vmul.f32 0.01, %v6221_v42  ;;  %v6096_v31 = vadd.f32 %v7272_v44, %v11627_v53  ;;  %v7273_v23 = vpop.f32.mrb[34].mxu0 }
 0x81f   :  { %v7274_v63 = vpop.f32.mrb[35].mxu0  ;;  %v7344_v1 = vpop.f32.mrb[34].mxu1 }
 0x820   :  { %v6302_v58 = vsel %vm6276_vm15, %v6221_v42, %v6289_v39  ;;  %v6226_v33 = vadd.f32 %v7343_v19, %v6096_v31  ;;  %v7275_v51 = vadd.f32 %v7274_v63, %v7273_v23  ;;  %v7345_v7 = vpop.f32.mrb[35].mxu1 }
 0x821   :  { %7001 = vst.msk [vmem:[%s11778_s19 + $0x78] sm:$0xff] %vm5947_vm14, %v6302_v58  ;;  %v7346_v8 = vadd.f32 %v7345_v7, %v7344_v1 }
 0x822   :  { %vm6277_vm0 = vcmp.ge.f32.partialorder %v6226_v33, 0.0  ;;  %v6290_v15 = vmul.f32 0.01, %v6226_v33  ;;  %v6101_v21 = vadd.f32 %v7275_v51, %v11627_v53  ;;  %v7276_v12 = vpop.f32.mrb[36].mxu0 }
 0x823   :  { %v7277_v59 = vpop.f32.mrb[37].mxu0  ;;  %v7347_v26 = vpop.f32.mrb[36].mxu1 }
 0x824   :  { %v6303_v40 = vsel %vm6277_vm0, %v6226_v33, %v6290_v15  ;;  %v6231_v36 = vadd.f32 %v7346_v8, %v6101_v21  ;;  %v7278_v18 = vadd.f32 %v7277_v59, %v7276_v12  ;;  %v7348_v17 = vpop.f32.mrb[37].mxu1 }
 0x825   :  { %7002 = vst.msk [vmem:[%s11778_s19 + $0x80] sm:$0xff] %vm5947_vm14, %v6303_v40  ;;  %v7349_v62 = vadd.f32 %v7348_v17, %v7347_v26 }
 0x826   :  { %vm6278_vm1 = vcmp.ge.f32.partialorder %v6231_v36, 0.0  ;;  %v6291_v5 = vmul.f32 0.01, %v6231_v36  ;;  %v6106_v38 = vadd.f32 %v7278_v18, %v11627_v53  ;;  %v7279_v43 = vpop.f32.mrb[38].mxu0 }
 0x827   :  { %v7280_v45 = vpop.f32.mrb[39].mxu0  ;;  %v7350_v49 = vpop.f32.mrb[38].mxu1 }
 0x828   :  { %v6304_v50 = vsel %vm6278_vm1, %v6231_v36, %v6291_v5  ;;  %v6236_v54 = vadd.f32 %v7349_v62, %v6106_v38  ;;  %v7281_v55 = vadd.f32 %v7280_v45, %v7279_v43  ;;  %v7351_v9 = vpop.f32.mrb[39].mxu1 }
 0x829   :  { %7003 = vst.msk [vmem:[%s11778_s19 + $0x88] sm:$0xff] %vm5947_vm14, %v6304_v50  ;;  %v7352_v29 = vadd.f32 %v7351_v9, %v7350_v49 }
 0x82a   :  { %vm6279_vm2 = vcmp.ge.f32.partialorder %v6236_v54, 0.0  ;;  %v6292_v34 = vmul.f32 0.01, %v6236_v54  ;;  %v6111_v47 = vadd.f32 %v7281_v55, %v11627_v53  ;;  %v7282_v56 = vpop.f32.mrb[40].mxu0 }
 0x82b   :  { %v7283_v60 = vpop.f32.mrb[41].mxu0  ;;  %v7353_v2 = vpop.f32.mrb[40].mxu1 }
 0x82c   :  { %v6305_v3 = vsel %vm6279_vm2, %v6236_v54, %v6292_v34  ;;  %v6241_v4 = vadd.f32 %v7352_v29, %v6111_v47  ;;  %v7284_v37 = vadd.f32 %v7283_v60, %v7282_v56  ;;  %v7354_v32 = vpop.f32.mrb[41].mxu1 }
 0x82d   :  { %7004 = vst.msk [vmem:[%s11778_s19 + $0x90] sm:$0xff] %vm5947_vm14, %v6305_v3  ;;  %v7355_v48 = vadd.f32 %v7354_v32, %v7353_v2 }
 0x82e   :  { %vm6280_vm3 = vcmp.ge.f32.partialorder %v6241_v4, 0.0  ;;  %v6293_v61 = vmul.f32 0.01, %v6241_v4  ;;  %v6116_v41 = vadd.f32 %v7284_v37, %v11627_v53  ;;  %v7285_v6 = vpop.f32.mrb[42].mxu0 }
 0x82f   :  { %v7286_v10 = vpop.f32.mrb[43].mxu0  ;;  %v7356_v13 = vpop.f32.mrb[42].mxu1 }
 0x830   :  { %v6306_v14 = vsel %vm6280_vm3, %v6241_v4, %v6293_v61  ;;  %v6246_v16 = vadd.f32 %v7355_v48, %v6116_v41  ;;  %v7287_v30 = vadd.f32 %v7286_v10, %v7285_v6  ;;  %v7357_v35 = vpop.f32.mrb[43].mxu1 }
 0x831   :  { %7005 = vst.msk [vmem:[%s11778_s19 + $0x98] sm:$0xff] %vm5947_vm14, %v6306_v14  ;;  %v7358_v20 = vadd.f32 %v7357_v35, %v7356_v13 }
 0x832   :  { %vm6281_vm4 = vcmp.ge.f32.partialorder %v6246_v16, 0.0  ;;  %v6294_v22 = vmul.f32 0.01, %v6246_v16  ;;  %v6121_v11 = vadd.f32 %v7287_v30, %v11627_v53  ;;  %v7288_v25 = vpop.f32.mrb[44].mxu0 }
 0x833   :  { %v7289_v24 = vpop.f32.mrb[45].mxu0  ;;  %v7359_v57 = vpop.f32.mrb[44].mxu1 }
 0x834   :  { %v6307_v0 = vsel %vm6281_vm4, %v6246_v16, %v6294_v22  ;;  %v6251_v27 = vadd.f32 %v7358_v20, %v6121_v11  ;;  %v7290_v28 = vadd.f32 %v7289_v24, %v7288_v25  ;;  %v7360_v46 = vpop.f32.mrb[45].mxu1 }
 0x835   :  { %7006 = vst.msk [vmem:[%s11778_s19 + $0xa0] sm:$0xff] %vm5947_vm14, %v6307_v0  ;;  %v7361_v42 = vadd.f32 %v7360_v46, %v7359_v57 }
 0x836   :  { %vm6282_vm5 = vcmp.ge.f32.partialorder %v6251_v27, 0.0  ;;  %v6295_v44 = vmul.f32 0.01, %v6251_v27  ;;  %v6126_v52 = vadd.f32 %v7290_v28, %v11627_v53  ;;  %v7291_v19 = vpop.f32.mrb[46].mxu0 }
 0x837   :  { %v7292_v39 = vpop.f32.mrb[47].mxu0  ;;  %v7362_v31 = vpop.f32.mrb[46].mxu1 }
 0x838   :  { %v6308_v23 = vsel %vm6282_vm5, %v6251_v27, %v6295_v44  ;;  %v6256_v63 = vadd.f32 %v7361_v42, %v6126_v52  ;;  %v7293_v1 = vadd.f32 %v7292_v39, %v7291_v19  ;;  %v7363_v58 = vpop.f32.mrb[47].mxu1 }
 0x839   :  { %7007 = vst.msk [vmem:[%s11778_s19 + $0xa8] sm:$0xff] %vm5947_vm14, %v6308_v23  ;;  %v7364_v33 = vadd.f32 %v7363_v58, %v7362_v31 }
 0x83a   :  { %vm6283_vm6 = vcmp.ge.f32.partialorder %v6256_v63, 0.0  ;;  %v6296_v51 = vmul.f32 0.01, %v6256_v63  ;;  %v6131_v7 = vadd.f32 %v7293_v1, %v11627_v53  ;;  %v7294_v8 = vpop.f32.mrb[48].mxu0 }
 0x83b   :  { %v7295_v15 = vpop.f32.mrb[49].mxu0  ;;  %v7365_v21 = vpop.f32.mrb[48].mxu1 }
 0x83c   :  { %v6309_v12 = vsel %vm6283_vm6, %v6256_v63, %v6296_v51  ;;  %v6261_v59 = vadd.f32 %v7364_v33, %v6131_v7  ;;  %v7296_v26 = vadd.f32 %v7295_v15, %v7294_v8  ;;  %v7366_v40 = vpop.f32.mrb[49].mxu1 }
 0x83d   :  { %7008 = vst.msk [vmem:[%s11778_s19 + $0xb0] sm:$0xff] %vm5947_vm14, %v6309_v12  ;;  %v7367_v36 = vadd.f32 %v7366_v40, %v7365_v21 }
 0x83e   :  { %vm6284_vm7 = vcmp.ge.f32.partialorder %v6261_v59, 0.0  ;;  %v6297_v18 = vmul.f32 0.01, %v6261_v59  ;;  %v6136_v17 = vadd.f32 %v7296_v26, %v11627_v53  ;;  %v7297_v62 = vpop.f32.mrb[50].mxu0 }
 0x83f   :  { %v7298_v5 = vpop.f32.mrb[51].mxu0  ;;  %v7368_v38 = vpop.f32.mrb[50].mxu1 }
 0x840   :  { %v6310_v43 = vsel %vm6284_vm7, %v6261_v59, %v6297_v18  ;;  %v6266_v45 = vadd.f32 %v7367_v36, %v6136_v17  ;;  %v7299_v49 = vadd.f32 %v7298_v5, %v7297_v62  ;;  %v7369_v50 = vpop.f32.mrb[51].mxu1 }
 0x841   :  { %7009 = vst.msk [vmem:[%s11778_s19 + $0xb8] sm:$0xff] %vm5947_vm14, %v6310_v43  ;;  %v7370_v54 = vadd.f32 %v7369_v50, %v7368_v38 }
 0x842   :  { %vm6285_vm8 = vcmp.ge.f32.partialorder %v6266_v45, 0.0  ;;  %v6298_v55 = vmul.f32 0.01, %v6266_v45  ;;  %v6141_v9 = vadd.f32 %v7299_v49, %v11627_v53 }
 0x844   :  { %v6311_v29 = vsel %vm6285_vm8, %v6266_v45, %v6298_v55  ;;  %v6271_v34 = vadd.f32 %v7370_v54, %v6141_v9 }
 0x845   :  { %7010 = vst.msk [vmem:[%s11778_s19 + $0xc0] sm:$0xff] %vm5947_vm14, %v6311_v29 }
 0x846   :  { %vm6286_vm9 = vcmp.ge.f32.partialorder %v6271_v34, 0.0  ;;  %v6299_v47 = vmul.f32 0.01, %v6271_v34 }
 0x848   :  { %v6312_v56 = vsel %vm6286_vm9, %v6271_v34, %v6299_v47 }
 0x849   :  { %7011 = vst.msk [vmem:[%s11778_s19 + $0xc8] sm:$0xf] %vm5960_vm11, %v6312_v56 }
 0x84a   :  { %8716 = dma.done.wait [#allocation4], 32  }
 0x84b   :  { %8717 = vsyncadd [#allocation4], 4294967264 }
 0x84c   :  { %8718 = dma.done.wait [#allocation6], 64  }
 0x84d   :  { %8719 = vsyncadd [#allocation6], 4294967232 }
 0x84e   :  { %6370 = vsyncpa [#allocation4], 1 }
 0x84f   :  { %6371 = vsyncpa [#allocation6], 1 }

</bundles_post_ra>
